<compile_context>
chip_gen: v7x
topology: tpu7x:2x2x1
jax: 0.10.0
libtpu: 0.0.40
codegen_flags: <defaults>
</compile_context>

<pallas_src>
import functools

import jax
import jax.numpy as jnp
from jax.experimental import pallas as pl
from jax.experimental.pallas import tpu as pltpu


def _round_up(x, m):
    return ((x + m - 1) // m) * m


def _cdiv(a, b):
    return -(-a // b)


def _mlp_kernel(num_layer, x_ref, *refs):
    """Fused MLP forward for one batch tile.

    refs = (w_0, b_0, w_1, b_1, ..., w_{L-1}, b_{L-1}, out_ref)
      x_ref : (TB, F)        f32 (cast to bf16 in-kernel)
      w_n   : (in_n, out_n)  bf16, resident in VMEM across the batch grid
      b_n   : (1, out_n)     f32
      out   : (TB, N_pad)    f32
    """
    out_ref = refs[-1]
    param_refs = refs[:-1]

    h = x_ref[...].astype(jnp.bfloat16)     # VPU cast, hidden under MXU work
    for n in range(num_layer):
        w = param_refs[2 * n][...]
        b = param_refs[2 * n + 1][...]
        # bf16 x bf16 -> f32 accumulation on the MXU; bias/ReLU in f32 on the VPU.
        acc = jnp.dot(h, w, preferred_element_type=jnp.float32) + b
        if n < num_layer - 1:
            acc = jnp.maximum(acc, 0.0)      # ReLU
            # Dropout(0.2): identity in eval/inference mode.
            # TODO(synk): training-mode dropout (pltpu.prng_random_bits mask) not emitted.
            h = acc.astype(jnp.bfloat16)     # bf16 operand for the next matmul
        else:
            out_ref[...] = acc.astype(out_ref.dtype)


def prepare_params(params, n_class):
    """One-time parameter prep, hoisted out of the per-call forward path.

    Casts weights to bf16 and zero-pads the final layer's output dim to a
    lane-dense multiple of 128. Returns (flat_params, n_pad).
    """
    num_layer = len(params)
    n_pad = _round_up(n_class, 128)
    flat = []
    for i, (w, b) in enumerate(params):
        if i == num_layer - 1 and w.shape[1] != n_pad:
            w = jnp.pad(w, ((0, 0), (0, n_pad - w.shape[1])))
            b = jnp.pad(b, ((0, 0), (0, n_pad - b.shape[1])))
        flat.append(jnp.asarray(w, jnp.bfloat16))   # MXU-native weights
        flat.append(jnp.asarray(b, jnp.float32))    # biases stay f32
    return tuple(flat), n_pad


def _vmem_capacity_bytes():
    try:
        return int(pltpu.get_tpu_info().vmem_capacity_bytes)
    except Exception:
        return 128 << 20   # v5e/v6e default if the query is unavailable


def mlp_forward(img, prepared, n_class, *, max_batch_tile=512):
    """img: (B, C, H, W) f32. prepared: output of prepare_params(params, n_class)."""
    flat_params, n_pad = prepared
    num_layer = len(flat_params) // 2

    B = img.shape[0]
    x = img.reshape(B, -1)          # torch flatten(1); stays f32, cast in-kernel
    F = x.shape[1]

    param_bytes = sum(int(a.size) * a.dtype.itemsize for a in flat_params)
    max_width = max(F, n_pad)

    # ---- per-generation VMEM budget (leave ~15% headroom) --------------------
    budget = int(_vmem_capacity_bytes() * 0.85)

    def stream_bytes(tb):
        # double-buffered f32 x / out tiles + f32 inter-layer activation working set
        return 2 * tb * F * 4 + 2 * tb * n_pad * 4 + 3 * tb * max_width * 4

    # ---- adaptive batch tile: big enough to amortize per-grid-step overhead,
    #      derived from the tile count so padding waste stays small, shrunk to
    #      fit the VMEM budget next to the resident (single-buffered) weights.
    num_tiles = _cdiv(B, max_batch_tile)
    TB = _round_up(_cdiv(B, num_tiles), 16)
    while TB > 16 and param_bytes + stream_bytes(TB) + (4 << 20) > budget:
        TB = _round_up(TB // 2, 16)
    B_pad = _round_up(B, TB)
    if B_pad != B:
        x = jnp.pad(x, ((0, B_pad - B), (0, 0)))
    grid = (B_pad // TB,)

    # TODO(synk): if bf16 weights alone approach the VMEM budget (v7x: 64 MiB),
    #             stream K/N weight tiles from HBM (pl.ANY + pltpu.emit_pipeline)
    #             with an f32 accumulator scratch instead of fully-resident weights.

    # Shard the batch across TensorCores only when the grid is long enough that
    # duplicating the resident-weight DMA per core is amortized (small-batch is
    # weight-bandwidth-bound).
    semantics = ("parallel",) if grid[0] >= 4 else ("arbitrary",)

    weight_flops = sum(
        flat_params[2 * n].shape[0] * flat_params[2 * n].shape[1]
        for n in range(num_layer)
    )
    cost = pl.CostEstimate(
        flops=2 * B_pad * weight_flops,
        transcendentals=0,
        bytes_accessed=B_pad * F * 4 + param_bytes + B_pad * n_pad * 4,
    )

    out_spec = pl.BlockSpec((TB, n_pad), lambda i: (i, 0))

    def call(single_buffer_params):
        in_specs = [pl.BlockSpec((TB, F), lambda i: (i, 0))]
        for arr in flat_params:
            if single_buffer_params:
                # Constant index_map -> resident across the grid; one buffer suffices.
                in_specs.append(pl.BlockSpec(
                    arr.shape, lambda i: (0, 0),
                    pipeline_mode=pl.Buffered(buffer_count=1)))
            else:
                in_specs.append(pl.BlockSpec(arr.shape, lambda i: (0, 0)))
        pb = param_bytes if single_buffer_params else 2 * param_bytes
        vmem_limit = int(min(max(pb + stream_bytes(TB) + (4 << 20), 32 << 20), budget))
        return pl.pallas_call(
            functools.partial(_mlp_kernel, num_layer),
            out_shape=jax.ShapeDtypeStruct((B_pad, n_pad), jnp.float32),
            grid=grid,
            in_specs=in_specs,
            out_specs=out_spec,
            compiler_params=pltpu.CompilerParams(
                dimension_semantics=semantics,
                vmem_limit_bytes=vmem_limit,
            ),
            cost_estimate=cost,
        )(x, *flat_params)

    try:
        out_padded = call(single_buffer_params=True)
    except Exception:
        # Fallback for jax versions without BlockSpec pipeline_mode=Buffered(1).
        out_padded = call(single_buffer_params=False)

    return out_padded[:B, :n_class]


def init_params(key, num_layer, in_channel, n_class):
    """Deterministic init mimicking nn.Linear defaults: U(-1/sqrt(fan_in), 1/sqrt(fan_in))."""
    params = []
    dims = [(in_channel, in_channel)] * (num_layer - 1) + [(in_channel, n_class)]
    for (fan_in, fan_out) in dims:
        key, kw, kb = jax.random.split(key, 3)
        bound = 1.0 / (fan_in ** 0.5)
        w = jax.random.uniform(kw, (fan_in, fan_out), jnp.float32, -bound, bound)
        b = jax.random.uniform(kb, (1, fan_out), jnp.float32, -bound, bound)
        params.append((w, b))
    return params


if __name__ == "__main__":
    # Small shapes: batch=2, channels=4, spatial=16 -> flattened feature dim 1024.
    B, C, H, W = 2, 4, 16, 16
    in_channel = C * H * W      # 1024 (Linear in_features must match flatten(1) size)
    n_class = 10
    num_layer = 3               # 2 hidden (Linear+ReLU+Dropout) + 1 output Linear

    key = jax.random.PRNGKey(0)
    key, kx = jax.random.split(key)
    img = jax.random.normal(kx, (B, C, H, W), jnp.float32)

    params = init_params(key, num_layer, in_channel, n_class)

    # One-time parameter prep (bf16 cast + lane-dense final-layer padding).
    prepared = prepare_params(params, n_class)

    out = mlp_forward(img, prepared, n_class)
    out = jax.block_until_ready(out)
    assert out.shape == (B, n_class)

    # Pure-JAX reference with the same bf16-operand / f32-accumulate math.
    h = img.reshape(B, -1).astype(jnp.bfloat16)
    for i, (w, b) in enumerate(params):
        acc = jnp.dot(h, w.astype(jnp.bfloat16),
                      preferred_element_type=jnp.float32) + b
        if i < num_layer - 1:
            acc = jnp.maximum(acc, 0.0)
            h = acc.astype(jnp.bfloat16)
        else:
            ref = acc
    assert jnp.allclose(out, ref, atol=1e-2, rtol=1e-2), (
        float(jnp.max(jnp.abs(out - ref))))

    print("KERNEL_OK")
</pallas_src>

<mosaic_0001>
module attributes {stable_mosaic.version = 11 : i64} {
  func.func @_mlp_kernel(%arg0: i32, %arg1: memref<16x1024xf32, #tpu.memory_space<vmem>>, %arg2: memref<1024x1024xbf16, #tpu.memory_space<vmem>>, %arg3: memref<1x1024xf32, #tpu.memory_space<vmem>>, %arg4: memref<1024x1024xbf16, #tpu.memory_space<vmem>>, %arg5: memref<1x1024xf32, #tpu.memory_space<vmem>>, %arg6: memref<1024x128xbf16, #tpu.memory_space<vmem>>, %arg7: memref<1x128xf32, #tpu.memory_space<vmem>>, %arg8: memref<16x128xf32, #tpu.memory_space<vmem>>) attributes {dimension_semantics = [#tpu.dimension_semantics<arbitrary>], iteration_bounds = array<i64: 1>, scalar_prefetch = 0 : i64, scratch_operands = 0 : i64, tpu.core_type = #tpu.core_type<tc>, window_params = [{transform_indices = @transform_0, window_bounds = array<i64: 16, 1024>}, {pipeline_mode = #tpu.pipeline_mode<synchronous>, transform_indices = @transform_1, window_bounds = array<i64: 1024, 1024>}, {pipeline_mode = #tpu.pipeline_mode<synchronous>, transform_indices = @transform_2, window_bounds = array<i64: 1, 1024>}, {pipeline_mode = #tpu.pipeline_mode<synchronous>, transform_indices = @transform_3, window_bounds = array<i64: 1024, 1024>}, {pipeline_mode = #tpu.pipeline_mode<synchronous>, transform_indices = @transform_4, window_bounds = array<i64: 1, 1024>}, {pipeline_mode = #tpu.pipeline_mode<synchronous>, transform_indices = @transform_5, window_bounds = array<i64: 1024, 128>}, {pipeline_mode = #tpu.pipeline_mode<synchronous>, transform_indices = @transform_6, window_bounds = array<i64: 1, 128>}, {transform_indices = @transform_7, window_bounds = array<i64: 16, 128>}]} {
    %c0 = arith.constant 0 : index
    %c0_0 = arith.constant 0 : index
    %0 = vector.load %arg1[%c0, %c0_0] : memref<16x1024xf32, #tpu.memory_space<vmem>>, vector<16x1024xf32>
    %1 = arith.truncf %0 : vector<16x1024xf32> to vector<16x1024xbf16>
    %c0_1 = arith.constant 0 : index
    %c0_2 = arith.constant 0 : index
    %2 = vector.load %arg2[%c0_1, %c0_2] : memref<1024x1024xbf16, #tpu.memory_space<vmem>>, vector<1024x1024xbf16>
    %c0_3 = arith.constant 0 : index
    %c0_4 = arith.constant 0 : index
    %3 = vector.load %arg3[%c0_3, %c0_4] : memref<1x1024xf32, #tpu.memory_space<vmem>>, vector<1x1024xf32>
    %cst = arith.constant dense<0.000000e+00> : vector<16x1024xf32>
    %4 = tpu.matmul %1, %2, %cst {dimension_numbers = #tpu.dot_dimension_numbers<[1], [0], [0], [1], [0, 0, 1, 1], [], []>} : vector<16x1024xbf16>, vector<1024x1024xbf16>, vector<16x1024xf32> -> vector<16x1024xf32>
    %5 = vector.broadcast %3 : vector<1x1024xf32> to vector<16x1024xf32>
    %6 = arith.addf %4, %5 : vector<16x1024xf32>
    %cst_5 = arith.constant 0.000000e+00 : f32
    %7 = vector.broadcast %cst_5 : f32 to vector<16x1024xf32>
    %8 = arith.maximumf %6, %7 : vector<16x1024xf32>
    %9 = arith.truncf %8 : vector<16x1024xf32> to vector<16x1024xbf16>
    %c0_6 = arith.constant 0 : index
    %c0_7 = arith.constant 0 : index
    %10 = vector.load %arg4[%c0_6, %c0_7] : memref<1024x1024xbf16, #tpu.memory_space<vmem>>, vector<1024x1024xbf16>
    %c0_8 = arith.constant 0 : index
    %c0_9 = arith.constant 0 : index
    %11 = vector.load %arg5[%c0_8, %c0_9] : memref<1x1024xf32, #tpu.memory_space<vmem>>, vector<1x1024xf32>
    %cst_10 = arith.constant dense<0.000000e+00> : vector<16x1024xf32>
    %12 = tpu.matmul %9, %10, %cst_10 {dimension_numbers = #tpu.dot_dimension_numbers<[1], [0], [0], [1], [0, 0, 1, 1], [], []>} : vector<16x1024xbf16>, vector<1024x1024xbf16>, vector<16x1024xf32> -> vector<16x1024xf32>
    %13 = vector.broadcast %11 : vector<1x1024xf32> to vector<16x1024xf32>
    %14 = arith.addf %12, %13 : vector<16x1024xf32>
    %cst_11 = arith.constant 0.000000e+00 : f32
    %15 = vector.broadcast %cst_11 : f32 to vector<16x1024xf32>
    %16 = arith.maximumf %14, %15 : vector<16x1024xf32>
    %17 = arith.truncf %16 : vector<16x1024xf32> to vector<16x1024xbf16>
    %c0_12 = arith.constant 0 : index
    %c0_13 = arith.constant 0 : index
    %18 = vector.load %arg6[%c0_12, %c0_13] : memref<1024x128xbf16, #tpu.memory_space<vmem>>, vector<1024x128xbf16>
    %c0_14 = arith.constant 0 : index
    %c0_15 = arith.constant 0 : index
    %19 = vector.load %arg7[%c0_14, %c0_15] : memref<1x128xf32, #tpu.memory_space<vmem>>, vector<1x128xf32>
    %cst_16 = arith.constant dense<0.000000e+00> : vector<16x128xf32>
    %20 = tpu.matmul %17, %18, %cst_16 {dimension_numbers = #tpu.dot_dimension_numbers<[1], [0], [0], [1], [0, 0, 1, 1], [], []>} : vector<16x1024xbf16>, vector<1024x128xbf16>, vector<16x128xf32> -> vector<16x128xf32>
    %21 = vector.broadcast %19 : vector<1x128xf32> to vector<16x128xf32>
    %22 = arith.addf %20, %21 : vector<16x128xf32>
    %c0_17 = arith.constant 0 : index
    %c0_18 = arith.constant 0 : index
    %23 = vector.load %arg8[%c0_17, %c0_18] : memref<16x128xf32, #tpu.memory_space<vmem>>, vector<16x128xf32>
    tpu.vector_store %arg8[%c0_17, %c0_18], %22 {strides = array<i32>} : memref<16x128xf32, #tpu.memory_space<vmem>>, vector<16x128xf32>,
    return
  }
  func.func @transform_0(%arg0: i32) -> (i32, i32) {
    %c0_i32 = arith.constant 0 : i32
    %c0_i32_0 = arith.constant 0 : i32
    return %arg0, %c0_i32 : i32, i32
  }
  func.func @transform_1(%arg0: i32) -> (i32, i32) {
    %c0_i32 = arith.constant 0 : i32
    %c0_i32_0 = arith.constant 0 : i32
    %c0_i32_1 = arith.constant 0 : i32
    return %c0_i32, %c0_i32_0 : i32, i32
  }
  func.func @transform_2(%arg0: i32) -> (i32, i32) {
    %c0_i32 = arith.constant 0 : i32
    %c0_i32_0 = arith.constant 0 : i32
    %c0_i32_1 = arith.constant 0 : i32
    return %c0_i32, %c0_i32_0 : i32, i32
  }
  func.func @transform_3(%arg0: i32) -> (i32, i32) {
    %c0_i32 = arith.constant 0 : i32
    %c0_i32_0 = arith.constant 0 : i32
    %c0_i32_1 = arith.constant 0 : i32
    return %c0_i32, %c0_i32_0 : i32, i32
  }
  func.func @transform_4(%arg0: i32) -> (i32, i32) {
    %c0_i32 = arith.constant 0 : i32
    %c0_i32_0 = arith.constant 0 : i32
    %c0_i32_1 = arith.constant 0 : i32
    return %c0_i32, %c0_i32_0 : i32, i32
  }
  func.func @transform_5(%arg0: i32) -> (i32, i32) {
    %c0_i32 = arith.constant 0 : i32
    %c0_i32_0 = arith.constant 0 : i32
    %c0_i32_1 = arith.constant 0 : i32
    return %c0_i32, %c0_i32_0 : i32, i32
  }
  func.func @transform_6(%arg0: i32) -> (i32, i32) {
    %c0_i32 = arith.constant 0 : i32
    %c0_i32_0 = arith.constant 0 : i32
    %c0_i32_1 = arith.constant 0 : i32
    return %c0_i32, %c0_i32_0 : i32, i32
  }
  func.func @transform_7(%arg0: i32) -> (i32, i32) {
    %c0_i32 = arith.constant 0 : i32
    %c0_i32_0 = arith.constant 0 : i32
    return %arg0, %c0_i32 : i32, i32
  }
}

module attributes {stable_mosaic.version = 11 : i64} {
  func.func @_mlp_kernel(%arg0: i32, %arg1: memref<16x1024xf32, #tpu.memory_space<vmem>>, %arg2: memref<1024x1024xbf16, #tpu.memory_space<vmem>>, %arg3: memref<1x1024xf32, #tpu.memory_space<vmem>>, %arg4: memref<1024x1024xbf16, #tpu.memory_space<vmem>>, %arg5: memref<1x1024xf32, #tpu.memory_space<vmem>>, %arg6: memref<1024x128xbf16, #tpu.memory_space<vmem>>, %arg7: memref<1x128xf32, #tpu.memory_space<vmem>>, %arg8: memref<16x128xf32, #tpu.memory_space<vmem>>) attributes {dimension_semantics = [#tpu.dimension_semantics<arbitrary>], iteration_bounds = array<i64: 1>, scalar_prefetch = 0 : i64, scratch_operands = 0 : i64, tpu.core_type = #tpu.core_type<tc>, window_params = [{transform_indices = @transform_0, window_bounds = array<i64: 16, 1024>}, {pipeline_mode = #tpu.pipeline_mode<synchronous>, transform_indices = @transform_1, window_bounds = array<i64: 1024, 1024>}, {pipeline_mode = #tpu.pipeline_mode<synchronous>, transform_indices = @transform_2, window_bounds = array<i64: 1, 1024>}, {pipeline_mode = #tpu.pipeline_mode<synchronous>, transform_indices = @transform_3, window_bounds = array<i64: 1024, 1024>}, {pipeline_mode = #tpu.pipeline_mode<synchronous>, transform_indices = @transform_4, window_bounds = array<i64: 1, 1024>}, {pipeline_mode = #tpu.pipeline_mode<synchronous>, transform_indices = @transform_5, window_bounds = array<i64: 1024, 128>}, {pipeline_mode = #tpu.pipeline_mode<synchronous>, transform_indices = @transform_6, window_bounds = array<i64: 1, 128>}, {transform_indices = @transform_7, window_bounds = array<i64: 16, 128>}]} {
    %c0 = arith.constant 0 : index
    %c0_0 = arith.constant 0 : index
    %0 = vector.load %arg1[%c0, %c0_0] : memref<16x1024xf32, #tpu.memory_space<vmem>>, vector<16x1024xf32>
    %1 = arith.truncf %0 : vector<16x1024xf32> to vector<16x1024xbf16>
    %c0_1 = arith.constant 0 : index
    %c0_2 = arith.constant 0 : index
    %2 = vector.load %arg2[%c0_1, %c0_2] : memref<1024x1024xbf16, #tpu.memory_space<vmem>>, vector<1024x1024xbf16>
    %c0_3 = arith.constant 0 : index
    %c0_4 = arith.constant 0 : index
    %3 = vector.load %arg3[%c0_3, %c0_4] : memref<1x1024xf32, #tpu.memory_space<vmem>>, vector<1x1024xf32>
    %cst = arith.constant dense<0.000000e+00> : vector<16x1024xf32>
    %4 = tpu.matmul %1, %2, %cst {dimension_numbers = #tpu.dot_dimension_numbers<[1], [0], [0], [1], [0, 0, 1, 1], [], []>} : vector<16x1024xbf16>, vector<1024x1024xbf16>, vector<16x1024xf32> -> vector<16x1024xf32>
    %5 = vector.broadcast %3 : vector<1x1024xf32> to vector<16x1024xf32>
    %6 = arith.addf %4, %5 : vector<16x1024xf32>
    %cst_5 = arith.constant 0.000000e+00 : f32
    %7 = vector.broadcast %cst_5 : f32 to vector<16x1024xf32>
    %8 = arith.maximumf %6, %7 : vector<16x1024xf32>
    %9 = arith.truncf %8 : vector<16x1024xf32> to vector<16x1024xbf16>
    %c0_6 = arith.constant 0 : index
    %c0_7 = arith.constant 0 : index
    %10 = vector.load %arg4[%c0_6, %c0_7] : memref<1024x1024xbf16, #tpu.memory_space<vmem>>, vector<1024x1024xbf16>
    %c0_8 = arith.constant 0 : index
    %c0_9 = arith.constant 0 : index
    %11 = vector.load %arg5[%c0_8, %c0_9] : memref<1x1024xf32, #tpu.memory_space<vmem>>, vector<1x1024xf32>
    %cst_10 = arith.constant dense<0.000000e+00> : vector<16x1024xf32>
    %12 = tpu.matmul %9, %10, %cst_10 {dimension_numbers = #tpu.dot_dimension_numbers<[1], [0], [0], [1], [0, 0, 1, 1], [], []>} : vector<16x1024xbf16>, vector<1024x1024xbf16>, vector<16x1024xf32> -> vector<16x1024xf32>
    %13 = vector.broadcast %11 : vector<1x1024xf32> to vector<16x1024xf32>
    %14 = arith.addf %12, %13 : vector<16x1024xf32>
    %cst_11 = arith.constant 0.000000e+00 : f32
    %15 = vector.broadcast %cst_11 : f32 to vector<16x1024xf32>
    %16 = arith.maximumf %14, %15 : vector<16x1024xf32>
    %17 = arith.truncf %16 : vector<16x1024xf32> to vector<16x1024xbf16>
    %c0_12 = arith.constant 0 : index
    %c0_13 = arith.constant 0 : index
    %18 = vector.load %arg6[%c0_12, %c0_13] : memref<1024x128xbf16, #tpu.memory_space<vmem>>, vector<1024x128xbf16>
    %c0_14 = arith.constant 0 : index
    %c0_15 = arith.constant 0 : index
    %19 = vector.load %arg7[%c0_14, %c0_15] : memref<1x128xf32, #tpu.memory_space<vmem>>, vector<1x128xf32>
    %cst_16 = arith.constant dense<0.000000e+00> : vector<16x128xf32>
    %20 = tpu.matmul %17, %18, %cst_16 {dimension_numbers = #tpu.dot_dimension_numbers<[1], [0], [0], [1], [0, 0, 1, 1], [], []>} : vector<16x1024xbf16>, vector<1024x128xbf16>, vector<16x128xf32> -> vector<16x128xf32>
    %21 = vector.broadcast %19 : vector<1x128xf32> to vector<16x128xf32>
    %22 = arith.addf %20, %21 : vector<16x128xf32>
    %c0_17 = arith.constant 0 : index
    %c0_18 = arith.constant 0 : index
    %23 = vector.load %arg8[%c0_17, %c0_18] : memref<16x128xf32, #tpu.memory_space<vmem>>, vector<16x128xf32>
    tpu.vector_store %arg8[%c0_17, %c0_18], %22 {strides = array<i32>} : memref<16x128xf32, #tpu.memory_space<vmem>>, vector<16x128xf32>,
    return
  }
  func.func @transform_0(%arg0: i32) -> (i32, i32) {
    %c0_i32 = arith.constant 0 : i32
    %c0_i32_0 = arith.constant 0 : i32
    return %arg0, %c0_i32 : i32, i32
  }
  func.func @transform_1(%arg0: i32) -> (i32, i32) {
    %c0_i32 = arith.constant 0 : i32
    %c0_i32_0 = arith.constant 0 : i32
    %c0_i32_1 = arith.constant 0 : i32
    return %c0_i32, %c0_i32_0 : i32, i32
  }
  func.func @transform_2(%arg0: i32) -> (i32, i32) {
    %c0_i32 = arith.constant 0 : i32
    %c0_i32_0 = arith.constant 0 : i32
    %c0_i32_1 = arith.constant 0 : i32
    return %c0_i32, %c0_i32_0 : i32, i32
  }
  func.func @transform_3(%arg0: i32) -> (i32, i32) {
    %c0_i32 = arith.constant 0 : i32
    %c0_i32_0 = arith.constant 0 : i32
    %c0_i32_1 = arith.constant 0 : i32
    return %c0_i32, %c0_i32_0 : i32, i32
  }
  func.func @transform_4(%arg0: i32) -> (i32, i32) {
    %c0_i32 = arith.constant 0 : i32
    %c0_i32_0 = arith.constant 0 : i32
    %c0_i32_1 = arith.constant 0 : i32
    return %c0_i32, %c0_i32_0 : i32, i32
  }
  func.func @transform_5(%arg0: i32) -> (i32, i32) {
    %c0_i32 = arith.constant 0 : i32
    %c0_i32_0 = arith.constant 0 : i32
    %c0_i32_1 = arith.constant 0 : i32
    return %c0_i32, %c0_i32_0 : i32, i32
  }
  func.func @transform_6(%arg0: i32) -> (i32, i32) {
    %c0_i32 = arith.constant 0 : i32
    %c0_i32_0 = arith.constant 0 : i32
    %c0_i32_1 = arith.constant 0 : i32
    return %c0_i32, %c0_i32_0 : i32, i32
  }
  func.func @transform_7(%arg0: i32) -> (i32, i32) {
    %c0_i32 = arith.constant 0 : i32
    %c0_i32_0 = arith.constant 0 : i32
    return %arg0, %c0_i32 : i32, i32
  }
}

</mosaic_0001>

<bundles_post_ra>
// kernel: tpu_custom_call.1
= control target key start
LH: loop header
LB: loop body
LE: loop exit
PB: predicated region body
PF: predicated region fallthrough
CT: control target
= control target key end

     0   :  { %12 = vsyncpa [#allocation3], 0  ;;  %s10396_s0 = inlined_call_operand.hbm [shape: f32[16,1024], index: 0, kind: input, shape index: {}]   ;;  %s10397_s1 = inlined_call_operand.hbm [shape: bf16[1024,1024], index: 1, kind: input, shape index: {}]   ;;  %s10398_s2 = inlined_call_operand.hbm [shape: f32[1,1024], index: 2, kind: input, shape index: {}]   ;;  %s10399_s3 = inlined_call_operand.hbm [shape: bf16[1024,1024], index: 3, kind: input, shape index: {}]   ;;  %s10400_s4 = inlined_call_operand.hbm [shape: f32[1,1024], index: 4, kind: input, shape index: {}]   ;;  %s10401_s5 = inlined_call_operand.hbm [shape: bf16[1024,128], index: 5, kind: input, shape index: {}]   ;;  %s10402_s6 = inlined_call_operand.hbm [shape: f32[1,128], index: 6, kind: input, shape index: {}]   ;;  %s10403_s7 = inlined_call_operand.hbm [shape: f32[16,128], index: 7, kind: output, shape index: {}]  }
   0x1   :  { %13 = vsyncpa [#allocation6], 0 }
   0x2   :  { %14 = vsyncpa [#allocation9], 0 }
   0x3   :  { %15 = vsyncpa [#allocation12], 0 }
   0x4   :  { %16 = vsyncpa [#allocation4], 0  ;;  %s10069_s24 = smov [#allocation5]   ;;  %s9883_s28 = scalar_lea.hbm %s10397_s1, 65536 }
   0x5   :  { %s34_s25 = sshll.u32 %s10069_s24, 4  ;;  %p9884_p0 = scmp.ne.s32.totalorder %s10397_s1, %s9883_s28  ;;  %s35_s25 = int_to_ptr.vmem [resolvable:$true] %s34_s25 }
   0x6   :  { %p9887_p1 = scmp.lt.u32.totalorder %s9883_s28, %s10397_s1 }
   0x8   :  { %p9889_p2 = pnand %p9887_p1, %p9884_p0 }
   0xa   :  { %9892 = shalt.err (!%p9889_p2)
}
   0xb   :  { %s9893_s10 = scalar_lea.vmem %s35_s25, 65536  ;;  %p9898_p4 = scmp.lt.s32.totalorder %s35_s25, %s35_s25 }
   0xc   :  { %p9894_p3 = scmp.ne.s32.totalorder %s35_s25, %s9893_s10  ;;  %p9899_p5 = scmp.lt.s32.totalorder %s9893_s10, %s9893_s10 }
   0xe   :  { %p9900_p6 = por %p9899_p5, %p9898_p4 }
  0x10   :  { %p9901_p7 = pnand %p9900_p6, %p9894_p3 }
  0x12   :  { %9904 = shalt.err (!%p9901_p7)
}
  0x13   :  { %s10070_s11 = smov 512   ;;  %s10071_s12 = smov 32  }
  0x14   :  { %40 = dma.hbm_to_vmem [thread:$0]  %s10397_s1, 65536, %s35_s25, [#allocation6], %s10070_s11, %s10070_s11, %s10071_s12  }
  0x15   :  { %s10072_s15 = smov [#allocation8]   ;;  %s9905_s19 = scalar_lea.hbm %s10399_s3, 65536 }
  0x16   :  { %s56_s16 = sshll.u32 %s10072_s15, 4  ;;  %p9906_p8 = scmp.ne.s32.totalorder %s10399_s3, %s9905_s19  ;;  %s57_s16 = int_to_ptr.vmem [resolvable:$true] %s56_s16 }
  0x17   :  { %p9909_p9 = scmp.lt.u32.totalorder %s9905_s19, %s10399_s3 }
  0x19   :  { %p9911_p10 = pnand %p9909_p9, %p9906_p8 }
  0x1b   :  { %9914 = shalt.err (!%p9911_p10)
}
  0x1c   :  { %s9915_s24 = scalar_lea.vmem %s57_s16, 65536  ;;  %p9920_p12 = scmp.lt.s32.totalorder %s57_s16, %s57_s16 }
  0x1d   :  { %p9916_p11 = scmp.ne.s32.totalorder %s57_s16, %s9915_s24  ;;  %p9921_p13 = scmp.lt.s32.totalorder %s9915_s24, %s9915_s24 }
  0x1f   :  { %p9922_p0 = por %p9921_p13, %p9920_p12 }
  0x21   :  { %p9923_p1 = pnand %p9922_p0, %p9916_p11 }
  0x23   :  { %9926 = shalt.err (!%p9923_p1)
}
  0x24   :  { %62 = dma.hbm_to_vmem [thread:$0]  %s10399_s3, 65536, %s57_s16, [#allocation9], %s10070_s11, %s10070_s11, %s10071_s12  }
  0x25   :  { %s10073_s26 = smov [#allocation11]   ;;  %s9927_s30 = scalar_lea.hbm %s10401_s5, 8192 }
  0x26   :  { %s78_s27 = sshll.u32 %s10073_s26, 4  ;;  %p9928_p2 = scmp.ne.s32.totalorder %s10401_s5, %s9927_s30  ;;  %s79_s27 = int_to_ptr.vmem [resolvable:$true] %s78_s27 }
  0x27   :  { %p9931_p3 = scmp.lt.u32.totalorder %s9927_s30, %s10401_s5 }
  0x29   :  { %p9933_p4 = pnand %p9931_p3, %p9928_p2 }
  0x2b   :  { %9936 = shalt.err (!%p9933_p4)
}
  0x2c   :  { %s9937_s14 = scalar_lea.vmem %s79_s27, 8192  ;;  %p9942_p6 = scmp.lt.s32.totalorder %s79_s27, %s79_s27 }
  0x2d   :  { %p9938_p5 = scmp.ne.s32.totalorder %s79_s27, %s9937_s14  ;;  %p9943_p7 = scmp.lt.s32.totalorder %s9937_s14, %s9937_s14 }
  0x2f   :  { %p9944_p8 = por %p9943_p7, %p9942_p6 }
  0x31   :  { %p9945_p9 = pnand %p9944_p8, %p9938_p5 }
  0x33   :  { %9948 = shalt.err (!%p9945_p9)
}
  0x34   :  { %s10074_s3 = smov 64   ;;  %s10075_s11 = smov 4  }
  0x35   :  { %84 = dma.hbm_to_vmem [thread:$0]  %s10401_s5, 8192, %s79_s27, [#allocation12], %s10074_s3, %s10074_s3, %s10075_s11  }
  0x36   :  { %s10076_s16 = smov [#allocation2]   ;;  %s9949_s20 = scalar_lea.hbm %s10396_s0, 2048 }
  0x37   :  { %s22_s17 = sshll.u32 %s10076_s16, 4  ;;  %p9950_p10 = scmp.ne.s32.totalorder %s10396_s0, %s9949_s20  ;;  %s23_s17 = int_to_ptr.vmem [resolvable:$true] %s22_s17 }
  0x38   :  { %p9953_p11 = scmp.lt.u32.totalorder %s9949_s20, %s10396_s0 }
  0x3a   :  { %p9955_p12 = pnand %p9953_p11, %p9950_p10 }
  0x3c   :  { %9958 = shalt.err (!%p9955_p12)
}
  0x3d   :  { %s9959_s1 = scalar_lea.vmem %s23_s17, 2048  ;;  %p9964_p0 = scmp.lt.s32.totalorder %s23_s17, %s23_s17 }
  0x3e   :  { %p9960_p13 = scmp.ne.s32.totalorder %s23_s17, %s9959_s1  ;;  %p9965_p1 = scmp.lt.s32.totalorder %s9959_s1, %s9959_s1 }
  0x40   :  { %p9966_p2 = por %p9965_p1, %p9964_p0 }
  0x42   :  { %p9967_p3 = pnand %p9966_p2, %p9960_p13 }
  0x44   :  { %9970 = shalt.err (!%p9967_p3)
}
  0x45   :  { %s10077_s5 = smov 1024   ;;  %s10078_s27 = smov [#allocation7]  }
  0x46   :  { %28 = dma.hbm_to_vmem [thread:$0]  %s10396_s0, 2048, %s23_s17, [#allocation3], %s10077_s5, %s10077_s5, %s10074_s3  }
  0x47   :  { %s47_s28 = sshll.u32 %s10078_s27, 4  ;;  %s10079_s29 = smov [#allocation10]   ;;  %s48_s28 = int_to_ptr.vmem [resolvable:$true] %s47_s28 }
  0x48   :  { %s69_s30 = sshll.u32 %s10079_s29, 4  ;;  %s9971_s10 = scalar_lea.hbm %s10398_s2, 128  ;;  %s70_s30 = int_to_ptr.vmem [resolvable:$true] %s69_s30 }
  0x49   :  { %p9972_p4 = scmp.ne.s32.totalorder %s10398_s2, %s9971_s10  ;;  %p9975_p5 = scmp.lt.u32.totalorder %s9971_s10, %s10398_s2 }
  0x4b   :  { %p9977_p6 = pnand %p9975_p5, %p9972_p4 }
  0x4d   :  { %9980 = shalt.err (!%p9977_p6)
}
  0x4e   :  { %s9981_s0 = scalar_lea.vmem %s48_s28, 128  ;;  %p9986_p8 = scmp.lt.s32.totalorder %s48_s28, %s48_s28 }
  0x4f   :  { %p9982_p7 = scmp.ne.s32.totalorder %s48_s28, %s9981_s0  ;;  %p9987_p9 = scmp.lt.s32.totalorder %s9981_s0, %s9981_s0 }
  0x51   :  { %p9988_p10 = por %p9987_p9, %p9986_p8 }
  0x53   :  { %p9989_p11 = pnand %p9988_p10, %p9982_p7 }
  0x55   :  { %9992 = shalt.err (!%p9989_p11)
}
  0x56   :  { %50 = dma.hbm_to_vmem [thread:$0]  %s10398_s2, 128, %s48_s28, [#allocation6]  }
  0x57   :  { %s9993_s18 = scalar_lea.hbm %s10400_s4, 128 }
  0x58   :  { %p9994_p12 = scmp.ne.s32.totalorder %s10400_s4, %s9993_s18  ;;  %p9997_p13 = scmp.lt.u32.totalorder %s9993_s18, %s10400_s4 }
  0x5a   :  { %p9999_p0 = pnand %p9997_p13, %p9994_p12 }
  0x5c   :  { %10002 = shalt.err (!%p9999_p0)
}
  0x5d   :  { %s10003_s23 = scalar_lea.vmem %s70_s30, 128  ;;  %p10008_p2 = scmp.lt.s32.totalorder %s70_s30, %s70_s30 }
  0x5e   :  { %p10004_p1 = scmp.ne.s32.totalorder %s70_s30, %s10003_s23  ;;  %p10009_p3 = scmp.lt.s32.totalorder %s10003_s23, %s10003_s23 }
  0x60   :  { %p10010_p4 = por %p10009_p3, %p10008_p2 }
  0x62   :  { %p10011_p5 = pnand %p10010_p4, %p10004_p1 }
  0x64   :  { %10014 = shalt.err (!%p10011_p5)
}
  0x65   :  { %72 = dma.hbm_to_vmem [thread:$0]  %s10400_s4, 128, %s70_s30, [#allocation9]  }
  0x66   :  { %s10080_s1 = smov [#allocation13]   ;;  %s10015_s27 = scalar_lea.hbm %s10402_s6, 16 }
  0x67   :  { %s91_s5 = sshll.u32 %s10080_s1, 4  ;;  %p10016_p6 = scmp.ne.s32.totalorder %s10402_s6, %s10015_s27  ;;  %s92_s5 = int_to_ptr.vmem [resolvable:$true] %s91_s5 }
  0x68   :  { %p10019_p7 = scmp.lt.u32.totalorder %s10015_s27, %s10402_s6 }
  0x6a   :  { %p10021_p8 = pnand %p10019_p7, %p10016_p6 }
  0x6c   :  { %10024 = shalt.err (!%p10021_p8)
}
  0x6d   :  { %s10025_s10 = scalar_lea.vmem %s92_s5, 16  ;;  %s10029_s4 = scalar_lea.vmem %s92_s5, 32 }
  0x6e   :  { %p10026_p9 = scmp.ne.s32.totalorder %s92_s5, %s10025_s10  ;;  %p10030_p10 = scmp.lt.s32.totalorder %s92_s5, %s92_s5 }
  0x6f   :  { %p10031_p11 = scmp.lt.s32.totalorder %s10029_s4, %s10025_s10 }
  0x71   :  { %p10032_p12 = por %p10031_p11, %p10030_p10 }
  0x73   :  { %p10033_p13 = pnand %p10032_p12, %p10026_p9 }
  0x75   :  { %10036 = shalt.err (!%p10033_p13)
}
  0x76   :  { %94 = dma.hbm_to_vmem [thread:$0]  %s10402_s6, 16, %s92_s5, [#allocation12]  }
  0x77   :  { %10059 = dma.done.wait [#allocation3], 2048  }
  0x78   :  { %10060 = vsyncadd [#allocation3], 4294965248 }
  0x79   :  { %10061 = dma.done.wait [#allocation6], 65664  }
  0x7a   :  { %10062 = vsyncadd [#allocation6], 4294901632 }
  0x7b   :  { %10063 = dma.done.wait [#allocation9], 65664  }
  0x7c   :  { %10064 = vsyncadd [#allocation9], 4294901632 }
  0x7d   :  { %10065 = dma.done.wait [#allocation12], 8208  }
  0x7e   :  { %10066 = vsyncadd [#allocation12], 4294959088  ;;  %v141_v0 = vld [vmem:[#allocation5] sm:$0xff]  ;;  %v142_v2 = vld [vmem:[#allocation5 + $0x8] sm:$0xff]  ;;  %s10081_s6 = smov [#allocation14]  }
  0x7f   :  { %v145_v1 = vld [vmem:[#allocation5 + $0x20] sm:$0xff]  ;;  %v146_v4 = vld [vmem:[#allocation5 + $0x28] sm:$0xff]  ;;  %s8483_s14 = sshll.u32 %s10081_s6, 4  ;;  %s8484_s14 = int_to_ptr.vmem [resolvable:$true] %s8483_s14 }
  0x80   :  { %v8499_v3 = vcombine.high %v141_v0, %v145_v1  ;;  %v8498_v5 = vcombine.low %v141_v0, %v145_v1  ;;  %v149_v6 = vld [vmem:[#allocation5 + $0x40] sm:$0xff]  ;;  %v8501_v8 = vcombine.high %v142_v2, %v146_v4  ;;  %v8500_v9 = vcombine.low %v142_v2, %v146_v4  ;;  %v150_v11 = vld [vmem:[#allocation5 + $0x48] sm:$0xff]  ;;  %s10037_s11 = scalar_lea.vmem %s8484_s14, 256  ;;  %p10042_p1 = scmp.lt.s32.totalorder %s8484_s14, %s8484_s14 }
  0x81   :  { %v153_v7 = vld [vmem:[#allocation5 + $0x60] sm:$0xff]  ;;  %v154_v12 = vld [vmem:[#allocation5 + $0x68] sm:$0xff]  ;;  %p10038_p0 = scmp.ne.s32.totalorder %s8484_s14, %s10037_s11  ;;  %p10043_p2 = scmp.lt.s32.totalorder %s10037_s11, %s10037_s11 }
  0x82   :  { %v8507_v10 = vcombine.high %v149_v6, %v153_v7  ;;  %v157_v13 = vld [vmem:[#allocation5 + $0x80] sm:$0xff]  ;;  %3255 = vmatprep.subr.bf16.mxu0 %v8499_v3  ;;  %v8509_v14 = vcombine.high %v150_v11, %v154_v12  ;;  %v158_v16 = vld [vmem:[#allocation5 + $0x88] sm:$0xff]  ;;  %3427 = vmatprep.subr.bf16.mxu1 %v8501_v8  ;;  %v8506_v18 = vcombine.low %v149_v6, %v153_v7 }
  0x83   :  { %v161_v15 = vld [vmem:[#allocation5 + $0xa0] sm:$0xff]  ;;  %v162_v17 = vld [vmem:[#allocation5 + $0xa8] sm:$0xff]  ;;  %3256 = vmatpush1.bf16.msra.mxu0 %v8498_v5  ;;  %3428 = vmatpush1.bf16.msra.mxu1 %v8500_v9  ;;  %v8508_v19 = vcombine.low %v150_v11, %v154_v12  ;;  %p10044_p3 = por %p10043_p2, %p10042_p1 }
  0x84   :  { %3257 = vmatprep.subr.bf16.mxu0 %v8507_v10  ;;  %v8515_v20 = vcombine.high %v157_v13, %v161_v15  ;;  %3429 = vmatprep.subr.bf16.mxu1 %v8509_v14  ;;  %v8517_v21 = vcombine.high %v158_v16, %v162_v17  ;;  %v165_v22 = vld [vmem:[#allocation5 + $0xc0] sm:$0xff]  ;;  %v166_v24 = vld [vmem:[#allocation5 + $0xc8] sm:$0xff]  ;;  %v8514_v26 = vcombine.low %v157_v13, %v161_v15 }
  0x85   :  { %v169_v23 = vld [vmem:[#allocation5 + $0xe0] sm:$0xff]  ;;  %v170_v25 = vld [vmem:[#allocation5 + $0xe8] sm:$0xff]  ;;  %v8516_v27 = vcombine.low %v158_v16, %v162_v17  ;;  %p10045_p4 = pnand %p10044_p3, %p10038_p0 }
  0x86   :  { %v8523_v28 = vcombine.high %v165_v22, %v169_v23  ;;  %v8525_v29 = vcombine.high %v166_v24, %v170_v25  ;;  %v173_v30 = vld [vmem:[#allocation5 + $0x100] sm:$0xff]  ;;  %v174_v32 = vld [vmem:[#allocation5 + $0x108] sm:$0xff]  ;;  %v8522_v34 = vcombine.low %v165_v22, %v169_v23  ;;  %v8524_v35 = vcombine.low %v166_v24, %v170_v25 }
  0x87   :  { %3258 = vmatpush1.bf16.msra.mxu0 %v8506_v18  ;;  %3430 = vmatpush1.bf16.msra.mxu1 %v8508_v19  ;;  %v177_v31 = vld [vmem:[#allocation5 + $0x120] sm:$0xff]  ;;  %v178_v33 = vld [vmem:[#allocation5 + $0x128] sm:$0xff] }
  0x88   :  { %3259 = vmatprep.subr.bf16.mxu0 %v8515_v20  ;;  %3431 = vmatprep.subr.bf16.mxu1 %v8517_v21  ;;  %v8531_v36 = vcombine.high %v173_v30, %v177_v31  ;;  %v8533_v37 = vcombine.high %v174_v32, %v178_v33  ;;  %v181_v38 = vld [vmem:[#allocation5 + $0x140] sm:$0xff]  ;;  %v182_v40 = vld [vmem:[#allocation5 + $0x148] sm:$0xff]  ;;  %v8530_v42 = vcombine.low %v173_v30, %v177_v31 }
  0x89   :  { %v185_v39 = vld [vmem:[#allocation5 + $0x160] sm:$0xff]  ;;  %v186_v41 = vld [vmem:[#allocation5 + $0x168] sm:$0xff]  ;;  %v8532_v43 = vcombine.low %v174_v32, %v178_v33 }
  0x8a   :  { %v8539_v44 = vcombine.high %v181_v38, %v185_v39  ;;  %v8541_v45 = vcombine.high %v182_v40, %v186_v41  ;;  %v189_v46 = vld [vmem:[#allocation5 + $0x180] sm:$0xff]  ;;  %v190_v48 = vld [vmem:[#allocation5 + $0x188] sm:$0xff]  ;;  %v8538_v50 = vcombine.low %v181_v38, %v185_v39  ;;  %v8540_v51 = vcombine.low %v182_v40, %v186_v41 }
  0x8b   :  { %3260 = vmatpush1.bf16.msra.mxu0 %v8514_v26  ;;  %3432 = vmatpush1.bf16.msra.mxu1 %v8516_v27  ;;  %v193_v47 = vld [vmem:[#allocation5 + $0x1a0] sm:$0xff]  ;;  %v194_v49 = vld [vmem:[#allocation5 + $0x1a8] sm:$0xff] }
  0x8c   :  { %3261 = vmatprep.subr.bf16.mxu0 %v8523_v28  ;;  %3433 = vmatprep.subr.bf16.mxu1 %v8525_v29  ;;  %v8547_v52 = vcombine.high %v189_v46, %v193_v47  ;;  %v118_v53 = vld [vmem:[#allocation2 + $0x8] sm:$0xff]  ;;  %v8549_v55 = vcombine.high %v190_v48, %v194_v49  ;;  %v197_v56 = vld [vmem:[#allocation5 + $0x1c0] sm:$0xff]  ;;  %v8546_v61 = vcombine.low %v189_v46, %v193_v47 }
  0x8d   :  { %v126_v54 = vld [vmem:[#allocation2 + $0x48] sm:$0xff]  ;;  %v201_v57 = vld [vmem:[#allocation5 + $0x1e0] sm:$0xff]  ;;  %v8548_v62 = vcombine.low %v190_v48, %v194_v49 }
  0x8e   :  { %v10208_v58 = vpack.c.bf16 %v126_v54, %v118_v53  ;;  %v198_v59 = vld [vmem:[#allocation5 + $0x1c8] sm:$0xff]  ;;  %v8555_v63 = vcombine.high %v197_v56, %v201_v57  ;;  %v205_v1 = vld [vmem:[#allocation5 + $0x200] sm:$0xff]  ;;  %v8554_v5 = vcombine.low %v197_v56, %v201_v57 }
  0x8f   :  { %3262 = vmatpush1.bf16.msra.mxu0 %v8522_v34  ;;  %3434 = vmatpush1.bf16.msra.mxu1 %v8524_v35  ;;  %v202_v60 = vld [vmem:[#allocation5 + $0x1e8] sm:$0xff]  ;;  %v209_v2 = vld [vmem:[#allocation5 + $0x220] sm:$0xff] }
  0x90   :  { %3263 = vmatprep.subr.bf16.mxu0 %v8531_v36  ;;  %3435 = vmatprep.subr.bf16.mxu1 %v8533_v37  ;;  %v8557_v0 = vcombine.high %v198_v59, %v202_v60  ;;  %v206_v3 = vld [vmem:[#allocation5 + $0x208] sm:$0xff]  ;;  %v8556_v6 = vcombine.low %v198_v59, %v202_v60  ;;  %v8563_v7 = vcombine.high %v205_v1, %v209_v2  ;;  %v213_v9 = vld [vmem:[#allocation5 + $0x240] sm:$0xff] }
  0x91   :  { %3287 = vmatprep.mubr.bf16.mxu0 %v10208_v58  ;;  %3459 = vmatprep.mubr.bf16.mxu1 %v10208_v58  ;;  %v210_v4 = vld [vmem:[#allocation5 + $0x228] sm:$0xff]  ;;  %v217_v10 = vld [vmem:[#allocation5 + $0x260] sm:$0xff]  ;;  %v8562_v13 = vcombine.low %v205_v1, %v209_v2 }
  0x92   :  { %v8565_v8 = vcombine.high %v206_v3, %v210_v4  ;;  %v214_v11 = vld [vmem:[#allocation5 + $0x248] sm:$0xff]  ;;  %v8564_v14 = vcombine.low %v206_v3, %v210_v4  ;;  %v8571_v15 = vcombine.high %v213_v9, %v217_v10  ;;  %v221_v17 = vld [vmem:[#allocation5 + $0x280] sm:$0xff]  ;;  %v8570_v21 = vcombine.low %v213_v9, %v217_v10 }
  0x93   :  { %3264 = vmatpush1.bf16.msra.mxu0 %v8530_v42  ;;  %3436 = vmatpush1.bf16.msra.mxu1 %v8532_v43  ;;  %v218_v12 = vld [vmem:[#allocation5 + $0x268] sm:$0xff]  ;;  %v225_v18 = vld [vmem:[#allocation5 + $0x2a0] sm:$0xff] }
  0x94   :  { %3265 = vmatprep.subr.bf16.mxu0 %v8539_v44  ;;  %3437 = vmatprep.subr.bf16.mxu1 %v8541_v45  ;;  %v8573_v16 = vcombine.high %v214_v11, %v218_v12  ;;  %v222_v19 = vld [vmem:[#allocation5 + $0x288] sm:$0xff]  ;;  %v8572_v22 = vcombine.low %v214_v11, %v218_v12  ;;  %v8579_v23 = vcombine.high %v221_v17, %v225_v18  ;;  %v229_v25 = vld [vmem:[#allocation5 + $0x2c0] sm:$0xff] }
  0x95   :  { %v226_v20 = vld [vmem:[#allocation5 + $0x2a8] sm:$0xff]  ;;  %v233_v26 = vld [vmem:[#allocation5 + $0x2e0] sm:$0xff]  ;;  %v8578_v29 = vcombine.low %v221_v17, %v225_v18  ;;  %v120_v17 = vld [vmem:[#allocation2 + $0x18] sm:$0xff] }
  0x96   :  { %v8581_v24 = vcombine.high %v222_v19, %v226_v20  ;;  %v230_v27 = vld [vmem:[#allocation5 + $0x2c8] sm:$0xff]  ;;  %v8580_v30 = vcombine.low %v222_v19, %v226_v20  ;;  %v8587_v31 = vcombine.high %v229_v25, %v233_v26  ;;  %v237_v33 = vld [vmem:[#allocation5 + $0x300] sm:$0xff]  ;;  %v8586_v37 = vcombine.low %v229_v25, %v233_v26  ;;  %v128_v18 = vld [vmem:[#allocation2 + $0x58] sm:$0xff] }
  0x97   :  { %3266 = vmatpush1.bf16.msra.mxu0 %v8538_v50  ;;  %3438 = vmatpush1.bf16.msra.mxu1 %v8540_v51  ;;  %v234_v28 = vld [vmem:[#allocation5 + $0x2e8] sm:$0xff]  ;;  %v241_v34 = vld [vmem:[#allocation5 + $0x320] sm:$0xff]  ;;  %v10214_v25 = vpack.c.bf16 %v128_v18, %v120_v17 }
  0x98   :  { %3267 = vmatprep.subr.bf16.mxu0 %v8547_v52  ;;  %3439 = vmatprep.subr.bf16.mxu1 %v8549_v55  ;;  %v8589_v32 = vcombine.high %v230_v27, %v234_v28  ;;  %v238_v35 = vld [vmem:[#allocation5 + $0x308] sm:$0xff]  ;;  %v8588_v38 = vcombine.low %v230_v27, %v234_v28  ;;  %v8595_v39 = vcombine.high %v237_v33, %v241_v34  ;;  %v245_v41 = vld [vmem:[#allocation5 + $0x340] sm:$0xff] }
  0x99   :  { %v242_v36 = vld [vmem:[#allocation5 + $0x328] sm:$0xff]  ;;  %v249_v42 = vld [vmem:[#allocation5 + $0x360] sm:$0xff]  ;;  %v8594_v45 = vcombine.low %v237_v33, %v241_v34 }
  0x9a   :  { %v8597_v40 = vcombine.high %v238_v35, %v242_v36  ;;  %v246_v43 = vld [vmem:[#allocation5 + $0x348] sm:$0xff]  ;;  %v8596_v46 = vcombine.low %v238_v35, %v242_v36  ;;  %v8603_v47 = vcombine.high %v245_v41, %v249_v42  ;;  %v253_v49 = vld [vmem:[#allocation5 + $0x380] sm:$0xff]  ;;  %v8602_v53 = vcombine.low %v245_v41, %v249_v42 }
  0x9b   :  { %3268 = vmatpush1.bf16.msra.mxu0 %v8546_v61  ;;  %3440 = vmatpush1.bf16.msra.mxu1 %v8548_v62  ;;  %v250_v44 = vld [vmem:[#allocation5 + $0x368] sm:$0xff]  ;;  %v257_v50 = vld [vmem:[#allocation5 + $0x3a0] sm:$0xff] }
  0x9c   :  { %3269 = vmatprep.subr.bf16.mxu0 %v8555_v63  ;;  %3441 = vmatprep.subr.bf16.mxu1 %v8557_v0  ;;  %v8605_v48 = vcombine.high %v246_v43, %v250_v44  ;;  %v254_v51 = vld [vmem:[#allocation5 + $0x388] sm:$0xff]  ;;  %v8604_v54 = vcombine.low %v246_v43, %v250_v44  ;;  %v8611_v55 = vcombine.high %v253_v49, %v257_v50  ;;  %v261_v57 = vld [vmem:[#allocation5 + $0x3c0] sm:$0xff] }
  0x9d   :  { %v258_v52 = vld [vmem:[#allocation5 + $0x3a8] sm:$0xff]  ;;  %v265_v59 = vld [vmem:[#allocation5 + $0x3e0] sm:$0xff]  ;;  %v8610_v62 = vcombine.low %v253_v49, %v257_v50 }
  0x9e   :  { %v8613_v56 = vcombine.high %v254_v51, %v258_v52  ;;  %v262_v60 = vld [vmem:[#allocation5 + $0x3c8] sm:$0xff]  ;;  %v8612_v63 = vcombine.low %v254_v51, %v258_v52  ;;  %v8619_v0 = vcombine.high %v261_v57, %v265_v59  ;;  %v269_v2 = vld [vmem:[#allocation5 + $0x400] sm:$0xff] }
  0x9f   :  { %3270 = vmatpush1.bf16.msra.mxu0 %v8554_v5  ;;  %3442 = vmatpush1.bf16.msra.mxu1 %v8556_v6  ;;  %v266_v61 = vld [vmem:[#allocation5 + $0x3e8] sm:$0xff]  ;;  %v273_v3 = vld [vmem:[#allocation5 + $0x420] sm:$0xff]  ;;  %v8618_v6 = vcombine.low %v261_v57, %v265_v59 }
  0xa0   :  { %3271 = vmatprep.subr.bf16.mxu0 %v8563_v7  ;;  %3443 = vmatprep.subr.bf16.mxu1 %v8565_v8  ;;  %v8621_v1 = vcombine.high %v262_v60, %v266_v61  ;;  %v270_v4 = vld [vmem:[#allocation5 + $0x408] sm:$0xff]  ;;  %v117_v7 = vld [vmem:[#allocation2] sm:$0xff]  ;;  %v8620_v9 = vcombine.low %v262_v60, %v266_v61  ;;  %v8627_v10 = vcombine.high %v269_v2, %v273_v3 }
  0xa1   :  { %v274_v5 = vld [vmem:[#allocation5 + $0x428] sm:$0xff]  ;;  %v125_v8 = vld [vmem:[#allocation2 + $0x40] sm:$0xff]  ;;  %v8626_v19 = vcombine.low %v269_v2, %v273_v3 }
  0xa2   :  { %v8629_v11 = vcombine.high %v270_v4, %v274_v5  ;;  %v277_v12 = vld [vmem:[#allocation5 + $0x440] sm:$0xff]  ;;  %v8628_v20 = vcombine.low %v270_v4, %v274_v5  ;;  %v286_v26 = vld [vmem:[#allocation5 + $0x488] sm:$0xff] }
  0xa3   :  { %3272 = vmatpush1.bf16.msra.mxu0 %v8562_v13  ;;  %3444 = vmatpush1.bf16.msra.mxu1 %v8564_v14  ;;  %v281_v13 = vld [vmem:[#allocation5 + $0x460] sm:$0xff]  ;;  %v278_v14 = vld [vmem:[#allocation5 + $0x448] sm:$0xff] }
  0xa4   :  { %3273 = vmatprep.subr.bf16.mxu0 %v8571_v15  ;;  %3445 = vmatprep.subr.bf16.mxu1 %v8573_v16  ;;  %v10212_v15 = vpack.c.bf16 %v125_v8, %v117_v7  ;;  %v282_v16 = vld [vmem:[#allocation5 + $0x468] sm:$0xff]  ;;  %v8634_v28 = vcombine.low %v277_v12, %v281_v13  ;;  %v333_v8 = vld [vmem:[#allocation5 + $0x600] sm:$0xff] }
  0xa5   :  { %v290_v27 = vld [vmem:[#allocation5 + $0x4a8] sm:$0xff]  ;;  %v341_v17 = vld [vmem:[#allocation5 + $0x640] sm:$0xff] }
  0xa6   :  { %v8645_v33 = vcombine.high %v286_v26, %v290_v27  ;;  %v294_v34 = vld [vmem:[#allocation5 + $0x4c8] sm:$0xff]  ;;  %v345_v18 = vld [vmem:[#allocation5 + $0x660] sm:$0xff] }
  0xa7   :  { %3274 = vmatpush1.bf16.msra.mxu0 %v8570_v21  ;;  %3446 = vmatpush1.bf16.msra.mxu1 %v8572_v22  ;;  %v8635_v21 = vcombine.high %v277_v12, %v281_v13  ;;  %v8637_v22 = vcombine.high %v278_v14, %v282_v16  ;;  %v298_v35 = vld [vmem:[#allocation5 + $0x4e8] sm:$0xff] }
  0xa8   :  { %3275 = vmatprep.subr.bf16.mxu0 %v8579_v23  ;;  %3447 = vmatprep.subr.bf16.mxu1 %v8581_v24  ;;  %v285_v23 = vld [vmem:[#allocation5 + $0x480] sm:$0xff]  ;;  %v302_v41 = vld [vmem:[#allocation5 + $0x508] sm:$0xff]  ;;  %v8653_v42 = vcombine.high %v294_v34, %v298_v35 }
  0xa9   :  { %v289_v24 = vld [vmem:[#allocation5 + $0x4a0] sm:$0xff]  ;;  %v306_v43 = vld [vmem:[#allocation5 + $0x528] sm:$0xff] }
  0xaa   :  { %v8642_v36 = vcombine.low %v285_v23, %v289_v24  ;;  %v310_v49 = vld [vmem:[#allocation5 + $0x548] sm:$0xff]  ;;  %v8661_v50 = vcombine.high %v302_v41, %v306_v43 }
  0xab   :  { %3276 = vmatpush1.bf16.msra.mxu0 %v8578_v29  ;;  %3448 = vmatpush1.bf16.msra.mxu1 %v8580_v30  ;;  %v8636_v29 = vcombine.low %v278_v14, %v282_v16  ;;  %v8643_v30 = vcombine.high %v285_v23, %v289_v24  ;;  %v314_v51 = vld [vmem:[#allocation5 + $0x568] sm:$0xff]  ;;  %v8699_v24 = vcombine.high %v341_v17, %v345_v18 }
  0xac   :  { %3277 = vmatprep.subr.bf16.mxu0 %v8587_v31  ;;  %3449 = vmatprep.subr.bf16.mxu1 %v8589_v32  ;;  %v293_v31 = vld [vmem:[#allocation5 + $0x4c0] sm:$0xff]  ;;  %v318_v57 = vld [vmem:[#allocation5 + $0x588] sm:$0xff]  ;;  %v8669_v59 = vcombine.high %v310_v49, %v314_v51 }
  0xad   :  { %v297_v32 = vld [vmem:[#allocation5 + $0x4e0] sm:$0xff]  ;;  %v322_v60 = vld [vmem:[#allocation5 + $0x5a8] sm:$0xff] }
  0xae   :  { %v8650_v44 = vcombine.low %v293_v31, %v297_v32  ;;  %v326_v2 = vld [vmem:[#allocation5 + $0x5c8] sm:$0xff]  ;;  %v8677_v3 = vcombine.high %v318_v57, %v322_v60 }
  0xaf   :  { %3278 = vmatpush1.bf16.msra.mxu0 %v8586_v37  ;;  %3450 = vmatpush1.bf16.msra.mxu1 %v8588_v38  ;;  %v8644_v37 = vcombine.low %v286_v26, %v290_v27  ;;  %v8651_v38 = vcombine.high %v293_v31, %v297_v32  ;;  %v330_v4 = vld [vmem:[#allocation5 + $0x5e8] sm:$0xff]  ;;  %v349_v26 = vld [vmem:[#allocation5 + $0x680] sm:$0xff]  ;;  %v8698_v31 = vcombine.low %v341_v17, %v345_v18  ;;  %v119_v17 = vld [vmem:[#allocation2 + $0x10] sm:$0xff] }
  0xb0   :  { %3279 = vmatprep.subr.bf16.mxu0 %v8595_v39  ;;  %3451 = vmatprep.subr.bf16.mxu1 %v8597_v40  ;;  %v301_v39 = vld [vmem:[#allocation5 + $0x500] sm:$0xff]  ;;  %v338_v12 = vld [vmem:[#allocation5 + $0x628] sm:$0xff]  ;;  %v8684_v14 = vcombine.low %v326_v2, %v330_v4  ;;  %v127_v18 = vld [vmem:[#allocation2 + $0x50] sm:$0xff] }
  0xb1   :  { %v305_v40 = vld [vmem:[#allocation5 + $0x520] sm:$0xff] }
  0xb2   :  { %v8658_v52 = vcombine.low %v301_v39, %v305_v40  ;;  %v353_v27 = vld [vmem:[#allocation5 + $0x6a0] sm:$0xff] }
  0xb3   :  { %3280 = vmatpush1.bf16.msra.mxu0 %v8594_v45  ;;  %3452 = vmatpush1.bf16.msra.mxu1 %v8596_v46  ;;  %v8652_v45 = vcombine.low %v294_v34, %v298_v35  ;;  %v8659_v46 = vcombine.high %v301_v39, %v305_v40  ;;  %v357_v34 = vld [vmem:[#allocation5 + $0x6c0] sm:$0xff]  ;;  %v8706_v39 = vcombine.low %v349_v26, %v353_v27 }
  0xb4   :  { %3281 = vmatprep.subr.bf16.mxu0 %v8603_v47  ;;  %3453 = vmatprep.subr.bf16.mxu1 %v8605_v48  ;;  %v309_v47 = vld [vmem:[#allocation5 + $0x540] sm:$0xff] }
  0xb5   :  { %v313_v48 = vld [vmem:[#allocation5 + $0x560] sm:$0xff] }
  0xb6   :  { %v8666_v61 = vcombine.low %v309_v47, %v313_v48  ;;  %v361_v35 = vld [vmem:[#allocation5 + $0x6e0] sm:$0xff] }
  0xb7   :  { %3282 = vmatpush1.bf16.msra.mxu0 %v8602_v53  ;;  %3454 = vmatpush1.bf16.msra.mxu1 %v8604_v54  ;;  %v8660_v53 = vcombine.low %v302_v41, %v306_v43  ;;  %v8667_v54 = vcombine.high %v309_v47, %v313_v48  ;;  %v8715_v41 = vcombine.high %v357_v34, %v361_v35  ;;  %v369_v43 = vld [vmem:[#allocation5 + $0x720] sm:$0xff] }
  0xb8   :  { %3283 = vmatprep.subr.bf16.mxu0 %v8611_v55  ;;  %3455 = vmatprep.subr.bf16.mxu1 %v8613_v56  ;;  %v317_v55 = vld [vmem:[#allocation5 + $0x580] sm:$0xff]  ;;  %v8714_v47 = vcombine.low %v357_v34, %v361_v35 }
  0xb9   :  { %v321_v56 = vld [vmem:[#allocation5 + $0x5a0] sm:$0xff] }
  0xba   :  { %v8674_v5 = vcombine.low %v317_v55, %v321_v56  ;;  %v413_v34 = vld [vmem:[#allocation5 + $0x880] sm:$0xff] }
  0xbb   :  { %3284 = vmatpush1.bf16.msra.mxu0 %v8610_v62  ;;  %3456 = vmatpush1.bf16.msra.mxu1 %v8612_v63  ;;  %v8668_v62 = vcombine.low %v310_v49, %v314_v51  ;;  %v8675_v63 = vcombine.high %v317_v55, %v321_v56  ;;  %v377_v51 = vld [vmem:[#allocation5 + $0x760] sm:$0xff] }
  0xbc   :  { %3285 = vmatprep.subr.bf16.mxu0 %v8619_v0  ;;  %3457 = vmatprep.subr.bf16.mxu1 %v8621_v1  ;;  %v325_v0 = vld [vmem:[#allocation5 + $0x5c0] sm:$0xff] }
  0xbd   :  { %v329_v1 = vld [vmem:[#allocation5 + $0x5e0] sm:$0xff] }
  0xbe   :  { %v8683_v7 = vcombine.high %v325_v0, %v329_v1  ;;  %v8682_v13 = vcombine.low %v325_v0, %v329_v1 }
  0xbf   :  { %3286 = vmatpush1.bf16.msra.mxu0 %v8618_v6  ;;  %3458 = vmatpush1.bf16.msra.mxu1 %v8620_v9  ;;  %v8676_v6 = vcombine.low %v318_v57, %v322_v60  ;;  %v337_v9 = vld [vmem:[#allocation5 + $0x620] sm:$0xff] }
  0xc0   :  { %3298 = vmatprep.subr.bf16.mxu0 %v8627_v10  ;;  %3470 = vmatprep.subr.bf16.mxu1 %v8629_v11  ;;  %v334_v10 = vld [vmem:[#allocation5 + $0x608] sm:$0xff]  ;;  %v8685_v11 = vcombine.high %v326_v2, %v330_v4  ;;  %v8691_v16 = vcombine.high %v333_v8, %v337_v9  ;;  %v385_v60 = vld [vmem:[#allocation5 + $0x7a0] sm:$0xff] }
  0xc1   :  { %v8692_v23 = vcombine.low %v334_v10, %v338_v12  ;;  %v393_v4 = vld [vmem:[#allocation5 + $0x7e0] sm:$0xff] }
  0xc2   :  { %3288 = vmatmul.mubr.bf16.vlgmr.msra.gmra.mrb[0].mxu0 %v10212_v15  ;;  %3460 = vmatmul.mubr.bf16.vlgmr.msra.gmra.mrb[0].mxu1 %v10212_v15 }
  0xc3   :  { %3299 = vmatpush1.bf16.msra.mxu0 %v8626_v19  ;;  %3471 = vmatpush1.bf16.msra.mxu1 %v8628_v20  ;;  %v342_v19 = vld [vmem:[#allocation5 + $0x648] sm:$0xff]  ;;  %v8693_v20 = vcombine.high %v334_v10, %v338_v12  ;;  %v401_v12 = vld [vmem:[#allocation5 + $0x820] sm:$0xff] }
  0xc4   :  { %3300 = vmatprep.subr.bf16.mxu0 %v8635_v21  ;;  %3472 = vmatprep.subr.bf16.mxu1 %v8637_v22  ;;  %v346_v21 = vld [vmem:[#allocation5 + $0x668] sm:$0xff]  ;;  %v8690_v22 = vcombine.low %v333_v8, %v337_v9  ;;  %v397_v9 = vld [vmem:[#allocation5 + $0x800] sm:$0xff] }
  0xc5   :  { %3330 = vmatprep.mubr.bf16.mxu0 %v10214_v25  ;;  %3502 = vmatprep.mubr.bf16.mxu1 %v10214_v25  ;;  %v8700_v32 = vcombine.low %v342_v19, %v346_v21 }
  0xc7   :  { %3301 = vmatpush1.bf16.msra.mxu0 %v8634_v28  ;;  %3473 = vmatpush1.bf16.msra.mxu1 %v8636_v29  ;;  %v350_v28 = vld [vmem:[#allocation5 + $0x688] sm:$0xff]  ;;  %v8701_v29 = vcombine.high %v342_v19, %v346_v21  ;;  %v409_v21 = vld [vmem:[#allocation5 + $0x860] sm:$0xff] }
  0xc8   :  { %3302 = vmatprep.subr.bf16.mxu0 %v8643_v30  ;;  %3474 = vmatprep.subr.bf16.mxu1 %v8645_v33  ;;  %v354_v30 = vld [vmem:[#allocation5 + $0x6a8] sm:$0xff]  ;;  %v8707_v33 = vcombine.high %v349_v26, %v353_v27 }
  0xc9   :  { %v8708_v40 = vcombine.low %v350_v28, %v354_v30  ;;  %v410_v26 = vld [vmem:[#allocation5 + $0x868] sm:$0xff] }
  0xca   :  { %v122_v27 = vld [vmem:[#allocation2 + $0x28] sm:$0xff] }
  0xcb   :  { %3303 = vmatpush1.bf16.msra.mxu0 %v8642_v36  ;;  %3475 = vmatpush1.bf16.msra.mxu1 %v8644_v37  ;;  %v358_v36 = vld [vmem:[#allocation5 + $0x6c8] sm:$0xff]  ;;  %v8709_v37 = vcombine.high %v350_v28, %v354_v30  ;;  %v10220_v30 = vpack.c.bf16 %v127_v18, %v119_v17 }
  0xcc   :  { %3304 = vmatprep.subr.bf16.mxu0 %v8651_v38  ;;  %3476 = vmatprep.subr.bf16.mxu1 %v8653_v42  ;;  %v362_v38 = vld [vmem:[#allocation5 + $0x6e8] sm:$0xff]  ;;  %v365_v42 = vld [vmem:[#allocation5 + $0x700] sm:$0xff] }
  0xcd   :  { %v8716_v48 = vcombine.low %v358_v36, %v362_v38  ;;  %v8723_v49 = vcombine.high %v365_v42, %v369_v43  ;;  %v8722_v55 = vcombine.low %v365_v42, %v369_v43  ;;  %v421_v43 = vld [vmem:[#allocation5 + $0x8c0] sm:$0xff]  ;;  %v458_v17 = vld [vmem:[#allocation5 + $0x9e8] sm:$0xff] }
  0xcf   :  { %3305 = vmatpush1.bf16.msra.mxu0 %v8650_v44  ;;  %3477 = vmatpush1.bf16.msra.mxu1 %v8652_v45  ;;  %v366_v44 = vld [vmem:[#allocation5 + $0x708] sm:$0xff]  ;;  %v8717_v45 = vcombine.high %v358_v36, %v362_v38  ;;  %v417_v36 = vld [vmem:[#allocation5 + $0x8a0] sm:$0xff] }
  0xd0   :  { %3306 = vmatprep.subr.bf16.mxu0 %v8659_v46  ;;  %3478 = vmatprep.subr.bf16.mxu1 %v8661_v50  ;;  %v370_v46 = vld [vmem:[#allocation5 + $0x728] sm:$0xff]  ;;  %v373_v50 = vld [vmem:[#allocation5 + $0x740] sm:$0xff]  ;;  %v8771_v42 = vcombine.high %v413_v34, %v417_v36 }
  0xd1   :  { %v8724_v56 = vcombine.low %v366_v44, %v370_v46  ;;  %v8731_v57 = vcombine.high %v373_v50, %v377_v51  ;;  %v8730_v0 = vcombine.low %v373_v50, %v377_v51  ;;  %v418_v38 = vld [vmem:[#allocation5 + $0x8a8] sm:$0xff] }
  0xd3   :  { %3307 = vmatpush1.bf16.msra.mxu0 %v8658_v52  ;;  %3479 = vmatpush1.bf16.msra.mxu1 %v8660_v53  ;;  %v374_v52 = vld [vmem:[#allocation5 + $0x748] sm:$0xff]  ;;  %v8725_v53 = vcombine.high %v366_v44, %v370_v46  ;;  %v425_v44 = vld [vmem:[#allocation5 + $0x8e0] sm:$0xff] }
  0xd4   :  { %3308 = vmatprep.subr.bf16.mxu0 %v8667_v54  ;;  %3480 = vmatprep.subr.bf16.mxu1 %v8669_v59  ;;  %v378_v54 = vld [vmem:[#allocation5 + $0x768] sm:$0xff]  ;;  %v381_v59 = vld [vmem:[#allocation5 + $0x780] sm:$0xff]  ;;  %v8779_v50 = vcombine.high %v421_v43, %v425_v44 }
  0xd5   :  { %v8732_v1 = vcombine.low %v374_v52, %v378_v54  ;;  %v8739_v2 = vcombine.high %v381_v59, %v385_v60  ;;  %v8738_v8 = vcombine.low %v381_v59, %v385_v60 }
  0xd7   :  { %3309 = vmatpush1.bf16.msra.mxu0 %v8666_v61  ;;  %3481 = vmatpush1.bf16.msra.mxu1 %v8668_v62  ;;  %v382_v61 = vld [vmem:[#allocation5 + $0x788] sm:$0xff]  ;;  %v8733_v62 = vcombine.high %v374_v52, %v378_v54  ;;  %v429_v52 = vld [vmem:[#allocation5 + $0x900] sm:$0xff] }
  0xd8   :  { %3310 = vmatprep.subr.bf16.mxu0 %v8675_v63  ;;  %3482 = vmatprep.subr.bf16.mxu1 %v8677_v3  ;;  %v386_v63 = vld [vmem:[#allocation5 + $0x7a8] sm:$0xff]  ;;  %v389_v3 = vld [vmem:[#allocation5 + $0x7c0] sm:$0xff] }
  0xd9   :  { %v8740_v10 = vcombine.low %v382_v61, %v386_v63  ;;  %v8746_v19 = vcombine.low %v389_v3, %v393_v4  ;;  %v430_v54 = vld [vmem:[#allocation5 + $0x908] sm:$0xff] }
  0xdb   :  { %3311 = vmatpush1.bf16.msra.mxu0 %v8674_v5  ;;  %3483 = vmatpush1.bf16.msra.mxu1 %v8676_v6  ;;  %v390_v5 = vld [vmem:[#allocation5 + $0x7c8] sm:$0xff]  ;;  %v8741_v6 = vcombine.high %v382_v61, %v386_v63  ;;  %v437_v61 = vld [vmem:[#allocation5 + $0x940] sm:$0xff] }
  0xdc   :  { %3312 = vmatprep.subr.bf16.mxu0 %v8683_v7  ;;  %3484 = vmatprep.subr.bf16.mxu1 %v8685_v11  ;;  %v394_v7 = vld [vmem:[#allocation5 + $0x7e8] sm:$0xff]  ;;  %v8747_v11 = vcombine.high %v389_v3, %v393_v4 }
  0xdd   :  { %v438_v63 = vld [vmem:[#allocation5 + $0x948] sm:$0xff] }
  0xdf   :  { %3313 = vmatpush1.bf16.msra.mxu0 %v8682_v13  ;;  %3485 = vmatpush1.bf16.msra.mxu1 %v8684_v14  ;;  %v398_v13 = vld [vmem:[#allocation5 + $0x808] sm:$0xff] }
  0xe0   :  { %3314 = vmatprep.subr.bf16.mxu0 %v8691_v16  ;;  %3486 = vmatprep.subr.bf16.mxu1 %v8693_v20  ;;  %v402_v14 = vld [vmem:[#allocation5 + $0x828] sm:$0xff]  ;;  %v8749_v16 = vcombine.high %v390_v5, %v394_v7  ;;  %v405_v20 = vld [vmem:[#allocation5 + $0x840] sm:$0xff] }
  0xe1   :  { %v8757_v28 = vcombine.high %v398_v13, %v402_v14 }
  0xe3   :  { %3315 = vmatpush1.bf16.msra.mxu0 %v8690_v22  ;;  %3487 = vmatpush1.bf16.msra.mxu1 %v8692_v23  ;;  %v8748_v22 = vcombine.low %v390_v5, %v394_v7  ;;  %v8755_v23 = vcombine.high %v397_v9, %v401_v12  ;;  %v445_v5 = vld [vmem:[#allocation5 + $0x980] sm:$0xff]  ;;  %v446_v7 = vld [vmem:[#allocation5 + $0x988] sm:$0xff] }
  0xe4   :  { %3316 = vmatprep.subr.bf16.mxu0 %v8699_v24  ;;  %3488 = vmatprep.subr.bf16.mxu1 %v8701_v29  ;;  %v406_v24 = vld [vmem:[#allocation5 + $0x848] sm:$0xff] }
  0xe5   :  { %v130_v29 = vld [vmem:[#allocation2 + $0x68] sm:$0xff]  ;;  %v8765_v35 = vcombine.high %v406_v24, %v410_v26 }
  0xe7   :  { %3317 = vmatpush1.bf16.msra.mxu0 %v8698_v31  ;;  %3489 = vmatpush1.bf16.msra.mxu1 %v8700_v32  ;;  %v8754_v31 = vcombine.low %v397_v9, %v401_v12  ;;  %v8756_v32 = vcombine.low %v398_v13, %v402_v14  ;;  %v453_v13 = vld [vmem:[#allocation5 + $0x9c0] sm:$0xff] }
  0xe8   :  { %3318 = vmatprep.subr.bf16.mxu0 %v8707_v33  ;;  %3490 = vmatprep.subr.bf16.mxu1 %v8709_v37  ;;  %v8763_v33 = vcombine.high %v405_v20, %v409_v21  ;;  %v414_v37 = vld [vmem:[#allocation5 + $0x888] sm:$0xff]  ;;  %v457_v14 = vld [vmem:[#allocation5 + $0x9e0] sm:$0xff] }
  0xe9   :  { %v8773_v46 = vcombine.high %v414_v37, %v418_v38 }
  0xeb   :  { %3319 = vmatpush1.bf16.msra.mxu0 %v8706_v39  ;;  %3491 = vmatpush1.bf16.msra.mxu1 %v8708_v40  ;;  %v10222_v39 = vpack.c.bf16 %v130_v29, %v122_v27  ;;  %v8762_v40 = vcombine.low %v405_v20, %v409_v21  ;;  %v8811_v20 = vcombine.high %v453_v13, %v457_v14 }
  0xec   :  { %3320 = vmatprep.subr.bf16.mxu0 %v8715_v41  ;;  %3492 = vmatprep.subr.bf16.mxu1 %v8717_v45  ;;  %v8764_v41 = vcombine.low %v406_v24, %v410_v26  ;;  %v422_v45 = vld [vmem:[#allocation5 + $0x8c8] sm:$0xff]  ;;  %v8810_v27 = vcombine.low %v453_v13, %v457_v14 }
  0xed   :  { %v462_v24 = vld [vmem:[#allocation5 + $0xa08] sm:$0xff] }
  0xee   :  { %v466_v26 = vld [vmem:[#allocation5 + $0xa28] sm:$0xff] }
  0xef   :  { %3321 = vmatpush1.bf16.msra.mxu0 %v8714_v47  ;;  %3493 = vmatpush1.bf16.msra.mxu1 %v8716_v48  ;;  %v426_v47 = vld [vmem:[#allocation5 + $0x8e8] sm:$0xff]  ;;  %v8770_v48 = vcombine.low %v413_v34, %v417_v36 }
  0xf0   :  { %3322 = vmatprep.subr.bf16.mxu0 %v8723_v49  ;;  %3494 = vmatprep.subr.bf16.mxu1 %v8725_v53  ;;  %v8772_v49 = vcombine.low %v414_v37, %v418_v38  ;;  %v8781_v51 = vcombine.high %v422_v45, %v426_v47  ;;  %v433_v53 = vld [vmem:[#allocation5 + $0x920] sm:$0xff]  ;;  %v470_v34 = vld [vmem:[#allocation5 + $0xa48] sm:$0xff]  ;;  %v8820_v37 = vcombine.low %v462_v24, %v466_v26 }
  0xf1   :  { %v8787_v59 = vcombine.high %v429_v52, %v433_v53  ;;  %v514_v13 = vld [vmem:[#allocation5 + $0xba8] sm:$0xff] }
  0xf3   :  { %3323 = vmatpush1.bf16.msra.mxu0 %v8722_v55  ;;  %3495 = vmatpush1.bf16.msra.mxu1 %v8724_v56  ;;  %v434_v55 = vld [vmem:[#allocation5 + $0x928] sm:$0xff]  ;;  %v8778_v56 = vcombine.low %v421_v43, %v425_v44 }
  0xf4   :  { %3324 = vmatprep.subr.bf16.mxu0 %v8731_v57  ;;  %3496 = vmatprep.subr.bf16.mxu1 %v8733_v62  ;;  %v8780_v57 = vcombine.low %v422_v45, %v426_v47  ;;  %v8789_v60 = vcombine.high %v430_v54, %v434_v55  ;;  %v441_v62 = vld [vmem:[#allocation5 + $0x960] sm:$0xff]  ;;  %v478_v43 = vld [vmem:[#allocation5 + $0xa88] sm:$0xff] }
  0xf5   :  { %v8795_v3 = vcombine.high %v437_v61, %v441_v62  ;;  %v8794_v9 = vcombine.low %v437_v61, %v441_v62  ;;  %v482_v44 = vld [vmem:[#allocation5 + $0xaa8] sm:$0xff] }
  0xf6   :  { %v498_v61 = vld [vmem:[#allocation5 + $0xb28] sm:$0xff] }
  0xf7   :  { %3325 = vmatpush1.bf16.msra.mxu0 %v8730_v0  ;;  %3497 = vmatpush1.bf16.msra.mxu1 %v8732_v1  ;;  %v442_v0 = vld [vmem:[#allocation5 + $0x968] sm:$0xff]  ;;  %v8786_v1 = vcombine.low %v429_v52, %v433_v53 }
  0xf8   :  { %3326 = vmatprep.subr.bf16.mxu0 %v8739_v2  ;;  %3498 = vmatprep.subr.bf16.mxu1 %v8741_v6  ;;  %v8788_v2 = vcombine.low %v430_v54, %v434_v55  ;;  %v8797_v4 = vcombine.high %v438_v63, %v442_v0  ;;  %v449_v6 = vld [vmem:[#allocation5 + $0x9a0] sm:$0xff]  ;;  %v490_v52 = vld [vmem:[#allocation5 + $0xae8] sm:$0xff]  ;;  %v8836_v54 = vcombine.low %v478_v43, %v482_v44 }
  0xf9   :  { %v8802_v18 = vcombine.low %v445_v5, %v449_v6 }
  0xfb   :  { %3327 = vmatpush1.bf16.msra.mxu0 %v8738_v8  ;;  %3499 = vmatpush1.bf16.msra.mxu1 %v8740_v10  ;;  %v450_v8 = vld [vmem:[#allocation5 + $0x9a8] sm:$0xff]  ;;  %v8796_v10 = vcombine.low %v438_v63, %v442_v0 }
  0xfc   :  { %3328 = vmatprep.subr.bf16.mxu0 %v8747_v11  ;;  %3500 = vmatprep.subr.bf16.mxu1 %v8749_v16  ;;  %v8803_v11 = vcombine.high %v445_v5, %v449_v6  ;;  %v8805_v12 = vcombine.high %v446_v7, %v450_v8  ;;  %v454_v16 = vld [vmem:[#allocation5 + $0x9c8] sm:$0xff] }
  0xfd   :  { %v8813_v21 = vcombine.high %v454_v16, %v458_v17  ;;  %v506_v5 = vld [vmem:[#allocation5 + $0xb68] sm:$0xff] }
  0xff   :  { %3329 = vmatpush1.bf16.msra.mxu0 %v8746_v19  ;;  %3501 = vmatpush1.bf16.msra.mxu1 %v8748_v22  ;;  %v8804_v19 = vcombine.low %v446_v7, %v450_v8  ;;  %v461_v22 = vld [vmem:[#allocation5 + $0xa00] sm:$0xff] }
 0x100   :  { %3341 = vmatprep.subr.bf16.mxu0 %v8755_v23  ;;  %3513 = vmatprep.subr.bf16.mxu1 %v8757_v28  ;;  %v465_v23 = vld [vmem:[#allocation5 + $0xa20] sm:$0xff]  ;;  %v8812_v28 = vcombine.low %v454_v16, %v458_v17 }
 0x101   :  { %v8819_v29 = vcombine.high %v461_v22, %v465_v23  ;;  %v8818_v36 = vcombine.low %v461_v22, %v465_v23  ;;  %v522_v22 = vld [vmem:[#allocation5 + $0xbe8] sm:$0xff] }
 0x102   :  { %3331 = vmatmul.mubr.bf16.vlgmr.msra.gmra.mrb[0].mxu0 %v10220_v30  ;;  %3503 = vmatmul.mubr.bf16.vlgmr.msra.gmra.mrb[0].mxu1 %v10220_v30 }
 0x103   :  { %3342 = vmatpush1.bf16.msra.mxu0 %v8754_v31  ;;  %3514 = vmatpush1.bf16.msra.mxu1 %v8756_v32  ;;  %v8821_v31 = vcombine.high %v462_v24, %v466_v26  ;;  %v469_v32 = vld [vmem:[#allocation5 + $0xa40] sm:$0xff] }
 0x104   :  { %3343 = vmatprep.subr.bf16.mxu0 %v8763_v33  ;;  %3515 = vmatprep.subr.bf16.mxu1 %v8765_v35  ;;  %v473_v33 = vld [vmem:[#allocation5 + $0xa60] sm:$0xff]  ;;  %v474_v35 = vld [vmem:[#allocation5 + $0xa68] sm:$0xff] }
 0x105   :  { %3373 = vmatprep.mubr.bf16.mxu0 %v10222_v39  ;;  %3545 = vmatprep.mubr.bf16.mxu1 %v10222_v39  ;;  %v8827_v38 = vcombine.high %v469_v32, %v473_v33  ;;  %v8826_v45 = vcombine.low %v469_v32, %v473_v33  ;;  %v530_v32 = vld [vmem:[#allocation5 + $0xc28] sm:$0xff] }
 0x107   :  { %3344 = vmatpush1.bf16.msra.mxu0 %v8762_v40  ;;  %3516 = vmatpush1.bf16.msra.mxu1 %v8764_v41  ;;  %v8829_v40 = vcombine.high %v470_v34, %v474_v35  ;;  %v477_v41 = vld [vmem:[#allocation5 + $0xa80] sm:$0xff] }
 0x108   :  { %3345 = vmatprep.subr.bf16.mxu0 %v8771_v42  ;;  %3517 = vmatprep.subr.bf16.mxu1 %v8773_v46  ;;  %v481_v42 = vld [vmem:[#allocation5 + $0xaa0] sm:$0xff]  ;;  %v8828_v46 = vcombine.low %v470_v34, %v474_v35 }
 0x109   :  { %v8835_v47 = vcombine.high %v477_v41, %v481_v42  ;;  %v8834_v53 = vcombine.low %v477_v41, %v481_v42  ;;  %v121_v34 = vld [vmem:[#allocation2 + $0x20] sm:$0xff]  ;;  %v534_v42 = vld [vmem:[#allocation5 + $0xc48] sm:$0xff] }
 0x10a   :  { %v129_v35 = vld [vmem:[#allocation2 + $0x60] sm:$0xff] }
 0x10b   :  { %3346 = vmatpush1.bf16.msra.mxu0 %v8770_v48  ;;  %3518 = vmatpush1.bf16.msra.mxu1 %v8772_v49  ;;  %v8837_v48 = vcombine.high %v478_v43, %v482_v44  ;;  %v485_v49 = vld [vmem:[#allocation5 + $0xac0] sm:$0xff]  ;;  %v10228_v43 = vpack.c.bf16 %v129_v35, %v121_v34  ;;  %v538_v44 = vld [vmem:[#allocation5 + $0xc68] sm:$0xff] }
 0x10c   :  { %3347 = vmatprep.subr.bf16.mxu0 %v8779_v50  ;;  %3519 = vmatprep.subr.bf16.mxu1 %v8781_v51  ;;  %v489_v50 = vld [vmem:[#allocation5 + $0xae0] sm:$0xff]  ;;  %v486_v51 = vld [vmem:[#allocation5 + $0xac8] sm:$0xff] }
 0x10d   :  { %v8843_v55 = vcombine.high %v485_v49, %v489_v50  ;;  %v8842_v62 = vcombine.low %v485_v49, %v489_v50  ;;  %v8844_v63 = vcombine.low %v486_v51, %v490_v52  ;;  %v537_v41 = vld [vmem:[#allocation5 + $0xc60] sm:$0xff]  ;;  %v8893_v50 = vcombine.high %v534_v42, %v538_v44  ;;  %v582_v34 = vld [vmem:[#allocation5 + $0xdc8] sm:$0xff] }
 0x10e   :  { %v586_v35 = vld [vmem:[#allocation5 + $0xde8] sm:$0xff] }
 0x10f   :  { %3348 = vmatpush1.bf16.msra.mxu0 %v8778_v56  ;;  %3520 = vmatpush1.bf16.msra.mxu1 %v8780_v57  ;;  %v8845_v56 = vcombine.high %v486_v51, %v490_v52  ;;  %v493_v57 = vld [vmem:[#allocation5 + $0xb00] sm:$0xff] }
 0x110   :  { %3349 = vmatprep.subr.bf16.mxu0 %v8787_v59  ;;  %3521 = vmatprep.subr.bf16.mxu1 %v8789_v60  ;;  %v497_v59 = vld [vmem:[#allocation5 + $0xb20] sm:$0xff]  ;;  %v494_v60 = vld [vmem:[#allocation5 + $0xb08] sm:$0xff] }
 0x111   :  { %v8851_v0 = vcombine.high %v493_v57, %v497_v59  ;;  %v8850_v6 = vcombine.low %v493_v57, %v497_v59  ;;  %v8852_v7 = vcombine.low %v494_v60, %v498_v61  ;;  %v541_v51 = vld [vmem:[#allocation5 + $0xc80] sm:$0xff]  ;;  %v8892_v57 = vcombine.low %v534_v42, %v538_v44  ;;  %v590_v44 = vld [vmem:[#allocation5 + $0xe08] sm:$0xff] }
 0x112   :  { %v545_v52 = vld [vmem:[#allocation5 + $0xca0] sm:$0xff] }
 0x113   :  { %3350 = vmatpush1.bf16.msra.mxu0 %v8786_v1  ;;  %3522 = vmatpush1.bf16.msra.mxu1 %v8788_v2  ;;  %v8853_v1 = vcombine.high %v494_v60, %v498_v61  ;;  %v501_v2 = vld [vmem:[#allocation5 + $0xb40] sm:$0xff]  ;;  %v8899_v59 = vcombine.high %v541_v51, %v545_v52 }
 0x114   :  { %3351 = vmatprep.subr.bf16.mxu0 %v8795_v3  ;;  %3523 = vmatprep.subr.bf16.mxu1 %v8797_v4  ;;  %v505_v3 = vld [vmem:[#allocation5 + $0xb60] sm:$0xff]  ;;  %v502_v4 = vld [vmem:[#allocation5 + $0xb48] sm:$0xff] }
 0x115   :  { %v8859_v8 = vcombine.high %v501_v2, %v505_v3  ;;  %v8858_v14 = vcombine.low %v501_v2, %v505_v3  ;;  %v8860_v16 = vcombine.low %v502_v4, %v506_v5  ;;  %v549_v61 = vld [vmem:[#allocation5 + $0xcc0] sm:$0xff] }
 0x116   :  { %v593_v42 = vld [vmem:[#allocation5 + $0xe20] sm:$0xff] }
 0x117   :  { %3352 = vmatpush1.bf16.msra.mxu0 %v8794_v9  ;;  %3524 = vmatpush1.bf16.msra.mxu1 %v8796_v10  ;;  %v8861_v9 = vcombine.high %v502_v4, %v506_v5  ;;  %v509_v10 = vld [vmem:[#allocation5 + $0xb80] sm:$0xff] }
 0x118   :  { %3353 = vmatprep.subr.bf16.mxu0 %v8803_v11  ;;  %3525 = vmatprep.subr.bf16.mxu1 %v8805_v12  ;;  %v513_v11 = vld [vmem:[#allocation5 + $0xba0] sm:$0xff]  ;;  %v510_v12 = vld [vmem:[#allocation5 + $0xb88] sm:$0xff] }
 0x119   :  { %v8867_v17 = vcombine.high %v509_v10, %v513_v11  ;;  %v8866_v23 = vcombine.low %v509_v10, %v513_v11  ;;  %v8868_v24 = vcombine.low %v510_v12, %v514_v13  ;;  %v557_v5 = vld [vmem:[#allocation5 + $0xd00] sm:$0xff] }
 0x11b   :  { %3354 = vmatpush1.bf16.msra.mxu0 %v8802_v18  ;;  %3526 = vmatpush1.bf16.msra.mxu1 %v8804_v19  ;;  %v8869_v18 = vcombine.high %v510_v12, %v514_v13  ;;  %v517_v19 = vld [vmem:[#allocation5 + $0xbc0] sm:$0xff] }
 0x11c   :  { %3355 = vmatprep.subr.bf16.mxu0 %v8811_v20  ;;  %3527 = vmatprep.subr.bf16.mxu1 %v8813_v21  ;;  %v521_v20 = vld [vmem:[#allocation5 + $0xbe0] sm:$0xff]  ;;  %v518_v21 = vld [vmem:[#allocation5 + $0xbc8] sm:$0xff] }
 0x11d   :  { %v8875_v26 = vcombine.high %v517_v19, %v521_v20  ;;  %v8874_v33 = vcombine.low %v517_v19, %v521_v20  ;;  %v565_v13 = vld [vmem:[#allocation5 + $0xd40] sm:$0xff] }
 0x11f   :  { %3356 = vmatpush1.bf16.msra.mxu0 %v8810_v27  ;;  %3528 = vmatpush1.bf16.msra.mxu1 %v8812_v28  ;;  %v8877_v27 = vcombine.high %v518_v21, %v522_v22  ;;  %v525_v28 = vld [vmem:[#allocation5 + $0xc00] sm:$0xff] }
 0x120   :  { %3357 = vmatprep.subr.bf16.mxu0 %v8819_v29  ;;  %3529 = vmatprep.subr.bf16.mxu1 %v8821_v31  ;;  %v529_v29 = vld [vmem:[#allocation5 + $0xc20] sm:$0xff]  ;;  %v526_v31 = vld [vmem:[#allocation5 + $0xc08] sm:$0xff] }
 0x123   :  { %3358 = vmatpush1.bf16.msra.mxu0 %v8818_v36  ;;  %3530 = vmatpush1.bf16.msra.mxu1 %v8820_v37  ;;  %v8876_v36 = vcombine.low %v518_v21, %v522_v22  ;;  %v8883_v37 = vcombine.high %v525_v28, %v529_v29  ;;  %v573_v22 = vld [vmem:[#allocation5 + $0xd80] sm:$0xff] }
 0x124   :  { %3359 = vmatprep.subr.bf16.mxu0 %v8827_v38  ;;  %3531 = vmatprep.subr.bf16.mxu1 %v8829_v40  ;;  %v8885_v38 = vcombine.high %v526_v31, %v530_v32  ;;  %v533_v40 = vld [vmem:[#allocation5 + $0xc40] sm:$0xff] }
 0x125   :  { %v8891_v49 = vcombine.high %v533_v40, %v537_v41 }
 0x127   :  { %3360 = vmatpush1.bf16.msra.mxu0 %v8826_v45  ;;  %3532 = vmatpush1.bf16.msra.mxu1 %v8828_v46  ;;  %v124_v45 = vld [vmem:[#allocation2 + $0x38] sm:$0xff] }
 0x128   :  { %3361 = vmatprep.subr.bf16.mxu0 %v8835_v47  ;;  %3533 = vmatprep.subr.bf16.mxu1 %v8837_v48  ;;  %v132_v46 = vld [vmem:[#allocation2 + $0x78] sm:$0xff]  ;;  %v8882_v47 = vcombine.low %v525_v28, %v529_v29  ;;  %v8884_v48 = vcombine.low %v526_v31, %v530_v32  ;;  %v581_v32 = vld [vmem:[#allocation5 + $0xdc0] sm:$0xff] }
 0x12b   :  { %3362 = vmatpush1.bf16.msra.mxu0 %v8834_v53  ;;  %3534 = vmatpush1.bf16.msra.mxu1 %v8836_v54  ;;  %v10230_v53 = vpack.c.bf16 %v132_v46, %v124_v45  ;;  %v542_v54 = vld [vmem:[#allocation5 + $0xc88] sm:$0xff] }
 0x12c   :  { %3363 = vmatprep.subr.bf16.mxu0 %v8843_v55  ;;  %3535 = vmatprep.subr.bf16.mxu1 %v8845_v56  ;;  %v546_v55 = vld [vmem:[#allocation5 + $0xca8] sm:$0xff]  ;;  %v8890_v56 = vcombine.low %v533_v40, %v537_v41  ;;  %v8941_v40 = vcombine.high %v582_v34, %v586_v35  ;;  %v589_v41 = vld [vmem:[#allocation5 + $0xe00] sm:$0xff] }
 0x12d   :  { %v8901_v60 = vcombine.high %v542_v54, %v546_v55  ;;  %v8900_v2 = vcombine.low %v542_v54, %v546_v55  ;;  %v594_v45 = vld [vmem:[#allocation5 + $0xe28] sm:$0xff]  ;;  %v8946_v55 = vcombine.low %v589_v41, %v593_v42 }
 0x12e   :  { %v602_v54 = vld [vmem:[#allocation5 + $0xe68] sm:$0xff] }
 0x12f   :  { %3364 = vmatpush1.bf16.msra.mxu0 %v8842_v62  ;;  %3536 = vmatpush1.bf16.msra.mxu1 %v8844_v63  ;;  %v553_v62 = vld [vmem:[#allocation5 + $0xce0] sm:$0xff]  ;;  %v550_v63 = vld [vmem:[#allocation5 + $0xcc8] sm:$0xff] }
 0x130   :  { %3365 = vmatprep.subr.bf16.mxu0 %v8851_v0  ;;  %3537 = vmatprep.subr.bf16.mxu1 %v8853_v1  ;;  %v554_v0 = vld [vmem:[#allocation5 + $0xce8] sm:$0xff]  ;;  %v8898_v1 = vcombine.low %v541_v51, %v545_v52  ;;  %v8907_v3 = vcombine.high %v549_v61, %v553_v62  ;;  %v601_v51 = vld [vmem:[#allocation5 + $0xe60] sm:$0xff] }
 0x131   :  { %v8909_v4 = vcombine.high %v550_v63, %v554_v0  ;;  %v8908_v10 = vcombine.low %v550_v63, %v554_v0  ;;  %v598_v52 = vld [vmem:[#allocation5 + $0xe48] sm:$0xff] }
 0x132   :  { %v610_v63 = vld [vmem:[#allocation5 + $0xea8] sm:$0xff] }
 0x133   :  { %3366 = vmatpush1.bf16.msra.mxu0 %v8850_v6  ;;  %3538 = vmatpush1.bf16.msra.mxu1 %v8852_v7  ;;  %v561_v6 = vld [vmem:[#allocation5 + $0xd20] sm:$0xff]  ;;  %v558_v7 = vld [vmem:[#allocation5 + $0xd08] sm:$0xff] }
 0x134   :  { %3367 = vmatprep.subr.bf16.mxu0 %v8859_v8  ;;  %3539 = vmatprep.subr.bf16.mxu1 %v8861_v9  ;;  %v562_v8 = vld [vmem:[#allocation5 + $0xd28] sm:$0xff]  ;;  %v8906_v9 = vcombine.low %v549_v61, %v553_v62  ;;  %v8915_v11 = vcombine.high %v557_v5, %v561_v6  ;;  %v609_v61 = vld [vmem:[#allocation5 + $0xea0] sm:$0xff] }
 0x135   :  { %v8917_v12 = vcombine.high %v558_v7, %v562_v8  ;;  %v8916_v19 = vcombine.low %v558_v7, %v562_v8  ;;  %v606_v62 = vld [vmem:[#allocation5 + $0xe88] sm:$0xff] }
 0x136   :  { %v618_v7 = vld [vmem:[#allocation5 + $0xee8] sm:$0xff] }
 0x137   :  { %3368 = vmatpush1.bf16.msra.mxu0 %v8858_v14  ;;  %3540 = vmatpush1.bf16.msra.mxu1 %v8860_v16  ;;  %v569_v14 = vld [vmem:[#allocation5 + $0xd60] sm:$0xff]  ;;  %v566_v16 = vld [vmem:[#allocation5 + $0xd48] sm:$0xff] }
 0x138   :  { %3369 = vmatprep.subr.bf16.mxu0 %v8867_v17  ;;  %3541 = vmatprep.subr.bf16.mxu1 %v8869_v18  ;;  %v570_v17 = vld [vmem:[#allocation5 + $0xd68] sm:$0xff]  ;;  %v8914_v18 = vcombine.low %v557_v5, %v561_v6  ;;  %v8923_v20 = vcombine.high %v565_v13, %v569_v14  ;;  %v617_v5 = vld [vmem:[#allocation5 + $0xee0] sm:$0xff] }
 0x139   :  { %v8925_v21 = vcombine.high %v566_v16, %v570_v17  ;;  %v8924_v28 = vcombine.low %v566_v16, %v570_v17  ;;  %v614_v6 = vld [vmem:[#allocation5 + $0xec8] sm:$0xff] }
 0x13a   :  { %v626_v16 = vld [vmem:[#allocation5 + $0xf28] sm:$0xff] }
 0x13b   :  { %3370 = vmatpush1.bf16.msra.mxu0 %v8866_v23  ;;  %3542 = vmatpush1.bf16.msra.mxu1 %v8868_v24  ;;  %v577_v23 = vld [vmem:[#allocation5 + $0xda0] sm:$0xff]  ;;  %v574_v24 = vld [vmem:[#allocation5 + $0xd88] sm:$0xff] }
 0x13c   :  { %3371 = vmatprep.subr.bf16.mxu0 %v8875_v26  ;;  %3543 = vmatprep.subr.bf16.mxu1 %v8877_v27  ;;  %v578_v26 = vld [vmem:[#allocation5 + $0xda8] sm:$0xff]  ;;  %v8922_v27 = vcombine.low %v565_v13, %v569_v14  ;;  %v8931_v29 = vcombine.high %v573_v22, %v577_v23  ;;  %v625_v13 = vld [vmem:[#allocation5 + $0xf20] sm:$0xff] }
 0x13d   :  { %v8933_v31 = vcombine.high %v574_v24, %v578_v26  ;;  %v622_v14 = vld [vmem:[#allocation5 + $0xf08] sm:$0xff] }
 0x13f   :  { %3372 = vmatpush1.bf16.msra.mxu0 %v8874_v33  ;;  %3544 = vmatpush1.bf16.msra.mxu1 %v8876_v36  ;;  %v585_v33 = vld [vmem:[#allocation5 + $0xde0] sm:$0xff]  ;;  %v8930_v36 = vcombine.low %v573_v22, %v577_v23  ;;  %v630_v23 = vld [vmem:[#allocation5 + $0xf48] sm:$0xff] }
 0x140   :  { %3384 = vmatprep.subr.bf16.mxu0 %v8883_v37  ;;  %3556 = vmatprep.subr.bf16.mxu1 %v8885_v38  ;;  %v8932_v37 = vcombine.low %v574_v24, %v578_v26  ;;  %v8939_v38 = vcombine.high %v581_v32, %v585_v33  ;;  %v8938_v46 = vcombine.low %v581_v32, %v585_v33  ;;  %v633_v22 = vld [vmem:[#allocation5 + $0xf60] sm:$0xff]  ;;  %v634_v24 = vld [vmem:[#allocation5 + $0xf68] sm:$0xff] }
 0x141   :  { %v641_v32 = vld [vmem:[#allocation5 + $0xfa0] sm:$0xff]  ;;  %v638_v33 = vld [vmem:[#allocation5 + $0xf88] sm:$0xff] }
 0x142   :  { %3374 = vmatmul.mubr.bf16.vlgmr.msra.gmra.mrb[0].mxu0 %v10228_v43  ;;  %3546 = vmatmul.mubr.bf16.vlgmr.msra.gmra.mrb[0].mxu1 %v10228_v43 }
 0x143   :  { %3385 = vmatpush1.bf16.msra.mxu0 %v8882_v47  ;;  %3557 = vmatpush1.bf16.msra.mxu1 %v8884_v48  ;;  %v8940_v47 = vcombine.low %v582_v34, %v586_v35  ;;  %v8947_v48 = vcombine.high %v589_v41, %v593_v42  ;;  %v642_v34 = vld [vmem:[#allocation5 + $0xfa8] sm:$0xff]  ;;  %v649_v41 = vld [vmem:[#allocation5 + $0xfe0] sm:$0xff] }
 0x144   :  { %3386 = vmatprep.subr.bf16.mxu0 %v8891_v49  ;;  %3558 = vmatprep.subr.bf16.mxu1 %v8893_v50  ;;  %v8949_v49 = vcombine.high %v590_v44, %v594_v45  ;;  %v597_v50 = vld [vmem:[#allocation5 + $0xe40] sm:$0xff]  ;;  %v646_v42 = vld [vmem:[#allocation5 + $0xfc8] sm:$0xff] }
 0x145   :  { %3416 = vmatprep.mubr.bf16.mxu0 %v10230_v53  ;;  %3588 = vmatprep.mubr.bf16.mxu1 %v10230_v53  ;;  %v8954_v0 = vcombine.low %v597_v50, %v601_v51 }
 0x147   :  { %3387 = vmatpush1.bf16.msra.mxu0 %v8890_v56  ;;  %3559 = vmatpush1.bf16.msra.mxu1 %v8892_v57  ;;  %v8948_v56 = vcombine.low %v590_v44, %v594_v45  ;;  %v8955_v57 = vcombine.high %v597_v50, %v601_v51  ;;  %v650_v44 = vld [vmem:[#allocation5 + $0xfe8] sm:$0xff]  ;;  %v147_v50 = vld [vmem:[#allocation5 + $0x30] sm:$0xff]  ;;  %v144_v51 = vld [vmem:[#allocation5 + $0x18] sm:$0xff] }
 0x148   :  { %3388 = vmatprep.subr.bf16.mxu0 %v8899_v59  ;;  %3560 = vmatprep.subr.bf16.mxu1 %v8901_v60  ;;  %v8957_v59 = vcombine.high %v598_v52, %v602_v54  ;;  %v605_v60 = vld [vmem:[#allocation5 + $0xe80] sm:$0xff] }
 0x149   :  { %v8962_v8 = vcombine.low %v605_v60, %v609_v61 }
 0x14b   :  { %3389 = vmatpush1.bf16.msra.mxu0 %v8898_v1  ;;  %3561 = vmatpush1.bf16.msra.mxu1 %v8900_v2  ;;  %v8956_v1 = vcombine.low %v598_v52, %v602_v54  ;;  %v8963_v2 = vcombine.high %v605_v60, %v609_v61  ;;  %v148_v52 = vld [vmem:[#allocation5 + $0x38] sm:$0xff]  ;;  %v151_v61 = vld [vmem:[#allocation5 + $0x50] sm:$0xff] }
 0x14c   :  { %3390 = vmatprep.subr.bf16.mxu0 %v8907_v3  ;;  %3562 = vmatprep.subr.bf16.mxu1 %v8909_v4  ;;  %v8965_v3 = vcombine.high %v606_v62, %v610_v63  ;;  %v613_v4 = vld [vmem:[#allocation5 + $0xec0] sm:$0xff]  ;;  %v8505_v60 = vcombine.high %v144_v51, %v148_v52 }
 0x14d   :  { %v8970_v17 = vcombine.low %v613_v4, %v617_v5 }
 0x14f   :  { %3391 = vmatpush1.bf16.msra.mxu0 %v8906_v9  ;;  %3563 = vmatpush1.bf16.msra.mxu1 %v8908_v10  ;;  %v8964_v9 = vcombine.low %v606_v62, %v610_v63  ;;  %v8971_v10 = vcombine.high %v613_v4, %v617_v5  ;;  %v155_v62 = vld [vmem:[#allocation5 + $0x70] sm:$0xff] }
 0x150   :  { %3392 = vmatprep.subr.bf16.mxu0 %v8915_v11  ;;  %3564 = vmatprep.subr.bf16.mxu1 %v8917_v12  ;;  %v8973_v11 = vcombine.high %v614_v6, %v618_v7  ;;  %v621_v12 = vld [vmem:[#allocation5 + $0xf00] sm:$0xff]  ;;  %v8511_v4 = vcombine.high %v151_v61, %v155_v62 }
 0x151   :  { %v8978_v26 = vcombine.low %v621_v12, %v625_v13 }
 0x153   :  { %3393 = vmatpush1.bf16.msra.mxu0 %v8914_v18  ;;  %3565 = vmatpush1.bf16.msra.mxu1 %v8916_v19  ;;  %v8972_v18 = vcombine.low %v614_v6, %v618_v7  ;;  %v8979_v19 = vcombine.high %v621_v12, %v625_v13  ;;  %v159_v6 = vld [vmem:[#allocation5 + $0x90] sm:$0xff] }
 0x154   :  { %3394 = vmatprep.subr.bf16.mxu0 %v8923_v20  ;;  %3566 = vmatprep.subr.bf16.mxu1 %v8925_v21  ;;  %v8981_v20 = vcombine.high %v622_v14, %v626_v16  ;;  %v629_v21 = vld [vmem:[#allocation5 + $0xf40] sm:$0xff]  ;;  %v163_v7 = vld [vmem:[#allocation5 + $0xb0] sm:$0xff] }
 0x155   :  { %v8986_v35 = vcombine.low %v629_v21, %v633_v22  ;;  %v8519_v12 = vcombine.high %v159_v6, %v163_v7 }
 0x157   :  { %3395 = vmatpush1.bf16.msra.mxu0 %v8922_v27  ;;  %3567 = vmatpush1.bf16.msra.mxu1 %v8924_v28  ;;  %v8980_v27 = vcombine.low %v622_v14, %v626_v16  ;;  %v8987_v28 = vcombine.high %v629_v21, %v633_v22  ;;  %v167_v14 = vld [vmem:[#allocation5 + $0xd0] sm:$0xff] }
 0x158   :  { %3396 = vmatprep.subr.bf16.mxu0 %v8931_v29  ;;  %3568 = vmatprep.subr.bf16.mxu1 %v8933_v31  ;;  %v8989_v29 = vcombine.high %v630_v23, %v634_v24  ;;  %v637_v31 = vld [vmem:[#allocation5 + $0xf80] sm:$0xff]  ;;  %v171_v16 = vld [vmem:[#allocation5 + $0xf0] sm:$0xff] }
 0x159   :  { %v8994_v45 = vcombine.low %v637_v31, %v641_v32  ;;  %v8527_v21 = vcombine.high %v167_v14, %v171_v16 }
 0x15b   :  { %3397 = vmatpush1.bf16.msra.mxu0 %v8930_v36  ;;  %3569 = vmatpush1.bf16.msra.mxu1 %v8932_v37  ;;  %v8988_v36 = vcombine.low %v630_v23, %v634_v24  ;;  %v8995_v37 = vcombine.high %v637_v31, %v641_v32  ;;  %v175_v23 = vld [vmem:[#allocation5 + $0x110] sm:$0xff] }
 0x15c   :  { %3398 = vmatprep.subr.bf16.mxu0 %v8939_v38  ;;  %3570 = vmatprep.subr.bf16.mxu1 %v8941_v40  ;;  %v8997_v38 = vcombine.high %v638_v33, %v642_v34  ;;  %v645_v40 = vld [vmem:[#allocation5 + $0xfc0] sm:$0xff]  ;;  %v179_v24 = vld [vmem:[#allocation5 + $0x130] sm:$0xff] }
 0x15d   :  { %v9002_v54 = vcombine.low %v645_v40, %v649_v41  ;;  %v8535_v31 = vcombine.high %v175_v23, %v179_v24  ;;  %v183_v32 = vld [vmem:[#allocation5 + $0x150] sm:$0xff] }
 0x15f   :  { %3399 = vmatpush1.bf16.msra.mxu0 %v8938_v46  ;;  %3571 = vmatpush1.bf16.msra.mxu1 %v8940_v47  ;;  %v8996_v46 = vcombine.low %v638_v33, %v642_v34  ;;  %v9003_v47 = vcombine.high %v645_v40, %v649_v41  ;;  %v187_v33 = vld [vmem:[#allocation5 + $0x170] sm:$0xff]  ;;  %v184_v34 = vld [vmem:[#allocation5 + $0x158] sm:$0xff] }
 0x160   :  { %3400 = vmatprep.subr.bf16.mxu0 %v8947_v48  ;;  %3572 = vmatprep.subr.bf16.mxu1 %v8949_v49  ;;  %v9005_v48 = vcombine.high %v646_v42, %v650_v44  ;;  %v143_v49 = vld [vmem:[#allocation5 + $0x10] sm:$0xff] }
 0x161   :  { %v191_v41 = vld [vmem:[#allocation5 + $0x190] sm:$0xff] }
 0x163   :  { %3401 = vmatpush1.bf16.msra.mxu0 %v8946_v55  ;;  %3573 = vmatpush1.bf16.msra.mxu1 %v8948_v56  ;;  %v123_v55 = vld [vmem:[#allocation2 + $0x30] sm:$0xff] }
 0x164   :  { %3402 = vmatprep.subr.bf16.mxu0 %v8955_v57  ;;  %3574 = vmatprep.subr.bf16.mxu1 %v8957_v59  ;;  %v131_v56 = vld [vmem:[#allocation2 + $0x70] sm:$0xff]  ;;  %v9004_v57 = vcombine.low %v646_v42, %v650_v44  ;;  %v8503_v59 = vcombine.high %v143_v49, %v147_v50  ;;  %v192_v44 = vld [vmem:[#allocation5 + $0x198] sm:$0xff] }
 0x165   :  { %v10236_v63 = vpack.c.bf16 %v131_v56, %v123_v55  ;;  %v195_v42 = vld [vmem:[#allocation5 + $0x1b0] sm:$0xff] }
 0x166   :  { %v8550_v55 = vcombine.low %v191_v41, %v195_v42 }
 0x167   :  { %3403 = vmatpush1.bf16.msra.mxu0 %v8954_v0  ;;  %3575 = vmatpush1.bf16.msra.mxu1 %v8956_v1  ;;  %v152_v0 = vld [vmem:[#allocation5 + $0x58] sm:$0xff] }
 0x168   :  { %3404 = vmatprep.subr.bf16.mxu0 %v8963_v2  ;;  %3576 = vmatprep.subr.bf16.mxu1 %v8965_v3  ;;  %v156_v1 = vld [vmem:[#allocation5 + $0x78] sm:$0xff]  ;;  %v8502_v2 = vcombine.low %v143_v49, %v147_v50  ;;  %v8504_v3 = vcombine.low %v144_v51, %v148_v52  ;;  %v199_v50 = vld [vmem:[#allocation5 + $0x1d0] sm:$0xff] }
 0x169   :  { %v8513_v5 = vcombine.high %v152_v0, %v156_v1  ;;  %v203_v51 = vld [vmem:[#allocation5 + $0x1f0] sm:$0xff]  ;;  %v200_v52 = vld [vmem:[#allocation5 + $0x1d8] sm:$0xff] }
 0x16b   :  { %3405 = vmatpush1.bf16.msra.mxu0 %v8962_v8  ;;  %3577 = vmatpush1.bf16.msra.mxu1 %v8964_v9  ;;  %v160_v8 = vld [vmem:[#allocation5 + $0x98] sm:$0xff] }
 0x16c   :  { %3406 = vmatprep.subr.bf16.mxu0 %v8971_v10  ;;  %3578 = vmatprep.subr.bf16.mxu1 %v8973_v11  ;;  %v164_v9 = vld [vmem:[#allocation5 + $0xb8] sm:$0xff]  ;;  %v8510_v10 = vcombine.low %v151_v61, %v155_v62  ;;  %v8512_v11 = vcombine.low %v152_v0, %v156_v1  ;;  %v211_v61 = vld [vmem:[#allocation5 + $0x230] sm:$0xff]  ;;  %v8558_v1 = vcombine.low %v199_v50, %v203_v51 }
 0x16d   :  { %v8521_v13 = vcombine.high %v160_v8, %v164_v9  ;;  %v208_v62 = vld [vmem:[#allocation5 + $0x218] sm:$0xff] }
 0x16e   :  { %v212_v0 = vld [vmem:[#allocation5 + $0x238] sm:$0xff] }
 0x16f   :  { %3407 = vmatpush1.bf16.msra.mxu0 %v8970_v17  ;;  %3579 = vmatpush1.bf16.msra.mxu1 %v8972_v18  ;;  %v168_v17 = vld [vmem:[#allocation5 + $0xd8] sm:$0xff] }
 0x170   :  { %3408 = vmatprep.subr.bf16.mxu0 %v8979_v19  ;;  %3580 = vmatprep.subr.bf16.mxu1 %v8981_v20  ;;  %v172_v18 = vld [vmem:[#allocation5 + $0xf8] sm:$0xff]  ;;  %v8518_v19 = vcombine.low %v159_v6, %v163_v7  ;;  %v8520_v20 = vcombine.low %v160_v8, %v164_v9  ;;  %v219_v6 = vld [vmem:[#allocation5 + $0x270] sm:$0xff] }
 0x171   :  { %v8529_v22 = vcombine.high %v168_v17, %v172_v18  ;;  %v216_v7 = vld [vmem:[#allocation5 + $0x258] sm:$0xff] }
 0x172   :  { %v220_v8 = vld [vmem:[#allocation5 + $0x278] sm:$0xff] }
 0x173   :  { %3409 = vmatpush1.bf16.msra.mxu0 %v8978_v26  ;;  %3581 = vmatpush1.bf16.msra.mxu1 %v8980_v27  ;;  %v176_v26 = vld [vmem:[#allocation5 + $0x118] sm:$0xff] }
 0x174   :  { %3410 = vmatprep.subr.bf16.mxu0 %v8987_v28  ;;  %3582 = vmatprep.subr.bf16.mxu1 %v8989_v29  ;;  %v180_v27 = vld [vmem:[#allocation5 + $0x138] sm:$0xff]  ;;  %v8526_v28 = vcombine.low %v167_v14, %v171_v16  ;;  %v8528_v29 = vcombine.low %v168_v17, %v172_v18  ;;  %v227_v14 = vld [vmem:[#allocation5 + $0x2b0] sm:$0xff] }
 0x175   :  { %v224_v16 = vld [vmem:[#allocation5 + $0x298] sm:$0xff] }
 0x176   :  { %v228_v17 = vld [vmem:[#allocation5 + $0x2b8] sm:$0xff] }
 0x177   :  { %3411 = vmatpush1.bf16.msra.mxu0 %v8986_v35  ;;  %3583 = vmatpush1.bf16.msra.mxu1 %v8988_v36  ;;  %v188_v35 = vld [vmem:[#allocation5 + $0x178] sm:$0xff]  ;;  %v8534_v36 = vcombine.low %v175_v23, %v179_v24  ;;  %v235_v23 = vld [vmem:[#allocation5 + $0x2f0] sm:$0xff] }
 0x178   :  { %3412 = vmatprep.subr.bf16.mxu0 %v8995_v37  ;;  %3584 = vmatprep.subr.bf16.mxu1 %v8997_v38  ;;  %v8536_v37 = vcombine.low %v176_v26, %v180_v27  ;;  %v8543_v38 = vcombine.high %v183_v32, %v187_v33  ;;  %v8545_v40 = vcombine.high %v184_v34, %v188_v35  ;;  %v232_v24 = vld [vmem:[#allocation5 + $0x2d8] sm:$0xff] }
 0x17b   :  { %3413 = vmatpush1.bf16.msra.mxu0 %v8994_v45  ;;  %3585 = vmatpush1.bf16.msra.mxu1 %v8996_v46  ;;  %v196_v45 = vld [vmem:[#allocation5 + $0x1b8] sm:$0xff]  ;;  %v8542_v46 = vcombine.low %v183_v32, %v187_v33  ;;  %v243_v32 = vld [vmem:[#allocation5 + $0x330] sm:$0xff] }
 0x17c   :  { %3414 = vmatprep.subr.bf16.mxu0 %v9003_v47  ;;  %3586 = vmatprep.subr.bf16.mxu1 %v9005_v48  ;;  %v8544_v47 = vcombine.low %v184_v34, %v188_v35  ;;  %v8551_v48 = vcombine.high %v191_v41, %v195_v42  ;;  %v8553_v49 = vcombine.high %v192_v44, %v196_v45  ;;  %v240_v33 = vld [vmem:[#allocation5 + $0x318] sm:$0xff]  ;;  %v251_v41 = vld [vmem:[#allocation5 + $0x370] sm:$0xff] }
 0x17d   :  { %v8552_v56 = vcombine.low %v192_v44, %v196_v45  ;;  %v244_v34 = vld [vmem:[#allocation5 + $0x338] sm:$0xff] }
 0x17e   :  { %v248_v42 = vld [vmem:[#allocation5 + $0x358] sm:$0xff] }
 0x17f   :  { %3415 = vmatpush1.bf16.msra.mxu0 %v9002_v54  ;;  %3587 = vmatpush1.bf16.msra.mxu1 %v9004_v57  ;;  %v204_v54 = vld [vmem:[#allocation5 + $0x1f8] sm:$0xff]  ;;  %v8559_v57 = vcombine.high %v199_v50, %v203_v51  ;;  %v259_v50 = vld [vmem:[#allocation5 + $0x3b0] sm:$0xff] }
 0x180   :  { %3599 = vmatprep.subr.bf16.mxu0 %v8503_v59  ;;  %3771 = vmatprep.subr.bf16.mxu1 %v8505_v60  ;;  %v8561_v59 = vcombine.high %v200_v52, %v204_v54  ;;  %v207_v60 = vld [vmem:[#allocation5 + $0x210] sm:$0xff]  ;;  %v252_v44 = vld [vmem:[#allocation5 + $0x378] sm:$0xff] }
 0x181   :  { %v8566_v9 = vcombine.low %v207_v60, %v211_v61  ;;  %v256_v51 = vld [vmem:[#allocation5 + $0x398] sm:$0xff] }
 0x182   :  { %3417 = vmatmul.mubr.bf16.vlgmr.msra.gmra.mrb[0].mxu0 %v10236_v63  ;;  %3589 = vmatmul.mubr.bf16.vlgmr.msra.gmra.mrb[0].mxu1 %v10236_v63 }
 0x183   :  { %3600 = vmatpush1.bf16.msra.mxu0 %v8502_v2  ;;  %3772 = vmatpush1.bf16.msra.mxu1 %v8504_v3  ;;  %v8560_v2 = vcombine.low %v200_v52, %v204_v54  ;;  %v8567_v3 = vcombine.high %v207_v60, %v211_v61  ;;  %v260_v52 = vld [vmem:[#allocation5 + $0x3b8] sm:$0xff]  ;;  %v267_v60 = vld [vmem:[#allocation5 + $0x3f0] sm:$0xff] }
 0x184   :  { %3601 = vmatprep.subr.bf16.mxu0 %v8511_v4  ;;  %3773 = vmatprep.subr.bf16.mxu1 %v8513_v5  ;;  %v8569_v4 = vcombine.high %v208_v62, %v212_v0  ;;  %v215_v5 = vld [vmem:[#allocation5 + $0x250] sm:$0xff]  ;;  %v264_v61 = vld [vmem:[#allocation5 + $0x3d8] sm:$0xff] }
 0x185   :  { %3631 = vmatprep.mubr.bf16.mxu0 %v10208_v58  ;;  %3803 = vmatprep.mubr.bf16.mxu1 %v10208_v58  ;;  %v8537_v58 = vcombine.high %v176_v26, %v180_v27  ;;  %v8574_v18 = vcombine.low %v215_v5, %v219_v6  ;;  %v236_v26 = vld [vmem:[#allocation5 + $0x2f8] sm:$0xff] }
 0x187   :  { %3602 = vmatpush1.bf16.msra.mxu0 %v8510_v10  ;;  %3774 = vmatpush1.bf16.msra.mxu1 %v8512_v11  ;;  %v8568_v10 = vcombine.low %v208_v62, %v212_v0  ;;  %v8575_v11 = vcombine.high %v215_v5, %v219_v6  ;;  %v268_v62 = vld [vmem:[#allocation5 + $0x3f8] sm:$0xff]  ;;  %v275_v5 = vld [vmem:[#allocation5 + $0x430] sm:$0xff] }
 0x188   :  { %3603 = vmatprep.subr.bf16.mxu0 %v8519_v12  ;;  %3775 = vmatprep.subr.bf16.mxu1 %v8521_v13  ;;  %v8577_v12 = vcombine.high %v216_v7, %v220_v8  ;;  %v223_v13 = vld [vmem:[#allocation5 + $0x290] sm:$0xff]  ;;  %v272_v6 = vld [vmem:[#allocation5 + $0x418] sm:$0xff] }
 0x189   :  { %v8582_v27 = vcombine.low %v223_v13, %v227_v14 }
 0x18b   :  { %3604 = vmatpush1.bf16.msra.mxu0 %v8518_v19  ;;  %3776 = vmatpush1.bf16.msra.mxu1 %v8520_v20  ;;  %v8576_v19 = vcombine.low %v216_v7, %v220_v8  ;;  %v8583_v20 = vcombine.high %v223_v13, %v227_v14  ;;  %v276_v7 = vld [vmem:[#allocation5 + $0x438] sm:$0xff]  ;;  %v283_v13 = vld [vmem:[#allocation5 + $0x470] sm:$0xff] }
 0x18c   :  { %3605 = vmatprep.subr.bf16.mxu0 %v8527_v21  ;;  %3777 = vmatprep.subr.bf16.mxu1 %v8529_v22  ;;  %v8585_v21 = vcombine.high %v224_v16, %v228_v17  ;;  %v231_v22 = vld [vmem:[#allocation5 + $0x2d0] sm:$0xff]  ;;  %v280_v14 = vld [vmem:[#allocation5 + $0x458] sm:$0xff] }
 0x18d   :  { %v8590_v35 = vcombine.low %v231_v22, %v235_v23 }
 0x18f   :  { %3606 = vmatpush1.bf16.msra.mxu0 %v8526_v28  ;;  %3778 = vmatpush1.bf16.msra.mxu1 %v8528_v29  ;;  %v8584_v28 = vcombine.low %v224_v16, %v228_v17  ;;  %v8591_v29 = vcombine.high %v231_v22, %v235_v23  ;;  %v284_v16 = vld [vmem:[#allocation5 + $0x478] sm:$0xff]  ;;  %v291_v22 = vld [vmem:[#allocation5 + $0x4b0] sm:$0xff] }
 0x190   :  { %3607 = vmatprep.subr.bf16.mxu0 %v8535_v31  ;;  %3779 = vmatprep.subr.bf16.mxu1 %v8537_v58  ;;  %v8593_v31 = vcombine.high %v232_v24, %v236_v26  ;;  %v239_v58 = vld [vmem:[#allocation5 + $0x310] sm:$0xff]  ;;  %v288_v23 = vld [vmem:[#allocation5 + $0x498] sm:$0xff] }
 0x191   :  { %v8598_v45 = vcombine.low %v239_v58, %v243_v32 }
 0x193   :  { %3608 = vmatpush1.bf16.msra.mxu0 %v8534_v36  ;;  %3780 = vmatpush1.bf16.msra.mxu1 %v8536_v37  ;;  %v8592_v36 = vcombine.low %v232_v24, %v236_v26  ;;  %v8599_v37 = vcombine.high %v239_v58, %v243_v32  ;;  %v292_v24 = vld [vmem:[#allocation5 + $0x4b8] sm:$0xff]  ;;  %v299_v58 = vld [vmem:[#allocation5 + $0x4f0] sm:$0xff] }
 0x194   :  { %3609 = vmatprep.subr.bf16.mxu0 %v8543_v38  ;;  %3781 = vmatprep.subr.bf16.mxu1 %v8545_v40  ;;  %v8601_v38 = vcombine.high %v240_v33, %v244_v34  ;;  %v247_v40 = vld [vmem:[#allocation5 + $0x350] sm:$0xff]  ;;  %v296_v32 = vld [vmem:[#allocation5 + $0x4d8] sm:$0xff] }
 0x195   :  { %v8606_v54 = vcombine.low %v247_v40, %v251_v41 }
 0x197   :  { %3610 = vmatpush1.bf16.msra.mxu0 %v8542_v46  ;;  %3782 = vmatpush1.bf16.msra.mxu1 %v8544_v47  ;;  %v8600_v46 = vcombine.low %v240_v33, %v244_v34  ;;  %v8607_v47 = vcombine.high %v247_v40, %v251_v41  ;;  %v300_v33 = vld [vmem:[#allocation5 + $0x4f8] sm:$0xff] }
 0x198   :  { %3611 = vmatprep.subr.bf16.mxu0 %v8551_v48  ;;  %3783 = vmatprep.subr.bf16.mxu1 %v8553_v49  ;;  %v8609_v48 = vcombine.high %v248_v42, %v252_v44  ;;  %v255_v49 = vld [vmem:[#allocation5 + $0x390] sm:$0xff]  ;;  %v304_v40 = vld [vmem:[#allocation5 + $0x518] sm:$0xff] }
 0x199   :  { %v8614_v0 = vcombine.low %v255_v49, %v259_v50  ;;  %v308_v41 = vld [vmem:[#allocation5 + $0x538] sm:$0xff] }
 0x19b   :  { %3612 = vmatpush1.bf16.msra.mxu0 %v8550_v55  ;;  %3784 = vmatpush1.bf16.msra.mxu1 %v8552_v56  ;;  %v8608_v55 = vcombine.low %v248_v42, %v252_v44  ;;  %v8615_v56 = vcombine.high %v255_v49, %v259_v50  ;;  %v8656_v44 = vcombine.low %v296_v32, %v300_v33  ;;  %v316_v49 = vld [vmem:[#allocation5 + $0x578] sm:$0xff] }
 0x19c   :  { %3613 = vmatprep.subr.bf16.mxu0 %v8559_v57  ;;  %3785 = vmatprep.subr.bf16.mxu1 %v8561_v59  ;;  %v8617_v57 = vcombine.high %v256_v51, %v260_v52  ;;  %v263_v59 = vld [vmem:[#allocation5 + $0x3d0] sm:$0xff] }
 0x19d   :  { %v8622_v8 = vcombine.low %v263_v59, %v267_v60 }
 0x19f   :  { %3614 = vmatpush1.bf16.msra.mxu0 %v8558_v1  ;;  %3786 = vmatpush1.bf16.msra.mxu1 %v8560_v2  ;;  %v8616_v1 = vcombine.low %v256_v51, %v260_v52  ;;  %v8623_v2 = vcombine.high %v263_v59, %v267_v60  ;;  %v8664_v51 = vcombine.low %v304_v40, %v308_v41  ;;  %v324_v59 = vld [vmem:[#allocation5 + $0x5b8] sm:$0xff] }
 0x1a0   :  { %3615 = vmatprep.subr.bf16.mxu0 %v8567_v3  ;;  %3787 = vmatprep.subr.bf16.mxu1 %v8569_v4  ;;  %v8625_v3 = vcombine.high %v264_v61, %v268_v62  ;;  %v271_v4 = vld [vmem:[#allocation5 + $0x410] sm:$0xff] }
 0x1a1   :  { %v8630_v17 = vcombine.low %v271_v4, %v275_v5 }
 0x1a3   :  { %3616 = vmatpush1.bf16.msra.mxu0 %v8566_v9  ;;  %3788 = vmatpush1.bf16.msra.mxu1 %v8568_v10  ;;  %v8624_v9 = vcombine.low %v264_v61, %v268_v62  ;;  %v8631_v10 = vcombine.high %v271_v4, %v275_v5  ;;  %v332_v4 = vld [vmem:[#allocation5 + $0x5f8] sm:$0xff] }
 0x1a4   :  { %3617 = vmatprep.subr.bf16.mxu0 %v8575_v11  ;;  %3789 = vmatprep.subr.bf16.mxu1 %v8577_v12  ;;  %v8633_v11 = vcombine.high %v272_v6, %v276_v7  ;;  %v279_v12 = vld [vmem:[#allocation5 + $0x450] sm:$0xff] }
 0x1a5   :  { %v8638_v26 = vcombine.low %v279_v12, %v283_v13 }
 0x1a7   :  { %3618 = vmatpush1.bf16.msra.mxu0 %v8574_v18  ;;  %3790 = vmatpush1.bf16.msra.mxu1 %v8576_v19  ;;  %v8632_v18 = vcombine.low %v272_v6, %v276_v7  ;;  %v8639_v19 = vcombine.high %v279_v12, %v283_v13  ;;  %v340_v12 = vld [vmem:[#allocation5 + $0x638] sm:$0xff] }
 0x1a8   :  { %3619 = vmatprep.subr.bf16.mxu0 %v8583_v20  ;;  %3791 = vmatprep.subr.bf16.mxu1 %v8585_v21  ;;  %v8641_v20 = vcombine.high %v280_v14, %v284_v16  ;;  %v287_v21 = vld [vmem:[#allocation5 + $0x490] sm:$0xff] }
 0x1a9   :  { %v8646_v34 = vcombine.low %v287_v21, %v291_v22 }
 0x1ab   :  { %3620 = vmatpush1.bf16.msra.mxu0 %v8582_v27  ;;  %3792 = vmatpush1.bf16.msra.mxu1 %v8584_v28  ;;  %v8640_v27 = vcombine.low %v280_v14, %v284_v16  ;;  %v8647_v28 = vcombine.high %v287_v21, %v291_v22  ;;  %v348_v21 = vld [vmem:[#allocation5 + $0x678] sm:$0xff] }
 0x1ac   :  { %3621 = vmatprep.subr.bf16.mxu0 %v8591_v29  ;;  %3793 = vmatprep.subr.bf16.mxu1 %v8593_v31  ;;  %v8649_v29 = vcombine.high %v288_v23, %v292_v24  ;;  %v295_v31 = vld [vmem:[#allocation5 + $0x4d0] sm:$0xff] }
 0x1ad   :  { %v8654_v42 = vcombine.low %v295_v31, %v299_v58 }
 0x1af   :  { %3622 = vmatpush1.bf16.msra.mxu0 %v8590_v35  ;;  %3794 = vmatpush1.bf16.msra.mxu1 %v8592_v36  ;;  %v8655_v35 = vcombine.high %v295_v31, %v299_v58  ;;  %v8657_v36 = vcombine.high %v296_v32, %v300_v33  ;;  %v356_v31 = vld [vmem:[#allocation5 + $0x6b8] sm:$0xff] }
 0x1b0   :  { %3623 = vmatprep.subr.bf16.mxu0 %v8599_v37  ;;  %3795 = vmatprep.subr.bf16.mxu1 %v8601_v38  ;;  %v303_v37 = vld [vmem:[#allocation5 + $0x510] sm:$0xff] }
 0x1b1   :  { %v307_v38 = vld [vmem:[#allocation5 + $0x530] sm:$0xff] }
 0x1b2   :  { %v8662_v50 = vcombine.low %v303_v37, %v307_v38 }
 0x1b3   :  { %3624 = vmatpush1.bf16.msra.mxu0 %v8598_v45  ;;  %3796 = vmatpush1.bf16.msra.mxu1 %v8600_v46  ;;  %v8663_v45 = vcombine.high %v303_v37, %v307_v38  ;;  %v311_v46 = vld [vmem:[#allocation5 + $0x550] sm:$0xff]  ;;  %v364_v37 = vld [vmem:[#allocation5 + $0x6f8] sm:$0xff] }
 0x1b4   :  { %3625 = vmatprep.subr.bf16.mxu0 %v8607_v47  ;;  %3797 = vmatprep.subr.bf16.mxu1 %v8609_v48  ;;  %v315_v47 = vld [vmem:[#allocation5 + $0x570] sm:$0xff]  ;;  %v312_v48 = vld [vmem:[#allocation5 + $0x558] sm:$0xff] }
 0x1b5   :  { %v8671_v52 = vcombine.high %v311_v46, %v315_v47  ;;  %v8670_v60 = vcombine.low %v311_v46, %v315_v47  ;;  %v8672_v61 = vcombine.low %v312_v48, %v316_v49  ;;  %v372_v46 = vld [vmem:[#allocation5 + $0x738] sm:$0xff] }
 0x1b7   :  { %3626 = vmatpush1.bf16.msra.mxu0 %v8606_v54  ;;  %3798 = vmatpush1.bf16.msra.mxu1 %v8608_v55  ;;  %v8673_v54 = vcombine.high %v312_v48, %v316_v49  ;;  %v319_v55 = vld [vmem:[#allocation5 + $0x590] sm:$0xff] }
 0x1b8   :  { %3627 = vmatprep.subr.bf16.mxu0 %v8615_v56  ;;  %3799 = vmatprep.subr.bf16.mxu1 %v8617_v57  ;;  %v323_v56 = vld [vmem:[#allocation5 + $0x5b0] sm:$0xff]  ;;  %v320_v57 = vld [vmem:[#allocation5 + $0x598] sm:$0xff] }
 0x1b9   :  { %v8679_v62 = vcombine.high %v319_v55, %v323_v56  ;;  %v8678_v5 = vcombine.low %v319_v55, %v323_v56  ;;  %v8680_v6 = vcombine.low %v320_v57, %v324_v59  ;;  %v380_v55 = vld [vmem:[#allocation5 + $0x778] sm:$0xff] }
 0x1bb   :  { %3628 = vmatpush1.bf16.msra.mxu0 %v8614_v0  ;;  %3800 = vmatpush1.bf16.msra.mxu1 %v8616_v1  ;;  %v8681_v0 = vcombine.high %v320_v57, %v324_v59  ;;  %v327_v1 = vld [vmem:[#allocation5 + $0x5d0] sm:$0xff] }
 0x1bc   :  { %3629 = vmatprep.subr.bf16.mxu0 %v8623_v2  ;;  %3801 = vmatprep.subr.bf16.mxu1 %v8625_v3  ;;  %v331_v2 = vld [vmem:[#allocation5 + $0x5f0] sm:$0xff]  ;;  %v328_v3 = vld [vmem:[#allocation5 + $0x5d8] sm:$0xff] }
 0x1bd   :  { %v8687_v7 = vcombine.high %v327_v1, %v331_v2  ;;  %v8686_v13 = vcombine.low %v327_v1, %v331_v2  ;;  %v8688_v14 = vcombine.low %v328_v3, %v332_v4  ;;  %v388_v1 = vld [vmem:[#allocation5 + $0x7b8] sm:$0xff] }
 0x1bf   :  { %3630 = vmatpush1.bf16.msra.mxu0 %v8622_v8  ;;  %3802 = vmatpush1.bf16.msra.mxu1 %v8624_v9  ;;  %v8689_v8 = vcombine.high %v328_v3, %v332_v4  ;;  %v335_v9 = vld [vmem:[#allocation5 + $0x610] sm:$0xff] }
 0x1c0   :  { %3642 = vmatprep.subr.bf16.mxu0 %v8631_v10  ;;  %3814 = vmatprep.subr.bf16.mxu1 %v8633_v11  ;;  %v339_v10 = vld [vmem:[#allocation5 + $0x630] sm:$0xff]  ;;  %v336_v11 = vld [vmem:[#allocation5 + $0x618] sm:$0xff] }
 0x1c1   :  { %v8695_v16 = vcombine.high %v335_v9, %v339_v10  ;;  %v8694_v22 = vcombine.low %v335_v9, %v339_v10  ;;  %v396_v9 = vld [vmem:[#allocation5 + $0x7f8] sm:$0xff] }
 0x1c2   :  { %3632 = vmatmul.mubr.bf16.vlgmr.msra.gmra.mrb[4].mxu0 %v10212_v15  ;;  %3804 = vmatmul.mubr.bf16.vlgmr.msra.gmra.mrb[4].mxu1 %v10212_v15  ;;  %v8648_v15 = vcombine.low %v288_v23, %v292_v24  ;;  %v8696_v23 = vcombine.low %v336_v11, %v340_v12 }
 0x1c3   :  { %3643 = vmatpush1.bf16.msra.mxu0 %v8630_v17  ;;  %3815 = vmatpush1.bf16.msra.mxu1 %v8632_v18  ;;  %v8697_v17 = vcombine.high %v336_v11, %v340_v12  ;;  %v343_v18 = vld [vmem:[#allocation5 + $0x650] sm:$0xff] }
 0x1c4   :  { %3644 = vmatprep.subr.bf16.mxu0 %v8639_v19  ;;  %3816 = vmatprep.subr.bf16.mxu1 %v8641_v20  ;;  %v347_v19 = vld [vmem:[#allocation5 + $0x670] sm:$0xff]  ;;  %v344_v20 = vld [vmem:[#allocation5 + $0x658] sm:$0xff] }
 0x1c5   :  { %3674 = vmatprep.mubr.bf16.mxu0 %v10214_v25  ;;  %3846 = vmatprep.mubr.bf16.mxu1 %v10214_v25  ;;  %v8665_v25 = vcombine.high %v304_v40, %v308_v41  ;;  %v8703_v24 = vcombine.high %v343_v18, %v347_v19  ;;  %v8702_v58 = vcombine.low %v343_v18, %v347_v19  ;;  %v404_v18 = vld [vmem:[#allocation5 + $0x838] sm:$0xff] }
 0x1c6   :  { %v8704_v32 = vcombine.low %v344_v20, %v348_v21 }
 0x1c7   :  { %3645 = vmatpush1.bf16.msra.mxu0 %v8638_v26  ;;  %3817 = vmatpush1.bf16.msra.mxu1 %v8640_v27  ;;  %v8705_v26 = vcombine.high %v344_v20, %v348_v21  ;;  %v351_v27 = vld [vmem:[#allocation5 + $0x690] sm:$0xff] }
 0x1c8   :  { %3646 = vmatprep.subr.bf16.mxu0 %v8647_v28  ;;  %3818 = vmatprep.subr.bf16.mxu1 %v8649_v29  ;;  %v355_v28 = vld [vmem:[#allocation5 + $0x6b0] sm:$0xff]  ;;  %v352_v29 = vld [vmem:[#allocation5 + $0x698] sm:$0xff] }
 0x1c9   :  { %v8711_v33 = vcombine.high %v351_v27, %v355_v28  ;;  %v8710_v38 = vcombine.low %v351_v27, %v355_v28  ;;  %v8712_v40 = vcombine.low %v352_v29, %v356_v31  ;;  %v412_v27 = vld [vmem:[#allocation5 + $0x878] sm:$0xff] }
 0x1cb   :  { %3647 = vmatpush1.bf16.msra.mxu0 %v8646_v34  ;;  %3819 = vmatpush1.bf16.msra.mxu1 %v8648_v15  ;;  %v8713_v34 = vcombine.high %v352_v29, %v356_v31  ;;  %v359_v15 = vld [vmem:[#allocation5 + $0x6d0] sm:$0xff] }
 0x1cc   :  { %3648 = vmatprep.subr.bf16.mxu0 %v8655_v35  ;;  %3820 = vmatprep.subr.bf16.mxu1 %v8657_v36  ;;  %v363_v35 = vld [vmem:[#allocation5 + $0x6f0] sm:$0xff]  ;;  %v360_v36 = vld [vmem:[#allocation5 + $0x6d8] sm:$0xff] }
 0x1cd   :  { %v8719_v41 = vcombine.high %v359_v15, %v363_v35  ;;  %v8718_v47 = vcombine.low %v359_v15, %v363_v35  ;;  %v8720_v48 = vcombine.low %v360_v36, %v364_v37  ;;  %v420_v15 = vld [vmem:[#allocation5 + $0x8b8] sm:$0xff] }
 0x1cf   :  { %3649 = vmatpush1.bf16.msra.mxu0 %v8654_v42  ;;  %3821 = vmatpush1.bf16.msra.mxu1 %v8656_v44  ;;  %v8721_v42 = vcombine.high %v360_v36, %v364_v37  ;;  %v367_v44 = vld [vmem:[#allocation5 + $0x710] sm:$0xff] }
 0x1d0   :  { %3650 = vmatprep.subr.bf16.mxu0 %v8663_v45  ;;  %3822 = vmatprep.subr.bf16.mxu1 %v8665_v25  ;;  %v371_v45 = vld [vmem:[#allocation5 + $0x730] sm:$0xff]  ;;  %v368_v25 = vld [vmem:[#allocation5 + $0x718] sm:$0xff] }
 0x1d1   :  { %v8727_v49 = vcombine.high %v367_v44, %v371_v45  ;;  %v8726_v56 = vcombine.low %v367_v44, %v371_v45  ;;  %v8728_v57 = vcombine.low %v368_v25, %v372_v46  ;;  %v428_v44 = vld [vmem:[#allocation5 + $0x8f8] sm:$0xff] }
 0x1d3   :  { %3651 = vmatpush1.bf16.msra.mxu0 %v8662_v50  ;;  %3823 = vmatpush1.bf16.msra.mxu1 %v8664_v51  ;;  %v8729_v50 = vcombine.high %v368_v25, %v372_v46  ;;  %v375_v51 = vld [vmem:[#allocation5 + $0x750] sm:$0xff] }
 0x1d4   :  { %3652 = vmatprep.subr.bf16.mxu0 %v8671_v52  ;;  %3824 = vmatprep.subr.bf16.mxu1 %v8673_v54  ;;  %v379_v52 = vld [vmem:[#allocation5 + $0x770] sm:$0xff]  ;;  %v376_v54 = vld [vmem:[#allocation5 + $0x758] sm:$0xff] }
 0x1d5   :  { %v8735_v59 = vcombine.high %v375_v51, %v379_v52  ;;  %v8734_v2 = vcombine.low %v375_v51, %v379_v52  ;;  %v8736_v3 = vcombine.low %v376_v54, %v380_v55 }
 0x1d7   :  { %3653 = vmatpush1.bf16.msra.mxu0 %v8670_v60  ;;  %3825 = vmatpush1.bf16.msra.mxu1 %v8672_v61  ;;  %v8737_v60 = vcombine.high %v376_v54, %v380_v55  ;;  %v383_v61 = vld [vmem:[#allocation5 + $0x790] sm:$0xff] }
 0x1d8   :  { %3654 = vmatprep.subr.bf16.mxu0 %v8679_v62  ;;  %3826 = vmatprep.subr.bf16.mxu1 %v8681_v0  ;;  %v387_v62 = vld [vmem:[#allocation5 + $0x7b0] sm:$0xff]  ;;  %v384_v0 = vld [vmem:[#allocation5 + $0x798] sm:$0xff] }
 0x1d9   :  { %v8743_v4 = vcombine.high %v383_v61, %v387_v62  ;;  %v8742_v10 = vcombine.low %v383_v61, %v387_v62  ;;  %v8744_v11 = vcombine.low %v384_v0, %v388_v1  ;;  %v439_v55 = vld [vmem:[#allocation5 + $0x950] sm:$0xff] }
 0x1db   :  { %3655 = vmatpush1.bf16.msra.mxu0 %v8678_v5  ;;  %3827 = vmatpush1.bf16.msra.mxu1 %v8680_v6  ;;  %v8745_v5 = vcombine.high %v384_v0, %v388_v1  ;;  %v391_v6 = vld [vmem:[#allocation5 + $0x7d0] sm:$0xff] }
 0x1dc   :  { %3656 = vmatprep.subr.bf16.mxu0 %v8687_v7  ;;  %3828 = vmatprep.subr.bf16.mxu1 %v8689_v8  ;;  %v395_v7 = vld [vmem:[#allocation5 + $0x7f0] sm:$0xff]  ;;  %v392_v8 = vld [vmem:[#allocation5 + $0x7d8] sm:$0xff] }
 0x1dd   :  { %v8751_v12 = vcombine.high %v391_v6, %v395_v7  ;;  %v8750_v19 = vcombine.low %v391_v6, %v395_v7  ;;  %v8752_v20 = vcombine.low %v392_v8, %v396_v9  ;;  %v447_v1 = vld [vmem:[#allocation5 + $0x990] sm:$0xff] }
 0x1df   :  { %3657 = vmatpush1.bf16.msra.mxu0 %v8686_v13  ;;  %3829 = vmatpush1.bf16.msra.mxu1 %v8688_v14  ;;  %v8753_v13 = vcombine.high %v392_v8, %v396_v9  ;;  %v399_v14 = vld [vmem:[#allocation5 + $0x810] sm:$0xff] }
 0x1e0   :  { %3658 = vmatprep.subr.bf16.mxu0 %v8695_v16  ;;  %3830 = vmatprep.subr.bf16.mxu1 %v8697_v17  ;;  %v403_v16 = vld [vmem:[#allocation5 + $0x830] sm:$0xff]  ;;  %v400_v17 = vld [vmem:[#allocation5 + $0x818] sm:$0xff] }
 0x1e1   :  { %v8759_v21 = vcombine.high %v399_v14, %v403_v16  ;;  %v8758_v28 = vcombine.low %v399_v14, %v403_v16  ;;  %v8760_v29 = vcombine.low %v400_v17, %v404_v18  ;;  %v455_v9 = vld [vmem:[#allocation5 + $0x9d0] sm:$0xff] }
 0x1e3   :  { %3659 = vmatpush1.bf16.msra.mxu0 %v8694_v22  ;;  %3831 = vmatpush1.bf16.msra.mxu1 %v8696_v23  ;;  %v8761_v22 = vcombine.high %v400_v17, %v404_v18  ;;  %v407_v23 = vld [vmem:[#allocation5 + $0x850] sm:$0xff] }
 0x1e4   :  { %3660 = vmatprep.subr.bf16.mxu0 %v8703_v24  ;;  %3832 = vmatprep.subr.bf16.mxu1 %v8705_v26  ;;  %v411_v24 = vld [vmem:[#allocation5 + $0x870] sm:$0xff]  ;;  %v408_v26 = vld [vmem:[#allocation5 + $0x858] sm:$0xff] }
 0x1e5   :  { %v8767_v31 = vcombine.high %v407_v23, %v411_v24  ;;  %v8766_v35 = vcombine.low %v407_v23, %v411_v24  ;;  %v8768_v36 = vcombine.low %v408_v26, %v412_v27  ;;  %v463_v18 = vld [vmem:[#allocation5 + $0xa10] sm:$0xff] }
 0x1e7   :  { %3661 = vmatpush1.bf16.msra.mxu0 %v8702_v58  ;;  %3833 = vmatpush1.bf16.msra.mxu1 %v8704_v32  ;;  %v8769_v58 = vcombine.high %v408_v26, %v412_v27  ;;  %v415_v32 = vld [vmem:[#allocation5 + $0x890] sm:$0xff] }
 0x1e8   :  { %3662 = vmatprep.subr.bf16.mxu0 %v8711_v33  ;;  %3834 = vmatprep.subr.bf16.mxu1 %v8713_v34  ;;  %v419_v33 = vld [vmem:[#allocation5 + $0x8b0] sm:$0xff]  ;;  %v416_v34 = vld [vmem:[#allocation5 + $0x898] sm:$0xff] }
 0x1e9   :  { %v8775_v37 = vcombine.high %v415_v32, %v419_v33  ;;  %v8774_v45 = vcombine.low %v415_v32, %v419_v33  ;;  %v471_v27 = vld [vmem:[#allocation5 + $0xa50] sm:$0xff] }
 0x1eb   :  { %3663 = vmatpush1.bf16.msra.mxu0 %v8710_v38  ;;  %3835 = vmatpush1.bf16.msra.mxu1 %v8712_v40  ;;  %v8777_v38 = vcombine.high %v416_v34, %v420_v15  ;;  %v423_v40 = vld [vmem:[#allocation5 + $0x8d0] sm:$0xff] }
 0x1ec   :  { %3664 = vmatprep.subr.bf16.mxu0 %v8719_v41  ;;  %3836 = vmatprep.subr.bf16.mxu1 %v8721_v42  ;;  %v427_v41 = vld [vmem:[#allocation5 + $0x8f0] sm:$0xff]  ;;  %v424_v42 = vld [vmem:[#allocation5 + $0x8d8] sm:$0xff] }
 0x1ed   :  { %v8783_v25 = vcombine.high %v423_v40, %v427_v41  ;;  %v8785_v46 = vcombine.high %v424_v42, %v428_v44  ;;  %v8782_v51 = vcombine.low %v423_v40, %v427_v41  ;;  %v8784_v52 = vcombine.low %v424_v42, %v428_v44  ;;  %v487_v44 = vld [vmem:[#allocation5 + $0xad0] sm:$0xff] }
 0x1ef   :  { %3665 = vmatpush1.bf16.msra.mxu0 %v8718_v47  ;;  %3837 = vmatpush1.bf16.msra.mxu1 %v8720_v48  ;;  %v431_v47 = vld [vmem:[#allocation5 + $0x910] sm:$0xff] }
 0x1f0   :  { %3666 = vmatprep.subr.bf16.mxu0 %v8727_v49  ;;  %3838 = vmatprep.subr.bf16.mxu1 %v8729_v50  ;;  %v435_v48 = vld [vmem:[#allocation5 + $0x930] sm:$0xff]  ;;  %v432_v49 = vld [vmem:[#allocation5 + $0x918] sm:$0xff] }
 0x1f1   :  { %v436_v50 = vld [vmem:[#allocation5 + $0x938] sm:$0xff]  ;;  %v8791_v54 = vcombine.high %v431_v47, %v435_v48 }
 0x1f2   :  { %v8792_v61 = vcombine.low %v432_v49, %v436_v50 }
 0x1f3   :  { %3667 = vmatpush1.bf16.msra.mxu0 %v8726_v56  ;;  %3839 = vmatpush1.bf16.msra.mxu1 %v8728_v57  ;;  %v443_v56 = vld [vmem:[#allocation5 + $0x970] sm:$0xff]  ;;  %v440_v57 = vld [vmem:[#allocation5 + $0x958] sm:$0xff] }
 0x1f4   :  { %3668 = vmatprep.subr.bf16.mxu0 %v8735_v59  ;;  %3840 = vmatprep.subr.bf16.mxu1 %v8737_v60  ;;  %v444_v59 = vld [vmem:[#allocation5 + $0x978] sm:$0xff]  ;;  %v8790_v60 = vcombine.low %v431_v47, %v435_v48  ;;  %v8799_v62 = vcombine.high %v439_v55, %v443_v56 }
 0x1f5   :  { %v8801_v0 = vcombine.high %v440_v57, %v444_v59  ;;  %v8800_v6 = vcombine.low %v440_v57, %v444_v59  ;;  %v503_v59 = vld [vmem:[#allocation5 + $0xb50] sm:$0xff] }
 0x1f7   :  { %3669 = vmatpush1.bf16.msra.mxu0 %v8734_v2  ;;  %3841 = vmatpush1.bf16.msra.mxu1 %v8736_v3  ;;  %v451_v2 = vld [vmem:[#allocation5 + $0x9b0] sm:$0xff]  ;;  %v448_v3 = vld [vmem:[#allocation5 + $0x998] sm:$0xff] }
 0x1f8   :  { %3670 = vmatprep.subr.bf16.mxu0 %v8743_v4  ;;  %3842 = vmatprep.subr.bf16.mxu1 %v8745_v5  ;;  %v452_v4 = vld [vmem:[#allocation5 + $0x9b8] sm:$0xff]  ;;  %v8798_v5 = vcombine.low %v439_v55, %v443_v56  ;;  %v8807_v7 = vcombine.high %v447_v1, %v451_v2 }
 0x1f9   :  { %v8809_v8 = vcombine.high %v448_v3, %v452_v4  ;;  %v8808_v14 = vcombine.low %v448_v3, %v452_v4  ;;  %v511_v4 = vld [vmem:[#allocation5 + $0xb90] sm:$0xff] }
 0x1fb   :  { %3671 = vmatpush1.bf16.msra.mxu0 %v8742_v10  ;;  %3843 = vmatpush1.bf16.msra.mxu1 %v8744_v11  ;;  %v459_v10 = vld [vmem:[#allocation5 + $0x9f0] sm:$0xff]  ;;  %v456_v11 = vld [vmem:[#allocation5 + $0x9d8] sm:$0xff] }
 0x1fc   :  { %3672 = vmatprep.subr.bf16.mxu0 %v8751_v12  ;;  %3844 = vmatprep.subr.bf16.mxu1 %v8753_v13  ;;  %v460_v12 = vld [vmem:[#allocation5 + $0x9f8] sm:$0xff]  ;;  %v8806_v13 = vcombine.low %v447_v1, %v451_v2  ;;  %v8815_v16 = vcombine.high %v455_v9, %v459_v10 }
 0x1fd   :  { %v8817_v17 = vcombine.high %v456_v11, %v460_v12  ;;  %v8816_v23 = vcombine.low %v456_v11, %v460_v12  ;;  %v519_v12 = vld [vmem:[#allocation5 + $0xbd0] sm:$0xff] }
 0x1ff   :  { %3673 = vmatpush1.bf16.msra.mxu0 %v8750_v19  ;;  %3845 = vmatpush1.bf16.msra.mxu1 %v8752_v20  ;;  %v467_v19 = vld [vmem:[#allocation5 + $0xa30] sm:$0xff]  ;;  %v464_v20 = vld [vmem:[#allocation5 + $0xa18] sm:$0xff] }
 0x200   :  { %3685 = vmatprep.subr.bf16.mxu0 %v8759_v21  ;;  %3857 = vmatprep.subr.bf16.mxu1 %v8761_v22  ;;  %v468_v21 = vld [vmem:[#allocation5 + $0xa38] sm:$0xff]  ;;  %v8814_v22 = vcombine.low %v455_v9, %v459_v10  ;;  %v8823_v24 = vcombine.high %v463_v18, %v467_v19 }
 0x201   :  { %v8825_v26 = vcombine.high %v464_v20, %v468_v21  ;;  %v8824_v32 = vcombine.low %v464_v20, %v468_v21  ;;  %v527_v21 = vld [vmem:[#allocation5 + $0xc10] sm:$0xff] }
 0x202   :  { %3675 = vmatmul.mubr.bf16.vlgmr.msra.gmra.mrb[4].mxu0 %v10220_v30  ;;  %3847 = vmatmul.mubr.bf16.vlgmr.msra.gmra.mrb[4].mxu1 %v10220_v30  ;;  %v8776_v30 = vcombine.low %v416_v34, %v420_v15  ;;  %v479_v15 = vld [vmem:[#allocation5 + $0xa90] sm:$0xff] }
 0x203   :  { %3686 = vmatpush1.bf16.msra.mxu0 %v8758_v28  ;;  %3858 = vmatpush1.bf16.msra.mxu1 %v8760_v29  ;;  %v475_v28 = vld [vmem:[#allocation5 + $0xa70] sm:$0xff]  ;;  %v472_v29 = vld [vmem:[#allocation5 + $0xa58] sm:$0xff] }
 0x204   :  { %3687 = vmatprep.subr.bf16.mxu0 %v8767_v31  ;;  %3859 = vmatprep.subr.bf16.mxu1 %v8769_v58  ;;  %v476_v31 = vld [vmem:[#allocation5 + $0xa78] sm:$0xff]  ;;  %v8822_v58 = vcombine.low %v463_v18, %v467_v19  ;;  %v8831_v33 = vcombine.high %v471_v27, %v475_v28 }
 0x205   :  { %3717 = vmatprep.mubr.bf16.mxu0 %v10222_v39  ;;  %3889 = vmatprep.mubr.bf16.mxu1 %v10222_v39  ;;  %v8793_v39 = vcombine.high %v432_v49, %v436_v50  ;;  %v8833_v34 = vcombine.high %v472_v29, %v476_v31  ;;  %v8832_v40 = vcombine.low %v472_v29, %v476_v31  ;;  %v495_v50 = vld [vmem:[#allocation5 + $0xb10] sm:$0xff] }
 0x206   :  { %v535_v31 = vld [vmem:[#allocation5 + $0xc50] sm:$0xff] }
 0x207   :  { %3688 = vmatpush1.bf16.msra.mxu0 %v8766_v35  ;;  %3860 = vmatpush1.bf16.msra.mxu1 %v8768_v36  ;;  %v483_v35 = vld [vmem:[#allocation5 + $0xab0] sm:$0xff]  ;;  %v480_v36 = vld [vmem:[#allocation5 + $0xa98] sm:$0xff] }
 0x208   :  { %3689 = vmatprep.subr.bf16.mxu0 %v8775_v37  ;;  %3861 = vmatprep.subr.bf16.mxu1 %v8777_v38  ;;  %v484_v37 = vld [vmem:[#allocation5 + $0xab8] sm:$0xff]  ;;  %v8830_v38 = vcombine.low %v471_v27, %v475_v28  ;;  %v8839_v41 = vcombine.high %v479_v15, %v483_v35 }
 0x209   :  { %v8841_v42 = vcombine.high %v480_v36, %v484_v37  ;;  %v8840_v47 = vcombine.low %v480_v36, %v484_v37  ;;  %v543_v37 = vld [vmem:[#allocation5 + $0xc90] sm:$0xff] }
 0x20b   :  { %3690 = vmatpush1.bf16.msra.mxu0 %v8774_v45  ;;  %3862 = vmatpush1.bf16.msra.mxu1 %v8776_v30  ;;  %v491_v45 = vld [vmem:[#allocation5 + $0xaf0] sm:$0xff]  ;;  %v488_v30 = vld [vmem:[#allocation5 + $0xad8] sm:$0xff] }
 0x20c   :  { %3691 = vmatprep.subr.bf16.mxu0 %v8783_v25  ;;  %3863 = vmatprep.subr.bf16.mxu1 %v8785_v46  ;;  %v492_v25 = vld [vmem:[#allocation5 + $0xaf8] sm:$0xff]  ;;  %v8838_v46 = vcombine.low %v479_v15, %v483_v35  ;;  %v8847_v48 = vcombine.high %v487_v44, %v491_v45 }
 0x20d   :  { %v8849_v49 = vcombine.high %v488_v30, %v492_v25  ;;  %v8848_v55 = vcombine.low %v488_v30, %v492_v25  ;;  %v551_v25 = vld [vmem:[#allocation5 + $0xcd0] sm:$0xff] }
 0x20f   :  { %3692 = vmatpush1.bf16.msra.mxu0 %v8782_v51  ;;  %3864 = vmatpush1.bf16.msra.mxu1 %v8784_v52  ;;  %v499_v51 = vld [vmem:[#allocation5 + $0xb30] sm:$0xff]  ;;  %v496_v52 = vld [vmem:[#allocation5 + $0xb18] sm:$0xff] }
 0x210   :  { %3693 = vmatprep.subr.bf16.mxu0 %v8791_v54  ;;  %3865 = vmatprep.subr.bf16.mxu1 %v8793_v39  ;;  %v500_v54 = vld [vmem:[#allocation5 + $0xb38] sm:$0xff]  ;;  %v8846_v39 = vcombine.low %v487_v44, %v491_v45  ;;  %v8855_v56 = vcombine.high %v495_v50, %v499_v51 }
 0x211   :  { %v8857_v57 = vcombine.high %v496_v52, %v500_v54  ;;  %v8856_v1 = vcombine.low %v496_v52, %v500_v54  ;;  %v559_v54 = vld [vmem:[#allocation5 + $0xd10] sm:$0xff] }
 0x213   :  { %3694 = vmatpush1.bf16.msra.mxu0 %v8790_v60  ;;  %3866 = vmatpush1.bf16.msra.mxu1 %v8792_v61  ;;  %v507_v60 = vld [vmem:[#allocation5 + $0xb70] sm:$0xff]  ;;  %v504_v61 = vld [vmem:[#allocation5 + $0xb58] sm:$0xff] }
 0x214   :  { %3695 = vmatprep.subr.bf16.mxu0 %v8799_v62  ;;  %3867 = vmatprep.subr.bf16.mxu1 %v8801_v0  ;;  %v508_v62 = vld [vmem:[#allocation5 + $0xb78] sm:$0xff]  ;;  %v8854_v0 = vcombine.low %v495_v50, %v499_v51  ;;  %v8863_v2 = vcombine.high %v503_v59, %v507_v60 }
 0x215   :  { %v8865_v3 = vcombine.high %v504_v61, %v508_v62  ;;  %v8864_v9 = vcombine.low %v504_v61, %v508_v62  ;;  %v567_v62 = vld [vmem:[#allocation5 + $0xd50] sm:$0xff] }
 0x217   :  { %3696 = vmatpush1.bf16.msra.mxu0 %v8798_v5  ;;  %3868 = vmatpush1.bf16.msra.mxu1 %v8800_v6  ;;  %v515_v5 = vld [vmem:[#allocation5 + $0xbb0] sm:$0xff]  ;;  %v512_v6 = vld [vmem:[#allocation5 + $0xb98] sm:$0xff] }
 0x218   :  { %3697 = vmatprep.subr.bf16.mxu0 %v8807_v7  ;;  %3869 = vmatprep.subr.bf16.mxu1 %v8809_v8  ;;  %v516_v7 = vld [vmem:[#allocation5 + $0xbb8] sm:$0xff]  ;;  %v8862_v8 = vcombine.low %v503_v59, %v507_v60  ;;  %v8871_v10 = vcombine.high %v511_v4, %v515_v5 }
 0x219   :  { %v8873_v11 = vcombine.high %v512_v6, %v516_v7  ;;  %v8872_v18 = vcombine.low %v512_v6, %v516_v7 }
 0x21b   :  { %3698 = vmatpush1.bf16.msra.mxu0 %v8806_v13  ;;  %3870 = vmatpush1.bf16.msra.mxu1 %v8808_v14  ;;  %v523_v13 = vld [vmem:[#allocation5 + $0xbf0] sm:$0xff]  ;;  %v520_v14 = vld [vmem:[#allocation5 + $0xbd8] sm:$0xff] }
 0x21c   :  { %3699 = vmatprep.subr.bf16.mxu0 %v8815_v16  ;;  %3871 = vmatprep.subr.bf16.mxu1 %v8817_v17  ;;  %v524_v16 = vld [vmem:[#allocation5 + $0xbf8] sm:$0xff]  ;;  %v8870_v17 = vcombine.low %v511_v4, %v515_v5  ;;  %v8879_v19 = vcombine.high %v519_v12, %v523_v13  ;;  %v653_v5 = vld [vmem:[#allocation7] sm:$0xff] }
 0x21d   :  { %v8881_v20 = vcombine.high %v520_v14, %v524_v16  ;;  %v8880_v27 = vcombine.low %v520_v14, %v524_v16  ;;  %v576_v16 = vld [vmem:[#allocation5 + $0xd98] sm:$0xff] }
 0x21f   :  { %3700 = vmatpush1.bf16.msra.mxu0 %v8814_v22  ;;  %3872 = vmatpush1.bf16.msra.mxu1 %v8816_v23  ;;  %v531_v22 = vld [vmem:[#allocation5 + $0xc30] sm:$0xff]  ;;  %v528_v23 = vld [vmem:[#allocation5 + $0xc18] sm:$0xff] }
 0x220   :  { %3701 = vmatprep.subr.bf16.mxu0 %v8823_v24  ;;  %3873 = vmatprep.subr.bf16.mxu1 %v8825_v26  ;;  %v532_v24 = vld [vmem:[#allocation5 + $0xc38] sm:$0xff]  ;;  %v8878_v26 = vcombine.low %v519_v12, %v523_v13  ;;  %v8887_v28 = vcombine.high %v527_v21, %v531_v22  ;;  %v575_v12 = vld [vmem:[#allocation5 + $0xd90] sm:$0xff] }
 0x221   :  { %v8889_v29 = vcombine.high %v528_v23, %v532_v24  ;;  %v8888_v15 = vcombine.low %v528_v23, %v532_v24  ;;  %v579_v13 = vld [vmem:[#allocation5 + $0xdb0] sm:$0xff] }
 0x222   :  { %v8935_v23 = vcombine.high %v575_v12, %v579_v13 }
 0x223   :  { %3702 = vmatpush1.bf16.msra.mxu0 %v8822_v58  ;;  %3874 = vmatpush1.bf16.msra.mxu1 %v8824_v32  ;;  %v539_v58 = vld [vmem:[#allocation5 + $0xc70] sm:$0xff]  ;;  %v536_v32 = vld [vmem:[#allocation5 + $0xc58] sm:$0xff] }
 0x224   :  { %3703 = vmatprep.subr.bf16.mxu0 %v8831_v33  ;;  %3875 = vmatprep.subr.bf16.mxu1 %v8833_v34  ;;  %v540_v33 = vld [vmem:[#allocation5 + $0xc78] sm:$0xff]  ;;  %v8886_v34 = vcombine.low %v527_v21, %v531_v22  ;;  %v8895_v35 = vcombine.high %v535_v31, %v539_v58 }
 0x225   :  { %v8897_v36 = vcombine.high %v536_v32, %v540_v33  ;;  %v8896_v44 = vcombine.low %v536_v32, %v540_v33  ;;  %v584_v32 = vld [vmem:[#allocation5 + $0xdd8] sm:$0xff] }
 0x226   :  { %v588_v33 = vld [vmem:[#allocation5 + $0xdf8] sm:$0xff] }
 0x227   :  { %3704 = vmatpush1.bf16.msra.mxu0 %v8830_v38  ;;  %3876 = vmatpush1.bf16.msra.mxu1 %v8832_v40  ;;  %v547_v38 = vld [vmem:[#allocation5 + $0xcb0] sm:$0xff]  ;;  %v544_v40 = vld [vmem:[#allocation5 + $0xc98] sm:$0xff] }
 0x228   :  { %3705 = vmatprep.subr.bf16.mxu0 %v8839_v41  ;;  %3877 = vmatprep.subr.bf16.mxu1 %v8841_v42  ;;  %v548_v41 = vld [vmem:[#allocation5 + $0xcb8] sm:$0xff]  ;;  %v8894_v42 = vcombine.low %v535_v31, %v539_v58  ;;  %v8903_v45 = vcombine.high %v543_v37, %v547_v38  ;;  %v8902_v50 = vcombine.low %v543_v37, %v547_v38 }
 0x229   :  { %v8905_v30 = vcombine.high %v544_v40, %v548_v41  ;;  %v8934_v37 = vcombine.low %v575_v12, %v579_v13  ;;  %v600_v12 = vld [vmem:[#allocation5 + $0xe58] sm:$0xff] }
 0x22a   :  { %v604_v13 = vld [vmem:[#allocation5 + $0xe78] sm:$0xff] }
 0x22b   :  { %3706 = vmatpush1.bf16.msra.mxu0 %v8838_v46  ;;  %3878 = vmatpush1.bf16.msra.mxu1 %v8840_v47  ;;  %v555_v46 = vld [vmem:[#allocation5 + $0xcf0] sm:$0xff]  ;;  %v552_v47 = vld [vmem:[#allocation5 + $0xcd8] sm:$0xff] }
 0x22c   :  { %3707 = vmatprep.subr.bf16.mxu0 %v8847_v48  ;;  %3879 = vmatprep.subr.bf16.mxu1 %v8849_v49  ;;  %v556_v48 = vld [vmem:[#allocation5 + $0xcf8] sm:$0xff]  ;;  %v655_v49 = vlaneseq  ;;  %v8911_v51 = vcombine.high %v551_v25, %v555_v46  ;;  %v8910_v59 = vcombine.low %v551_v25, %v555_v46 }
 0x22d   :  { %v8913_v52 = vcombine.high %v552_v47, %v556_v48  ;;  %v8912_v60 = vcombine.low %v552_v47, %v556_v48  ;;  %v8945_v48 = vcombine.high %v584_v32, %v588_v33 }
 0x22f   :  { %3708 = vmatpush1.bf16.msra.mxu0 %v8846_v39  ;;  %3880 = vmatpush1.bf16.msra.mxu1 %v8848_v55  ;;  %v563_v39 = vld [vmem:[#allocation5 + $0xd30] sm:$0xff]  ;;  %v560_v55 = vld [vmem:[#allocation5 + $0xd18] sm:$0xff] }
 0x230   :  { %3709 = vmatprep.subr.bf16.mxu0 %v8855_v56  ;;  %3881 = vmatprep.subr.bf16.mxu1 %v8857_v57  ;;  %v564_v56 = vld [vmem:[#allocation5 + $0xd38] sm:$0xff]  ;;  %v10254_v57 = vshrl.u32 %v655_v49, 7  ;;  %v8918_v4 = vcombine.low %v559_v54, %v563_v39  ;;  %v591_v49 = vld [vmem:[#allocation5 + $0xe10] sm:$0xff] }
 0x231   :  { %v8921_v61 = vcombine.high %v560_v55, %v564_v56 }
 0x232   :  { %v665_v6 = vsub.s32 2, %v10254_v57  ;;  %v661_v7 = vsub.s32 1, %v10254_v57 }
 0x233   :  { %3710 = vmatpush1.bf16.msra.mxu0 %v8854_v0  ;;  %3882 = vmatpush1.bf16.msra.mxu1 %v8856_v1  ;;  %v571_v0 = vld [vmem:[#allocation5 + $0xd70] sm:$0xff]  ;;  %v657_v1 = vsub.s32 0, %v10254_v57 }
 0x234   :  { %3711 = vmatprep.subr.bf16.mxu0 %v8863_v2  ;;  %3883 = vmatprep.subr.bf16.mxu1 %v8865_v3  ;;  %v568_v2 = vld [vmem:[#allocation5 + $0xd58] sm:$0xff] }
 0x235   :  { %v572_v3 = vld [vmem:[#allocation5 + $0xd78] sm:$0xff]  ;;  %v658_v14 = vrot.slane %v653_v5, %v657_v1 }
 0x236   :  { %v8928_v22 = vcombine.low %v568_v2, %v572_v3 }
 0x237   :  { %3712 = vmatpush1.bf16.msra.mxu0 %v8862_v8  ;;  %3884 = vmatpush1.bf16.msra.mxu1 %v8864_v9  ;;  %v8920_v8 = vcombine.low %v560_v55, %v564_v56  ;;  %v669_v9 = vsub.s32 3, %v10254_v57  ;;  %v596_v55 = vld [vmem:[#allocation5 + $0xe38] sm:$0xff] }
 0x238   :  { %3713 = vmatprep.subr.bf16.mxu0 %v8871_v10  ;;  %3885 = vmatprep.subr.bf16.mxu1 %v8873_v11  ;;  %v8927_v10 = vcombine.high %v567_v62, %v571_v0  ;;  %v8929_v11 = vcombine.high %v568_v2, %v572_v3 }
 0x239   :  { %v670_v21 = vrot.slane %v653_v5, %v669_v9 }
 0x23b   :  { %3714 = vmatpush1.bf16.msra.mxu0 %v8870_v17  ;;  %3886 = vmatpush1.bf16.msra.mxu1 %v8872_v18  ;;  %v580_v17 = vld [vmem:[#allocation5 + $0xdb8] sm:$0xff]  ;;  %v666_v18 = vrot.slane %v653_v5, %v665_v6 }
 0x23c   :  { %3715 = vmatprep.subr.bf16.mxu0 %v8879_v19  ;;  %3887 = vmatprep.subr.bf16.mxu1 %v8881_v20  ;;  %v662_v19 = vrot.slane %v653_v5, %v661_v7  ;;  %v8926_v20 = vcombine.low %v567_v62, %v571_v0  ;;  %v8936_v38 = vcombine.low %v576_v16, %v580_v17 }
 0x23f   :  { %3716 = vmatpush1.bf16.msra.mxu0 %v8878_v26  ;;  %3888 = vmatpush1.bf16.msra.mxu1 %v8880_v27  ;;  %v8937_v26 = vcombine.high %v576_v16, %v580_v17  ;;  %v583_v27 = vld [vmem:[#allocation5 + $0xdd0] sm:$0xff] }
 0x240   :  { %3728 = vmatprep.subr.bf16.mxu0 %v8887_v28  ;;  %3900 = vmatprep.subr.bf16.mxu1 %v8889_v29  ;;  %v587_v28 = vld [vmem:[#allocation5 + $0xdf0] sm:$0xff] }
 0x241   :  { %v8942_v47 = vcombine.low %v583_v27, %v587_v28 }
 0x242   :  { %3718 = vmatmul.mubr.bf16.vlgmr.msra.gmra.mrb[4].mxu0 %v10228_v43  ;;  %3890 = vmatmul.mubr.bf16.vlgmr.msra.gmra.mrb[4].mxu1 %v10228_v43  ;;  %v8904_v43 = vcombine.low %v544_v40, %v548_v41 }
 0x243   :  { %3729 = vmatpush1.bf16.msra.mxu0 %v8886_v34  ;;  %3901 = vmatpush1.bf16.msra.mxu1 %v8888_v15 }
 0x244   :  { %3730 = vmatprep.subr.bf16.mxu0 %v8895_v35  ;;  %3902 = vmatprep.subr.bf16.mxu1 %v8897_v36 }
 0x245   :  { %3760 = vmatprep.mubr.bf16.mxu0 %v10230_v53  ;;  %3932 = vmatprep.mubr.bf16.mxu1 %v10230_v53  ;;  %v8919_v53 = vcombine.high %v559_v54, %v563_v39  ;;  %v8944_v54 = vcombine.low %v584_v32, %v588_v33  ;;  %v592_v39 = vld [vmem:[#allocation5 + $0xe18] sm:$0xff] }
 0x246   :  { %v8953_v5 = vcombine.high %v592_v39, %v596_v55  ;;  %v8952_v16 = vcombine.low %v592_v39, %v596_v55 }
 0x247   :  { %3731 = vmatpush1.bf16.msra.mxu0 %v8894_v42  ;;  %3903 = vmatpush1.bf16.msra.mxu1 %v8896_v44 }
 0x248   :  { %3732 = vmatprep.subr.bf16.mxu0 %v8903_v45  ;;  %3904 = vmatprep.subr.bf16.mxu1 %v8905_v30  ;;  %v8943_v45 = vcombine.high %v583_v27, %v587_v28  ;;  %v615_v28 = vld [vmem:[#allocation5 + $0xed0] sm:$0xff] }
 0x24b   :  { %3733 = vmatpush1.bf16.msra.mxu0 %v8902_v50  ;;  %3905 = vmatpush1.bf16.msra.mxu1 %v8904_v43  ;;  %v595_v50 = vld [vmem:[#allocation5 + $0xe30] sm:$0xff] }
 0x24c   :  { %3734 = vmatprep.subr.bf16.mxu0 %v8911_v51  ;;  %3906 = vmatprep.subr.bf16.mxu1 %v8913_v52  ;;  %v8951_v2 = vcombine.high %v591_v49, %v595_v50 }
 0x24f   :  { %3735 = vmatpush1.bf16.msra.mxu0 %v8910_v59  ;;  %3907 = vmatpush1.bf16.msra.mxu1 %v8912_v60 }
 0x250   :  { %3736 = vmatprep.subr.bf16.mxu0 %v8919_v53  ;;  %3908 = vmatprep.subr.bf16.mxu1 %v8921_v61 }
 0x253   :  { %3737 = vmatpush1.bf16.msra.mxu0 %v8918_v4  ;;  %3909 = vmatpush1.bf16.msra.mxu1 %v8920_v8  ;;  %v599_v8 = vld [vmem:[#allocation5 + $0xe50] sm:$0xff] }
 0x254   :  { %3738 = vmatprep.subr.bf16.mxu0 %v8927_v10  ;;  %3910 = vmatprep.subr.bf16.mxu1 %v8929_v11  ;;  %v603_v10 = vld [vmem:[#allocation5 + $0xe70] sm:$0xff] }
 0x255   :  { %v3418_v24 = vpop.f32.mrb[0].mxu0  ;;  %v3590_v31 = vpop.f32.mrb[0].mxu1  ;;  %v8959_v17 = vcombine.high %v599_v8, %v603_v10 }
 0x256   :  { %v9675_v29 = vadd.f32 %v3418_v24, %v658_v14  ;;  %v3420_v58 = vpop.f32.mrb[1].mxu0  ;;  %v9679_v34 = vadd.f32 %v3590_v31, %v666_v18  ;;  %v3592_v35 = vpop.f32.mrb[1].mxu1  ;;  %v8960_v24 = vcombine.low %v600_v12, %v604_v13  ;;  %v616_v31 = vld [vmem:[#allocation5 + $0xed8] sm:$0xff] }
 0x257   :  { %v9676_v15 = vadd.f32 %v3420_v58, %v662_v19  ;;  %v3422_v36 = vpop.f32.mrb[2].mxu0  ;;  %3739 = vmatpush1.bf16.msra.mxu0 %v8926_v20  ;;  %v9680_v40 = vadd.f32 %v3592_v35, %v670_v21  ;;  %v3594_v42 = vpop.f32.mrb[2].mxu1  ;;  %3911 = vmatpush1.bf16.msra.mxu1 %v8928_v22  ;;  %v611_v20 = vld [vmem:[#allocation5 + $0xeb0] sm:$0xff]  ;;  %v612_v22 = vld [vmem:[#allocation5 + $0xeb8] sm:$0xff] }
 0x258   :  { %v9677_v41 = vadd.f32 %v3422_v36, %v658_v14  ;;  %v3424_v44 = vpop.f32.mrb[3].mxu0  ;;  %3740 = vmatprep.subr.bf16.mxu0 %v8935_v23  ;;  %v9681_v30 = vadd.f32 %v3594_v42, %v666_v18  ;;  %v3596_v46 = vpop.f32.mrb[3].mxu1  ;;  %3912 = vmatprep.subr.bf16.mxu1 %v8937_v26  ;;  %v3943_v43 = vmax.f32 %v9675_v29, 0.0  ;;  %v3945_v56 = vmax.f32 %v9679_v34, 0.0  ;;  %v619_v29 = vld [vmem:[#allocation5 + $0xef0] sm:$0xff]  ;;  %v620_v58 = vld [vmem:[#allocation5 + $0xef8] sm:$0xff] }
 0x259   :  { %v9678_v25 = vadd.f32 %v3424_v44, %v662_v19  ;;  %v9682_v52 = vadd.f32 %v3596_v46, %v670_v21  ;;  %v3944_v59 = vmax.f32 %v9676_v15, 0.0  ;;  %v3946_v61 = vmax.f32 %v9680_v40, 0.0  ;;  %v607_v19 = vld [vmem:[#allocation5 + $0xe90] sm:$0xff]  ;;  %v608_v21 = vld [vmem:[#allocation5 + $0xe98] sm:$0xff] }
 0x25a   :  { %v3951_v51 = vmax.f32 %v9677_v41, 0.0  ;;  %v3953_v60 = vmax.f32 %v9681_v30, 0.0  ;;  %v8950_v14 = vcombine.low %v591_v49, %v595_v50  ;;  %v8961_v18 = vcombine.high %v600_v12, %v604_v13  ;;  %v623_v35 = vld [vmem:[#allocation5 + $0xf10] sm:$0xff]  ;;  %v636_v46 = vld [vmem:[#allocation5 + $0xf78] sm:$0xff]  ;;  %v3967_v12 = vld [vmem:[#allocation8] sm:$0xff] }
 0x25b   :  { %v3952_v53 = vmax.f32 %v9678_v25, 0.0  ;;  %3741 = vmatpush1.bf16.msra.mxu0 %v8934_v37  ;;  %v3954_v0 = vmax.f32 %v9682_v52, 0.0  ;;  %3913 = vmatpush1.bf16.msra.mxu1 %v8936_v38  ;;  %v8958_v23 = vcombine.low %v599_v8, %v603_v10  ;;  %v8967_v26 = vcombine.high %v607_v19, %v611_v20  ;;  %v627_v36 = vld [vmem:[#allocation5 + $0xf30] sm:$0xff]  ;;  %v624_v37 = vld [vmem:[#allocation5 + $0xf18] sm:$0xff]  ;;  %v3971_v13 = vld [vmem:[#allocation8 + $0x20] sm:$0xff] }
 0x25c   :  { %v10268_v62 = vpack.c.bf16 %v3951_v51, %v3943_v43  ;;  %3742 = vmatprep.subr.bf16.mxu0 %v8943_v45  ;;  %v10270_v3 = vpack.c.bf16 %v3953_v60, %v3945_v56  ;;  %3914 = vmatprep.subr.bf16.mxu1 %v8945_v48  ;;  %v8969_v27 = vcombine.high %v608_v21, %v612_v22  ;;  %v628_v38 = vld [vmem:[#allocation5 + $0xf38] sm:$0xff]  ;;  %v631_v45 = vld [vmem:[#allocation5 + $0xf50] sm:$0xff] }
 0x25d   :  { %v10272_v4 = vpack.c.bf16 %v3952_v53, %v3944_v59  ;;  %v10274_v11 = vpack.c.bf16 %v3954_v0, %v3946_v61  ;;  %v8966_v32 = vcombine.low %v607_v19, %v611_v20  ;;  %v8968_v33 = vcombine.low %v608_v21, %v612_v22  ;;  %v635_v30 = vld [vmem:[#allocation5 + $0xf70] sm:$0xff]  ;;  %v632_v25 = vld [vmem:[#allocation5 + $0xf58] sm:$0xff]  ;;  %v3975_v21 = vld [vmem:[#allocation8 + $0x40] sm:$0xff] }
 0x25e   :  { %v8975_v34 = vcombine.high %v615_v28, %v619_v29  ;;  %v8977_v15 = vcombine.high %v616_v31, %v620_v58  ;;  %v8974_v40 = vcombine.low %v615_v28, %v619_v29  ;;  %v8976_v41 = vcombine.low %v616_v31, %v620_v58  ;;  %v639_v43 = vld [vmem:[#allocation5 + $0xf90] sm:$0xff]  ;;  %v640_v52 = vld [vmem:[#allocation5 + $0xf98] sm:$0xff]  ;;  %v3979_v22 = vld [vmem:[#allocation8 + $0x60] sm:$0xff] }
 0x25f   :  { %3743 = vmatpush1.bf16.msra.mxu0 %v8942_v47  ;;  %3915 = vmatpush1.bf16.msra.mxu1 %v8944_v54  ;;  %v8983_v42 = vcombine.high %v623_v35, %v627_v36  ;;  %v8985_v44 = vcombine.high %v624_v37, %v628_v38  ;;  %v8982_v47 = vcombine.low %v623_v35, %v627_v36  ;;  %v643_v51 = vld [vmem:[#allocation5 + $0xfb0] sm:$0xff]  ;;  %v644_v54 = vld [vmem:[#allocation5 + $0xfb8] sm:$0xff]  ;;  %v3983_v29 = vld [vmem:[#allocation8 + $0x80] sm:$0xff] }
 0x260   :  { %3744 = vmatprep.subr.bf16.mxu0 %v8951_v2  ;;  %3916 = vmatprep.subr.bf16.mxu1 %v8953_v5  ;;  %v8984_v48 = vcombine.low %v624_v37, %v628_v38  ;;  %v8991_v49 = vcombine.high %v631_v45, %v635_v30  ;;  %v8993_v50 = vcombine.high %v632_v25, %v636_v46  ;;  %v647_v60 = vld [vmem:[#allocation5 + $0xfd0] sm:$0xff]  ;;  %v648_v61 = vld [vmem:[#allocation5 + $0xfd8] sm:$0xff]  ;;  %v3987_v31 = vld [vmem:[#allocation8 + $0xa0] sm:$0xff] }
 0x261   :  { %v8990_v39 = vcombine.low %v631_v45, %v635_v30  ;;  %v8992_v55 = vcombine.low %v632_v25, %v636_v46  ;;  %v8999_v56 = vcombine.high %v639_v43, %v643_v51  ;;  %v9001_v59 = vcombine.high %v640_v52, %v644_v54  ;;  %v651_v53 = vld [vmem:[#allocation5 + $0xff0] sm:$0xff]  ;;  %v652_v0 = vld [vmem:[#allocation5 + $0xff8] sm:$0xff]  ;;  %v3991_v37 = vld [vmem:[#allocation8 + $0xc0] sm:$0xff] }
 0x262   :  { %v8998_v2 = vcombine.low %v639_v43, %v643_v51  ;;  %v9000_v5 = vcombine.low %v640_v52, %v644_v54  ;;  %v9007_v8 = vcombine.high %v647_v60, %v651_v53  ;;  %v9009_v10 = vcombine.high %v648_v61, %v652_v0  ;;  %v3995_v38 = vld [vmem:[#allocation8 + $0xe0] sm:$0xff]  ;;  %v4000_v46 = vld [vmem:[#allocation8 + $0x108] sm:$0xff] }
 0x263   :  { %3745 = vmatpush1.bf16.msra.mxu0 %v8950_v14  ;;  %3917 = vmatpush1.bf16.msra.mxu1 %v8952_v16  ;;  %v3968_v14 = vld [vmem:[#allocation8 + $0x8] sm:$0xff]  ;;  %v9011_v19 = vcombine.high %v3967_v12, %v3971_v13  ;;  %v9019_v28 = vcombine.high %v3975_v21, %v3979_v22  ;;  %v9027_v35 = vcombine.high %v3983_v29, %v3987_v31  ;;  %v3999_v30 = vld [vmem:[#allocation8 + $0x100] sm:$0xff] }
 0x264   :  { %3746 = vmatprep.subr.bf16.mxu0 %v8959_v17  ;;  %3918 = vmatprep.subr.bf16.mxu1 %v8961_v18  ;;  %v3972_v16 = vld [vmem:[#allocation8 + $0x28] sm:$0xff]  ;;  %v9006_v17 = vcombine.low %v647_v60, %v651_v53  ;;  %v9008_v18 = vcombine.low %v648_v61, %v652_v0  ;;  %v4003_v25 = vld [vmem:[#allocation8 + $0x120] sm:$0xff] }
 0x265   :  { %v9013_v20 = vcombine.high %v3968_v14, %v3972_v16  ;;  %v4007_v51 = vld [vmem:[#allocation8 + $0x140] sm:$0xff]  ;;  %v4008_v54 = vld [vmem:[#allocation8 + $0x148] sm:$0xff] }
 0x266   :  { %v4011_v52 = vld [vmem:[#allocation8 + $0x160] sm:$0xff]  ;;  %v4016_v0 = vld [vmem:[#allocation8 + $0x188] sm:$0xff] }
 0x267   :  { %3747 = vmatpush1.bf16.msra.mxu0 %v8958_v23  ;;  %3919 = vmatpush1.bf16.msra.mxu1 %v8960_v24  ;;  %v9010_v23 = vcombine.low %v3967_v12, %v3971_v13  ;;  %v3976_v24 = vld [vmem:[#allocation8 + $0x48] sm:$0xff]  ;;  %v4015_v53 = vld [vmem:[#allocation8 + $0x180] sm:$0xff] }
 0x268   :  { %3748 = vmatprep.subr.bf16.mxu0 %v8967_v26  ;;  %3920 = vmatprep.subr.bf16.mxu1 %v8969_v27  ;;  %v3980_v26 = vld [vmem:[#allocation8 + $0x68] sm:$0xff]  ;;  %v9012_v27 = vcombine.low %v3968_v14, %v3972_v16  ;;  %v4019_v61 = vld [vmem:[#allocation8 + $0x1a0] sm:$0xff] }
 0x269   :  { %v9021_v58 = vcombine.high %v3976_v24, %v3980_v26  ;;  %v4023_v13 = vld [vmem:[#allocation8 + $0x1c0] sm:$0xff]  ;;  %v4024_v16 = vld [vmem:[#allocation8 + $0x1c8] sm:$0xff] }
 0x26a   :  { %v4027_v14 = vld [vmem:[#allocation8 + $0x1e0] sm:$0xff] }
 0x26b   :  { %3749 = vmatpush1.bf16.msra.mxu0 %v8966_v32  ;;  %3921 = vmatpush1.bf16.msra.mxu1 %v8968_v33  ;;  %v3984_v32 = vld [vmem:[#allocation8 + $0x88] sm:$0xff] }
 0x26c   :  { %3750 = vmatprep.subr.bf16.mxu0 %v8975_v34  ;;  %3922 = vmatprep.subr.bf16.mxu1 %v8977_v15  ;;  %v3988_v33 = vld [vmem:[#allocation8 + $0xa8] sm:$0xff]  ;;  %v9018_v34 = vcombine.low %v3975_v21, %v3979_v22  ;;  %v9020_v15 = vcombine.low %v3976_v24, %v3980_v26  ;;  %v4031_v22 = vld [vmem:[#allocation8 + $0x200] sm:$0xff] }
 0x26d   :  { %v9029_v36 = vcombine.high %v3984_v32, %v3988_v33  ;;  %v4032_v24 = vld [vmem:[#allocation8 + $0x208] sm:$0xff] }
 0x26e   :  { %v4036_v26 = vld [vmem:[#allocation8 + $0x228] sm:$0xff] }
 0x26f   :  { %3751 = vmatpush1.bf16.msra.mxu0 %v8974_v40  ;;  %3923 = vmatpush1.bf16.msra.mxu1 %v8976_v41  ;;  %v3992_v40 = vld [vmem:[#allocation8 + $0xc8] sm:$0xff] }
 0x270   :  { %3752 = vmatprep.subr.bf16.mxu0 %v8983_v42  ;;  %3924 = vmatprep.subr.bf16.mxu1 %v8985_v44  ;;  %v3996_v41 = vld [vmem:[#allocation8 + $0xe8] sm:$0xff]  ;;  %v9026_v42 = vcombine.low %v3983_v29, %v3987_v31  ;;  %v9035_v44 = vcombine.high %v3991_v37, %v3995_v38  ;;  %v9077_v31 = vcombine.high %v4032_v24, %v4036_v26 }
 0x271   :  { %v9037_v45 = vcombine.high %v3992_v40, %v3996_v41 }
 0x273   :  { %3753 = vmatpush1.bf16.msra.mxu0 %v8982_v47  ;;  %3925 = vmatpush1.bf16.msra.mxu1 %v8984_v48  ;;  %v4004_v47 = vld [vmem:[#allocation8 + $0x128] sm:$0xff]  ;;  %v9034_v48 = vcombine.low %v3991_v37, %v3995_v38  ;;  %v4047_v38 = vld [vmem:[#allocation8 + $0x280] sm:$0xff] }
 0x274   :  { %3754 = vmatprep.subr.bf16.mxu0 %v8991_v49  ;;  %3926 = vmatprep.subr.bf16.mxu1 %v8993_v50  ;;  %v9036_v49 = vcombine.low %v3992_v40, %v3996_v41  ;;  %v9043_v50 = vcombine.high %v3999_v30, %v4003_v25  ;;  %v9045_v43 = vcombine.high %v4000_v46, %v4004_v47  ;;  %v4051_v40 = vld [vmem:[#allocation8 + $0x2a0] sm:$0xff]  ;;  %v4048_v41 = vld [vmem:[#allocation8 + $0x288] sm:$0xff] }
 0x277   :  { %3755 = vmatpush1.bf16.msra.mxu0 %v8990_v39  ;;  %3927 = vmatpush1.bf16.msra.mxu1 %v8992_v55  ;;  %v4012_v39 = vld [vmem:[#allocation8 + $0x168] sm:$0xff]  ;;  %v9042_v55 = vcombine.low %v3999_v30, %v4003_v25  ;;  %v4055_v25 = vld [vmem:[#allocation8 + $0x2c0] sm:$0xff] }
 0x278   :  { %3756 = vmatprep.subr.bf16.mxu0 %v8999_v56  ;;  %3928 = vmatprep.subr.bf16.mxu1 %v9001_v59  ;;  %v9044_v56 = vcombine.low %v4000_v46, %v4004_v47  ;;  %v9051_v59 = vcombine.high %v4007_v51, %v4011_v52  ;;  %v9053_v60 = vcombine.high %v4008_v54, %v4012_v39  ;;  %v4059_v46 = vld [vmem:[#allocation8 + $0x2e0] sm:$0xff]  ;;  %v4056_v47 = vld [vmem:[#allocation8 + $0x2c8] sm:$0xff] }
 0x27b   :  { %3757 = vmatpush1.bf16.msra.mxu0 %v8998_v2  ;;  %3929 = vmatpush1.bf16.msra.mxu1 %v9000_v5  ;;  %v4020_v2 = vld [vmem:[#allocation8 + $0x1a8] sm:$0xff]  ;;  %v9050_v5 = vcombine.low %v4007_v51, %v4011_v52  ;;  %v4063_v52 = vld [vmem:[#allocation8 + $0x300] sm:$0xff] }
 0x27c   :  { %3758 = vmatprep.subr.bf16.mxu0 %v9007_v8  ;;  %3930 = vmatprep.subr.bf16.mxu1 %v9009_v10  ;;  %v9052_v8 = vcombine.low %v4008_v54, %v4012_v39  ;;  %v9059_v10 = vcombine.high %v4015_v53, %v4019_v61  ;;  %v9061_v12 = vcombine.high %v4016_v0, %v4020_v2  ;;  %v4067_v54 = vld [vmem:[#allocation8 + $0x320] sm:$0xff]  ;;  %v4064_v39 = vld [vmem:[#allocation8 + $0x308] sm:$0xff] }
 0x27f   :  { %3759 = vmatpush1.bf16.msra.mxu0 %v9006_v17  ;;  %3931 = vmatpush1.bf16.msra.mxu1 %v9008_v18  ;;  %v4028_v17 = vld [vmem:[#allocation8 + $0x1e8] sm:$0xff]  ;;  %v9058_v18 = vcombine.low %v4015_v53, %v4019_v61  ;;  %v4071_v61 = vld [vmem:[#allocation8 + $0x340] sm:$0xff] }
 0x280   :  { %7081 = vmatprep.subr.bf16.mxu0 %v9011_v19  ;;  %7253 = vmatprep.subr.bf16.mxu1 %v9013_v20  ;;  %v9060_v19 = vcombine.low %v4016_v0, %v4020_v2  ;;  %v9067_v20 = vcombine.high %v4023_v13, %v4027_v14  ;;  %v9069_v21 = vcombine.high %v4024_v16, %v4028_v17  ;;  %v4075_v0 = vld [vmem:[#allocation8 + $0x360] sm:$0xff]  ;;  %v4072_v2 = vld [vmem:[#allocation8 + $0x348] sm:$0xff] }
 0x282   :  { %3761 = vmatmul.mubr.bf16.vlgmr.msra.gmra.mrb[4].mxu0 %v10236_v63  ;;  %3933 = vmatmul.mubr.bf16.vlgmr.msra.gmra.mrb[4].mxu1 %v10236_v63  ;;  %v9028_v63 = vcombine.low %v3984_v32, %v3988_v33  ;;  %v4043_v32 = vld [vmem:[#allocation8 + $0x260] sm:$0xff]  ;;  %v4040_v33 = vld [vmem:[#allocation8 + $0x248] sm:$0xff] }
 0x283   :  { %7082 = vmatpush1.bf16.msra.mxu0 %v9010_v23  ;;  %7113 = vmatprep.mubr.bf16.mxu0 %v10272_v4  ;;  %v4035_v23 = vld [vmem:[#allocation8 + $0x220] sm:$0xff] }
 0x284   :  { %7254 = vmatpush1.bf16.msra.mxu1 %v9012_v27  ;;  %7285 = vmatprep.mubr.bf16.mxu1 %v10272_v4  ;;  %v9066_v27 = vcombine.low %v4023_v13, %v4027_v14  ;;  %v9075_v29 = vcombine.high %v4031_v22, %v4035_v23  ;;  %v4079_v14 = vld [vmem:[#allocation8 + $0x380] sm:$0xff] }
 0x285   :  { %7083 = vmatprep.subr.bf16.mxu0 %v9019_v28  ;;  %7255 = vmatprep.subr.bf16.mxu1 %v9021_v58  ;;  %v9068_v28 = vcombine.low %v4024_v16, %v4028_v17  ;;  %v4039_v58 = vld [vmem:[#allocation8 + $0x240] sm:$0xff]  ;;  %v4080_v17 = vld [vmem:[#allocation8 + $0x388] sm:$0xff] }
 0x286   :  { %v4083_v16 = vld [vmem:[#allocation8 + $0x3a0] sm:$0xff] }
 0x287   :  { %7084 = vmatpush1.bf16.msra.mxu0 %v9018_v34  ;;  %v4044_v34 = vld [vmem:[#allocation8 + $0x268] sm:$0xff] }
 0x288   :  { %7256 = vmatpush1.bf16.msra.mxu1 %v9020_v15  ;;  %7085 = vmatprep.subr.bf16.mxu0 %v9027_v35  ;;  %v9074_v15 = vcombine.low %v4031_v22, %v4035_v23  ;;  %v9076_v35 = vcombine.low %v4032_v24, %v4036_v26  ;;  %v9085_v37 = vcombine.high %v4040_v33, %v4044_v34  ;;  %v4087_v23 = vld [vmem:[#allocation8 + $0x3c0] sm:$0xff]  ;;  %v4088_v26 = vld [vmem:[#allocation8 + $0x3c8] sm:$0xff] }
 0x289   :  { %7257 = vmatprep.subr.bf16.mxu1 %v9029_v36  ;;  %v9083_v36 = vcombine.high %v4039_v58, %v4043_v32  ;;  %v4091_v24 = vld [vmem:[#allocation8 + $0x3e0] sm:$0xff] }
 0x28b   :  { %7086 = vmatpush1.bf16.msra.mxu0 %v9026_v42  ;;  %v4052_v42 = vld [vmem:[#allocation8 + $0x2a8] sm:$0xff] }
 0x28c   :  { %7258 = vmatpush1.bf16.msra.mxu1 %v9028_v63  ;;  %7087 = vmatprep.subr.bf16.mxu0 %v9035_v44  ;;  %v9082_v63 = vcombine.low %v4039_v58, %v4043_v32  ;;  %v9084_v44 = vcombine.low %v4040_v33, %v4044_v34  ;;  %v9093_v30 = vcombine.high %v4048_v41, %v4052_v42  ;;  %v4095_v32 = vld [vmem:[#allocation8 + $0x400] sm:$0xff]  ;;  %v4096_v34 = vld [vmem:[#allocation8 + $0x408] sm:$0xff] }
 0x28d   :  { %7259 = vmatprep.subr.bf16.mxu1 %v9037_v45  ;;  %v9091_v45 = vcombine.high %v4047_v38, %v4051_v40  ;;  %v4099_v33 = vld [vmem:[#allocation8 + $0x420] sm:$0xff] }
 0x28f   :  { %7088 = vmatpush1.bf16.msra.mxu0 %v9034_v48  ;;  %v4060_v48 = vld [vmem:[#allocation8 + $0x2e8] sm:$0xff] }
 0x290   :  { %7260 = vmatpush1.bf16.msra.mxu1 %v9036_v49  ;;  %7089 = vmatprep.subr.bf16.mxu0 %v9043_v50  ;;  %v9090_v49 = vcombine.low %v4047_v38, %v4051_v40  ;;  %v9092_v50 = vcombine.low %v4048_v41, %v4052_v42  ;;  %v9101_v51 = vcombine.high %v4056_v47, %v4060_v48  ;;  %v4103_v40 = vld [vmem:[#allocation8 + $0x440] sm:$0xff] }
 0x291   :  { %7261 = vmatprep.subr.bf16.mxu1 %v9045_v43  ;;  %v9099_v43 = vcombine.high %v4055_v25, %v4059_v46  ;;  %v4107_v41 = vld [vmem:[#allocation8 + $0x460] sm:$0xff]  ;;  %v9138_v42 = vcombine.low %v4095_v32, %v4099_v33 }
 0x293   :  { %7090 = vmatpush1.bf16.msra.mxu0 %v9042_v55  ;;  %v4068_v55 = vld [vmem:[#allocation8 + $0x328] sm:$0xff] }
 0x294   :  { %7262 = vmatpush1.bf16.msra.mxu1 %v9044_v56  ;;  %7091 = vmatprep.subr.bf16.mxu0 %v9051_v59  ;;  %v9098_v56 = vcombine.low %v4055_v25, %v4059_v46  ;;  %v9100_v59 = vcombine.low %v4056_v47, %v4060_v48  ;;  %v9109_v53 = vcombine.high %v4064_v39, %v4068_v55  ;;  %v4111_v25 = vld [vmem:[#allocation8 + $0x480] sm:$0xff]  ;;  %v4112_v48 = vld [vmem:[#allocation8 + $0x488] sm:$0xff] }
 0x295   :  { %7263 = vmatprep.subr.bf16.mxu1 %v9053_v60  ;;  %v9107_v60 = vcombine.high %v4063_v52, %v4067_v54  ;;  %v4115_v46 = vld [vmem:[#allocation8 + $0x4a0] sm:$0xff] }
 0x297   :  { %7092 = vmatpush1.bf16.msra.mxu0 %v9050_v5  ;;  %v4076_v5 = vld [vmem:[#allocation8 + $0x368] sm:$0xff] }
 0x298   :  { %7264 = vmatpush1.bf16.msra.mxu1 %v9052_v8  ;;  %7093 = vmatprep.subr.bf16.mxu0 %v9059_v10  ;;  %v9106_v8 = vcombine.low %v4063_v52, %v4067_v54  ;;  %v9108_v10 = vcombine.low %v4064_v39, %v4068_v55  ;;  %v9117_v13 = vcombine.high %v4072_v2, %v4076_v5  ;;  %v4119_v54 = vld [vmem:[#allocation8 + $0x4c0] sm:$0xff]  ;;  %v4120_v55 = vld [vmem:[#allocation8 + $0x4c8] sm:$0xff] }
 0x299   :  { %7265 = vmatprep.subr.bf16.mxu1 %v9061_v12  ;;  %v9115_v12 = vcombine.high %v4071_v61, %v4075_v0  ;;  %v4123_v39 = vld [vmem:[#allocation8 + $0x4e0] sm:$0xff] }
 0x29b   :  { %7094 = vmatpush1.bf16.msra.mxu0 %v9058_v18  ;;  %v4084_v18 = vld [vmem:[#allocation8 + $0x3a8] sm:$0xff] }
 0x29c   :  { %7266 = vmatpush1.bf16.msra.mxu1 %v9060_v19  ;;  %7095 = vmatprep.subr.bf16.mxu0 %v9067_v20  ;;  %v9114_v19 = vcombine.low %v4071_v61, %v4075_v0  ;;  %v9116_v20 = vcombine.low %v4072_v2, %v4076_v5  ;;  %v9125_v22 = vcombine.high %v4080_v17, %v4084_v18  ;;  %v4127_v0 = vld [vmem:[#allocation8 + $0x500] sm:$0xff]  ;;  %v4128_v5 = vld [vmem:[#allocation8 + $0x508] sm:$0xff] }
 0x29d   :  { %7267 = vmatprep.subr.bf16.mxu1 %v9069_v21  ;;  %v9123_v21 = vcombine.high %v4079_v14, %v4083_v16  ;;  %v4131_v2 = vld [vmem:[#allocation8 + $0x520] sm:$0xff] }
 0x29f   :  { %7096 = vmatpush1.bf16.msra.mxu0 %v9066_v27  ;;  %v4092_v27 = vld [vmem:[#allocation8 + $0x3e8] sm:$0xff] }
 0x2a0   :  { %7268 = vmatpush1.bf16.msra.mxu1 %v9068_v28  ;;  %7097 = vmatprep.subr.bf16.mxu0 %v9075_v29  ;;  %v9122_v28 = vcombine.low %v4079_v14, %v4083_v16  ;;  %v9124_v29 = vcombine.low %v4080_v17, %v4084_v18  ;;  %v9133_v58 = vcombine.high %v4088_v26, %v4092_v27  ;;  %v4135_v16 = vld [vmem:[#allocation8 + $0x540] sm:$0xff]  ;;  %v4136_v18 = vld [vmem:[#allocation8 + $0x548] sm:$0xff] }
 0x2a1   :  { %7269 = vmatprep.subr.bf16.mxu1 %v9077_v31  ;;  %v9131_v31 = vcombine.high %v4087_v23, %v4091_v24  ;;  %v4139_v17 = vld [vmem:[#allocation8 + $0x560] sm:$0xff] }
 0x2a3   :  { %7098 = vmatpush1.bf16.msra.mxu0 %v9074_v15  ;;  %v4100_v15 = vld [vmem:[#allocation8 + $0x428] sm:$0xff] }
 0x2a4   :  { %7270 = vmatpush1.bf16.msra.mxu1 %v9076_v35  ;;  %7099 = vmatprep.subr.bf16.mxu0 %v9083_v36  ;;  %v9130_v35 = vcombine.low %v4087_v23, %v4091_v24  ;;  %v9132_v36 = vcombine.low %v4088_v26, %v4092_v27  ;;  %v9141_v38 = vcombine.high %v4096_v34, %v4100_v15  ;;  %v4143_v24 = vld [vmem:[#allocation8 + $0x580] sm:$0xff]  ;;  %v4144_v27 = vld [vmem:[#allocation8 + $0x588] sm:$0xff] }
 0x2a5   :  { %7271 = vmatprep.subr.bf16.mxu1 %v9085_v37  ;;  %v9139_v37 = vcombine.high %v4095_v32, %v4099_v33  ;;  %v4147_v26 = vld [vmem:[#allocation8 + $0x5a0] sm:$0xff] }
 0x2a6   :  { %v4151_v33 = vld [vmem:[#allocation8 + $0x5c0] sm:$0xff] }
 0x2a7   :  { %7100 = vmatpush1.bf16.msra.mxu0 %v9082_v63  ;;  %v4104_v63 = vld [vmem:[#allocation8 + $0x448] sm:$0xff] }
 0x2a8   :  { %7272 = vmatpush1.bf16.msra.mxu1 %v9084_v44  ;;  %7101 = vmatprep.subr.bf16.mxu0 %v9091_v45  ;;  %v4108_v44 = vld [vmem:[#allocation8 + $0x468] sm:$0xff]  ;;  %v9140_v45 = vcombine.low %v4096_v34, %v4100_v15  ;;  %v4155_v34 = vld [vmem:[#allocation8 + $0x5e0] sm:$0xff] }
 0x2a9   :  { %7273 = vmatprep.subr.bf16.mxu1 %v9093_v30  ;;  %v9147_v30 = vcombine.high %v4103_v40, %v4107_v41  ;;  %v9149_v47 = vcombine.high %v4104_v63, %v4108_v44  ;;  %v4152_v15 = vld [vmem:[#allocation8 + $0x5c8] sm:$0xff] }
 0x2ab   :  { %7102 = vmatpush1.bf16.msra.mxu0 %v9090_v49  ;;  %v4116_v49 = vld [vmem:[#allocation8 + $0x4a8] sm:$0xff] }
 0x2ac   :  { %7274 = vmatpush1.bf16.msra.mxu1 %v9092_v50  ;;  %7103 = vmatprep.subr.bf16.mxu0 %v9099_v43  ;;  %v9146_v50 = vcombine.low %v4103_v40, %v4107_v41  ;;  %v9148_v43 = vcombine.low %v4104_v63, %v4108_v44  ;;  %v9157_v52 = vcombine.high %v4112_v48, %v4116_v49  ;;  %v4159_v41 = vld [vmem:[#allocation8 + $0x600] sm:$0xff]  ;;  %v4160_v63 = vld [vmem:[#allocation8 + $0x608] sm:$0xff] }
 0x2ad   :  { %7275 = vmatprep.subr.bf16.mxu1 %v9101_v51  ;;  %v9155_v51 = vcombine.high %v4111_v25, %v4115_v46  ;;  %v4164_v44 = vld [vmem:[#allocation8 + $0x628] sm:$0xff] }
 0x2af   :  { %7104 = vmatpush1.bf16.msra.mxu0 %v9098_v56  ;;  %v4124_v56 = vld [vmem:[#allocation8 + $0x4e8] sm:$0xff] }
 0x2b0   :  { %7276 = vmatpush1.bf16.msra.mxu1 %v9100_v59  ;;  %7105 = vmatprep.subr.bf16.mxu0 %v9107_v60  ;;  %v9154_v59 = vcombine.low %v4111_v25, %v4115_v46  ;;  %v9156_v60 = vcombine.low %v4112_v48, %v4116_v49  ;;  %v9165_v61 = vcombine.high %v4120_v55, %v4124_v56  ;;  %v4171_v48 = vld [vmem:[#allocation8 + $0x660] sm:$0xff]  ;;  %v4168_v49 = vld [vmem:[#allocation8 + $0x648] sm:$0xff] }
 0x2b1   :  { %7277 = vmatprep.subr.bf16.mxu1 %v9109_v53  ;;  %v9163_v53 = vcombine.high %v4119_v54, %v4123_v39  ;;  %v9205_v46 = vcombine.high %v4160_v63, %v4164_v44 }
 0x2b3   :  { %7106 = vmatpush1.bf16.msra.mxu0 %v9106_v8  ;;  %v4132_v8 = vld [vmem:[#allocation8 + $0x528] sm:$0xff] }
 0x2b4   :  { %7278 = vmatpush1.bf16.msra.mxu1 %v9108_v10  ;;  %7107 = vmatprep.subr.bf16.mxu0 %v9115_v12  ;;  %v9162_v10 = vcombine.low %v4119_v54, %v4123_v39  ;;  %v9164_v12 = vcombine.low %v4120_v55, %v4124_v56  ;;  %v9173_v14 = vcombine.high %v4128_v5, %v4132_v8  ;;  %v4175_v39 = vld [vmem:[#allocation8 + $0x680] sm:$0xff]  ;;  %v4176_v56 = vld [vmem:[#allocation8 + $0x688] sm:$0xff] }
 0x2b5   :  { %7279 = vmatprep.subr.bf16.mxu1 %v9117_v13  ;;  %v9171_v13 = vcombine.high %v4127_v0, %v4131_v2  ;;  %v4179_v55 = vld [vmem:[#allocation8 + $0x6a0] sm:$0xff] }
 0x2b7   :  { %7108 = vmatpush1.bf16.msra.mxu0 %v9114_v19  ;;  %v4140_v19 = vld [vmem:[#allocation8 + $0x568] sm:$0xff] }
 0x2b8   :  { %7280 = vmatpush1.bf16.msra.mxu1 %v9116_v20  ;;  %7109 = vmatprep.subr.bf16.mxu0 %v9123_v21  ;;  %v9170_v20 = vcombine.low %v4127_v0, %v4131_v2  ;;  %v9172_v21 = vcombine.low %v4128_v5, %v4132_v8  ;;  %v9181_v23 = vcombine.high %v4136_v18, %v4140_v19  ;;  %v4183_v2 = vld [vmem:[#allocation8 + $0x6c0] sm:$0xff]  ;;  %v4184_v8 = vld [vmem:[#allocation8 + $0x6c8] sm:$0xff] }
 0x2b9   :  { %7281 = vmatprep.subr.bf16.mxu1 %v9125_v22  ;;  %v9179_v22 = vcombine.high %v4135_v16, %v4139_v17  ;;  %v4187_v5 = vld [vmem:[#allocation8 + $0x6e0] sm:$0xff] }
 0x2bb   :  { %7110 = vmatpush1.bf16.msra.mxu0 %v9122_v28  ;;  %v4148_v28 = vld [vmem:[#allocation8 + $0x5a8] sm:$0xff] }
 0x2bc   :  { %7282 = vmatpush1.bf16.msra.mxu1 %v9124_v29  ;;  %7111 = vmatprep.subr.bf16.mxu0 %v9131_v31  ;;  %v9178_v29 = vcombine.low %v4135_v16, %v4139_v17  ;;  %v9180_v31 = vcombine.low %v4136_v18, %v4140_v19  ;;  %v9189_v32 = vcombine.high %v4144_v27, %v4148_v28  ;;  %v4191_v17 = vld [vmem:[#allocation8 + $0x700] sm:$0xff]  ;;  %v4192_v19 = vld [vmem:[#allocation8 + $0x708] sm:$0xff] }
 0x2bd   :  { %7283 = vmatprep.subr.bf16.mxu1 %v9133_v58  ;;  %v9187_v58 = vcombine.high %v4143_v24, %v4147_v26  ;;  %v4195_v18 = vld [vmem:[#allocation8 + $0x720] sm:$0xff] }
 0x2bf   :  { %7112 = vmatpush1.bf16.msra.mxu0 %v9130_v35  ;;  %v4156_v35 = vld [vmem:[#allocation8 + $0x5e8] sm:$0xff] }
 0x2c0   :  { %7284 = vmatpush1.bf16.msra.mxu1 %v9132_v36  ;;  %7124 = vmatprep.subr.bf16.mxu0 %v9139_v37  ;;  %v9186_v36 = vcombine.low %v4143_v24, %v4147_v26  ;;  %v9188_v37 = vcombine.low %v4144_v27, %v4148_v28  ;;  %v9197_v40 = vcombine.high %v4152_v15, %v4156_v35  ;;  %v4199_v26 = vld [vmem:[#allocation8 + $0x740] sm:$0xff]  ;;  %v4200_v28 = vld [vmem:[#allocation8 + $0x748] sm:$0xff] }
 0x2c1   :  { %7296 = vmatprep.subr.bf16.mxu1 %v9141_v38  ;;  %v9195_v38 = vcombine.high %v4151_v33, %v4155_v34  ;;  %v4203_v27 = vld [vmem:[#allocation8 + $0x760] sm:$0xff] }
 0x2c2   :  { %7114 = vmatmul.mubr.bf16.vlgmr.msra.gmra.mrb[8].mxu0 %v10268_v62 }
 0x2c3   :  { %7286 = vmatmul.mubr.bf16.vlgmr.msra.gmra.mrb[8].mxu1 %v10268_v62  ;;  %7125 = vmatpush1.bf16.msra.mxu0 %v9138_v42  ;;  %v4163_v42 = vld [vmem:[#allocation8 + $0x620] sm:$0xff] }
 0x2c4   :  { %7156 = vmatprep.mubr.bf16.mxu0 %v10274_v11  ;;  %7297 = vmatpush1.bf16.msra.mxu1 %v9140_v45  ;;  %v9194_v45 = vcombine.low %v4151_v33, %v4155_v34  ;;  %v9203_v25 = vcombine.high %v4159_v41, %v4163_v42  ;;  %v4207_v34 = vld [vmem:[#allocation8 + $0x780] sm:$0xff] }
 0x2c5   :  { %7328 = vmatprep.mubr.bf16.mxu1 %v10274_v11  ;;  %7126 = vmatprep.subr.bf16.mxu0 %v9147_v30  ;;  %v9196_v30 = vcombine.low %v4152_v15, %v4156_v35  ;;  %v4211_v15 = vld [vmem:[#allocation8 + $0x7a0] sm:$0xff]  ;;  %v4208_v35 = vld [vmem:[#allocation8 + $0x788] sm:$0xff] }
 0x2c6   :  { %7298 = vmatprep.subr.bf16.mxu1 %v9149_v47  ;;  %v4167_v47 = vld [vmem:[#allocation8 + $0x640] sm:$0xff] }
 0x2c7   :  { %7127 = vmatpush1.bf16.msra.mxu0 %v9146_v50  ;;  %v4172_v50 = vld [vmem:[#allocation8 + $0x668] sm:$0xff] }
 0x2c8   :  { %7299 = vmatpush1.bf16.msra.mxu1 %v9148_v43  ;;  %7128 = vmatprep.subr.bf16.mxu0 %v9155_v51  ;;  %v9202_v43 = vcombine.low %v4159_v41, %v4163_v42  ;;  %v9204_v51 = vcombine.low %v4160_v63, %v4164_v44  ;;  %v9213_v54 = vcombine.high %v4168_v49, %v4172_v50  ;;  %v4215_v42 = vld [vmem:[#allocation8 + $0x7c0] sm:$0xff]  ;;  %v4216_v44 = vld [vmem:[#allocation8 + $0x7c8] sm:$0xff] }
 0x2c9   :  { %7300 = vmatprep.subr.bf16.mxu1 %v9157_v52  ;;  %v9211_v52 = vcombine.high %v4167_v47, %v4171_v48  ;;  %v4219_v63 = vld [vmem:[#allocation8 + $0x7e0] sm:$0xff] }
 0x2cb   :  { %7129 = vmatpush1.bf16.msra.mxu0 %v9154_v59  ;;  %v4180_v59 = vld [vmem:[#allocation8 + $0x6a8] sm:$0xff] }
 0x2cc   :  { %7301 = vmatpush1.bf16.msra.mxu1 %v9156_v60  ;;  %7130 = vmatprep.subr.bf16.mxu0 %v9163_v53  ;;  %v9210_v60 = vcombine.low %v4167_v47, %v4171_v48  ;;  %v9212_v53 = vcombine.low %v4168_v49, %v4172_v50  ;;  %v9221_v0 = vcombine.high %v4176_v56, %v4180_v59  ;;  %v4223_v48 = vld [vmem:[#allocation8 + $0x800] sm:$0xff]  ;;  %v4224_v50 = vld [vmem:[#allocation8 + $0x808] sm:$0xff] }
 0x2cd   :  { %7302 = vmatprep.subr.bf16.mxu1 %v9165_v61  ;;  %v9219_v61 = vcombine.high %v4175_v39, %v4179_v55  ;;  %v4227_v49 = vld [vmem:[#allocation8 + $0x820] sm:$0xff] }
 0x2cf   :  { %7131 = vmatpush1.bf16.msra.mxu0 %v9162_v10  ;;  %v4188_v10 = vld [vmem:[#allocation8 + $0x6e8] sm:$0xff] }
 0x2d0   :  { %7303 = vmatpush1.bf16.msra.mxu1 %v9164_v12  ;;  %7132 = vmatprep.subr.bf16.mxu0 %v9171_v13  ;;  %v9218_v12 = vcombine.low %v4175_v39, %v4179_v55  ;;  %v9220_v13 = vcombine.low %v4176_v56, %v4180_v59  ;;  %v9229_v16 = vcombine.high %v4184_v8, %v4188_v10  ;;  %v4231_v55 = vld [vmem:[#allocation8 + $0x840] sm:$0xff]  ;;  %v4232_v59 = vld [vmem:[#allocation8 + $0x848] sm:$0xff] }
 0x2d1   :  { %7304 = vmatprep.subr.bf16.mxu1 %v9173_v14  ;;  %v9227_v14 = vcombine.high %v4183_v2, %v4187_v5  ;;  %v4235_v56 = vld [vmem:[#allocation8 + $0x860] sm:$0xff] }
 0x2d3   :  { %7133 = vmatpush1.bf16.msra.mxu0 %v9170_v20  ;;  %v4196_v20 = vld [vmem:[#allocation8 + $0x728] sm:$0xff] }
 0x2d4   :  { %7305 = vmatpush1.bf16.msra.mxu1 %v9172_v21  ;;  %7134 = vmatprep.subr.bf16.mxu0 %v9179_v22  ;;  %v9226_v21 = vcombine.low %v4183_v2, %v4187_v5  ;;  %v9228_v22 = vcombine.low %v4184_v8, %v4188_v10  ;;  %v9237_v24 = vcombine.high %v4192_v19, %v4196_v20  ;;  %v4239_v5 = vld [vmem:[#allocation8 + $0x880] sm:$0xff]  ;;  %v4240_v10 = vld [vmem:[#allocation8 + $0x888] sm:$0xff] }
 0x2d5   :  { %7306 = vmatprep.subr.bf16.mxu1 %v9181_v23  ;;  %v9235_v23 = vcombine.high %v4191_v17, %v4195_v18  ;;  %v4243_v8 = vld [vmem:[#allocation8 + $0x8a0] sm:$0xff] }
 0x2d7   :  { %7135 = vmatpush1.bf16.msra.mxu0 %v9178_v29  ;;  %v4204_v29 = vld [vmem:[#allocation8 + $0x768] sm:$0xff] }
 0x2d8   :  { %7307 = vmatpush1.bf16.msra.mxu1 %v9180_v31  ;;  %7136 = vmatprep.subr.bf16.mxu0 %v9187_v58  ;;  %v9234_v31 = vcombine.low %v4191_v17, %v4195_v18  ;;  %v9236_v58 = vcombine.low %v4192_v19, %v4196_v20  ;;  %v9245_v33 = vcombine.high %v4200_v28, %v4204_v29  ;;  %v4247_v18 = vld [vmem:[#allocation8 + $0x8c0] sm:$0xff]  ;;  %v4248_v20 = vld [vmem:[#allocation8 + $0x8c8] sm:$0xff] }
 0x2d9   :  { %7308 = vmatprep.subr.bf16.mxu1 %v9189_v32  ;;  %v9243_v32 = vcombine.high %v4199_v26, %v4203_v27  ;;  %v4251_v19 = vld [vmem:[#allocation8 + $0x8e0] sm:$0xff] }
 0x2db   :  { %7137 = vmatpush1.bf16.msra.mxu0 %v9186_v36  ;;  %v4212_v36 = vld [vmem:[#allocation8 + $0x7a8] sm:$0xff] }
 0x2dc   :  { %7309 = vmatpush1.bf16.msra.mxu1 %v9188_v37  ;;  %7138 = vmatprep.subr.bf16.mxu0 %v9195_v38  ;;  %v9242_v37 = vcombine.low %v4199_v26, %v4203_v27  ;;  %v9244_v38 = vcombine.low %v4200_v28, %v4204_v29  ;;  %v9253_v41 = vcombine.high %v4208_v35, %v4212_v36  ;;  %v4255_v27 = vld [vmem:[#allocation8 + $0x900] sm:$0xff]  ;;  %v4256_v29 = vld [vmem:[#allocation8 + $0x908] sm:$0xff] }
 0x2dd   :  { %7310 = vmatprep.subr.bf16.mxu1 %v9197_v40  ;;  %v9251_v40 = vcombine.high %v4207_v34, %v4211_v15  ;;  %v4259_v28 = vld [vmem:[#allocation8 + $0x920] sm:$0xff] }
 0x2df   :  { %7139 = vmatpush1.bf16.msra.mxu0 %v9194_v45  ;;  %v4220_v45 = vld [vmem:[#allocation8 + $0x7e8] sm:$0xff] }
 0x2e0   :  { %7311 = vmatpush1.bf16.msra.mxu1 %v9196_v30  ;;  %7140 = vmatprep.subr.bf16.mxu0 %v9203_v25  ;;  %v9250_v30 = vcombine.low %v4207_v34, %v4211_v15  ;;  %v9252_v25 = vcombine.low %v4208_v35, %v4212_v36  ;;  %v9261_v47 = vcombine.high %v4216_v44, %v4220_v45  ;;  %v4263_v15 = vld [vmem:[#allocation8 + $0x940] sm:$0xff]  ;;  %v4264_v36 = vld [vmem:[#allocation8 + $0x948] sm:$0xff] }
 0x2e1   :  { %7312 = vmatprep.subr.bf16.mxu1 %v9205_v46  ;;  %v9259_v46 = vcombine.high %v4215_v42, %v4219_v63  ;;  %v4267_v35 = vld [vmem:[#allocation8 + $0x960] sm:$0xff] }
 0x2e3   :  { %7141 = vmatpush1.bf16.msra.mxu0 %v9202_v43  ;;  %v4228_v43 = vld [vmem:[#allocation8 + $0x828] sm:$0xff] }
 0x2e4   :  { %7313 = vmatpush1.bf16.msra.mxu1 %v9204_v51  ;;  %7142 = vmatprep.subr.bf16.mxu0 %v9211_v52  ;;  %v9258_v51 = vcombine.low %v4215_v42, %v4219_v63  ;;  %v9260_v52 = vcombine.low %v4216_v44, %v4220_v45  ;;  %v9269_v39 = vcombine.high %v4224_v50, %v4228_v43  ;;  %v4271_v63 = vld [vmem:[#allocation8 + $0x980] sm:$0xff]  ;;  %v4272_v45 = vld [vmem:[#allocation8 + $0x988] sm:$0xff] }
 0x2e5   :  { %7314 = vmatprep.subr.bf16.mxu1 %v9213_v54  ;;  %v9267_v54 = vcombine.high %v4223_v48, %v4227_v49  ;;  %v4275_v44 = vld [vmem:[#allocation8 + $0x9a0] sm:$0xff] }
 0x2e7   :  { %7143 = vmatpush1.bf16.msra.mxu0 %v9210_v60  ;;  %v4236_v60 = vld [vmem:[#allocation8 + $0x868] sm:$0xff] }
 0x2e8   :  { %7315 = vmatpush1.bf16.msra.mxu1 %v9212_v53  ;;  %7144 = vmatprep.subr.bf16.mxu0 %v9219_v61  ;;  %v9266_v53 = vcombine.low %v4223_v48, %v4227_v49  ;;  %v9268_v61 = vcombine.low %v4224_v50, %v4228_v43  ;;  %v9277_v2 = vcombine.high %v4232_v59, %v4236_v60  ;;  %v4279_v49 = vld [vmem:[#allocation8 + $0x9c0] sm:$0xff]  ;;  %v4280_v43 = vld [vmem:[#allocation8 + $0x9c8] sm:$0xff] }
 0x2e9   :  { %7316 = vmatprep.subr.bf16.mxu1 %v9221_v0  ;;  %v9275_v0 = vcombine.high %v4231_v55, %v4235_v56  ;;  %v4283_v50 = vld [vmem:[#allocation8 + $0x9e0] sm:$0xff] }
 0x2eb   :  { %7145 = vmatpush1.bf16.msra.mxu0 %v9218_v12  ;;  %v4244_v12 = vld [vmem:[#allocation8 + $0x8a8] sm:$0xff] }
 0x2ec   :  { %7317 = vmatpush1.bf16.msra.mxu1 %v9220_v13  ;;  %7146 = vmatprep.subr.bf16.mxu0 %v9227_v14  ;;  %v9274_v13 = vcombine.low %v4231_v55, %v4235_v56  ;;  %v9276_v14 = vcombine.low %v4232_v59, %v4236_v60  ;;  %v9285_v17 = vcombine.high %v4240_v10, %v4244_v12  ;;  %v4287_v56 = vld [vmem:[#allocation8 + $0xa00] sm:$0xff]  ;;  %v4288_v60 = vld [vmem:[#allocation8 + $0xa08] sm:$0xff] }
 0x2ed   :  { %7318 = vmatprep.subr.bf16.mxu1 %v9229_v16  ;;  %v9283_v16 = vcombine.high %v4239_v5, %v4243_v8  ;;  %v4291_v59 = vld [vmem:[#allocation8 + $0xa20] sm:$0xff] }
 0x2ef   :  { %7147 = vmatpush1.bf16.msra.mxu0 %v9226_v21  ;;  %v4252_v21 = vld [vmem:[#allocation8 + $0x8e8] sm:$0xff] }
 0x2f0   :  { %7319 = vmatpush1.bf16.msra.mxu1 %v9228_v22  ;;  %7148 = vmatprep.subr.bf16.mxu0 %v9235_v23  ;;  %v9282_v22 = vcombine.low %v4239_v5, %v4243_v8  ;;  %v9284_v23 = vcombine.low %v4240_v10, %v4244_v12  ;;  %v9293_v26 = vcombine.high %v4248_v20, %v4252_v21  ;;  %v4295_v8 = vld [vmem:[#allocation8 + $0xa40] sm:$0xff]  ;;  %v4296_v12 = vld [vmem:[#allocation8 + $0xa48] sm:$0xff] }
 0x2f1   :  { %7320 = vmatprep.subr.bf16.mxu1 %v9237_v24  ;;  %v9291_v24 = vcombine.high %v4247_v18, %v4251_v19  ;;  %v4299_v10 = vld [vmem:[#allocation8 + $0xa60] sm:$0xff] }
 0x2f3   :  { %7149 = vmatpush1.bf16.msra.mxu0 %v9234_v31  ;;  %v4260_v31 = vld [vmem:[#allocation8 + $0x928] sm:$0xff] }
 0x2f4   :  { %7321 = vmatpush1.bf16.msra.mxu1 %v9236_v58  ;;  %7150 = vmatprep.subr.bf16.mxu0 %v9243_v32  ;;  %v9290_v58 = vcombine.low %v4247_v18, %v4251_v19  ;;  %v9292_v32 = vcombine.low %v4248_v20, %v4252_v21  ;;  %v9301_v34 = vcombine.high %v4256_v29, %v4260_v31  ;;  %v4303_v19 = vld [vmem:[#allocation8 + $0xa80] sm:$0xff]  ;;  %v4304_v21 = vld [vmem:[#allocation8 + $0xa88] sm:$0xff] }
 0x2f5   :  { %7322 = vmatprep.subr.bf16.mxu1 %v9245_v33  ;;  %v9299_v33 = vcombine.high %v4255_v27, %v4259_v28  ;;  %v4307_v20 = vld [vmem:[#allocation8 + $0xaa0] sm:$0xff] }
 0x2f7   :  { %7151 = vmatpush1.bf16.msra.mxu0 %v9242_v37  ;;  %v4268_v37 = vld [vmem:[#allocation8 + $0x968] sm:$0xff] }
 0x2f8   :  { %7323 = vmatpush1.bf16.msra.mxu1 %v9244_v38  ;;  %7152 = vmatprep.subr.bf16.mxu0 %v9251_v40  ;;  %v9298_v38 = vcombine.low %v4255_v27, %v4259_v28  ;;  %v9300_v40 = vcombine.low %v4256_v29, %v4260_v31  ;;  %v9309_v42 = vcombine.high %v4264_v36, %v4268_v37  ;;  %v4311_v28 = vld [vmem:[#allocation8 + $0xac0] sm:$0xff]  ;;  %v4312_v31 = vld [vmem:[#allocation8 + $0xac8] sm:$0xff] }
 0x2f9   :  { %7324 = vmatprep.subr.bf16.mxu1 %v9253_v41  ;;  %v9307_v41 = vcombine.high %v4263_v15, %v4267_v35  ;;  %v4315_v29 = vld [vmem:[#allocation8 + $0xae0] sm:$0xff] }
 0x2fb   :  { %7153 = vmatpush1.bf16.msra.mxu0 %v9250_v30  ;;  %v4276_v30 = vld [vmem:[#allocation8 + $0x9a8] sm:$0xff] }
 0x2fc   :  { %7325 = vmatpush1.bf16.msra.mxu1 %v9252_v25  ;;  %7154 = vmatprep.subr.bf16.mxu0 %v9259_v46  ;;  %v9306_v25 = vcombine.low %v4263_v15, %v4267_v35  ;;  %v9308_v46 = vcombine.low %v4264_v36, %v4268_v37  ;;  %v9317_v48 = vcombine.high %v4272_v45, %v4276_v30  ;;  %v4319_v35 = vld [vmem:[#allocation8 + $0xb00] sm:$0xff]  ;;  %v4320_v37 = vld [vmem:[#allocation8 + $0xb08] sm:$0xff] }
 0x2fd   :  { %7326 = vmatprep.subr.bf16.mxu1 %v9261_v47  ;;  %v9315_v47 = vcombine.high %v4271_v63, %v4275_v44  ;;  %v4323_v36 = vld [vmem:[#allocation8 + $0xb20] sm:$0xff] }
 0x2ff   :  { %7155 = vmatpush1.bf16.msra.mxu0 %v9258_v51  ;;  %v4284_v51 = vld [vmem:[#allocation8 + $0x9e8] sm:$0xff] }
 0x300   :  { %7327 = vmatpush1.bf16.msra.mxu1 %v9260_v52  ;;  %7167 = vmatprep.subr.bf16.mxu0 %v9267_v54  ;;  %v9314_v52 = vcombine.low %v4271_v63, %v4275_v44  ;;  %v9316_v54 = vcombine.low %v4272_v45, %v4276_v30  ;;  %v9325_v55 = vcombine.high %v4280_v43, %v4284_v51  ;;  %v4327_v44 = vld [vmem:[#allocation8 + $0xb40] sm:$0xff]  ;;  %v4328_v30 = vld [vmem:[#allocation8 + $0xb48] sm:$0xff] }
 0x301   :  { %7339 = vmatprep.subr.bf16.mxu1 %v9269_v39  ;;  %v9323_v39 = vcombine.high %v4279_v49, %v4283_v50  ;;  %v4331_v45 = vld [vmem:[#allocation8 + $0xb60] sm:$0xff] }
 0x302   :  { %7157 = vmatmul.mubr.bf16.vlgmr.msra.gmra.mrb[8].mxu0 %v10270_v3 }
 0x303   :  { %7329 = vmatmul.mubr.bf16.vlgmr.msra.gmra.mrb[8].mxu1 %v10270_v3  ;;  %7168 = vmatpush1.bf16.msra.mxu0 %v9266_v53  ;;  %v4292_v53 = vld [vmem:[#allocation8 + $0xa28] sm:$0xff] }
 0x304   :  { %7340 = vmatpush1.bf16.msra.mxu1 %v9268_v61  ;;  %7169 = vmatprep.subr.bf16.mxu0 %v9275_v0  ;;  %v9322_v61 = vcombine.low %v4279_v49, %v4283_v50  ;;  %v9324_v0 = vcombine.low %v4280_v43, %v4284_v51  ;;  %v9333_v5 = vcombine.high %v4288_v60, %v4292_v53  ;;  %v4335_v50 = vld [vmem:[#allocation8 + $0xb80] sm:$0xff]  ;;  %v4336_v51 = vld [vmem:[#allocation8 + $0xb88] sm:$0xff] }
 0x305   :  { %7341 = vmatprep.subr.bf16.mxu1 %v9277_v2  ;;  %v9331_v2 = vcombine.high %v4287_v56, %v4291_v59  ;;  %v4339_v43 = vld [vmem:[#allocation8 + $0xba0] sm:$0xff] }
 0x307   :  { %7170 = vmatpush1.bf16.msra.mxu0 %v9274_v13  ;;  %v4300_v13 = vld [vmem:[#allocation8 + $0xa68] sm:$0xff] }
 0x308   :  { %7342 = vmatpush1.bf16.msra.mxu1 %v9276_v14  ;;  %7171 = vmatprep.subr.bf16.mxu0 %v9283_v16  ;;  %v9330_v14 = vcombine.low %v4287_v56, %v4291_v59  ;;  %v9332_v16 = vcombine.low %v4288_v60, %v4292_v53  ;;  %v9341_v18 = vcombine.high %v4296_v12, %v4300_v13  ;;  %v4343_v59 = vld [vmem:[#allocation8 + $0xbc0] sm:$0xff]  ;;  %v4344_v53 = vld [vmem:[#allocation8 + $0xbc8] sm:$0xff] }
 0x309   :  { %7343 = vmatprep.subr.bf16.mxu1 %v9285_v17  ;;  %v9339_v17 = vcombine.high %v4295_v8, %v4299_v10  ;;  %v4347_v60 = vld [vmem:[#allocation8 + $0xbe0] sm:$0xff] }
 0x30b   :  { %7172 = vmatpush1.bf16.msra.mxu0 %v9282_v22  ;;  %v4308_v22 = vld [vmem:[#allocation8 + $0xaa8] sm:$0xff] }
 0x30c   :  { %7344 = vmatpush1.bf16.msra.mxu1 %v9284_v23  ;;  %7173 = vmatprep.subr.bf16.mxu0 %v9291_v24  ;;  %v9338_v23 = vcombine.low %v4295_v8, %v4299_v10  ;;  %v9340_v24 = vcombine.low %v4296_v12, %v4300_v13  ;;  %v9349_v27 = vcombine.high %v4304_v21, %v4308_v22  ;;  %v10286_v10 = vld [vmem:[#allocation8 + $0xc00] sm:$0xff]  ;;  %v10290_v13 = vld [vmem:[#allocation8 + $0xc08] sm:$0xff] }
 0x30d   :  { %7345 = vmatprep.subr.bf16.mxu1 %v9293_v26  ;;  %v9347_v26 = vcombine.high %v4303_v19, %v4307_v20  ;;  %v10288_v12 = vld [vmem:[#allocation8 + $0xc20] sm:$0xff] }
 0x30f   :  { %7174 = vmatpush1.bf16.msra.mxu0 %v9290_v58  ;;  %v4316_v58 = vld [vmem:[#allocation8 + $0xae8] sm:$0xff] }
 0x310   :  { %7346 = vmatpush1.bf16.msra.mxu1 %v9292_v32  ;;  %7175 = vmatprep.subr.bf16.mxu0 %v9299_v33  ;;  %v9346_v32 = vcombine.low %v4303_v19, %v4307_v20  ;;  %v9348_v33 = vcombine.low %v4304_v21, %v4308_v22  ;;  %v9357_v15 = vcombine.high %v4312_v31, %v4316_v58  ;;  %v673_v20 = vsub.s32 4, %v10254_v57 }
 0x311   :  { %7347 = vmatprep.subr.bf16.mxu1 %v9301_v34  ;;  %v9355_v34 = vcombine.high %v4311_v28, %v4315_v29  ;;  %v681_v21 = vsub.s32 6, %v10254_v57  ;;  %v677_v22 = vsub.s32 5, %v10254_v57 }
 0x313   :  { %7176 = vmatpush1.bf16.msra.mxu0 %v9298_v38  ;;  %v4324_v38 = vld [vmem:[#allocation8 + $0xb28] sm:$0xff] }
 0x314   :  { %7348 = vmatpush1.bf16.msra.mxu1 %v9300_v40  ;;  %7177 = vmatprep.subr.bf16.mxu0 %v9307_v41  ;;  %v9354_v40 = vcombine.low %v4311_v28, %v4315_v29  ;;  %v9356_v41 = vcombine.low %v4312_v31, %v4316_v58  ;;  %v9365_v63 = vcombine.high %v4320_v37, %v4324_v38 }
 0x315   :  { %7349 = vmatprep.subr.bf16.mxu1 %v9309_v42  ;;  %v9363_v42 = vcombine.high %v4319_v35, %v4323_v36 }
 0x317   :  { %7178 = vmatpush1.bf16.msra.mxu0 %v9306_v25  ;;  %v4332_v25 = vld [vmem:[#allocation8 + $0xb68] sm:$0xff] }
 0x318   :  { %7350 = vmatpush1.bf16.msra.mxu1 %v9308_v46  ;;  %7179 = vmatprep.subr.bf16.mxu0 %v9315_v47  ;;  %v9362_v46 = vcombine.low %v4319_v35, %v4323_v36  ;;  %v9364_v47 = vcombine.low %v4320_v37, %v4324_v38  ;;  %v9373_v49 = vcombine.high %v4328_v30, %v4332_v25 }
 0x319   :  { %7351 = vmatprep.subr.bf16.mxu1 %v9317_v48  ;;  %v9371_v48 = vcombine.high %v4327_v44, %v4331_v45 }
 0x31b   :  { %7180 = vmatpush1.bf16.msra.mxu0 %v9314_v52  ;;  %v4340_v52 = vld [vmem:[#allocation8 + $0xba8] sm:$0xff] }
 0x31c   :  { %7352 = vmatpush1.bf16.msra.mxu1 %v9316_v54  ;;  %7181 = vmatprep.subr.bf16.mxu0 %v9323_v39  ;;  %v9370_v54 = vcombine.low %v4327_v44, %v4331_v45  ;;  %v9372_v39 = vcombine.low %v4328_v30, %v4332_v25  ;;  %v9381_v56 = vcombine.high %v4336_v51, %v4340_v52 }
 0x31d   :  { %7353 = vmatprep.subr.bf16.mxu1 %v9325_v55  ;;  %v9379_v55 = vcombine.high %v4335_v50, %v4339_v43 }
 0x31f   :  { %7182 = vmatpush1.bf16.msra.mxu0 %v9322_v61  ;;  %v4348_v61 = vld [vmem:[#allocation8 + $0xbe8] sm:$0xff] }
 0x320   :  { %7354 = vmatpush1.bf16.msra.mxu1 %v9324_v0  ;;  %7183 = vmatprep.subr.bf16.mxu0 %v9331_v2  ;;  %v9378_v0 = vcombine.low %v4335_v50, %v4339_v43  ;;  %v9380_v2 = vcombine.low %v4336_v51, %v4340_v52  ;;  %v9389_v8 = vcombine.high %v4344_v53, %v4348_v61  ;;  %v4359_v50 = vld [vmem:[#allocation8 + $0xc40] sm:$0xff] }
 0x321   :  { %7355 = vmatprep.subr.bf16.mxu1 %v9333_v5  ;;  %v9387_v5 = vcombine.high %v4343_v59, %v4347_v60 }
 0x323   :  { %7184 = vmatpush1.bf16.msra.mxu0 %v9330_v14  ;;  %v10292_v14 = vld [vmem:[#allocation8 + $0xc28] sm:$0xff] }
 0x324   :  { %7356 = vmatpush1.bf16.msra.mxu1 %v9332_v16  ;;  %7185 = vmatprep.subr.bf16.mxu0 %v9339_v17  ;;  %v9386_v16 = vcombine.low %v4343_v59, %v4347_v60  ;;  %v9388_v17 = vcombine.low %v4344_v53, %v4348_v61  ;;  %v9397_v19 = vcombine.high %v10290_v13, %v10292_v14 }
 0x325   :  { %7357 = vmatprep.subr.bf16.mxu1 %v9341_v18  ;;  %v9395_v18 = vcombine.high %v10286_v10, %v10288_v12  ;;  %v9394_v60 = vcombine.low %v10286_v10, %v10288_v12  ;;  %v9396_v53 = vcombine.low %v10290_v13, %v10292_v14 }
 0x327   :  { %7186 = vmatpush1.bf16.msra.mxu0 %v9338_v23  ;;  %v685_v23 = vsub.s32 7, %v10254_v57 }
 0x328   :  { %7358 = vmatpush1.bf16.msra.mxu1 %v9340_v24  ;;  %7187 = vmatprep.subr.bf16.mxu0 %v9347_v26  ;;  %v9882_v24 = vld [vmem:[#allocation7] sm:$0xff] }
 0x329   :  { %7359 = vmatprep.subr.bf16.mxu1 %v9349_v27  ;;  %v674_v26 = vrot.slane %v9882_v24, %v673_v20  ;;  %v682_v27 = vrot.slane %v9882_v24, %v681_v21  ;;  %v678_v28 = vrot.slane %v9882_v24, %v677_v22  ;;  %v686_v29 = vrot.slane %v9882_v24, %v685_v23  ;;  %v4376_v24 = vld [vmem:[#allocation8 + $0xcc8] sm:$0xff] }
 0x32b   :  { %7188 = vmatpush1.bf16.msra.mxu0 %v9346_v32 }
 0x32c   :  { %7360 = vmatpush1.bf16.msra.mxu1 %v9348_v33  ;;  %7189 = vmatprep.subr.bf16.mxu0 %v9355_v34 }
 0x32d   :  { %7361 = vmatprep.subr.bf16.mxu1 %v9357_v15 }
 0x32f   :  { %7190 = vmatpush1.bf16.msra.mxu0 %v9354_v40 }
 0x330   :  { %7362 = vmatpush1.bf16.msra.mxu1 %v9356_v41  ;;  %7191 = vmatprep.subr.bf16.mxu0 %v9363_v42 }
 0x331   :  { %7363 = vmatprep.subr.bf16.mxu1 %v9365_v63 }
 0x333   :  { %7192 = vmatpush1.bf16.msra.mxu0 %v9362_v46 }
 0x334   :  { %7364 = vmatpush1.bf16.msra.mxu1 %v9364_v47  ;;  %7193 = vmatprep.subr.bf16.mxu0 %v9371_v48 }
 0x335   :  { %7365 = vmatprep.subr.bf16.mxu1 %v9373_v49 }
 0x337   :  { %7194 = vmatpush1.bf16.msra.mxu0 %v9370_v54  ;;  %v4363_v54 = vld [vmem:[#allocation8 + $0xc60] sm:$0xff] }
 0x338   :  { %7366 = vmatpush1.bf16.msra.mxu1 %v9372_v39  ;;  %7195 = vmatprep.subr.bf16.mxu0 %v9379_v55  ;;  %v4360_v39 = vld [vmem:[#allocation8 + $0xc48] sm:$0xff]  ;;  %v9402_v10 = vcombine.low %v4359_v50, %v4363_v54 }
 0x339   :  { %7367 = vmatprep.subr.bf16.mxu1 %v9381_v56  ;;  %v4364_v55 = vld [vmem:[#allocation8 + $0xc68] sm:$0xff] }
 0x33a   :  { %v9404_v12 = vcombine.low %v4360_v39, %v4364_v55 }
 0x33b   :  { %7196 = vmatpush1.bf16.msra.mxu0 %v9378_v0  ;;  %v4367_v0 = vld [vmem:[#allocation8 + $0xc80] sm:$0xff] }
 0x33c   :  { %7368 = vmatpush1.bf16.msra.mxu1 %v9380_v2  ;;  %7197 = vmatprep.subr.bf16.mxu0 %v9387_v5  ;;  %v9403_v2 = vcombine.high %v4359_v50, %v4363_v54  ;;  %v9405_v5 = vcombine.high %v4360_v39, %v4364_v55  ;;  %v4407_v54 = vld [vmem:[#allocation8 + $0xdc0] sm:$0xff]  ;;  %v4408_v55 = vld [vmem:[#allocation8 + $0xdc8] sm:$0xff] }
 0x33d   :  { %7369 = vmatprep.subr.bf16.mxu1 %v9389_v8  ;;  %v4371_v8 = vld [vmem:[#allocation8 + $0xca0] sm:$0xff] }
 0x33e   :  { %v9411_v13 = vcombine.high %v4367_v0, %v4371_v8  ;;  %v4411_v39 = vld [vmem:[#allocation8 + $0xde0] sm:$0xff] }
 0x33f   :  { %7198 = vmatpush1.bf16.msra.mxu0 %v9386_v16  ;;  %v4368_v16 = vld [vmem:[#allocation8 + $0xc88] sm:$0xff] }
 0x340   :  { %7370 = vmatpush1.bf16.msra.mxu1 %v9388_v17  ;;  %7210 = vmatprep.subr.bf16.mxu0 %v9395_v18  ;;  %v4372_v17 = vld [vmem:[#allocation8 + $0xca8] sm:$0xff]  ;;  %v4375_v18 = vld [vmem:[#allocation8 + $0xcc0] sm:$0xff] }
 0x341   :  { %7382 = vmatprep.subr.bf16.mxu1 %v9397_v19  ;;  %v9413_v14 = vcombine.high %v4368_v16, %v4372_v17  ;;  %v4379_v19 = vld [vmem:[#allocation8 + $0xce0] sm:$0xff] }
 0x355   :  { %v3762_v31 = vpop.f32.mrb[4].mxu0  ;;  %v3934_v32 = vpop.f32.mrb[4].mxu1 }
 0x356   :  { %v9683_v58 = vadd.f32 %v3762_v31, %v674_v26  ;;  %v3764_v33 = vpop.f32.mrb[5].mxu0  ;;  %v9687_v34 = vadd.f32 %v3934_v32, %v682_v27  ;;  %v3936_v35 = vpop.f32.mrb[5].mxu1  ;;  %v4387_v32 = vld [vmem:[#allocation8 + $0xd20] sm:$0xff] }
 0x357   :  { %v9684_v15 = vadd.f32 %v3764_v33, %v678_v28  ;;  %v3766_v36 = vpop.f32.mrb[6].mxu0  ;;  %v9688_v37 = vadd.f32 %v3936_v35, %v686_v29  ;;  %v3938_v40 = vpop.f32.mrb[6].mxu1  ;;  %v4384_v33 = vld [vmem:[#allocation8 + $0xd08] sm:$0xff] }
 0x358   :  { %v9685_v38 = vadd.f32 %v3766_v36, %v674_v26  ;;  %v3768_v41 = vpop.f32.mrb[7].mxu0  ;;  %v9689_v42 = vadd.f32 %v3938_v40, %v682_v27  ;;  %v3940_v44 = vpop.f32.mrb[7].mxu1  ;;  %v3947_v45 = vmax.f32 %v9683_v58, 0.0  ;;  %v3949_v46 = vmax.f32 %v9687_v34, 0.0  ;;  %v4380_v26 = vld [vmem:[#allocation8 + $0xce8] sm:$0xff]  ;;  %v4383_v58 = vld [vmem:[#allocation8 + $0xd00] sm:$0xff] }
 0x359   :  { %v9686_v63 = vadd.f32 %v3768_v41, %v678_v28  ;;  %v9690_v25 = vadd.f32 %v3940_v44, %v686_v29  ;;  %v3948_v47 = vmax.f32 %v9684_v15, 0.0  ;;  %v3950_v43 = vmax.f32 %v9688_v37, 0.0  ;;  %v4388_v34 = vld [vmem:[#allocation8 + $0xd28] sm:$0xff]  ;;  %v4395_v40 = vld [vmem:[#allocation8 + $0xd60] sm:$0xff] }
 0x35a   :  { %v3955_v30 = vmax.f32 %v9685_v38, 0.0  ;;  %v3957_v48 = vmax.f32 %v9689_v42, 0.0  ;;  %v9410_v27 = vcombine.low %v4367_v0, %v4371_v8  ;;  %v9412_v28 = vcombine.low %v4368_v16, %v4372_v17  ;;  %v4391_v38 = vld [vmem:[#allocation8 + $0xd40] sm:$0xff]  ;;  %v4392_v41 = vld [vmem:[#allocation8 + $0xd48] sm:$0xff] }
 0x35b   :  { %v3956_v49 = vmax.f32 %v9686_v63, 0.0  ;;  %v3958_v52 = vmax.f32 %v9690_v25, 0.0  ;;  %v9419_v29 = vcombine.high %v4375_v18, %v4379_v19  ;;  %v9421_v31 = vcombine.high %v4376_v24, %v4380_v26  ;;  %v4396_v42 = vld [vmem:[#allocation8 + $0xd68] sm:$0xff]  ;;  %v4399_v25 = vld [vmem:[#allocation8 + $0xd80] sm:$0xff] }
 0x35c   :  { %v10310_v51 = vpack.c.bf16 %v3955_v30, %v3947_v45  ;;  %v10312_v56 = vpack.c.bf16 %v3957_v48, %v3949_v46  ;;  %v9418_v15 = vcombine.low %v4375_v18, %v4379_v19  ;;  %v9420_v35 = vcombine.low %v4376_v24, %v4380_v26  ;;  %v4403_v46 = vld [vmem:[#allocation8 + $0xda0] sm:$0xff]  ;;  %v4404_v48 = vld [vmem:[#allocation8 + $0xda8] sm:$0xff] }
 0x35d   :  { %v10314_v59 = vpack.c.bf16 %v3956_v49, %v3948_v47  ;;  %v10320_v61 = vpack.c.bf16 %v3958_v52, %v3950_v43  ;;  %v9427_v36 = vcombine.high %v4383_v58, %v4387_v32  ;;  %v9429_v37 = vcombine.high %v4384_v33, %v4388_v34  ;;  %v4400_v47 = vld [vmem:[#allocation8 + $0xd88] sm:$0xff]  ;;  %v4415_v8 = vld [vmem:[#allocation8 + $0xe00] sm:$0xff] }
 0x35e   :  { %v9426_v63 = vcombine.low %v4383_v58, %v4387_v32  ;;  %v9428_v44 = vcombine.low %v4384_v33, %v4388_v34  ;;  %v9435_v45 = vcombine.high %v4391_v38, %v4395_v40  ;;  %v9437_v30 = vcombine.high %v4392_v41, %v4396_v42  ;;  %v4419_v16 = vld [vmem:[#allocation8 + $0xe20] sm:$0xff]  ;;  %v4416_v17 = vld [vmem:[#allocation8 + $0xe08] sm:$0xff] }
 0x35f   :  { %7199 = vmatprep.mubr.bf16.mxu0 %v10314_v59  ;;  %7371 = vmatprep.mubr.bf16.mxu1 %v10314_v59  ;;  %v9434_v49 = vcombine.low %v4391_v38, %v4395_v40  ;;  %v9436_v50 = vcombine.low %v4392_v41, %v4396_v42  ;;  %v9443_v43 = vcombine.high %v4399_v25, %v4403_v46  ;;  %v4423_v19 = vld [vmem:[#allocation8 + $0xe40] sm:$0xff]  ;;  %v4424_v26 = vld [vmem:[#allocation8 + $0xe48] sm:$0xff] }
 0x360   :  { %7200 = vmatmul.mubr.bf16.vlgmr.msra.gmra.mrb[8].mxu0 %v10310_v51  ;;  %7372 = vmatmul.mubr.bf16.vlgmr.msra.gmra.mrb[8].mxu1 %v10310_v51  ;;  %v9445_v52 = vcombine.high %v4400_v47, %v4404_v48  ;;  %v9444_v0 = vcombine.low %v4400_v47, %v4404_v48  ;;  %v4427_v24 = vld [vmem:[#allocation8 + $0xe60] sm:$0xff]  ;;  %v4432_v34 = vld [vmem:[#allocation8 + $0xe88] sm:$0xff] }
 0x361   :  { %7211 = vmatpush1.bf16.msra.mxu0 %v9394_v60  ;;  %7383 = vmatpush1.bf16.msra.mxu1 %v9396_v53  ;;  %v4412_v60 = vld [vmem:[#allocation8 + $0xde8] sm:$0xff]  ;;  %v9442_v53 = vcombine.low %v4399_v25, %v4403_v46  ;;  %v4431_v32 = vld [vmem:[#allocation8 + $0xe80] sm:$0xff] }
 0x362   :  { %7242 = vmatprep.mubr.bf16.mxu0 %v10320_v61  ;;  %7414 = vmatprep.mubr.bf16.mxu1 %v10320_v61  ;;  %v4435_v33 = vld [vmem:[#allocation8 + $0xea0] sm:$0xff]  ;;  %v4440_v42 = vld [vmem:[#allocation8 + $0xec8] sm:$0xff] }
 0x363   :  { %7212 = vmatprep.subr.bf16.mxu0 %v9403_v2  ;;  %7384 = vmatprep.subr.bf16.mxu1 %v9405_v5  ;;  %v9451_v2 = vcombine.high %v4407_v54, %v4411_v39  ;;  %v9453_v5 = vcombine.high %v4408_v55, %v4412_v60  ;;  %v4439_v40 = vld [vmem:[#allocation8 + $0xec0] sm:$0xff]  ;;  %v4448_v48 = vld [vmem:[#allocation8 + $0xf08] sm:$0xff] }
 0x364   :  { %v4443_v41 = vld [vmem:[#allocation8 + $0xee0] sm:$0xff] }
 0x365   :  { %7213 = vmatpush1.bf16.msra.mxu0 %v9402_v10  ;;  %7385 = vmatpush1.bf16.msra.mxu1 %v9404_v12  ;;  %v4420_v10 = vld [vmem:[#allocation8 + $0xe28] sm:$0xff]  ;;  %v9450_v12 = vcombine.low %v4407_v54, %v4411_v39  ;;  %v4447_v46 = vld [vmem:[#allocation8 + $0xf00] sm:$0xff] }
 0x366   :  { %7214 = vmatprep.subr.bf16.mxu0 %v9411_v13  ;;  %7386 = vmatprep.subr.bf16.mxu1 %v9413_v14  ;;  %v9452_v13 = vcombine.low %v4408_v55, %v4412_v60  ;;  %v9459_v14 = vcombine.high %v4415_v8, %v4419_v16  ;;  %v9461_v18 = vcombine.high %v4416_v17, %v4420_v10  ;;  %v4451_v47 = vld [vmem:[#allocation8 + $0xf20] sm:$0xff]  ;;  %v4456_v60 = vld [vmem:[#allocation8 + $0xf48] sm:$0xff] }
 0x367   :  { %v4455_v39 = vld [vmem:[#allocation8 + $0xf40] sm:$0xff] }
 0x368   :  { %v4459_v55 = vld [vmem:[#allocation8 + $0xf60] sm:$0xff] }
 0x369   :  { %7215 = vmatpush1.bf16.msra.mxu0 %v9410_v27  ;;  %7387 = vmatpush1.bf16.msra.mxu1 %v9412_v28  ;;  %v4428_v27 = vld [vmem:[#allocation8 + $0xe68] sm:$0xff]  ;;  %v9458_v28 = vcombine.low %v4415_v8, %v4419_v16  ;;  %v4463_v16 = vld [vmem:[#allocation8 + $0xf80] sm:$0xff] }
 0x36a   :  { %7216 = vmatprep.subr.bf16.mxu0 %v9419_v29  ;;  %7388 = vmatprep.subr.bf16.mxu1 %v9421_v31  ;;  %v9460_v29 = vcombine.low %v4416_v17, %v4420_v10  ;;  %v9467_v31 = vcombine.high %v4423_v19, %v4427_v24  ;;  %v9469_v58 = vcombine.high %v4424_v26, %v4428_v27  ;;  %v4467_v17 = vld [vmem:[#allocation8 + $0xfa0] sm:$0xff]  ;;  %v4464_v10 = vld [vmem:[#allocation8 + $0xf88] sm:$0xff] }
 0x36d   :  { %7217 = vmatpush1.bf16.msra.mxu0 %v9418_v15  ;;  %7389 = vmatpush1.bf16.msra.mxu1 %v9420_v35  ;;  %v4436_v15 = vld [vmem:[#allocation8 + $0xea8] sm:$0xff]  ;;  %v9466_v35 = vcombine.low %v4423_v19, %v4427_v24  ;;  %v4471_v24 = vld [vmem:[#allocation8 + $0xfc0] sm:$0xff] }
 0x36e   :  { %7218 = vmatprep.subr.bf16.mxu0 %v9427_v36  ;;  %7390 = vmatprep.subr.bf16.mxu1 %v9429_v37  ;;  %v9468_v36 = vcombine.low %v4424_v26, %v4428_v27  ;;  %v9475_v37 = vcombine.high %v4431_v32, %v4435_v33  ;;  %v9477_v38 = vcombine.high %v4432_v34, %v4436_v15  ;;  %v4475_v26 = vld [vmem:[#allocation8 + $0xfe0] sm:$0xff]  ;;  %v4472_v27 = vld [vmem:[#allocation8 + $0xfc8] sm:$0xff] }
 0x371   :  { %7219 = vmatpush1.bf16.msra.mxu0 %v9426_v63  ;;  %7391 = vmatpush1.bf16.msra.mxu1 %v9428_v44  ;;  %v4444_v63 = vld [vmem:[#allocation8 + $0xee8] sm:$0xff]  ;;  %v9474_v44 = vcombine.low %v4431_v32, %v4435_v33  ;;  %v3969_v33 = vld [vmem:[#allocation8 + $0x10] sm:$0xff] }
 0x372   :  { %7220 = vmatprep.subr.bf16.mxu0 %v9435_v45  ;;  %7392 = vmatprep.subr.bf16.mxu1 %v9437_v30  ;;  %v9476_v45 = vcombine.low %v4432_v34, %v4436_v15  ;;  %v9483_v30 = vcombine.high %v4439_v40, %v4443_v41  ;;  %v9485_v25 = vcombine.high %v4440_v42, %v4444_v63  ;;  %v3973_v34 = vld [vmem:[#allocation8 + $0x30] sm:$0xff]  ;;  %v3970_v15 = vld [vmem:[#allocation8 + $0x18] sm:$0xff] }
 0x375   :  { %7221 = vmatpush1.bf16.msra.mxu0 %v9434_v49  ;;  %7393 = vmatpush1.bf16.msra.mxu1 %v9436_v50  ;;  %v4452_v49 = vld [vmem:[#allocation8 + $0xf28] sm:$0xff]  ;;  %v9482_v50 = vcombine.low %v4439_v40, %v4443_v41  ;;  %v3977_v41 = vld [vmem:[#allocation8 + $0x50] sm:$0xff] }
 0x376   :  { %7222 = vmatprep.subr.bf16.mxu0 %v9443_v43  ;;  %7394 = vmatprep.subr.bf16.mxu1 %v9445_v52  ;;  %v9484_v43 = vcombine.low %v4440_v42, %v4444_v63  ;;  %v9491_v52 = vcombine.high %v4447_v46, %v4451_v47  ;;  %v9493_v54 = vcombine.high %v4448_v48, %v4452_v49  ;;  %v3981_v42 = vld [vmem:[#allocation8 + $0x70] sm:$0xff]  ;;  %v3978_v63 = vld [vmem:[#allocation8 + $0x58] sm:$0xff] }
 0x379   :  { %7223 = vmatpush1.bf16.msra.mxu0 %v9442_v53  ;;  %7395 = vmatpush1.bf16.msra.mxu1 %v9444_v0  ;;  %v4460_v53 = vld [vmem:[#allocation8 + $0xf68] sm:$0xff]  ;;  %v9490_v0 = vcombine.low %v4447_v46, %v4451_v47  ;;  %v3985_v47 = vld [vmem:[#allocation8 + $0x90] sm:$0xff] }
 0x37a   :  { %7224 = vmatprep.subr.bf16.mxu0 %v9451_v2  ;;  %7396 = vmatprep.subr.bf16.mxu1 %v9453_v5  ;;  %v9492_v2 = vcombine.low %v4448_v48, %v4452_v49  ;;  %v9499_v5 = vcombine.high %v4455_v39, %v4459_v55  ;;  %v9501_v8 = vcombine.high %v4456_v60, %v4460_v53  ;;  %v3989_v48 = vld [vmem:[#allocation8 + $0xb0] sm:$0xff]  ;;  %v3986_v49 = vld [vmem:[#allocation8 + $0x98] sm:$0xff] }
 0x37d   :  { %7225 = vmatpush1.bf16.msra.mxu0 %v9450_v12  ;;  %7397 = vmatpush1.bf16.msra.mxu1 %v9452_v13  ;;  %v4468_v12 = vld [vmem:[#allocation8 + $0xfa8] sm:$0xff]  ;;  %v9498_v13 = vcombine.low %v4455_v39, %v4459_v55  ;;  %v3993_v55 = vld [vmem:[#allocation8 + $0xd0] sm:$0xff] }
 0x37e   :  { %7226 = vmatprep.subr.bf16.mxu0 %v9459_v14  ;;  %7398 = vmatprep.subr.bf16.mxu1 %v9461_v18  ;;  %v9500_v14 = vcombine.low %v4456_v60, %v4460_v53  ;;  %v9507_v18 = vcombine.high %v4463_v16, %v4467_v17  ;;  %v9509_v19 = vcombine.high %v4464_v10, %v4468_v12  ;;  %v3997_v60 = vld [vmem:[#allocation8 + $0xf0] sm:$0xff]  ;;  %v3994_v53 = vld [vmem:[#allocation8 + $0xd8] sm:$0xff] }
 0x381   :  { %7227 = vmatpush1.bf16.msra.mxu0 %v9458_v28  ;;  %7399 = vmatpush1.bf16.msra.mxu1 %v9460_v29  ;;  %v4476_v28 = vld [vmem:[#allocation8 + $0xfe8] sm:$0xff]  ;;  %v9506_v29 = vcombine.low %v4463_v16, %v4467_v17  ;;  %v4001_v17 = vld [vmem:[#allocation8 + $0x110] sm:$0xff] }
 0x382   :  { %7228 = vmatprep.subr.bf16.mxu0 %v9467_v31  ;;  %7400 = vmatprep.subr.bf16.mxu1 %v9469_v58  ;;  %v9508_v31 = vcombine.low %v4464_v10, %v4468_v12  ;;  %v9515_v58 = vcombine.high %v4471_v24, %v4475_v26  ;;  %v9517_v32 = vcombine.high %v4472_v27, %v4476_v28  ;;  %v4005_v10 = vld [vmem:[#allocation8 + $0x130] sm:$0xff]  ;;  %v4006_v12 = vld [vmem:[#allocation8 + $0x138] sm:$0xff] }
 0x385   :  { %7229 = vmatpush1.bf16.msra.mxu0 %v9466_v35  ;;  %7401 = vmatpush1.bf16.msra.mxu1 %v9468_v36  ;;  %v3974_v35 = vld [vmem:[#allocation8 + $0x38] sm:$0xff]  ;;  %v9514_v36 = vcombine.low %v4471_v24, %v4475_v26  ;;  %v4009_v24 = vld [vmem:[#allocation8 + $0x150] sm:$0xff] }
 0x386   :  { %7230 = vmatprep.subr.bf16.mxu0 %v9475_v37  ;;  %7402 = vmatprep.subr.bf16.mxu1 %v9477_v38  ;;  %v9516_v37 = vcombine.low %v4472_v27, %v4476_v28  ;;  %v9015_v38 = vcombine.high %v3969_v33, %v3973_v34  ;;  %v9017_v40 = vcombine.high %v3970_v15, %v3974_v35  ;;  %v4013_v26 = vld [vmem:[#allocation8 + $0x170] sm:$0xff]  ;;  %v4010_v27 = vld [vmem:[#allocation8 + $0x158] sm:$0xff] }
 0x387   :  { %v4014_v28 = vld [vmem:[#allocation8 + $0x178] sm:$0xff] }
 0x389   :  { %7231 = vmatpush1.bf16.msra.mxu0 %v9474_v44  ;;  %7403 = vmatpush1.bf16.msra.mxu1 %v9476_v45  ;;  %v3982_v44 = vld [vmem:[#allocation8 + $0x78] sm:$0xff]  ;;  %v9014_v45 = vcombine.low %v3969_v33, %v3973_v34  ;;  %v4017_v33 = vld [vmem:[#allocation8 + $0x190] sm:$0xff] }
 0x38a   :  { %7232 = vmatprep.subr.bf16.mxu0 %v9483_v30  ;;  %7404 = vmatprep.subr.bf16.mxu1 %v9485_v25  ;;  %v9016_v30 = vcombine.low %v3970_v15, %v3974_v35  ;;  %v9023_v25 = vcombine.high %v3977_v41, %v3981_v42  ;;  %v9025_v46 = vcombine.high %v3978_v63, %v3982_v44  ;;  %v4021_v34 = vld [vmem:[#allocation8 + $0x1b0] sm:$0xff]  ;;  %v4018_v15 = vld [vmem:[#allocation8 + $0x198] sm:$0xff] }
 0x38b   :  { %v4022_v35 = vld [vmem:[#allocation8 + $0x1b8] sm:$0xff] }
 0x38d   :  { %7233 = vmatpush1.bf16.msra.mxu0 %v9482_v50  ;;  %7405 = vmatpush1.bf16.msra.mxu1 %v9484_v43  ;;  %v3990_v50 = vld [vmem:[#allocation8 + $0xb8] sm:$0xff]  ;;  %v9022_v43 = vcombine.low %v3977_v41, %v3981_v42  ;;  %v4025_v41 = vld [vmem:[#allocation8 + $0x1d0] sm:$0xff] }
 0x38e   :  { %7234 = vmatprep.subr.bf16.mxu0 %v9491_v52  ;;  %7406 = vmatprep.subr.bf16.mxu1 %v9493_v54  ;;  %v9024_v52 = vcombine.low %v3978_v63, %v3982_v44  ;;  %v9031_v54 = vcombine.high %v3985_v47, %v3989_v48  ;;  %v9033_v39 = vcombine.high %v3986_v49, %v3990_v50  ;;  %v4029_v42 = vld [vmem:[#allocation8 + $0x1f0] sm:$0xff]  ;;  %v4026_v63 = vld [vmem:[#allocation8 + $0x1d8] sm:$0xff] }
 0x38f   :  { %v4030_v44 = vld [vmem:[#allocation8 + $0x1f8] sm:$0xff] }
 0x391   :  { %7235 = vmatpush1.bf16.msra.mxu0 %v9490_v0  ;;  %7407 = vmatpush1.bf16.msra.mxu1 %v9492_v2  ;;  %v3998_v0 = vld [vmem:[#allocation8 + $0xf8] sm:$0xff]  ;;  %v9030_v2 = vcombine.low %v3985_v47, %v3989_v48  ;;  %v4033_v47 = vld [vmem:[#allocation8 + $0x210] sm:$0xff] }
 0x392   :  { %7236 = vmatprep.subr.bf16.mxu0 %v9499_v5  ;;  %7408 = vmatprep.subr.bf16.mxu1 %v9501_v8  ;;  %v9032_v5 = vcombine.low %v3986_v49, %v3990_v50  ;;  %v9039_v8 = vcombine.high %v3993_v55, %v3997_v60  ;;  %v9041_v16 = vcombine.high %v3994_v53, %v3998_v0  ;;  %v4037_v48 = vld [vmem:[#allocation8 + $0x230] sm:$0xff]  ;;  %v4034_v49 = vld [vmem:[#allocation8 + $0x218] sm:$0xff] }
 0x393   :  { %v4038_v50 = vld [vmem:[#allocation8 + $0x238] sm:$0xff] }
 0x395   :  { %7237 = vmatpush1.bf16.msra.mxu0 %v9498_v13  ;;  %7409 = vmatpush1.bf16.msra.mxu1 %v9500_v14  ;;  %v9038_v13 = vcombine.low %v3993_v55, %v3997_v60  ;;  %v9040_v14 = vcombine.low %v3994_v53, %v3998_v0  ;;  %v4041_v55 = vld [vmem:[#allocation8 + $0x250] sm:$0xff]  ;;  %v4042_v53 = vld [vmem:[#allocation8 + $0x258] sm:$0xff] }
 0x396   :  { %7238 = vmatprep.subr.bf16.mxu0 %v9507_v18  ;;  %7410 = vmatprep.subr.bf16.mxu1 %v9509_v19  ;;  %v9047_v18 = vcombine.high %v4001_v17, %v4005_v10  ;;  %v4045_v60 = vld [vmem:[#allocation8 + $0x270] sm:$0xff]  ;;  %v4046_v0 = vld [vmem:[#allocation8 + $0x278] sm:$0xff] }
 0x399   :  { %7239 = vmatpush1.bf16.msra.mxu0 %v9506_v29  ;;  %7411 = vmatpush1.bf16.msra.mxu1 %v9508_v31  ;;  %v9046_v29 = vcombine.low %v4001_v17, %v4005_v10  ;;  %v4049_v17 = vld [vmem:[#allocation8 + $0x290] sm:$0xff] }
 0x39a   :  { %7240 = vmatprep.subr.bf16.mxu0 %v9515_v58  ;;  %7412 = vmatprep.subr.bf16.mxu1 %v9517_v32  ;;  %v9055_v58 = vcombine.high %v4009_v24, %v4013_v26  ;;  %v9057_v32 = vcombine.high %v4010_v27, %v4014_v28  ;;  %v4053_v10 = vld [vmem:[#allocation8 + $0x2b0] sm:$0xff] }
 0x39d   :  { %7241 = vmatpush1.bf16.msra.mxu0 %v9514_v36  ;;  %7413 = vmatpush1.bf16.msra.mxu1 %v9516_v37  ;;  %v9054_v36 = vcombine.low %v4009_v24, %v4013_v26  ;;  %v9056_v37 = vcombine.low %v4010_v27, %v4014_v28  ;;  %v4057_v24 = vld [vmem:[#allocation8 + $0x2d0] sm:$0xff]  ;;  %v4058_v27 = vld [vmem:[#allocation8 + $0x2d8] sm:$0xff] }
 0x39e   :  { %7425 = vmatprep.subr.bf16.mxu0 %v9015_v38  ;;  %7597 = vmatprep.subr.bf16.mxu1 %v9017_v40  ;;  %v9063_v38 = vcombine.high %v4017_v33, %v4021_v34  ;;  %v9065_v40 = vcombine.high %v4018_v15, %v4022_v35  ;;  %v4061_v26 = vld [vmem:[#allocation8 + $0x2f0] sm:$0xff]  ;;  %v4062_v28 = vld [vmem:[#allocation8 + $0x2f8] sm:$0xff] }
 0x3a0   :  { %7243 = vmatmul.mubr.bf16.vlgmr.msra.gmra.mrb[8].mxu0 %v10312_v56  ;;  %7415 = vmatmul.mubr.bf16.vlgmr.msra.gmra.mrb[8].mxu1 %v10312_v56 }
 0x3a1   :  { %7426 = vmatpush1.bf16.msra.mxu0 %v9014_v45  ;;  %7457 = vmatprep.mubr.bf16.mxu0 %v10272_v4  ;;  %v9062_v45 = vcombine.low %v4017_v33, %v4021_v34  ;;  %v4065_v33 = vld [vmem:[#allocation8 + $0x310] sm:$0xff] }
 0x3a2   :  { %7598 = vmatpush1.bf16.msra.mxu1 %v9016_v30  ;;  %7629 = vmatprep.mubr.bf16.mxu1 %v10272_v4  ;;  %v4002_v4 = vld [vmem:[#allocation8 + $0x118] sm:$0xff]  ;;  %v9064_v30 = vcombine.low %v4018_v15, %v4022_v35  ;;  %v4069_v34 = vld [vmem:[#allocation8 + $0x330] sm:$0xff] }
 0x3a3   :  { %7427 = vmatprep.subr.bf16.mxu0 %v9023_v25  ;;  %7599 = vmatprep.subr.bf16.mxu1 %v9025_v46  ;;  %v9049_v19 = vcombine.high %v4002_v4, %v4006_v12  ;;  %v9048_v31 = vcombine.low %v4002_v4, %v4006_v12  ;;  %v9071_v25 = vcombine.high %v4025_v41, %v4029_v42  ;;  %v4050_v4 = vld [vmem:[#allocation8 + $0x298] sm:$0xff] }
 0x3a4   :  { %v9073_v46 = vcombine.high %v4026_v63, %v4030_v44  ;;  %v4054_v12 = vld [vmem:[#allocation8 + $0x2b8] sm:$0xff] }
 0x3a5   :  { %7428 = vmatpush1.bf16.msra.mxu0 %v9022_v43  ;;  %v9070_v43 = vcombine.low %v4025_v41, %v4029_v42  ;;  %v4066_v15 = vld [vmem:[#allocation8 + $0x318] sm:$0xff]  ;;  %v4073_v41 = vld [vmem:[#allocation8 + $0x350] sm:$0xff] }
 0x3a6   :  { %7600 = vmatpush1.bf16.msra.mxu1 %v9024_v52  ;;  %7429 = vmatprep.subr.bf16.mxu0 %v9031_v54  ;;  %v9072_v52 = vcombine.low %v4026_v63, %v4030_v44  ;;  %v9079_v54 = vcombine.high %v4033_v47, %v4037_v48  ;;  %v4070_v35 = vld [vmem:[#allocation8 + $0x338] sm:$0xff]  ;;  %v4077_v42 = vld [vmem:[#allocation8 + $0x370] sm:$0xff] }
 0x3a7   :  { %7601 = vmatprep.subr.bf16.mxu1 %v9033_v39  ;;  %v9081_v39 = vcombine.high %v4034_v49, %v4038_v50  ;;  %v4074_v63 = vld [vmem:[#allocation8 + $0x358] sm:$0xff] }
 0x3a8   :  { %v4078_v44 = vld [vmem:[#allocation8 + $0x378] sm:$0xff] }
 0x3a9   :  { %7430 = vmatpush1.bf16.msra.mxu0 %v9030_v2  ;;  %v9078_v2 = vcombine.low %v4033_v47, %v4037_v48  ;;  %v4081_v47 = vld [vmem:[#allocation8 + $0x390] sm:$0xff] }
 0x3aa   :  { %7602 = vmatpush1.bf16.msra.mxu1 %v9032_v5  ;;  %7431 = vmatprep.subr.bf16.mxu0 %v9039_v8  ;;  %v9080_v5 = vcombine.low %v4034_v49, %v4038_v50  ;;  %v9087_v8 = vcombine.high %v4041_v55, %v4045_v60  ;;  %v4085_v48 = vld [vmem:[#allocation8 + $0x3b0] sm:$0xff]  ;;  %v4082_v49 = vld [vmem:[#allocation8 + $0x398] sm:$0xff] }
 0x3ab   :  { %7603 = vmatprep.subr.bf16.mxu1 %v9041_v16  ;;  %v9089_v16 = vcombine.high %v4042_v53, %v4046_v0  ;;  %v4086_v50 = vld [vmem:[#allocation8 + $0x3b8] sm:$0xff] }
 0x3ad   :  { %7432 = vmatpush1.bf16.msra.mxu0 %v9038_v13  ;;  %v9086_v13 = vcombine.low %v4041_v55, %v4045_v60  ;;  %v4089_v55 = vld [vmem:[#allocation8 + $0x3d0] sm:$0xff] }
 0x3ae   :  { %7604 = vmatpush1.bf16.msra.mxu1 %v9040_v14  ;;  %7433 = vmatprep.subr.bf16.mxu0 %v9047_v18  ;;  %v9088_v14 = vcombine.low %v4042_v53, %v4046_v0  ;;  %v9095_v18 = vcombine.high %v4049_v17, %v4053_v10  ;;  %v4093_v60 = vld [vmem:[#allocation8 + $0x3f0] sm:$0xff]  ;;  %v4090_v53 = vld [vmem:[#allocation8 + $0x3d8] sm:$0xff] }
 0x3af   :  { %7605 = vmatprep.subr.bf16.mxu1 %v9049_v19  ;;  %v9097_v19 = vcombine.high %v4050_v4, %v4054_v12  ;;  %v4094_v0 = vld [vmem:[#allocation8 + $0x3f8] sm:$0xff] }
 0x3b1   :  { %7434 = vmatpush1.bf16.msra.mxu0 %v9046_v29  ;;  %v9094_v29 = vcombine.low %v4049_v17, %v4053_v10  ;;  %v4097_v17 = vld [vmem:[#allocation8 + $0x410] sm:$0xff] }
 0x3b2   :  { %7606 = vmatpush1.bf16.msra.mxu1 %v9048_v31  ;;  %7435 = vmatprep.subr.bf16.mxu0 %v9055_v58  ;;  %v9096_v31 = vcombine.low %v4050_v4, %v4054_v12  ;;  %v9103_v58 = vcombine.high %v4057_v24, %v4061_v26  ;;  %v4101_v10 = vld [vmem:[#allocation8 + $0x430] sm:$0xff]  ;;  %v4098_v4 = vld [vmem:[#allocation8 + $0x418] sm:$0xff] }
 0x3b3   :  { %7607 = vmatprep.subr.bf16.mxu1 %v9057_v32  ;;  %v9105_v32 = vcombine.high %v4058_v27, %v4062_v28  ;;  %v4102_v12 = vld [vmem:[#allocation8 + $0x438] sm:$0xff] }
 0x3b5   :  { %7436 = vmatpush1.bf16.msra.mxu0 %v9054_v36  ;;  %v9102_v36 = vcombine.low %v4057_v24, %v4061_v26  ;;  %v4105_v24 = vld [vmem:[#allocation8 + $0x450] sm:$0xff] }
 0x3b6   :  { %7608 = vmatpush1.bf16.msra.mxu1 %v9056_v37  ;;  %7437 = vmatprep.subr.bf16.mxu0 %v9063_v38  ;;  %v9104_v37 = vcombine.low %v4058_v27, %v4062_v28  ;;  %v9111_v38 = vcombine.high %v4065_v33, %v4069_v34  ;;  %v4109_v26 = vld [vmem:[#allocation8 + $0x470] sm:$0xff]  ;;  %v9142_v27 = vcombine.low %v4097_v17, %v4101_v10  ;;  %v4106_v28 = vld [vmem:[#allocation8 + $0x458] sm:$0xff] }
 0x3b7   :  { %7609 = vmatprep.subr.bf16.mxu1 %v9065_v40  ;;  %v9113_v40 = vcombine.high %v4066_v15, %v4070_v35 }
 0x3b9   :  { %7438 = vmatpush1.bf16.msra.mxu0 %v9062_v45  ;;  %v9110_v45 = vcombine.low %v4065_v33, %v4069_v34  ;;  %v4117_v33 = vld [vmem:[#allocation8 + $0x4b0] sm:$0xff] }
 0x3ba   :  { %7610 = vmatpush1.bf16.msra.mxu1 %v9064_v30  ;;  %7439 = vmatprep.subr.bf16.mxu0 %v9071_v25  ;;  %v9112_v30 = vcombine.low %v4066_v15, %v4070_v35  ;;  %v9119_v25 = vcombine.high %v4073_v41, %v4077_v42  ;;  %v4114_v15 = vld [vmem:[#allocation8 + $0x498] sm:$0xff] }
 0x3bb   :  { %7611 = vmatprep.subr.bf16.mxu1 %v9073_v46  ;;  %v9121_v46 = vcombine.high %v4074_v63, %v4078_v44  ;;  %v4118_v35 = vld [vmem:[#allocation8 + $0x4b8] sm:$0xff] }
 0x3bd   :  { %7440 = vmatpush1.bf16.msra.mxu0 %v9070_v43  ;;  %v9118_v43 = vcombine.low %v4073_v41, %v4077_v42  ;;  %v4121_v41 = vld [vmem:[#allocation8 + $0x4d0] sm:$0xff] }
 0x3be   :  { %7612 = vmatpush1.bf16.msra.mxu1 %v9072_v52  ;;  %7441 = vmatprep.subr.bf16.mxu0 %v9079_v54  ;;  %v9120_v52 = vcombine.low %v4074_v63, %v4078_v44  ;;  %v9127_v54 = vcombine.high %v4081_v47, %v4085_v48  ;;  %v4125_v42 = vld [vmem:[#allocation8 + $0x4f0] sm:$0xff]  ;;  %v4122_v63 = vld [vmem:[#allocation8 + $0x4d8] sm:$0xff] }
 0x3bf   :  { %7613 = vmatprep.subr.bf16.mxu1 %v9081_v39  ;;  %v9129_v39 = vcombine.high %v4082_v49, %v4086_v50  ;;  %v4126_v44 = vld [vmem:[#allocation8 + $0x4f8] sm:$0xff] }
 0x3c1   :  { %7442 = vmatpush1.bf16.msra.mxu0 %v9078_v2  ;;  %v9126_v2 = vcombine.low %v4081_v47, %v4085_v48  ;;  %v4133_v47 = vld [vmem:[#allocation8 + $0x530] sm:$0xff]  ;;  %v4130_v48 = vld [vmem:[#allocation8 + $0x518] sm:$0xff] }
 0x3c2   :  { %7614 = vmatpush1.bf16.msra.mxu1 %v9080_v5  ;;  %7443 = vmatprep.subr.bf16.mxu0 %v9087_v8  ;;  %v9128_v5 = vcombine.low %v4082_v49, %v4086_v50  ;;  %v9135_v8 = vcombine.high %v4089_v55, %v4093_v60  ;;  %v4134_v49 = vld [vmem:[#allocation8 + $0x538] sm:$0xff]  ;;  %v9168_v50 = vcombine.low %v4122_v63, %v4126_v44 }
 0x3c3   :  { %7615 = vmatprep.subr.bf16.mxu1 %v9089_v16  ;;  %v9137_v16 = vcombine.high %v4090_v53, %v4094_v0 }
 0x3c5   :  { %7444 = vmatpush1.bf16.msra.mxu0 %v9086_v13  ;;  %v9134_v13 = vcombine.low %v4089_v55, %v4093_v60  ;;  %v4138_v55 = vld [vmem:[#allocation8 + $0x558] sm:$0xff] }
 0x3c6   :  { %7616 = vmatpush1.bf16.msra.mxu1 %v9088_v14  ;;  %7445 = vmatprep.subr.bf16.mxu0 %v9095_v18  ;;  %v9136_v14 = vcombine.low %v4090_v53, %v4094_v0  ;;  %v9143_v18 = vcombine.high %v4097_v17, %v4101_v10  ;;  %v4142_v60 = vld [vmem:[#allocation8 + $0x578] sm:$0xff]  ;;  %v9176_v0 = vcombine.low %v4130_v48, %v4134_v49 }
 0x3c7   :  { %7617 = vmatprep.subr.bf16.mxu1 %v9097_v19  ;;  %v9145_v19 = vcombine.high %v4098_v4, %v4102_v12  ;;  %v4146_v17 = vld [vmem:[#allocation8 + $0x598] sm:$0xff] }
 0x3c8   :  { %v4150_v10 = vld [vmem:[#allocation8 + $0x5b8] sm:$0xff] }
 0x3c9   :  { %7446 = vmatpush1.bf16.msra.mxu0 %v9094_v29  ;;  %v4110_v29 = vld [vmem:[#allocation8 + $0x478] sm:$0xff] }
 0x3ca   :  { %7618 = vmatpush1.bf16.msra.mxu1 %v9096_v31  ;;  %7447 = vmatprep.subr.bf16.mxu0 %v9103_v58  ;;  %v9144_v31 = vcombine.low %v4098_v4, %v4102_v12  ;;  %v9151_v58 = vcombine.high %v4105_v24, %v4109_v26  ;;  %v9153_v34 = vcombine.high %v4106_v28, %v4110_v29 }
 0x3cb   :  { %7619 = vmatprep.subr.bf16.mxu1 %v9105_v32  ;;  %v4113_v32 = vld [vmem:[#allocation8 + $0x490] sm:$0xff]  ;;  %v9184_v12 = vcombine.low %v4138_v55, %v4142_v60 }
 0x3cd   :  { %7448 = vmatpush1.bf16.msra.mxu0 %v9102_v36  ;;  %v9150_v36 = vcombine.low %v4105_v24, %v4109_v26  ;;  %v4154_v24 = vld [vmem:[#allocation8 + $0x5d8] sm:$0xff] }
 0x3ce   :  { %7620 = vmatpush1.bf16.msra.mxu1 %v9104_v37  ;;  %7449 = vmatprep.subr.bf16.mxu0 %v9111_v38  ;;  %v9152_v37 = vcombine.low %v4106_v28, %v4110_v29  ;;  %v9159_v38 = vcombine.high %v4113_v32, %v4117_v33  ;;  %v4158_v26 = vld [vmem:[#allocation8 + $0x5f8] sm:$0xff]  ;;  %v9192_v28 = vcombine.low %v4146_v17, %v4150_v10 }
 0x3cf   :  { %7621 = vmatprep.subr.bf16.mxu1 %v9113_v40  ;;  %v9161_v40 = vcombine.high %v4114_v15, %v4118_v35 }
 0x3d1   :  { %7450 = vmatpush1.bf16.msra.mxu0 %v9110_v45  ;;  %v9158_v45 = vcombine.low %v4113_v32, %v4117_v33  ;;  %v4165_v32 = vld [vmem:[#allocation8 + $0x630] sm:$0xff]  ;;  %v4162_v33 = vld [vmem:[#allocation8 + $0x618] sm:$0xff] }
 0x3d2   :  { %7622 = vmatpush1.bf16.msra.mxu1 %v9112_v30  ;;  %7451 = vmatprep.subr.bf16.mxu0 %v9119_v25  ;;  %v9167_v30 = vcombine.high %v4121_v41, %v4125_v42  ;;  %v9169_v25 = vcombine.high %v4122_v63, %v4126_v44 }
 0x3d3   :  { %7623 = vmatprep.subr.bf16.mxu1 %v9121_v46  ;;  %v4129_v46 = vld [vmem:[#allocation8 + $0x510] sm:$0xff] }
 0x3d4   :  { %v9174_v53 = vcombine.low %v4129_v46, %v4133_v47 }
 0x3d5   :  { %7452 = vmatpush1.bf16.msra.mxu0 %v9118_v43  ;;  %v9175_v43 = vcombine.high %v4129_v46, %v4133_v47  ;;  %v4178_v46 = vld [vmem:[#allocation8 + $0x698] sm:$0xff] }
 0x3d6   :  { %7624 = vmatpush1.bf16.msra.mxu1 %v9120_v52  ;;  %7453 = vmatprep.subr.bf16.mxu0 %v9127_v54  ;;  %v9177_v52 = vcombine.high %v4130_v48, %v4134_v49  ;;  %v4137_v54 = vld [vmem:[#allocation8 + $0x550] sm:$0xff]  ;;  %v4182_v47 = vld [vmem:[#allocation8 + $0x6b8] sm:$0xff] }
 0x3d7   :  { %7625 = vmatprep.subr.bf16.mxu1 %v9129_v39  ;;  %v4141_v39 = vld [vmem:[#allocation8 + $0x570] sm:$0xff] }
 0x3d8   :  { %v9182_v4 = vcombine.low %v4137_v54, %v4141_v39 }
 0x3d9   :  { %7454 = vmatpush1.bf16.msra.mxu0 %v9126_v2  ;;  %v9183_v2 = vcombine.high %v4137_v54, %v4141_v39  ;;  %v4186_v54 = vld [vmem:[#allocation8 + $0x6d8] sm:$0xff] }
 0x3da   :  { %7626 = vmatpush1.bf16.msra.mxu1 %v9128_v5  ;;  %7455 = vmatprep.subr.bf16.mxu0 %v9135_v8  ;;  %v9185_v5 = vcombine.high %v4138_v55, %v4142_v60  ;;  %v4145_v8 = vld [vmem:[#allocation8 + $0x590] sm:$0xff]  ;;  %v4190_v39 = vld [vmem:[#allocation8 + $0x6f8] sm:$0xff]  ;;  %v9224_v60 = vcombine.low %v4178_v46, %v4182_v47 }
 0x3db   :  { %7627 = vmatprep.subr.bf16.mxu1 %v9137_v16  ;;  %v4149_v16 = vld [vmem:[#allocation8 + $0x5b0] sm:$0xff] }
 0x3dd   :  { %7456 = vmatpush1.bf16.msra.mxu0 %v9134_v13  ;;  %v9191_v13 = vcombine.high %v4145_v8, %v4149_v16 }
 0x3de   :  { %7628 = vmatpush1.bf16.msra.mxu1 %v9136_v14  ;;  %7468 = vmatprep.subr.bf16.mxu0 %v9143_v18  ;;  %v9193_v14 = vcombine.high %v4146_v17, %v4150_v10  ;;  %v4153_v18 = vld [vmem:[#allocation8 + $0x5d0] sm:$0xff]  ;;  %v9232_v10 = vcombine.low %v4186_v54, %v4190_v39 }
 0x3df   :  { %7640 = vmatprep.subr.bf16.mxu1 %v9145_v19  ;;  %v4157_v19 = vld [vmem:[#allocation8 + $0x5f0] sm:$0xff] }
 0x3e0   :  { %7458 = vmatmul.mubr.bf16.vlgmr.msra.gmra.mrb[12].mxu0 %v10268_v62  ;;  %v9199_v29 = vcombine.high %v4153_v18, %v4157_v19 }
 0x3e1   :  { %7630 = vmatmul.mubr.bf16.vlgmr.msra.gmra.mrb[12].mxu1 %v10268_v62  ;;  %7469 = vmatpush1.bf16.msra.mxu0 %v9142_v27  ;;  %v9160_v62 = vcombine.low %v4114_v15, %v4118_v35  ;;  %v9190_v27 = vcombine.low %v4145_v8, %v4149_v16  ;;  %v9198_v15 = vcombine.low %v4153_v18, %v4157_v19  ;;  %v4194_v8 = vld [vmem:[#allocation8 + $0x718] sm:$0xff] }
 0x3e2   :  { %7500 = vmatprep.mubr.bf16.mxu0 %v10274_v11  ;;  %7641 = vmatpush1.bf16.msra.mxu1 %v9144_v31  ;;  %v9201_v31 = vcombine.high %v4154_v24, %v4158_v26  ;;  %v9200_v35 = vcombine.low %v4154_v24, %v4158_v26  ;;  %v4198_v16 = vld [vmem:[#allocation8 + $0x738] sm:$0xff] }
 0x3e3   :  { %7672 = vmatprep.mubr.bf16.mxu1 %v10274_v11  ;;  %7470 = vmatprep.subr.bf16.mxu0 %v9151_v58  ;;  %v9166_v11 = vcombine.low %v4121_v41, %v4125_v42  ;;  %v4161_v58 = vld [vmem:[#allocation8 + $0x610] sm:$0xff]  ;;  %v4170_v41 = vld [vmem:[#allocation8 + $0x658] sm:$0xff]  ;;  %v9240_v26 = vcombine.low %v4194_v8, %v4198_v16 }
 0x3e4   :  { %7642 = vmatprep.subr.bf16.mxu1 %v9153_v34  ;;  %v4166_v34 = vld [vmem:[#allocation8 + $0x638] sm:$0xff]  ;;  %v9206_v63 = vcombine.low %v4161_v58, %v4165_v32 }
 0x3e5   :  { %7471 = vmatpush1.bf16.msra.mxu0 %v9150_v36  ;;  %v9207_v36 = vcombine.high %v4161_v58, %v4165_v32  ;;  %v4174_v42 = vld [vmem:[#allocation8 + $0x678] sm:$0xff]  ;;  %v9208_v44 = vcombine.low %v4162_v33, %v4166_v34 }
 0x3e6   :  { %7643 = vmatpush1.bf16.msra.mxu1 %v9152_v37  ;;  %7472 = vmatprep.subr.bf16.mxu0 %v9159_v38  ;;  %v9209_v37 = vcombine.high %v4162_v33, %v4166_v34  ;;  %v4169_v38 = vld [vmem:[#allocation8 + $0x650] sm:$0xff]  ;;  %v9216_v49 = vcombine.low %v4170_v41, %v4174_v42  ;;  %v4202_v18 = vld [vmem:[#allocation8 + $0x758] sm:$0xff] }
 0x3e7   :  { %7644 = vmatprep.subr.bf16.mxu1 %v9161_v40  ;;  %v4173_v40 = vld [vmem:[#allocation8 + $0x670] sm:$0xff]  ;;  %v4206_v19 = vld [vmem:[#allocation8 + $0x778] sm:$0xff] }
 0x3e8   :  { %v9214_v48 = vcombine.low %v4169_v38, %v4173_v40  ;;  %v4210_v58 = vld [vmem:[#allocation8 + $0x798] sm:$0xff]  ;;  %v9248_v34 = vcombine.low %v4202_v18, %v4206_v19 }
 0x3e9   :  { %7473 = vmatpush1.bf16.msra.mxu0 %v9158_v45  ;;  %v9215_v45 = vcombine.high %v4169_v38, %v4173_v40  ;;  %v4214_v32 = vld [vmem:[#allocation8 + $0x7b8] sm:$0xff] }
 0x3ea   :  { %7645 = vmatpush1.bf16.msra.mxu1 %v9160_v62  ;;  %7474 = vmatprep.subr.bf16.mxu0 %v9167_v30  ;;  %v9217_v62 = vcombine.high %v4170_v41, %v4174_v42  ;;  %v4177_v30 = vld [vmem:[#allocation8 + $0x690] sm:$0xff]  ;;  %v4218_v38 = vld [vmem:[#allocation8 + $0x7d8] sm:$0xff]  ;;  %v9256_v42 = vcombine.low %v4210_v58, %v4214_v32 }
 0x3eb   :  { %7646 = vmatprep.subr.bf16.mxu1 %v9169_v25  ;;  %v4181_v25 = vld [vmem:[#allocation8 + $0x6b0] sm:$0xff]  ;;  %v4222_v40 = vld [vmem:[#allocation8 + $0x7f8] sm:$0xff] }
 0x3ec   :  { %v9222_v55 = vcombine.low %v4177_v30, %v4181_v25 }
 0x3ed   :  { %7475 = vmatpush1.bf16.msra.mxu0 %v9166_v11  ;;  %v9223_v11 = vcombine.high %v4177_v30, %v4181_v25  ;;  %v4226_v30 = vld [vmem:[#allocation8 + $0x818] sm:$0xff] }
 0x3ee   :  { %7647 = vmatpush1.bf16.msra.mxu1 %v9168_v50  ;;  %7476 = vmatprep.subr.bf16.mxu0 %v9175_v43  ;;  %v9225_v50 = vcombine.high %v4178_v46, %v4182_v47  ;;  %v4185_v43 = vld [vmem:[#allocation8 + $0x6d0] sm:$0xff]  ;;  %v4230_v25 = vld [vmem:[#allocation8 + $0x838] sm:$0xff]  ;;  %v9264_v47 = vcombine.low %v4218_v38, %v4222_v40 }
 0x3ef   :  { %7648 = vmatprep.subr.bf16.mxu1 %v9177_v52  ;;  %v4189_v52 = vld [vmem:[#allocation8 + $0x6f0] sm:$0xff] }
 0x3f0   :  { %v9230_v17 = vcombine.low %v4185_v43, %v4189_v52 }
 0x3f1   :  { %7477 = vmatpush1.bf16.msra.mxu0 %v9174_v53  ;;  %v9231_v53 = vcombine.high %v4185_v43, %v4189_v52  ;;  %v4234_v52 = vld [vmem:[#allocation8 + $0x858] sm:$0xff] }
 0x3f2   :  { %7649 = vmatpush1.bf16.msra.mxu1 %v9176_v0  ;;  %7478 = vmatprep.subr.bf16.mxu0 %v9183_v2  ;;  %v9233_v0 = vcombine.high %v4186_v54, %v4190_v39  ;;  %v4193_v2 = vld [vmem:[#allocation8 + $0x710] sm:$0xff]  ;;  %v4238_v54 = vld [vmem:[#allocation8 + $0x878] sm:$0xff]  ;;  %v9272_v39 = vcombine.low %v4226_v30, %v4230_v25 }
 0x3f3   :  { %7650 = vmatprep.subr.bf16.mxu1 %v9185_v5  ;;  %v4197_v5 = vld [vmem:[#allocation8 + $0x730] sm:$0xff] }
 0x3f4   :  { %v9238_v24 = vcombine.low %v4193_v2, %v4197_v5 }
 0x3f5   :  { %7479 = vmatpush1.bf16.msra.mxu0 %v9182_v4  ;;  %v9239_v4 = vcombine.high %v4193_v2, %v4197_v5  ;;  %v4242_v2 = vld [vmem:[#allocation8 + $0x898] sm:$0xff] }
 0x3f6   :  { %7651 = vmatpush1.bf16.msra.mxu1 %v9184_v12  ;;  %7480 = vmatprep.subr.bf16.mxu0 %v9191_v13  ;;  %v9241_v12 = vcombine.high %v4194_v8, %v4198_v16  ;;  %v4201_v13 = vld [vmem:[#allocation8 + $0x750] sm:$0xff]  ;;  %v4246_v5 = vld [vmem:[#allocation8 + $0x8b8] sm:$0xff]  ;;  %v9280_v16 = vcombine.low %v4234_v52, %v4238_v54 }
 0x3f7   :  { %7652 = vmatprep.subr.bf16.mxu1 %v9193_v14  ;;  %v4205_v14 = vld [vmem:[#allocation8 + $0x770] sm:$0xff] }
 0x3f8   :  { %v9246_v33 = vcombine.low %v4201_v13, %v4205_v14 }
 0x3f9   :  { %7481 = vmatpush1.bf16.msra.mxu0 %v9190_v27  ;;  %v9247_v27 = vcombine.high %v4201_v13, %v4205_v14  ;;  %v4250_v13 = vld [vmem:[#allocation8 + $0x8d8] sm:$0xff] }
 0x3fa   :  { %7653 = vmatpush1.bf16.msra.mxu1 %v9192_v28  ;;  %7482 = vmatprep.subr.bf16.mxu0 %v9199_v29  ;;  %v9249_v28 = vcombine.high %v4202_v18, %v4206_v19  ;;  %v4209_v29 = vld [vmem:[#allocation8 + $0x790] sm:$0xff]  ;;  %v4254_v14 = vld [vmem:[#allocation8 + $0x8f8] sm:$0xff] }
 0x3fb   :  { %7654 = vmatprep.subr.bf16.mxu1 %v9201_v31  ;;  %v4213_v31 = vld [vmem:[#allocation8 + $0x7b0] sm:$0xff] }
 0x3fc   :  { %v9254_v41 = vcombine.low %v4209_v29, %v4213_v31 }
 0x3fd   :  { %7483 = vmatpush1.bf16.msra.mxu0 %v9198_v15  ;;  %v9255_v15 = vcombine.high %v4209_v29, %v4213_v31  ;;  %v4262_v29 = vld [vmem:[#allocation8 + $0x938] sm:$0xff]  ;;  %v9296_v31 = vcombine.low %v4250_v13, %v4254_v14 }
 0x3fe   :  { %7655 = vmatpush1.bf16.msra.mxu1 %v9200_v35  ;;  %7484 = vmatprep.subr.bf16.mxu0 %v9207_v36  ;;  %v9257_v35 = vcombine.high %v4210_v58, %v4214_v32  ;;  %v4217_v36 = vld [vmem:[#allocation8 + $0x7d0] sm:$0xff] }
 0x3ff   :  { %7656 = vmatprep.subr.bf16.mxu1 %v9209_v37  ;;  %v4221_v37 = vld [vmem:[#allocation8 + $0x7f0] sm:$0xff] }
 0x400   :  { %v9262_v46 = vcombine.low %v4217_v36, %v4221_v37 }
 0x401   :  { %7485 = vmatpush1.bf16.msra.mxu0 %v9206_v63  ;;  %v9263_v63 = vcombine.high %v4217_v36, %v4221_v37 }
 0x402   :  { %7657 = vmatpush1.bf16.msra.mxu1 %v9208_v44  ;;  %7486 = vmatprep.subr.bf16.mxu0 %v9215_v45  ;;  %v9265_v44 = vcombine.high %v4218_v38, %v4222_v40  ;;  %v4225_v45 = vld [vmem:[#allocation8 + $0x810] sm:$0xff] }
 0x403   :  { %7658 = vmatprep.subr.bf16.mxu1 %v9217_v62  ;;  %v4229_v62 = vld [vmem:[#allocation8 + $0x830] sm:$0xff] }
 0x404   :  { %v9270_v43 = vcombine.low %v4225_v45, %v4229_v62 }
 0x405   :  { %7487 = vmatpush1.bf16.msra.mxu0 %v9214_v48  ;;  %v9271_v48 = vcombine.high %v4225_v45, %v4229_v62 }
 0x406   :  { %7659 = vmatpush1.bf16.msra.mxu1 %v9216_v49  ;;  %7488 = vmatprep.subr.bf16.mxu0 %v9223_v11  ;;  %v9273_v49 = vcombine.high %v4226_v30, %v4230_v25  ;;  %v4233_v11 = vld [vmem:[#allocation8 + $0x850] sm:$0xff] }
 0x407   :  { %7660 = vmatprep.subr.bf16.mxu1 %v9225_v50  ;;  %v4237_v50 = vld [vmem:[#allocation8 + $0x870] sm:$0xff] }
 0x408   :  { %v9278_v8 = vcombine.low %v4233_v11, %v4237_v50 }
 0x409   :  { %7489 = vmatpush1.bf16.msra.mxu0 %v9222_v55  ;;  %v9279_v55 = vcombine.high %v4233_v11, %v4237_v50 }
 0x40a   :  { %7661 = vmatpush1.bf16.msra.mxu1 %v9224_v60  ;;  %7490 = vmatprep.subr.bf16.mxu0 %v9231_v53  ;;  %v4241_v60 = vld [vmem:[#allocation8 + $0x890] sm:$0xff] }
 0x40b   :  { %7662 = vmatprep.subr.bf16.mxu1 %v9233_v0  ;;  %v4245_v53 = vld [vmem:[#allocation8 + $0x8b0] sm:$0xff]  ;;  %v9281_v0 = vcombine.high %v4234_v52, %v4238_v54 }
 0x40c   :  { %v9286_v18 = vcombine.low %v4241_v60, %v4245_v53  ;;  %v4289_v54 = vld [vmem:[#allocation8 + $0xa10] sm:$0xff] }
 0x40d   :  { %7491 = vmatpush1.bf16.msra.mxu0 %v9230_v17  ;;  %v9287_v17 = vcombine.high %v4241_v60, %v4245_v53  ;;  %v4294_v60 = vld [vmem:[#allocation8 + $0xa38] sm:$0xff] }
 0x40e   :  { %7663 = vmatpush1.bf16.msra.mxu1 %v9232_v10  ;;  %7492 = vmatprep.subr.bf16.mxu0 %v9239_v4  ;;  %v9289_v10 = vcombine.high %v4242_v2, %v4246_v5  ;;  %v4249_v4 = vld [vmem:[#allocation8 + $0x8d0] sm:$0xff] }
 0x40f   :  { %7664 = vmatprep.subr.bf16.mxu1 %v9241_v12  ;;  %v4253_v12 = vld [vmem:[#allocation8 + $0x8f0] sm:$0xff] }
 0x410   :  { %v9295_v19 = vcombine.high %v4249_v4, %v4253_v12 }
 0x411   :  { %7493 = vmatpush1.bf16.msra.mxu0 %v9238_v24  ;;  %v9297_v24 = vcombine.high %v4250_v13, %v4254_v14 }
 0x412   :  { %7665 = vmatpush1.bf16.msra.mxu1 %v9240_v26  ;;  %7494 = vmatprep.subr.bf16.mxu0 %v9247_v27  ;;  %v4257_v26 = vld [vmem:[#allocation8 + $0x910] sm:$0xff] }
 0x413   :  { %7666 = vmatprep.subr.bf16.mxu1 %v9249_v28  ;;  %v4261_v27 = vld [vmem:[#allocation8 + $0x930] sm:$0xff]  ;;  %v4258_v28 = vld [vmem:[#allocation8 + $0x918] sm:$0xff] }
 0x414   :  { %v9303_v58 = vcombine.high %v4257_v26, %v4261_v27  ;;  %v9305_v32 = vcombine.high %v4258_v28, %v4262_v29  ;;  %v9302_v36 = vcombine.low %v4257_v26, %v4261_v27  ;;  %v9304_v37 = vcombine.low %v4258_v28, %v4262_v29 }
 0x415   :  { %7495 = vmatpush1.bf16.msra.mxu0 %v9246_v33  ;;  %v4265_v33 = vld [vmem:[#allocation8 + $0x950] sm:$0xff] }
 0x416   :  { %7667 = vmatpush1.bf16.msra.mxu1 %v9248_v34  ;;  %7496 = vmatprep.subr.bf16.mxu0 %v9255_v15  ;;  %v4269_v34 = vld [vmem:[#allocation8 + $0x970] sm:$0xff]  ;;  %v4266_v15 = vld [vmem:[#allocation8 + $0x958] sm:$0xff] }
 0x417   :  { %7668 = vmatprep.subr.bf16.mxu1 %v9257_v35  ;;  %v4270_v35 = vld [vmem:[#allocation8 + $0x978] sm:$0xff]  ;;  %v9311_v38 = vcombine.high %v4265_v33, %v4269_v34  ;;  %v9310_v45 = vcombine.low %v4265_v33, %v4269_v34 }
 0x418   :  { %v9313_v40 = vcombine.high %v4266_v15, %v4270_v35  ;;  %v9312_v62 = vcombine.low %v4266_v15, %v4270_v35 }
 0x419   :  { %7497 = vmatpush1.bf16.msra.mxu0 %v9254_v41  ;;  %v4273_v41 = vld [vmem:[#allocation8 + $0x990] sm:$0xff] }
 0x41a   :  { %7669 = vmatpush1.bf16.msra.mxu1 %v9256_v42  ;;  %7498 = vmatprep.subr.bf16.mxu0 %v9263_v63  ;;  %v4277_v42 = vld [vmem:[#allocation8 + $0x9b0] sm:$0xff]  ;;  %v4274_v63 = vld [vmem:[#allocation8 + $0x998] sm:$0xff] }
 0x41b   :  { %7670 = vmatprep.subr.bf16.mxu1 %v9265_v44  ;;  %v4278_v44 = vld [vmem:[#allocation8 + $0x9b8] sm:$0xff]  ;;  %v9319_v30 = vcombine.high %v4273_v41, %v4277_v42  ;;  %v9318_v11 = vcombine.low %v4273_v41, %v4277_v42 }
 0x41c   :  { %v9321_v25 = vcombine.high %v4274_v63, %v4278_v44  ;;  %v9320_v50 = vcombine.low %v4274_v63, %v4278_v44 }
 0x41d   :  { %7499 = vmatpush1.bf16.msra.mxu0 %v9262_v46  ;;  %v4281_v46 = vld [vmem:[#allocation8 + $0x9d0] sm:$0xff] }
 0x41e   :  { %7671 = vmatpush1.bf16.msra.mxu1 %v9264_v47  ;;  %7511 = vmatprep.subr.bf16.mxu0 %v9271_v48  ;;  %v4285_v47 = vld [vmem:[#allocation8 + $0x9f0] sm:$0xff]  ;;  %v4282_v48 = vld [vmem:[#allocation8 + $0x9d8] sm:$0xff] }
 0x41f   :  { %7683 = vmatprep.subr.bf16.mxu1 %v9273_v49  ;;  %v4286_v49 = vld [vmem:[#allocation8 + $0x9f8] sm:$0xff]  ;;  %v9326_v53 = vcombine.low %v4281_v46, %v4285_v47 }
 0x420   :  { %7501 = vmatmul.mubr.bf16.vlgmr.msra.gmra.mrb[12].mxu0 %v10270_v3  ;;  %v9329_v52 = vcombine.high %v4282_v48, %v4286_v49 }
 0x421   :  { %7673 = vmatmul.mubr.bf16.vlgmr.msra.gmra.mrb[12].mxu1 %v10270_v3  ;;  %7512 = vmatpush1.bf16.msra.mxu0 %v9270_v43  ;;  %v9288_v3 = vcombine.low %v4242_v2, %v4246_v5  ;;  %v9327_v43 = vcombine.high %v4281_v46, %v4285_v47 }
 0x422   :  { %7543 = vmatprep.mubr.bf16.mxu0 %v10314_v59  ;;  %7684 = vmatpush1.bf16.msra.mxu1 %v9272_v39  ;;  %v4293_v39 = vld [vmem:[#allocation8 + $0xa30] sm:$0xff] }
 0x423   :  { %7715 = vmatprep.mubr.bf16.mxu1 %v10314_v59  ;;  %7513 = vmatprep.subr.bf16.mxu0 %v9279_v55  ;;  %v9294_v59 = vcombine.low %v4249_v4, %v4253_v12  ;;  %v4290_v55 = vld [vmem:[#allocation8 + $0xa18] sm:$0xff]  ;;  %v9335_v2 = vcombine.high %v4289_v54, %v4293_v39  ;;  %v9334_v4 = vcombine.low %v4289_v54, %v4293_v39 }
 0x424   :  { %7685 = vmatprep.subr.bf16.mxu1 %v9281_v0  ;;  %v9328_v0 = vcombine.low %v4282_v48, %v4286_v49  ;;  %v9337_v5 = vcombine.high %v4290_v55, %v4294_v60  ;;  %v9336_v12 = vcombine.low %v4290_v55, %v4294_v60 }
 0x425   :  { %7514 = vmatpush1.bf16.msra.mxu0 %v9278_v8  ;;  %v4297_v8 = vld [vmem:[#allocation8 + $0xa50] sm:$0xff] }
 0x426   :  { %7686 = vmatpush1.bf16.msra.mxu1 %v9280_v16  ;;  %7515 = vmatprep.subr.bf16.mxu0 %v9287_v17  ;;  %v4301_v16 = vld [vmem:[#allocation8 + $0xa70] sm:$0xff]  ;;  %v4298_v17 = vld [vmem:[#allocation8 + $0xa58] sm:$0xff] }
 0x427   :  { %7687 = vmatprep.subr.bf16.mxu1 %v9289_v10  ;;  %v4302_v10 = vld [vmem:[#allocation8 + $0xa78] sm:$0xff]  ;;  %v9343_v13 = vcombine.high %v4297_v8, %v4301_v16  ;;  %v9342_v26 = vcombine.low %v4297_v8, %v4301_v16 }
 0x428   :  { %v9345_v14 = vcombine.high %v4298_v17, %v4302_v10  ;;  %v9344_v27 = vcombine.low %v4298_v17, %v4302_v10 }
 0x429   :  { %7516 = vmatpush1.bf16.msra.mxu0 %v9286_v18  ;;  %v4305_v18 = vld [vmem:[#allocation8 + $0xa90] sm:$0xff] }
 0x42a   :  { %7688 = vmatpush1.bf16.msra.mxu1 %v9288_v3  ;;  %7517 = vmatprep.subr.bf16.mxu0 %v9295_v19  ;;  %v4309_v3 = vld [vmem:[#allocation8 + $0xab0] sm:$0xff]  ;;  %v4306_v19 = vld [vmem:[#allocation8 + $0xa98] sm:$0xff] }
 0x42b   :  { %7689 = vmatprep.subr.bf16.mxu1 %v9297_v24  ;;  %v4310_v24 = vld [vmem:[#allocation8 + $0xab8] sm:$0xff]  ;;  %v9351_v28 = vcombine.high %v4305_v18, %v4309_v3  ;;  %v9350_v33 = vcombine.low %v4305_v18, %v4309_v3 }
 0x42c   :  { %v9353_v29 = vcombine.high %v4306_v19, %v4310_v24  ;;  %v9352_v34 = vcombine.low %v4306_v19, %v4310_v24 }
 0x42d   :  { %7518 = vmatpush1.bf16.msra.mxu0 %v9294_v59  ;;  %v4313_v59 = vld [vmem:[#allocation8 + $0xad0] sm:$0xff] }
 0x42e   :  { %7690 = vmatpush1.bf16.msra.mxu1 %v9296_v31  ;;  %7519 = vmatprep.subr.bf16.mxu0 %v9303_v58  ;;  %v4317_v31 = vld [vmem:[#allocation8 + $0xaf0] sm:$0xff]  ;;  %v4314_v58 = vld [vmem:[#allocation8 + $0xad8] sm:$0xff] }
 0x42f   :  { %7691 = vmatprep.subr.bf16.mxu1 %v9305_v32  ;;  %v4318_v32 = vld [vmem:[#allocation8 + $0xaf8] sm:$0xff]  ;;  %v9359_v15 = vcombine.high %v4313_v59, %v4317_v31  ;;  %v9358_v41 = vcombine.low %v4313_v59, %v4317_v31 }
 0x430   :  { %v9361_v35 = vcombine.high %v4314_v58, %v4318_v32  ;;  %v9360_v42 = vcombine.low %v4314_v58, %v4318_v32  ;;  %v4366_v59 = vld [vmem:[#allocation8 + $0xc78] sm:$0xff]  ;;  %v4369_v32 = vld [vmem:[#allocation8 + $0xc90] sm:$0xff] }
 0x431   :  { %7520 = vmatpush1.bf16.msra.mxu0 %v9302_v36  ;;  %v4321_v36 = vld [vmem:[#allocation8 + $0xb10] sm:$0xff] }
 0x432   :  { %7692 = vmatpush1.bf16.msra.mxu1 %v9304_v37  ;;  %7521 = vmatprep.subr.bf16.mxu0 %v9311_v38  ;;  %v4325_v37 = vld [vmem:[#allocation8 + $0xb30] sm:$0xff]  ;;  %v4322_v38 = vld [vmem:[#allocation8 + $0xb18] sm:$0xff] }
 0x433   :  { %7693 = vmatprep.subr.bf16.mxu1 %v9313_v40  ;;  %v4326_v40 = vld [vmem:[#allocation8 + $0xb38] sm:$0xff]  ;;  %v9367_v63 = vcombine.high %v4321_v36, %v4325_v37  ;;  %v9366_v46 = vcombine.low %v4321_v36, %v4325_v37 }
 0x434   :  { %v9369_v44 = vcombine.high %v4322_v38, %v4326_v40  ;;  %v9368_v47 = vcombine.low %v4322_v38, %v4326_v40 }
 0x435   :  { %7522 = vmatpush1.bf16.msra.mxu0 %v9310_v45  ;;  %v4329_v45 = vld [vmem:[#allocation8 + $0xb50] sm:$0xff] }
 0x436   :  { %7694 = vmatpush1.bf16.msra.mxu1 %v9312_v62  ;;  %7523 = vmatprep.subr.bf16.mxu0 %v9319_v30  ;;  %v4333_v62 = vld [vmem:[#allocation8 + $0xb70] sm:$0xff]  ;;  %v4330_v30 = vld [vmem:[#allocation8 + $0xb58] sm:$0xff] }
 0x437   :  { %7695 = vmatprep.subr.bf16.mxu1 %v9321_v25  ;;  %v4334_v25 = vld [vmem:[#allocation8 + $0xb78] sm:$0xff]  ;;  %v9375_v48 = vcombine.high %v4329_v45, %v4333_v62  ;;  %v9374_v54 = vcombine.low %v4329_v45, %v4333_v62 }
 0x438   :  { %v9377_v49 = vcombine.high %v4330_v30, %v4334_v25  ;;  %v9376_v39 = vcombine.low %v4330_v30, %v4334_v25  ;;  %v4385_v25 = vld [vmem:[#allocation8 + $0xd10] sm:$0xff] }
 0x439   :  { %7524 = vmatpush1.bf16.msra.mxu0 %v9318_v11  ;;  %v4337_v11 = vld [vmem:[#allocation8 + $0xb90] sm:$0xff] }
 0x43a   :  { %7696 = vmatpush1.bf16.msra.mxu1 %v9320_v50  ;;  %7525 = vmatprep.subr.bf16.mxu0 %v9327_v43  ;;  %v4341_v50 = vld [vmem:[#allocation8 + $0xbb0] sm:$0xff]  ;;  %v4338_v43 = vld [vmem:[#allocation8 + $0xb98] sm:$0xff] }
 0x43b   :  { %7697 = vmatprep.subr.bf16.mxu1 %v9329_v52  ;;  %v4342_v52 = vld [vmem:[#allocation8 + $0xbb8] sm:$0xff]  ;;  %v9383_v55 = vcombine.high %v4337_v11, %v4341_v50  ;;  %v9382_v8 = vcombine.low %v4337_v11, %v4341_v50 }
 0x43c   :  { %v9385_v60 = vcombine.high %v4338_v43, %v4342_v52  ;;  %v9384_v16 = vcombine.low %v4338_v43, %v4342_v52  ;;  %v4393_v43 = vld [vmem:[#allocation8 + $0xd50] sm:$0xff] }
 0x43d   :  { %7526 = vmatpush1.bf16.msra.mxu0 %v9326_v53  ;;  %v4345_v53 = vld [vmem:[#allocation8 + $0xbd0] sm:$0xff] }
 0x43e   :  { %7698 = vmatpush1.bf16.msra.mxu1 %v9328_v0  ;;  %7527 = vmatprep.subr.bf16.mxu0 %v9335_v2  ;;  %v4349_v0 = vld [vmem:[#allocation8 + $0xbf0] sm:$0xff]  ;;  %v4346_v2 = vld [vmem:[#allocation8 + $0xbd8] sm:$0xff] }
 0x43f   :  { %7699 = vmatprep.subr.bf16.mxu1 %v9337_v5  ;;  %v4350_v5 = vld [vmem:[#allocation8 + $0xbf8] sm:$0xff]  ;;  %v9391_v17 = vcombine.high %v4345_v53, %v4349_v0  ;;  %v9390_v18 = vcombine.low %v4345_v53, %v4349_v0  ;;  %v4397_v52 = vld [vmem:[#allocation8 + $0xd70] sm:$0xff] }
 0x440   :  { %v9393_v10 = vcombine.high %v4346_v2, %v4350_v5  ;;  %v9392_v3 = vcombine.low %v4346_v2, %v4350_v5  ;;  %v9439_v0 = vcombine.high %v4393_v43, %v4397_v52  ;;  %v4401_v5 = vld [vmem:[#allocation8 + $0xd90] sm:$0xff] }
 0x441   :  { %7528 = vmatpush1.bf16.msra.mxu0 %v9334_v4  ;;  %v4353_v4 = vld [vmem:[#allocation8 + $0xc10] sm:$0xff] }
 0x442   :  { %7700 = vmatpush1.bf16.msra.mxu1 %v9336_v12  ;;  %7529 = vmatprep.subr.bf16.mxu0 %v9343_v13  ;;  %v4357_v12 = vld [vmem:[#allocation8 + $0xc30] sm:$0xff]  ;;  %v4354_v13 = vld [vmem:[#allocation8 + $0xc18] sm:$0xff] }
 0x443   :  { %7701 = vmatprep.subr.bf16.mxu1 %v9345_v14  ;;  %v4358_v14 = vld [vmem:[#allocation8 + $0xc38] sm:$0xff]  ;;  %v9399_v19 = vcombine.high %v4353_v4, %v4357_v12 }
 0x444   :  { %v9401_v24 = vcombine.high %v4354_v13, %v4358_v14  ;;  %v9400_v31 = vcombine.low %v4354_v13, %v4358_v14  ;;  %v9438_v14 = vcombine.low %v4393_v43, %v4397_v52 }
 0x445   :  { %7530 = vmatpush1.bf16.msra.mxu0 %v9342_v26  ;;  %v4361_v26 = vld [vmem:[#allocation8 + $0xc50] sm:$0xff] }
 0x446   :  { %7702 = vmatpush1.bf16.msra.mxu1 %v9344_v27  ;;  %7531 = vmatprep.subr.bf16.mxu0 %v9351_v28  ;;  %v4365_v27 = vld [vmem:[#allocation8 + $0xc70] sm:$0xff]  ;;  %v9398_v28 = vcombine.low %v4353_v4, %v4357_v12  ;;  %v4406_v4 = vld [vmem:[#allocation8 + $0xdb8] sm:$0xff] }
 0x447   :  { %7703 = vmatprep.subr.bf16.mxu1 %v9353_v29  ;;  %v4362_v29 = vld [vmem:[#allocation8 + $0xc58] sm:$0xff]  ;;  %v9407_v58 = vcombine.high %v4361_v26, %v4365_v27  ;;  %v9406_v36 = vcombine.low %v4361_v26, %v4365_v27 }
 0x448   :  { %v9408_v37 = vcombine.low %v4362_v29, %v4366_v59 }
 0x449   :  { %7532 = vmatpush1.bf16.msra.mxu0 %v9350_v33  ;;  %v4373_v33 = vld [vmem:[#allocation8 + $0xcb0] sm:$0xff] }
 0x44a   :  { %7704 = vmatpush1.bf16.msra.mxu1 %v9352_v34  ;;  %7533 = vmatprep.subr.bf16.mxu0 %v9359_v15  ;;  %v9409_v34 = vcombine.high %v4362_v29, %v4366_v59  ;;  %v4370_v15 = vld [vmem:[#allocation8 + $0xc98] sm:$0xff]  ;;  %v9415_v38 = vcombine.high %v4369_v32, %v4373_v33  ;;  %v9414_v45 = vcombine.low %v4369_v32, %v4373_v33 }
 0x44b   :  { %7705 = vmatprep.subr.bf16.mxu1 %v9361_v35  ;;  %v4374_v35 = vld [vmem:[#allocation8 + $0xcb8] sm:$0xff] }
 0x44c   :  { %v9417_v40 = vcombine.high %v4370_v15, %v4374_v35 }
 0x44d   :  { %7534 = vmatpush1.bf16.msra.mxu0 %v9358_v41  ;;  %v4377_v41 = vld [vmem:[#allocation8 + $0xcd0] sm:$0xff] }
 0x44e   :  { %7706 = vmatpush1.bf16.msra.mxu1 %v9360_v42  ;;  %7535 = vmatprep.subr.bf16.mxu0 %v9367_v63  ;;  %v4381_v42 = vld [vmem:[#allocation8 + $0xcf0] sm:$0xff]  ;;  %v4378_v63 = vld [vmem:[#allocation8 + $0xcd8] sm:$0xff] }
 0x44f   :  { %7707 = vmatprep.subr.bf16.mxu1 %v9369_v44  ;;  %v4382_v44 = vld [vmem:[#allocation8 + $0xcf8] sm:$0xff]  ;;  %v9423_v62 = vcombine.high %v4377_v41, %v4381_v42 }
 0x450   :  { %v9425_v30 = vcombine.high %v4378_v63, %v4382_v44 }
 0x451   :  { %7536 = vmatpush1.bf16.msra.mxu0 %v9366_v46  ;;  %v4389_v46 = vld [vmem:[#allocation8 + $0xd30] sm:$0xff] }
 0x452   :  { %7708 = vmatpush1.bf16.msra.mxu1 %v9368_v47  ;;  %7537 = vmatprep.subr.bf16.mxu0 %v9375_v48  ;;  %v4386_v47 = vld [vmem:[#allocation8 + $0xd18] sm:$0xff]  ;;  %v9431_v11 = vcombine.high %v4385_v25, %v4389_v46 }
 0x453   :  { %7709 = vmatprep.subr.bf16.mxu1 %v9377_v49  ;;  %v4390_v48 = vld [vmem:[#allocation8 + $0xd38] sm:$0xff]  ;;  %v9424_v49 = vcombine.low %v4378_v63, %v4382_v44 }
 0x454   :  { %v9433_v50 = vcombine.high %v4386_v47, %v4390_v48  ;;  %v9432_v53 = vcombine.low %v4386_v47, %v4390_v48  ;;  %v4418_v48 = vld [vmem:[#allocation8 + $0xe18] sm:$0xff] }
 0x455   :  { %7538 = vmatpush1.bf16.msra.mxu0 %v9374_v54  ;;  %v4394_v54 = vld [vmem:[#allocation8 + $0xd58] sm:$0xff] }
 0x456   :  { %7710 = vmatpush1.bf16.msra.mxu1 %v9376_v39  ;;  %7539 = vmatprep.subr.bf16.mxu0 %v9383_v55  ;;  %v4398_v39 = vld [vmem:[#allocation8 + $0xd78] sm:$0xff]  ;;  %v9430_v55 = vcombine.low %v4385_v25, %v4389_v46 }
 0x457   :  { %7711 = vmatprep.subr.bf16.mxu1 %v9385_v60  ;;  %v10344_v60 = vld [vmem:[#allocation10] sm:$0xff]  ;;  %v9441_v2 = vcombine.high %v4394_v54, %v4398_v39 }
 0x458   :  { %v4488_v12 = vrot.slane %v10344_v60, %v661_v7  ;;  %v4496_v13 = vrot.slane %v10344_v60, %v669_v9 }
 0x459   :  { %7540 = vmatpush1.bf16.msra.mxu0 %v9382_v8  ;;  %v4405_v8 = vld [vmem:[#allocation8 + $0xdb0] sm:$0xff] }
 0x45a   :  { %7712 = vmatpush1.bf16.msra.mxu1 %v9384_v16  ;;  %7541 = vmatprep.subr.bf16.mxu0 %v9391_v17  ;;  %v4484_v16 = vrot.slane %v10344_v60, %v657_v1  ;;  %v4492_v17 = vrot.slane %v10344_v60, %v665_v6  ;;  %v9447_v1 = vcombine.high %v4401_v5, %v4405_v8 }
 0x45b   :  { %7713 = vmatprep.subr.bf16.mxu1 %v9393_v10  ;;  %v4402_v10 = vld [vmem:[#allocation8 + $0xd98] sm:$0xff]  ;;  %v9446_v7 = vcombine.low %v4401_v5, %v4405_v8  ;;  %v4429_v5 = vld [vmem:[#allocation8 + $0xe70] sm:$0xff] }
 0x45c   :  { %v9449_v26 = vcombine.high %v4402_v10, %v4406_v4  ;;  %v4426_v8 = vld [vmem:[#allocation8 + $0xe58] sm:$0xff] }
 0x45d   :  { %7542 = vmatpush1.bf16.msra.mxu0 %v9390_v18  ;;  %v9440_v18 = vcombine.low %v4394_v54, %v4398_v39 }
 0x45e   :  { %7714 = vmatpush1.bf16.msra.mxu1 %v9392_v3  ;;  %7554 = vmatprep.subr.bf16.mxu0 %v9399_v19  ;;  %v4409_v3 = vld [vmem:[#allocation8 + $0xdd0] sm:$0xff] }
 0x45f   :  { %7726 = vmatprep.subr.bf16.mxu1 %v9401_v24  ;;  %v4413_v19 = vld [vmem:[#allocation8 + $0xdf0] sm:$0xff] }
 0x460   :  { %7544 = vmatmul.mubr.bf16.vlgmr.msra.gmra.mrb[12].mxu0 %v10310_v51 }
 0x461   :  { %7716 = vmatmul.mubr.bf16.vlgmr.msra.gmra.mrb[12].mxu1 %v10310_v51  ;;  %7555 = vmatpush1.bf16.msra.mxu0 %v9398_v28  ;;  %v9416_v51 = vcombine.low %v4370_v15, %v4374_v35  ;;  %v9448_v15 = vcombine.low %v4402_v10, %v4406_v4  ;;  %v9454_v35 = vcombine.low %v4409_v3, %v4413_v19 }
 0x462   :  { %7586 = vmatprep.mubr.bf16.mxu0 %v10320_v61  ;;  %7727 = vmatpush1.bf16.msra.mxu1 %v9400_v31  ;;  %v4410_v31 = vld [vmem:[#allocation8 + $0xdd8] sm:$0xff] }
 0x463   :  { %7758 = vmatprep.mubr.bf16.mxu1 %v10320_v61  ;;  %7556 = vmatprep.subr.bf16.mxu0 %v9407_v58  ;;  %v9422_v61 = vcombine.low %v4377_v41, %v4381_v42  ;;  %v4414_v58 = vld [vmem:[#allocation8 + $0xdf8] sm:$0xff]  ;;  %v9455_v41 = vcombine.high %v4409_v3, %v4413_v19 }
 0x464   :  { %7728 = vmatprep.subr.bf16.mxu1 %v9409_v34  ;;  %v9456_v44 = vcombine.low %v4410_v31, %v4414_v58 }
 0x465   :  { %7557 = vmatpush1.bf16.msra.mxu0 %v9406_v36 }
 0x466   :  { %7729 = vmatpush1.bf16.msra.mxu1 %v9408_v37  ;;  %7558 = vmatprep.subr.bf16.mxu0 %v9415_v38 }
 0x467   :  { %7730 = vmatprep.subr.bf16.mxu1 %v9417_v40 }
 0x469   :  { %7559 = vmatpush1.bf16.msra.mxu0 %v9414_v45  ;;  %v9457_v45 = vcombine.high %v4410_v31, %v4414_v58 }
 0x46a   :  { %7731 = vmatpush1.bf16.msra.mxu1 %v9416_v51  ;;  %7560 = vmatprep.subr.bf16.mxu0 %v9423_v62  ;;  %v4417_v51 = vld [vmem:[#allocation8 + $0xe10] sm:$0xff] }
 0x46b   :  { %7732 = vmatprep.subr.bf16.mxu1 %v9425_v30  ;;  %v4421_v62 = vld [vmem:[#allocation8 + $0xe30] sm:$0xff] }
 0x46c   :  { %v9463_v39 = vcombine.high %v4417_v51, %v4421_v62 }
 0x46d   :  { %7561 = vmatpush1.bf16.msra.mxu0 %v9422_v61  ;;  %v4422_v61 = vld [vmem:[#allocation8 + $0xe38] sm:$0xff] }
 0x46e   :  { %7733 = vmatpush1.bf16.msra.mxu1 %v9424_v49  ;;  %7562 = vmatprep.subr.bf16.mxu0 %v9431_v11  ;;  %v9464_v10 = vcombine.low %v4418_v48, %v4422_v61 }
 0x46f   :  { %7734 = vmatprep.subr.bf16.mxu1 %v9433_v50 }
 0x471   :  { %7563 = vmatpush1.bf16.msra.mxu0 %v9430_v55 }
 0x472   :  { %7735 = vmatpush1.bf16.msra.mxu1 %v9432_v53  ;;  %7564 = vmatprep.subr.bf16.mxu0 %v9439_v0  ;;  %v9465_v0 = vcombine.high %v4418_v48, %v4422_v61 }
 0x473   :  { %v7244_v24 = vpop.f32.mrb[8].mxu0  ;;  %v7416_v6 = vpop.f32.mrb[8].mxu1  ;;  %7736 = vmatprep.subr.bf16.mxu1 %v9441_v2  ;;  %v4425_v2 = vld [vmem:[#allocation8 + $0xe50] sm:$0xff] }
 0x474   :  { %v9691_v27 = vadd.f32 %v7244_v24, %v4484_v16  ;;  %v9695_v28 = vadd.f32 %v7416_v6, %v4492_v17  ;;  %v7246_v29 = vpop.f32.mrb[9].mxu0  ;;  %v7418_v59 = vpop.f32.mrb[9].mxu1  ;;  %v9471_v4 = vcombine.high %v4425_v2, %v4429_v5  ;;  %v9470_v3 = vcombine.low %v4425_v2, %v4429_v5 }
 0x475   :  { %v9692_v32 = vadd.f32 %v7246_v29, %v4488_v12  ;;  %v9696_v9 = vadd.f32 %v7418_v59, %v4496_v13  ;;  %v7248_v33 = vpop.f32.mrb[10].mxu0  ;;  %v7420_v34 = vpop.f32.mrb[10].mxu1  ;;  %7565 = vmatpush1.bf16.msra.mxu0 %v9438_v14  ;;  %v4437_v14 = vld [vmem:[#allocation8 + $0xeb0] sm:$0xff]  ;;  %v4446_v29 = vld [vmem:[#allocation8 + $0xef8] sm:$0xff] }
 0x476   :  { %v9693_v36 = vadd.f32 %v7248_v33, %v4484_v16  ;;  %v9697_v37 = vadd.f32 %v7420_v34, %v4492_v17  ;;  %7737 = vmatpush1.bf16.msra.mxu1 %v9440_v18  ;;  %v7250_v38 = vpop.f32.mrb[11].mxu0  ;;  %v7422_v40 = vpop.f32.mrb[11].mxu1  ;;  %7566 = vmatprep.subr.bf16.mxu0 %v9447_v1  ;;  %v7769_v30 = vmax.f32 %v9691_v27, 0.0  ;;  %v7771_v25 = vmax.f32 %v9695_v28, 0.0  ;;  %v4430_v16 = vld [vmem:[#allocation8 + $0xe78] sm:$0xff]  ;;  %v4445_v27 = vld [vmem:[#allocation8 + $0xef0] sm:$0xff] }
 0x477   :  { %v9694_v42 = vadd.f32 %v7250_v38, %v4488_v12  ;;  %v9698_v63 = vadd.f32 %v7422_v40, %v4496_v13  ;;  %7738 = vmatprep.subr.bf16.mxu1 %v9449_v26  ;;  %v7770_v49 = vmax.f32 %v9692_v32, 0.0  ;;  %v7772_v11 = vmax.f32 %v9696_v9, 0.0  ;;  %v4433_v13 = vld [vmem:[#allocation8 + $0xe90] sm:$0xff]  ;;  %v4434_v18 = vld [vmem:[#allocation8 + $0xe98] sm:$0xff] }
 0x478   :  { %v7777_v46 = vmax.f32 %v9693_v36, 0.0  ;;  %v7779_v47 = vmax.f32 %v9697_v37, 0.0  ;;  %v9462_v17 = vcombine.low %v4417_v51, %v4421_v62  ;;  %v9473_v12 = vcombine.high %v4426_v8, %v4430_v16  ;;  %v4438_v1 = vld [vmem:[#allocation8 + $0xeb8] sm:$0xff]  ;;  %v4441_v26 = vld [vmem:[#allocation8 + $0xed0] sm:$0xff] }
 0x479   :  { %v7778_v50 = vmax.f32 %v9694_v42, 0.0  ;;  %v7780_v43 = vmax.f32 %v9698_v63, 0.0  ;;  %7567 = vmatpush1.bf16.msra.mxu0 %v9446_v7  ;;  %v9472_v19 = vcombine.low %v4426_v8, %v4430_v16  ;;  %v9479_v24 = vcombine.high %v4433_v13, %v4437_v14  ;;  %v4442_v28 = vld [vmem:[#allocation8 + $0xed8] sm:$0xff]  ;;  %v4449_v32 = vld [vmem:[#allocation8 + $0xf10] sm:$0xff] }
 0x47a   :  { %v10358_v52 = vpack.c.bf16 %v7777_v46, %v7769_v30  ;;  %v10360_v54 = vpack.c.bf16 %v7779_v47, %v7771_v25  ;;  %7739 = vmatpush1.bf16.msra.mxu1 %v9448_v15  ;;  %7568 = vmatprep.subr.bf16.mxu0 %v9455_v41  ;;  %v9481_v6 = vcombine.high %v4434_v18, %v4438_v1  ;;  %v4453_v9 = vld [vmem:[#allocation8 + $0xf30] sm:$0xff]  ;;  %v4450_v33 = vld [vmem:[#allocation8 + $0xf18] sm:$0xff] }
 0x47b   :  { %v10362_v55 = vpack.c.bf16 %v7778_v50, %v7770_v49  ;;  %v10364_v53 = vpack.c.bf16 %v7780_v43, %v7772_v11  ;;  %7740 = vmatprep.subr.bf16.mxu1 %v9457_v45  ;;  %v9478_v59 = vcombine.low %v4433_v13, %v4437_v14  ;;  %v9480_v7 = vcombine.low %v4434_v18, %v4438_v1  ;;  %v4454_v34 = vld [vmem:[#allocation8 + $0xf38] sm:$0xff]  ;;  %v4457_v38 = vld [vmem:[#allocation8 + $0xf50] sm:$0xff]  ;;  %v9821_v13 = vld [vmem:[#allocation11 + $0x80] sm:$0xff]  }
 0x47c   :  { %v9487_v31 = vcombine.high %v4441_v26, %v4445_v27  ;;  %v9489_v58 = vcombine.high %v4442_v28, %v4446_v29  ;;  %v9486_v15 = vcombine.low %v4441_v26, %v4445_v27  ;;  %v9495_v36 = vcombine.high %v4449_v32, %v4453_v9  ;;  %v4461_v40 = vld [vmem:[#allocation8 + $0xf70] sm:$0xff]  ;;  %v4458_v41 = vld [vmem:[#allocation8 + $0xf58] sm:$0xff]  ;;  %v9830_v27 = vld [vmem:[#allocation11 + $0x58] sm:$0xff]  }
 0x47d   :  { %7569 = vmatpush1.bf16.msra.mxu0 %v9454_v35  ;;  %v9488_v35 = vcombine.low %v4442_v28, %v4446_v29  ;;  %v9497_v37 = vcombine.high %v4450_v33, %v4454_v34  ;;  %v4462_v42 = vld [vmem:[#allocation8 + $0xf78] sm:$0xff]  ;;  %v9494_v63 = vcombine.low %v4449_v32, %v4453_v9  ;;  %v9503_v45 = vcombine.high %v4457_v38, %v4461_v40  ;;  %v4465_v62 = vld [vmem:[#allocation8 + $0xf90] sm:$0xff]  ;;  %v9832_v28 = vld [vmem:[#allocation11 + $0x18] sm:$0xff]  }
 0x47e   :  { %7741 = vmatpush1.bf16.msra.mxu1 %v9456_v44  ;;  %7570 = vmatprep.subr.bf16.mxu0 %v9463_v39  ;;  %v9496_v44 = vcombine.low %v4450_v33, %v4454_v34  ;;  %v9505_v51 = vcombine.high %v4458_v41, %v4462_v42  ;;  %v4469_v30 = vld [vmem:[#allocation8 + $0xfb0] sm:$0xff]  ;;  %v4466_v25 = vld [vmem:[#allocation8 + $0xf98] sm:$0xff]  ;;  %v9502_v47 = vcombine.low %v4457_v38, %v4461_v40  ;;  %v9834_v29 = vld [vmem:[#allocation11 + $0x60] sm:$0xff]  }
 0x47f   :  { %7742 = vmatprep.subr.bf16.mxu1 %v9465_v0  ;;  %v4470_v46 = vld [vmem:[#allocation8 + $0xfb8] sm:$0xff]  ;;  %v9504_v48 = vcombine.low %v4458_v41, %v4462_v42  ;;  %v9511_v61 = vcombine.high %v4465_v62, %v4469_v30  ;;  %v4473_v11 = vld [vmem:[#allocation8 + $0xfd0] sm:$0xff]  ;;  %v9510_v0 = vcombine.low %v4465_v62, %v4469_v30  ;;  %v9848_v38 = vld [vmem:[#allocation11 + $0x38] sm:$0xff]  }
 0x480   :  { %v9513_v49 = vcombine.high %v4466_v25, %v4470_v46  ;;  %v4477_v50 = vld [vmem:[#allocation8 + $0xff0] sm:$0xff]  ;;  %v4474_v43 = vld [vmem:[#allocation8 + $0xfd8] sm:$0xff]  ;;  %v9512_v2 = vcombine.low %v4466_v25, %v4470_v46  ;;  %v9849_v40 = vld [vmem:[#allocation11 + $0xb8] sm:$0xff]  }
 0x481   :  { %7571 = vmatpush1.bf16.msra.mxu0 %v9462_v17  ;;  %v4478_v39 = vld [vmem:[#allocation8 + $0xff8] sm:$0xff]  ;;  %v9519_v5 = vcombine.high %v4473_v11, %v4477_v50  ;;  %v9518_v16 = vcombine.low %v4473_v11, %v4477_v50  ;;  %v9822_v14 = vld [vmem:[#allocation11 + $0x48] sm:$0xff]   ;;  %v9850_v41 = vld [vmem:[#allocation11 + $0x140] sm:$0xff]  }
 0x482   :  { %7743 = vmatpush1.bf16.msra.mxu1 %v9464_v10  ;;  %7572 = vmatprep.subr.bf16.mxu0 %v9471_v4  ;;  %v9521_v8 = vcombine.high %v4474_v43, %v4478_v39  ;;  %v9520_v17 = vcombine.low %v4474_v43, %v4478_v39  ;;  %v9818_v10 = vld [vmem:[#allocation11 + $0x40] sm:$0xff]   ;;  %v9823_v18 = vld [vmem:[#allocation11 + $0xc8] sm:$0xff]   ;;  %v9829_v26 = vld [vmem:[#allocation11 + $0x90] sm:$0xff]  }
 0x483   :  { %7744 = vmatprep.subr.bf16.mxu1 %v9473_v12  ;;  %v9819_v4 = vld [vmem:[#allocation11 + $0xc0] sm:$0xff]   ;;  %v9824_v1 = vld [vmem:[#allocation11 + $0x8] sm:$0xff]   ;;  %v9842_v33 = vld [vmem:[#allocation11 + $0x70] sm:$0xff]  }
 0x484   :  { %v9820_v12 = vld [vmem:[#allocation11] sm:$0xff]   ;;  %v9840_v32 = vld [vmem:[#allocation11 + $0x28] sm:$0xff]   ;;  %v9843_v34 = vld [vmem:[#allocation11 + $0xf0] sm:$0xff]  }
 0x485   :  { %7573 = vmatpush1.bf16.msra.mxu0 %v9470_v3  ;;  %v9825_v3 = vld [vmem:[#allocation11 + $0x88] sm:$0xff]   ;;  %v9851_v42 = vld [vmem:[#allocation11 + $0x1c0] sm:$0xff]   ;;  %v9858_v25 = vld [vmem:[#allocation11 + $0x150] sm:$0xff]  }
 0x486   :  { %7745 = vmatpush1.bf16.msra.mxu1 %v9472_v19  ;;  %7574 = vmatprep.subr.bf16.mxu0 %v9479_v24  ;;  %v9826_v19 = vld [vmem:[#allocation11 + $0x50] sm:$0xff]   ;;  %v9841_v9 = vld [vmem:[#allocation11 + $0xa8] sm:$0xff]   ;;  %v9866_v11 = vld [vmem:[#allocation11 + $0x160] sm:$0xff]  }
 0x487   :  { %7746 = vmatprep.subr.bf16.mxu1 %v9481_v6  ;;  %v9827_v24 = vld [vmem:[#allocation11 + $0xd0] sm:$0xff]   ;;  %v9856_v62 = vld [vmem:[#allocation11 + $0x108] sm:$0xff]   ;;  %v9867_v50 = vld [vmem:[#allocation11 + $0x1e0] sm:$0xff]  }
 0x488   :  { %v9828_v6 = vld [vmem:[#allocation11 + $0x10] sm:$0xff]   ;;  %v9857_v30 = vld [vmem:[#allocation11 + $0x188] sm:$0xff]   ;;  %v9868_v43 = vld [vmem:[#allocation11 + $0x120] sm:$0xff]  }
 0x489   :  { %7575 = vmatpush1.bf16.msra.mxu0 %v9478_v59  ;;  %v9835_v59 = vld [vmem:[#allocation11 + $0xe0] sm:$0xff]   ;;  %v9859_v46 = vld [vmem:[#allocation11 + $0x1d0] sm:$0xff]  }
 0x48a   :  { %7747 = vmatpush1.bf16.msra.mxu1 %v9480_v7  ;;  %7576 = vmatprep.subr.bf16.mxu0 %v9487_v31  ;;  %v9837_v7 = vld [vmem:[#allocation11 + $0xa0] sm:$0xff]   ;;  %v9838_v31 = vld [vmem:[#allocation11 + $0x68] sm:$0xff]  }
 0x48b   :  { %7748 = vmatprep.subr.bf16.mxu1 %v9489_v58  ;;  %v9839_v58 = vld [vmem:[#allocation11 + $0xe8] sm:$0xff]   ;;  %v9869_v39 = vld [vmem:[#allocation11 + $0x1a0] sm:$0xff]  }
 0x48d   :  { %7577 = vmatpush1.bf16.msra.mxu0 %v9486_v15  ;;  %v9844_v15 = vld [vmem:[#allocation11 + $0x30] sm:$0xff]  }
 0x48e   :  { %7749 = vmatpush1.bf16.msra.mxu1 %v9488_v35  ;;  %7578 = vmatprep.subr.bf16.mxu0 %v9495_v36  ;;  %v9845_v35 = vld [vmem:[#allocation11 + $0xb0] sm:$0xff]   ;;  %v9846_v36 = vld [vmem:[#allocation11 + $0x78] sm:$0xff]  }
 0x48f   :  { %7750 = vmatprep.subr.bf16.mxu1 %v9497_v37  ;;  %v9847_v37 = vld [vmem:[#allocation11 + $0xf8] sm:$0xff]  }
 0x491   :  { %7579 = vmatpush1.bf16.msra.mxu0 %v9494_v63  ;;  %v9852_v63 = vld [vmem:[#allocation11 + $0x100] sm:$0xff]  }
 0x492   :  { %7751 = vmatpush1.bf16.msra.mxu1 %v9496_v44  ;;  %7580 = vmatprep.subr.bf16.mxu0 %v9503_v45  ;;  %v9853_v44 = vld [vmem:[#allocation11 + $0x180] sm:$0xff]   ;;  %v9854_v45 = vld [vmem:[#allocation11 + $0x148] sm:$0xff]  }
 0x493   :  { %7752 = vmatprep.subr.bf16.mxu1 %v9505_v51  ;;  %v9855_v51 = vld [vmem:[#allocation11 + $0x1c8] sm:$0xff]  }
 0x495   :  { %7581 = vmatpush1.bf16.msra.mxu0 %v9502_v47  ;;  %v9860_v47 = vld [vmem:[#allocation11 + $0x110] sm:$0xff]  }
 0x496   :  { %7753 = vmatpush1.bf16.msra.mxu1 %v9504_v48  ;;  %7582 = vmatprep.subr.bf16.mxu0 %v9511_v61  ;;  %v9861_v48 = vld [vmem:[#allocation11 + $0x190] sm:$0xff]   ;;  %v9862_v61 = vld [vmem:[#allocation11 + $0x158] sm:$0xff]  }
 0x497   :  { %7754 = vmatprep.subr.bf16.mxu1 %v9513_v49  ;;  %v9863_v49 = vld [vmem:[#allocation11 + $0x1d8] sm:$0xff]  }
 0x499   :  { %7583 = vmatpush1.bf16.msra.mxu0 %v9510_v0  ;;  %v9870_v0 = vld [vmem:[#allocation11 + $0x168] sm:$0xff]  }
 0x49a   :  { %7755 = vmatpush1.bf16.msra.mxu1 %v9512_v2  ;;  %7584 = vmatprep.subr.bf16.mxu0 %v9519_v5  ;;  %v9871_v2 = vld [vmem:[#allocation11 + $0x1e8] sm:$0xff]  }
 0x49b   :  { %7756 = vmatprep.subr.bf16.mxu1 %v9521_v8  ;;  %v9872_v5 = vld [vmem:[#allocation11 + $0x128] sm:$0xff]  }
 0x49c   :  { %v9873_v8 = vld [vmem:[#allocation11 + $0x1a8] sm:$0xff]  }
 0x49d   :  { %7585 = vmatpush1.bf16.msra.mxu0 %v9518_v16  ;;  %v9874_v16 = vld [vmem:[#allocation11 + $0x170] sm:$0xff]  }
 0x49e   :  { %7757 = vmatpush1.bf16.msra.mxu1 %v9520_v17  ;;  %9587 = vmatprep.subr.bf16.mxu0 %v9818_v10  ;;  %v9875_v17 = vld [vmem:[#allocation11 + $0x1f0] sm:$0xff]  }
 0x49f   :  { %9609 = vmatprep.subr.bf16.mxu1 %v9819_v4  ;;  %v9876_v10 = vld [vmem:[#allocation11 + $0x130] sm:$0xff]  }
 0x4a0   :  { %7587 = vmatmul.mubr.bf16.vlgmr.msra.gmra.mrb[12].mxu0 %v10312_v56  ;;  %v9877_v4 = vld [vmem:[#allocation11 + $0x1b0] sm:$0xff]  }
 0x4a1   :  { %7759 = vmatmul.mubr.bf16.vlgmr.msra.gmra.mrb[12].mxu1 %v10312_v56  ;;  %9588 = vmatpush3.bf16.msra.mxu0 %v9820_v12  ;;  %v9831_v56 = vld [vmem:[#allocation11 + $0xd8] sm:$0xff]  }
 0x4a2   :  { %8344 = vmatprep.mubr.bf16.mxu0 %v10362_v55  ;;  %9610 = vmatpush3.bf16.msra.mxu1 %v9821_v13  ;;  %v9833_v55 = vld [vmem:[#allocation11 + $0x98] sm:$0xff]  }
 0x4a3   :  { %8385 = vmatprep.mubr.bf16.mxu1 %v10364_v53  ;;  %9589 = vmatprep.subr.bf16.mxu0 %v9822_v14  ;;  %v9836_v53 = vld [vmem:[#allocation11 + $0x20] sm:$0xff]   ;;  %v9878_v12 = vld [vmem:[#allocation11 + $0x178] sm:$0xff]  }
 0x4a4   :  { %9611 = vmatprep.subr.bf16.mxu1 %v9823_v18  ;;  %v9879_v13 = vld [vmem:[#allocation11 + $0x1f8] sm:$0xff]  }
 0x4a5   :  { %9590 = vmatpush3.bf16.msra.mxu0 %v9824_v1  ;;  %v9880_v14 = vld [vmem:[#allocation11 + $0x138] sm:$0xff]   ;;  %v4500_v1 = vrot.slane %v10344_v60, %v673_v20 }
 0x4a6   :  { %9612 = vmatpush3.bf16.msra.mxu1 %v9825_v3  ;;  %9591 = vmatprep.subr.bf16.mxu0 %v9826_v19  ;;  %v9881_v18 = vld [vmem:[#allocation11 + $0x1b8] sm:$0xff]   ;;  %v4508_v3 = vrot.slane %v10344_v60, %v681_v21  ;;  %v4504_v19 = vrot.slane %v10344_v60, %v677_v22 }
 0x4a7   :  { %9613 = vmatprep.subr.bf16.mxu1 %v9827_v24  ;;  %v4512_v24 = vrot.slane %v10344_v60, %v685_v23 }
 0x4a9   :  { %9592 = vmatpush3.bf16.msra.mxu0 %v9828_v6 }
 0x4aa   :  { %9614 = vmatpush3.bf16.msra.mxu1 %v9829_v26  ;;  %9593 = vmatprep.subr.bf16.mxu0 %v9830_v27 }
 0x4ab   :  { %9615 = vmatprep.subr.bf16.mxu1 %v9831_v56 }
 0x4ad   :  { %9594 = vmatpush3.bf16.msra.mxu0 %v9832_v28 }
 0x4ae   :  { %9616 = vmatpush3.bf16.msra.mxu1 %v9833_v55  ;;  %9595 = vmatprep.subr.bf16.mxu0 %v9834_v29 }
 0x4af   :  { %9617 = vmatprep.subr.bf16.mxu1 %v9835_v59 }
 0x4b1   :  { %9596 = vmatpush3.bf16.msra.mxu0 %v9836_v53 }
 0x4b2   :  { %9618 = vmatpush3.bf16.msra.mxu1 %v9837_v7  ;;  %9597 = vmatprep.subr.bf16.mxu0 %v9838_v31 }
 0x4b3   :  { %9619 = vmatprep.subr.bf16.mxu1 %v9839_v58 }
 0x4b5   :  { %9598 = vmatpush3.bf16.msra.mxu0 %v9840_v32 }
 0x4b6   :  { %9620 = vmatpush3.bf16.msra.mxu1 %v9841_v9  ;;  %9599 = vmatprep.subr.bf16.mxu0 %v9842_v33 }
 0x4b7   :  { %9621 = vmatprep.subr.bf16.mxu1 %v9843_v34 }
 0x4b9   :  { %9600 = vmatpush3.bf16.msra.mxu0 %v9844_v15 }
 0x4ba   :  { %9622 = vmatpush3.bf16.msra.mxu1 %v9845_v35  ;;  %9601 = vmatprep.subr.bf16.mxu0 %v9846_v36 }
 0x4bb   :  { %9623 = vmatprep.subr.bf16.mxu1 %v9847_v37 }
 0x4bd   :  { %9602 = vmatpush3.bf16.msra.mxu0 %v9848_v38 }
 0x4be   :  { %9624 = vmatpush3.bf16.msra.mxu1 %v9849_v40  ;;  %9631 = vmatprep.subr.bf16.mxu0 %v9850_v41 }
 0x4bf   :  { %9653 = vmatprep.subr.bf16.mxu1 %v9851_v42 }
 0x4c0   :  { %8345 = vmatmul.mubr.bf16.vlgmr.msra.gmra.mrb[16].mxu0 %v10358_v52  ;;  %v9864_v52 = vld [vmem:[#allocation11 + $0x118] sm:$0xff]  }
 0x4c1   :  { %8386 = vmatmul.mubr.bf16.vlgmr.msra.gmra.mrb[16].mxu1 %v10360_v54  ;;  %9632 = vmatpush3.bf16.msra.mxu0 %v9852_v63  ;;  %v9865_v54 = vld [vmem:[#allocation11 + $0x198] sm:$0xff]   ;;  %v9522_v63 = vld [vmem:[#allocation13] ss:$0 sm:$0xff] }
 0x4c2   :  { %9654 = vmatpush3.bf16.msra.mxu1 %v9853_v44  ;;  %9633 = vmatprep.subr.bf16.mxu0 %v9854_v45 }
 0x4c3   :  { %9655 = vmatprep.subr.bf16.mxu1 %v9855_v51 }
 0x4c5   :  { %9634 = vmatpush3.bf16.msra.mxu0 %v9856_v62 }
 0x4c6   :  { %9656 = vmatpush3.bf16.msra.mxu1 %v9857_v30  ;;  %9635 = vmatprep.subr.bf16.mxu0 %v9858_v25 }
 0x4c7   :  { %9657 = vmatprep.subr.bf16.mxu1 %v9859_v46 }
 0x4c9   :  { %9636 = vmatpush3.bf16.msra.mxu0 %v9860_v47 }
 0x4ca   :  { %9658 = vmatpush3.bf16.msra.mxu1 %v9861_v48  ;;  %9637 = vmatprep.subr.bf16.mxu0 %v9862_v61 }
 0x4cb   :  { %9659 = vmatprep.subr.bf16.mxu1 %v9863_v49 }
 0x4cd   :  { %9638 = vmatpush3.bf16.msra.mxu0 %v9864_v52 }
 0x4ce   :  { %9660 = vmatpush3.bf16.msra.mxu1 %v9865_v54  ;;  %9639 = vmatprep.subr.bf16.mxu0 %v9866_v11 }
 0x4cf   :  { %9661 = vmatprep.subr.bf16.mxu1 %v9867_v50 }
 0x4d1   :  { %9640 = vmatpush3.bf16.msra.mxu0 %v9868_v43 }
 0x4d2   :  { %9662 = vmatpush3.bf16.msra.mxu1 %v9869_v39  ;;  %9641 = vmatprep.subr.bf16.mxu0 %v9870_v0 }
 0x4d3   :  { %9663 = vmatprep.subr.bf16.mxu1 %v9871_v2 }
 0x4d5   :  { %9642 = vmatpush3.bf16.msra.mxu0 %v9872_v5 }
 0x4d6   :  { %9664 = vmatpush3.bf16.msra.mxu1 %v9873_v8  ;;  %9643 = vmatprep.subr.bf16.mxu0 %v9874_v16 }
 0x4d7   :  { %9665 = vmatprep.subr.bf16.mxu1 %v9875_v17 }
 0x4d9   :  { %9644 = vmatpush3.bf16.msra.mxu0 %v9876_v10 }
 0x4da   :  { %9666 = vmatpush3.bf16.msra.mxu1 %v9877_v4  ;;  %9645 = vmatprep.subr.bf16.mxu0 %v9878_v12 }
 0x4db   :  { %9667 = vmatprep.subr.bf16.mxu1 %v9879_v13 }
 0x4dd   :  { %9646 = vmatpush3.bf16.msra.mxu0 %v9880_v14 }
 0x4de   :  { %9668 = vmatpush3.bf16.msra.mxu1 %v9881_v18 }
 0x573   :  { %v7588_v6 = vpop.f32.mrb[12].mxu0 }
 0x574   :  { %v9699_v26 = vadd.f32 %v7588_v6, %v4500_v1  ;;  %v7760_v27 = vpop.f32.mrb[12].mxu1  ;;  %v7590_v56 = vpop.f32.mrb[13].mxu0 }
 0x575   :  { %v9703_v28 = vadd.f32 %v7760_v27, %v4508_v3  ;;  %v9700_v55 = vadd.f32 %v7590_v56, %v4504_v19  ;;  %v7762_v29 = vpop.f32.mrb[13].mxu1  ;;  %v7592_v20 = vpop.f32.mrb[14].mxu0 }
 0x576   :  { %v9704_v59 = vadd.f32 %v7762_v29, %v4512_v24  ;;  %v9701_v53 = vadd.f32 %v7592_v20, %v4500_v1  ;;  %v7764_v7 = vpop.f32.mrb[14].mxu1  ;;  %v7594_v21 = vpop.f32.mrb[15].mxu0  ;;  %v7773_v22 = vmax.f32 %v9699_v26, 0.0 }
 0x577   :  { %v9705_v31 = vadd.f32 %v7764_v7, %v4508_v3  ;;  %v9702_v58 = vadd.f32 %v7594_v21, %v4504_v19  ;;  %v7766_v32 = vpop.f32.mrb[15].mxu1  ;;  %v7775_v33 = vmax.f32 %v9703_v28, 0.0  ;;  %v7774_v23 = vmax.f32 %v9700_v55, 0.0 }
 0x578   :  { %v7781_v9 = vmax.f32 %v9701_v53, 0.0  ;;  %v9706_v57 = vadd.f32 %v7766_v32, %v4512_v24  ;;  %v7776_v15 = vmax.f32 %v9704_v59, 0.0 }
 0x579   :  { %v7783_v60 = vmax.f32 %v9705_v31, 0.0  ;;  %v7782_v34 = vmax.f32 %v9702_v58, 0.0 }
 0x57a   :  { %v7789_v35 = vpack.c.bf16 %v7781_v9, %v7773_v22  ;;  %v7784_v36 = vmax.f32 %v9706_v57, 0.0 }
 0x57b   :  { %v7791_v37 = vpack.c.bf16 %v7783_v60, %v7775_v33  ;;  %v7790_v38 = vpack.c.bf16 %v7782_v34, %v7774_v23 }
 0x57c   :  { %v7792_v40 = vpack.c.bf16 %v7784_v36, %v7776_v15 }
 0x57d   :  { %8426 = vmatprep.mubr.bf16.mxu0 %v7790_v38 }
 0x57e   :  { %8467 = vmatprep.mubr.bf16.mxu1 %v7792_v40  ;;  %8427 = vmatmul.mubr.bf16.vlgmr.msra.gmra.mrb[20].mxu0 %v7789_v35 }
 0x57f   :  { %8468 = vmatmul.mubr.bf16.vlgmr.msra.gmra.mrb[20].mxu1 %v7791_v37 }
 0x593   :  { %v9603_v41 = vpop.f32.mrb[16].mxu0 }
 0x594   :  { %v9625_v42 = vpop.f32.mrb[16].mxu1  ;;  %v9604_v44 = vpop.f32.mrb[17].mxu0 }
 0x595   :  { %v9605_v45 = vadd.f32 %v9604_v44, %v9603_v41  ;;  %v9626_v51 = vpop.f32.mrb[17].mxu1  ;;  %v9606_v62 = vpop.f32.mrb[18].mxu0 }
 0x596   :  { %v9627_v30 = vadd.f32 %v9626_v51, %v9625_v42  ;;  %v9628_v25 = vpop.f32.mrb[18].mxu1  ;;  %v9607_v46 = vpop.f32.mrb[19].mxu0 }
 0x597   :  { %v8347_v47 = vadd.f32 %v9605_v45, %v9522_v63  ;;  %v9608_v48 = vadd.f32 %v9607_v46, %v9606_v62  ;;  %v9629_v61 = vpop.f32.mrb[19].mxu1 }
 0x598   :  { %v9630_v49 = vadd.f32 %v9629_v61, %v9628_v25 }
 0x599   :  { %v8388_v52 = vadd.f32 %v9627_v30, %v8347_v47  ;;  %v8350_v54 = vadd.f32 %v9608_v48, %v9522_v63 }
 0x59b   :  { %v8391_v11 = vadd.f32 %v9630_v49, %v8350_v54 }
 0x651   :  { %v9647_v50 = vpop.f32.mrb[20].mxu0 }
 0x652   :  { %v9669_v43 = vpop.f32.mrb[20].mxu1  ;;  %v9648_v39 = vpop.f32.mrb[21].mxu0 }
 0x653   :  { %v9649_v0 = vadd.f32 %v9648_v39, %v9647_v50  ;;  %v9670_v2 = vpop.f32.mrb[21].mxu1  ;;  %v9650_v5 = vpop.f32.mrb[22].mxu0 }
 0x654   :  { %v9671_v8 = vadd.f32 %v9670_v2, %v9669_v43  ;;  %v9672_v16 = vpop.f32.mrb[22].mxu1  ;;  %v9651_v17 = vpop.f32.mrb[23].mxu0 }
 0x655   :  { %v8429_v10 = vadd.f32 %v9649_v0, %v8388_v52  ;;  %v9652_v4 = vadd.f32 %v9651_v17, %v9650_v5  ;;  %v9673_v12 = vpop.f32.mrb[23].mxu1 }
 0x656   :  { %v9674_v13 = vadd.f32 %v9673_v12, %v9672_v16 }
 0x657   :  { %v8470_v14 = vadd.f32 %v9671_v8, %v8429_v10  ;;  %v8432_v18 = vadd.f32 %v9652_v4, %v8391_v11 }
 0x659   :  { %8476 = vst [vmem:[#allocation14] sm:$0xff] %v8470_v14  ;;  %v8473_v1 = vadd.f32 %v9674_v13, %v8432_v18 }
 0x65b   :  { %8477 = vst [vmem:[#allocation14 + $0x8] sm:$0xff] %v8473_v1 }
 0x65c   :  { %10048 = shalt.err (!%p10045_p4)
}
 0x65d   :  { %s10049_s3 = scalar_lea.hbm %s10403_s7, 256 }
 0x65e   :  { %p10050_p5 = scmp.ne.s32.totalorder %s10403_s7, %s10049_s3  ;;  %p10053_p6 = scmp.lt.u32.totalorder %s10049_s3, %s10403_s7 }
 0x660   :  { %p10055_p7 = pnand %p10053_p6, %p10050_p5 }
 0x662   :  { %10058 = shalt.err (!%p10055_p7)
}
 0x663   :  { %s10082_s19 = smov 128   ;;  %s10083_s20 = smov 8  }
 0x664   :  { %8489 = dma.vmem_to_hbm [thread:$0]  %s8484_s14, 256, %s10403_s7, [#allocation4], %s10082_s19, %s10082_s19, %s10083_s20  }
 0x665   :  { %10067 = dma.done.wait [#allocation4], 256  }
 0x666   :  { %10068 = vsyncadd [#allocation4], 4294967040 }
 0x667   :  { %8493 = vsyncpa [#allocation3], 1 }
 0x668   :  { %8494 = vsyncpa [#allocation6], 1 }
 0x669   :  { %8495 = vsyncpa [#allocation9], 1 }
 0x66a   :  { %8496 = vsyncpa [#allocation12], 1 }
 0x66b   :  { %8497 = vsyncpa [#allocation4], 1 }

// kernel: tpu_custom_call.1
= control target key start
LH: loop header
LB: loop body
LE: loop exit
PB: predicated region body
PF: predicated region fallthrough
CT: control target
= control target key end

     0   :  { %12 = vsyncpa [#allocation3], 0  ;;  %s10396_s0 = inlined_call_operand.hbm [shape: f32[16,1024], index: 0, kind: input, shape index: {}]   ;;  %s10397_s1 = inlined_call_operand.hbm [shape: bf16[1024,1024], index: 1, kind: input, shape index: {}]   ;;  %s10398_s2 = inlined_call_operand.hbm [shape: f32[1,1024], index: 2, kind: input, shape index: {}]   ;;  %s10399_s3 = inlined_call_operand.hbm [shape: bf16[1024,1024], index: 3, kind: input, shape index: {}]   ;;  %s10400_s4 = inlined_call_operand.hbm [shape: f32[1,1024], index: 4, kind: input, shape index: {}]   ;;  %s10401_s5 = inlined_call_operand.hbm [shape: bf16[1024,128], index: 5, kind: input, shape index: {}]   ;;  %s10402_s6 = inlined_call_operand.hbm [shape: f32[1,128], index: 6, kind: input, shape index: {}]   ;;  %s10403_s7 = inlined_call_operand.hbm [shape: f32[16,128], index: 7, kind: output, shape index: {}]  }
   0x1   :  { %13 = vsyncpa [#allocation6], 0 }
   0x2   :  { %14 = vsyncpa [#allocation9], 0 }
   0x3   :  { %15 = vsyncpa [#allocation12], 0 }
   0x4   :  { %16 = vsyncpa [#allocation4], 0  ;;  %s10069_s24 = smov [#allocation5]   ;;  %s9883_s28 = scalar_lea.hbm %s10397_s1, 65536 }
   0x5   :  { %s34_s25 = sshll.u32 %s10069_s24, 4  ;;  %p9884_p0 = scmp.ne.s32.totalorder %s10397_s1, %s9883_s28  ;;  %s35_s25 = int_to_ptr.vmem [resolvable:$true] %s34_s25 }
   0x6   :  { %p9887_p1 = scmp.lt.u32.totalorder %s9883_s28, %s10397_s1 }
   0x8   :  { %p9889_p2 = pnand %p9887_p1, %p9884_p0 }
   0xa   :  { %9892 = shalt.err (!%p9889_p2)
}
   0xb   :  { %s9893_s10 = scalar_lea.vmem %s35_s25, 65536  ;;  %p9898_p4 = scmp.lt.s32.totalorder %s35_s25, %s35_s25 }
   0xc   :  { %p9894_p3 = scmp.ne.s32.totalorder %s35_s25, %s9893_s10  ;;  %p9899_p5 = scmp.lt.s32.totalorder %s9893_s10, %s9893_s10 }
   0xe   :  { %p9900_p6 = por %p9899_p5, %p9898_p4 }
  0x10   :  { %p9901_p7 = pnand %p9900_p6, %p9894_p3 }
  0x12   :  { %9904 = shalt.err (!%p9901_p7)
}
  0x13   :  { %s10070_s11 = smov 512   ;;  %s10071_s12 = smov 32  }
  0x14   :  { %40 = dma.hbm_to_vmem [thread:$0]  %s10397_s1, 65536, %s35_s25, [#allocation6], %s10070_s11, %s10070_s11, %s10071_s12  }
  0x15   :  { %s10072_s15 = smov [#allocation8]   ;;  %s9905_s19 = scalar_lea.hbm %s10399_s3, 65536 }
  0x16   :  { %s56_s16 = sshll.u32 %s10072_s15, 4  ;;  %p9906_p8 = scmp.ne.s32.totalorder %s10399_s3, %s9905_s19  ;;  %s57_s16 = int_to_ptr.vmem [resolvable:$true] %s56_s16 }
  0x17   :  { %p9909_p9 = scmp.lt.u32.totalorder %s9905_s19, %s10399_s3 }
  0x19   :  { %p9911_p10 = pnand %p9909_p9, %p9906_p8 }
  0x1b   :  { %9914 = shalt.err (!%p9911_p10)
}
  0x1c   :  { %s9915_s24 = scalar_lea.vmem %s57_s16, 65536  ;;  %p9920_p12 = scmp.lt.s32.totalorder %s57_s16, %s57_s16 }
  0x1d   :  { %p9916_p11 = scmp.ne.s32.totalorder %s57_s16, %s9915_s24  ;;  %p9921_p13 = scmp.lt.s32.totalorder %s9915_s24, %s9915_s24 }
  0x1f   :  { %p9922_p0 = por %p9921_p13, %p9920_p12 }
  0x21   :  { %p9923_p1 = pnand %p9922_p0, %p9916_p11 }
  0x23   :  { %9926 = shalt.err (!%p9923_p1)
}
  0x24   :  { %62 = dma.hbm_to_vmem [thread:$0]  %s10399_s3, 65536, %s57_s16, [#allocation9], %s10070_s11, %s10070_s11, %s10071_s12  }
  0x25   :  { %s10073_s26 = smov [#allocation11]   ;;  %s9927_s30 = scalar_lea.hbm %s10401_s5, 8192 }
  0x26   :  { %s78_s27 = sshll.u32 %s10073_s26, 4  ;;  %p9928_p2 = scmp.ne.s32.totalorder %s10401_s5, %s9927_s30  ;;  %s79_s27 = int_to_ptr.vmem [resolvable:$true] %s78_s27 }
  0x27   :  { %p9931_p3 = scmp.lt.u32.totalorder %s9927_s30, %s10401_s5 }
  0x29   :  { %p9933_p4 = pnand %p9931_p3, %p9928_p2 }
  0x2b   :  { %9936 = shalt.err (!%p9933_p4)
}
  0x2c   :  { %s9937_s14 = scalar_lea.vmem %s79_s27, 8192  ;;  %p9942_p6 = scmp.lt.s32.totalorder %s79_s27, %s79_s27 }
  0x2d   :  { %p9938_p5 = scmp.ne.s32.totalorder %s79_s27, %s9937_s14  ;;  %p9943_p7 = scmp.lt.s32.totalorder %s9937_s14, %s9937_s14 }
  0x2f   :  { %p9944_p8 = por %p9943_p7, %p9942_p6 }
  0x31   :  { %p9945_p9 = pnand %p9944_p8, %p9938_p5 }
  0x33   :  { %9948 = shalt.err (!%p9945_p9)
}
  0x34   :  { %s10074_s3 = smov 64   ;;  %s10075_s11 = smov 4  }
  0x35   :  { %84 = dma.hbm_to_vmem [thread:$0]  %s10401_s5, 8192, %s79_s27, [#allocation12], %s10074_s3, %s10074_s3, %s10075_s11  }
  0x36   :  { %s10076_s16 = smov [#allocation2]   ;;  %s9949_s20 = scalar_lea.hbm %s10396_s0, 2048 }
  0x37   :  { %s22_s17 = sshll.u32 %s10076_s16, 4  ;;  %p9950_p10 = scmp.ne.s32.totalorder %s10396_s0, %s9949_s20  ;;  %s23_s17 = int_to_ptr.vmem [resolvable:$true] %s22_s17 }
  0x38   :  { %p9953_p11 = scmp.lt.u32.totalorder %s9949_s20, %s10396_s0 }
  0x3a   :  { %p9955_p12 = pnand %p9953_p11, %p9950_p10 }
  0x3c   :  { %9958 = shalt.err (!%p9955_p12)
}
  0x3d   :  { %s9959_s1 = scalar_lea.vmem %s23_s17, 2048  ;;  %p9964_p0 = scmp.lt.s32.totalorder %s23_s17, %s23_s17 }
  0x3e   :  { %p9960_p13 = scmp.ne.s32.totalorder %s23_s17, %s9959_s1  ;;  %p9965_p1 = scmp.lt.s32.totalorder %s9959_s1, %s9959_s1 }
  0x40   :  { %p9966_p2 = por %p9965_p1, %p9964_p0 }
  0x42   :  { %p9967_p3 = pnand %p9966_p2, %p9960_p13 }
  0x44   :  { %9970 = shalt.err (!%p9967_p3)
}
  0x45   :  { %s10077_s5 = smov 1024   ;;  %s10078_s27 = smov [#allocation7]  }
  0x46   :  { %28 = dma.hbm_to_vmem [thread:$0]  %s10396_s0, 2048, %s23_s17, [#allocation3], %s10077_s5, %s10077_s5, %s10074_s3  }
  0x47   :  { %s47_s28 = sshll.u32 %s10078_s27, 4  ;;  %s10079_s29 = smov [#allocation10]   ;;  %s48_s28 = int_to_ptr.vmem [resolvable:$true] %s47_s28 }
  0x48   :  { %s69_s30 = sshll.u32 %s10079_s29, 4  ;;  %s9971_s10 = scalar_lea.hbm %s10398_s2, 128  ;;  %s70_s30 = int_to_ptr.vmem [resolvable:$true] %s69_s30 }
  0x49   :  { %p9972_p4 = scmp.ne.s32.totalorder %s10398_s2, %s9971_s10  ;;  %p9975_p5 = scmp.lt.u32.totalorder %s9971_s10, %s10398_s2 }
  0x4b   :  { %p9977_p6 = pnand %p9975_p5, %p9972_p4 }
  0x4d   :  { %9980 = shalt.err (!%p9977_p6)
}
  0x4e   :  { %s9981_s0 = scalar_lea.vmem %s48_s28, 128  ;;  %p9986_p8 = scmp.lt.s32.totalorder %s48_s28, %s48_s28 }
  0x4f   :  { %p9982_p7 = scmp.ne.s32.totalorder %s48_s28, %s9981_s0  ;;  %p9987_p9 = scmp.lt.s32.totalorder %s9981_s0, %s9981_s0 }
  0x51   :  { %p9988_p10 = por %p9987_p9, %p9986_p8 }
  0x53   :  { %p9989_p11 = pnand %p9988_p10, %p9982_p7 }
  0x55   :  { %9992 = shalt.err (!%p9989_p11)
}
  0x56   :  { %50 = dma.hbm_to_vmem [thread:$0]  %s10398_s2, 128, %s48_s28, [#allocation6]  }
  0x57   :  { %s9993_s18 = scalar_lea.hbm %s10400_s4, 128 }
  0x58   :  { %p9994_p12 = scmp.ne.s32.totalorder %s10400_s4, %s9993_s18  ;;  %p9997_p13 = scmp.lt.u32.totalorder %s9993_s18, %s10400_s4 }
  0x5a   :  { %p9999_p0 = pnand %p9997_p13, %p9994_p12 }
  0x5c   :  { %10002 = shalt.err (!%p9999_p0)
}
  0x5d   :  { %s10003_s23 = scalar_lea.vmem %s70_s30, 128  ;;  %p10008_p2 = scmp.lt.s32.totalorder %s70_s30, %s70_s30 }
  0x5e   :  { %p10004_p1 = scmp.ne.s32.totalorder %s70_s30, %s10003_s23  ;;  %p10009_p3 = scmp.lt.s32.totalorder %s10003_s23, %s10003_s23 }
  0x60   :  { %p10010_p4 = por %p10009_p3, %p10008_p2 }
  0x62   :  { %p10011_p5 = pnand %p10010_p4, %p10004_p1 }
  0x64   :  { %10014 = shalt.err (!%p10011_p5)
}
  0x65   :  { %72 = dma.hbm_to_vmem [thread:$0]  %s10400_s4, 128, %s70_s30, [#allocation9]  }
  0x66   :  { %s10080_s1 = smov [#allocation13]   ;;  %s10015_s27 = scalar_lea.hbm %s10402_s6, 16 }
  0x67   :  { %s91_s5 = sshll.u32 %s10080_s1, 4  ;;  %p10016_p6 = scmp.ne.s32.totalorder %s10402_s6, %s10015_s27  ;;  %s92_s5 = int_to_ptr.vmem [resolvable:$true] %s91_s5 }
  0x68   :  { %p10019_p7 = scmp.lt.u32.totalorder %s10015_s27, %s10402_s6 }
  0x6a   :  { %p10021_p8 = pnand %p10019_p7, %p10016_p6 }
  0x6c   :  { %10024 = shalt.err (!%p10021_p8)
}
  0x6d   :  { %s10025_s10 = scalar_lea.vmem %s92_s5, 16  ;;  %s10029_s4 = scalar_lea.vmem %s92_s5, 32 }
  0x6e   :  { %p10026_p9 = scmp.ne.s32.totalorder %s92_s5, %s10025_s10  ;;  %p10030_p10 = scmp.lt.s32.totalorder %s92_s5, %s92_s5 }
  0x6f   :  { %p10031_p11 = scmp.lt.s32.totalorder %s10029_s4, %s10025_s10 }
  0x71   :  { %p10032_p12 = por %p10031_p11, %p10030_p10 }
  0x73   :  { %p10033_p13 = pnand %p10032_p12, %p10026_p9 }
  0x75   :  { %10036 = shalt.err (!%p10033_p13)
}
  0x76   :  { %94 = dma.hbm_to_vmem [thread:$0]  %s10402_s6, 16, %s92_s5, [#allocation12]  }
  0x77   :  { %10059 = dma.done.wait [#allocation3], 2048  }
  0x78   :  { %10060 = vsyncadd [#allocation3], 4294965248 }
  0x79   :  { %10061 = dma.done.wait [#allocation6], 65664  }
  0x7a   :  { %10062 = vsyncadd [#allocation6], 4294901632 }
  0x7b   :  { %10063 = dma.done.wait [#allocation9], 65664  }
  0x7c   :  { %10064 = vsyncadd [#allocation9], 4294901632 }
  0x7d   :  { %10065 = dma.done.wait [#allocation12], 8208  }
  0x7e   :  { %10066 = vsyncadd [#allocation12], 4294959088  ;;  %v141_v0 = vld [vmem:[#allocation5] sm:$0xff]  ;;  %v142_v2 = vld [vmem:[#allocation5 + $0x8] sm:$0xff]  ;;  %s10081_s6 = smov [#allocation14]  }
  0x7f   :  { %v145_v1 = vld [vmem:[#allocation5 + $0x20] sm:$0xff]  ;;  %v146_v4 = vld [vmem:[#allocation5 + $0x28] sm:$0xff]  ;;  %s8483_s14 = sshll.u32 %s10081_s6, 4  ;;  %s8484_s14 = int_to_ptr.vmem [resolvable:$true] %s8483_s14 }
  0x80   :  { %v8499_v3 = vcombine.high %v141_v0, %v145_v1  ;;  %v8498_v5 = vcombine.low %v141_v0, %v145_v1  ;;  %v149_v6 = vld [vmem:[#allocation5 + $0x40] sm:$0xff]  ;;  %v8501_v8 = vcombine.high %v142_v2, %v146_v4  ;;  %v8500_v9 = vcombine.low %v142_v2, %v146_v4  ;;  %v150_v11 = vld [vmem:[#allocation5 + $0x48] sm:$0xff]  ;;  %s10037_s11 = scalar_lea.vmem %s8484_s14, 256  ;;  %p10042_p1 = scmp.lt.s32.totalorder %s8484_s14, %s8484_s14 }
  0x81   :  { %v153_v7 = vld [vmem:[#allocation5 + $0x60] sm:$0xff]  ;;  %v154_v12 = vld [vmem:[#allocation5 + $0x68] sm:$0xff]  ;;  %p10038_p0 = scmp.ne.s32.totalorder %s8484_s14, %s10037_s11  ;;  %p10043_p2 = scmp.lt.s32.totalorder %s10037_s11, %s10037_s11 }
  0x82   :  { %v8507_v10 = vcombine.high %v149_v6, %v153_v7  ;;  %v157_v13 = vld [vmem:[#allocation5 + $0x80] sm:$0xff]  ;;  %3255 = vmatprep.subr.bf16.mxu0 %v8499_v3  ;;  %v8509_v14 = vcombine.high %v150_v11, %v154_v12  ;;  %v158_v16 = vld [vmem:[#allocation5 + $0x88] sm:$0xff]  ;;  %3427 = vmatprep.subr.bf16.mxu1 %v8501_v8  ;;  %v8506_v18 = vcombine.low %v149_v6, %v153_v7 }
  0x83   :  { %v161_v15 = vld [vmem:[#allocation5 + $0xa0] sm:$0xff]  ;;  %v162_v17 = vld [vmem:[#allocation5 + $0xa8] sm:$0xff]  ;;  %3256 = vmatpush1.bf16.msra.mxu0 %v8498_v5  ;;  %3428 = vmatpush1.bf16.msra.mxu1 %v8500_v9  ;;  %v8508_v19 = vcombine.low %v150_v11, %v154_v12  ;;  %p10044_p3 = por %p10043_p2, %p10042_p1 }
  0x84   :  { %3257 = vmatprep.subr.bf16.mxu0 %v8507_v10  ;;  %v8515_v20 = vcombine.high %v157_v13, %v161_v15  ;;  %3429 = vmatprep.subr.bf16.mxu1 %v8509_v14  ;;  %v8517_v21 = vcombine.high %v158_v16, %v162_v17  ;;  %v165_v22 = vld [vmem:[#allocation5 + $0xc0] sm:$0xff]  ;;  %v166_v24 = vld [vmem:[#allocation5 + $0xc8] sm:$0xff]  ;;  %v8514_v26 = vcombine.low %v157_v13, %v161_v15 }
  0x85   :  { %v169_v23 = vld [vmem:[#allocation5 + $0xe0] sm:$0xff]  ;;  %v170_v25 = vld [vmem:[#allocation5 + $0xe8] sm:$0xff]  ;;  %v8516_v27 = vcombine.low %v158_v16, %v162_v17  ;;  %p10045_p4 = pnand %p10044_p3, %p10038_p0 }
  0x86   :  { %v8523_v28 = vcombine.high %v165_v22, %v169_v23  ;;  %v8525_v29 = vcombine.high %v166_v24, %v170_v25  ;;  %v173_v30 = vld [vmem:[#allocation5 + $0x100] sm:$0xff]  ;;  %v174_v32 = vld [vmem:[#allocation5 + $0x108] sm:$0xff]  ;;  %v8522_v34 = vcombine.low %v165_v22, %v169_v23  ;;  %v8524_v35 = vcombine.low %v166_v24, %v170_v25 }
  0x87   :  { %3258 = vmatpush1.bf16.msra.mxu0 %v8506_v18  ;;  %3430 = vmatpush1.bf16.msra.mxu1 %v8508_v19  ;;  %v177_v31 = vld [vmem:[#allocation5 + $0x120] sm:$0xff]  ;;  %v178_v33 = vld [vmem:[#allocation5 + $0x128] sm:$0xff] }
  0x88   :  { %3259 = vmatprep.subr.bf16.mxu0 %v8515_v20  ;;  %3431 = vmatprep.subr.bf16.mxu1 %v8517_v21  ;;  %v8531_v36 = vcombine.high %v173_v30, %v177_v31  ;;  %v8533_v37 = vcombine.high %v174_v32, %v178_v33  ;;  %v181_v38 = vld [vmem:[#allocation5 + $0x140] sm:$0xff]  ;;  %v182_v40 = vld [vmem:[#allocation5 + $0x148] sm:$0xff]  ;;  %v8530_v42 = vcombine.low %v173_v30, %v177_v31 }
  0x89   :  { %v185_v39 = vld [vmem:[#allocation5 + $0x160] sm:$0xff]  ;;  %v186_v41 = vld [vmem:[#allocation5 + $0x168] sm:$0xff]  ;;  %v8532_v43 = vcombine.low %v174_v32, %v178_v33 }
  0x8a   :  { %v8539_v44 = vcombine.high %v181_v38, %v185_v39  ;;  %v8541_v45 = vcombine.high %v182_v40, %v186_v41  ;;  %v189_v46 = vld [vmem:[#allocation5 + $0x180] sm:$0xff]  ;;  %v190_v48 = vld [vmem:[#allocation5 + $0x188] sm:$0xff]  ;;  %v8538_v50 = vcombine.low %v181_v38, %v185_v39  ;;  %v8540_v51 = vcombine.low %v182_v40, %v186_v41 }
  0x8b   :  { %3260 = vmatpush1.bf16.msra.mxu0 %v8514_v26  ;;  %3432 = vmatpush1.bf16.msra.mxu1 %v8516_v27  ;;  %v193_v47 = vld [vmem:[#allocation5 + $0x1a0] sm:$0xff]  ;;  %v194_v49 = vld [vmem:[#allocation5 + $0x1a8] sm:$0xff] }
  0x8c   :  { %3261 = vmatprep.subr.bf16.mxu0 %v8523_v28  ;;  %3433 = vmatprep.subr.bf16.mxu1 %v8525_v29  ;;  %v8547_v52 = vcombine.high %v189_v46, %v193_v47  ;;  %v118_v53 = vld [vmem:[#allocation2 + $0x8] sm:$0xff]  ;;  %v8549_v55 = vcombine.high %v190_v48, %v194_v49  ;;  %v197_v56 = vld [vmem:[#allocation5 + $0x1c0] sm:$0xff]  ;;  %v8546_v61 = vcombine.low %v189_v46, %v193_v47 }
  0x8d   :  { %v126_v54 = vld [vmem:[#allocation2 + $0x48] sm:$0xff]  ;;  %v201_v57 = vld [vmem:[#allocation5 + $0x1e0] sm:$0xff]  ;;  %v8548_v62 = vcombine.low %v190_v48, %v194_v49 }
  0x8e   :  { %v10208_v58 = vpack.c.bf16 %v126_v54, %v118_v53  ;;  %v198_v59 = vld [vmem:[#allocation5 + $0x1c8] sm:$0xff]  ;;  %v8555_v63 = vcombine.high %v197_v56, %v201_v57  ;;  %v205_v1 = vld [vmem:[#allocation5 + $0x200] sm:$0xff]  ;;  %v8554_v5 = vcombine.low %v197_v56, %v201_v57 }
  0x8f   :  { %3262 = vmatpush1.bf16.msra.mxu0 %v8522_v34  ;;  %3434 = vmatpush1.bf16.msra.mxu1 %v8524_v35  ;;  %v202_v60 = vld [vmem:[#allocation5 + $0x1e8] sm:$0xff]  ;;  %v209_v2 = vld [vmem:[#allocation5 + $0x220] sm:$0xff] }
  0x90   :  { %3263 = vmatprep.subr.bf16.mxu0 %v8531_v36  ;;  %3435 = vmatprep.subr.bf16.mxu1 %v8533_v37  ;;  %v8557_v0 = vcombine.high %v198_v59, %v202_v60  ;;  %v206_v3 = vld [vmem:[#allocation5 + $0x208] sm:$0xff]  ;;  %v8556_v6 = vcombine.low %v198_v59, %v202_v60  ;;  %v8563_v7 = vcombine.high %v205_v1, %v209_v2  ;;  %v213_v9 = vld [vmem:[#allocation5 + $0x240] sm:$0xff] }
  0x91   :  { %3287 = vmatprep.mubr.bf16.mxu0 %v10208_v58  ;;  %3459 = vmatprep.mubr.bf16.mxu1 %v10208_v58  ;;  %v210_v4 = vld [vmem:[#allocation5 + $0x228] sm:$0xff]  ;;  %v217_v10 = vld [vmem:[#allocation5 + $0x260] sm:$0xff]  ;;  %v8562_v13 = vcombine.low %v205_v1, %v209_v2 }
  0x92   :  { %v8565_v8 = vcombine.high %v206_v3, %v210_v4  ;;  %v214_v11 = vld [vmem:[#allocation5 + $0x248] sm:$0xff]  ;;  %v8564_v14 = vcombine.low %v206_v3, %v210_v4  ;;  %v8571_v15 = vcombine.high %v213_v9, %v217_v10  ;;  %v221_v17 = vld [vmem:[#allocation5 + $0x280] sm:$0xff]  ;;  %v8570_v21 = vcombine.low %v213_v9, %v217_v10 }
  0x93   :  { %3264 = vmatpush1.bf16.msra.mxu0 %v8530_v42  ;;  %3436 = vmatpush1.bf16.msra.mxu1 %v8532_v43  ;;  %v218_v12 = vld [vmem:[#allocation5 + $0x268] sm:$0xff]  ;;  %v225_v18 = vld [vmem:[#allocation5 + $0x2a0] sm:$0xff] }
  0x94   :  { %3265 = vmatprep.subr.bf16.mxu0 %v8539_v44  ;;  %3437 = vmatprep.subr.bf16.mxu1 %v8541_v45  ;;  %v8573_v16 = vcombine.high %v214_v11, %v218_v12  ;;  %v222_v19 = vld [vmem:[#allocation5 + $0x288] sm:$0xff]  ;;  %v8572_v22 = vcombine.low %v214_v11, %v218_v12  ;;  %v8579_v23 = vcombine.high %v221_v17, %v225_v18  ;;  %v229_v25 = vld [vmem:[#allocation5 + $0x2c0] sm:$0xff] }
  0x95   :  { %v226_v20 = vld [vmem:[#allocation5 + $0x2a8] sm:$0xff]  ;;  %v233_v26 = vld [vmem:[#allocation5 + $0x2e0] sm:$0xff]  ;;  %v8578_v29 = vcombine.low %v221_v17, %v225_v18  ;;  %v120_v17 = vld [vmem:[#allocation2 + $0x18] sm:$0xff] }
  0x96   :  { %v8581_v24 = vcombine.high %v222_v19, %v226_v20  ;;  %v230_v27 = vld [vmem:[#allocation5 + $0x2c8] sm:$0xff]  ;;  %v8580_v30 = vcombine.low %v222_v19, %v226_v20  ;;  %v8587_v31 = vcombine.high %v229_v25, %v233_v26  ;;  %v237_v33 = vld [vmem:[#allocation5 + $0x300] sm:$0xff]  ;;  %v8586_v37 = vcombine.low %v229_v25, %v233_v26  ;;  %v128_v18 = vld [vmem:[#allocation2 + $0x58] sm:$0xff] }
  0x97   :  { %3266 = vmatpush1.bf16.msra.mxu0 %v8538_v50  ;;  %3438 = vmatpush1.bf16.msra.mxu1 %v8540_v51  ;;  %v234_v28 = vld [vmem:[#allocation5 + $0x2e8] sm:$0xff]  ;;  %v241_v34 = vld [vmem:[#allocation5 + $0x320] sm:$0xff]  ;;  %v10214_v25 = vpack.c.bf16 %v128_v18, %v120_v17 }
  0x98   :  { %3267 = vmatprep.subr.bf16.mxu0 %v8547_v52  ;;  %3439 = vmatprep.subr.bf16.mxu1 %v8549_v55  ;;  %v8589_v32 = vcombine.high %v230_v27, %v234_v28  ;;  %v238_v35 = vld [vmem:[#allocation5 + $0x308] sm:$0xff]  ;;  %v8588_v38 = vcombine.low %v230_v27, %v234_v28  ;;  %v8595_v39 = vcombine.high %v237_v33, %v241_v34  ;;  %v245_v41 = vld [vmem:[#allocation5 + $0x340] sm:$0xff] }
  0x99   :  { %v242_v36 = vld [vmem:[#allocation5 + $0x328] sm:$0xff]  ;;  %v249_v42 = vld [vmem:[#allocation5 + $0x360] sm:$0xff]  ;;  %v8594_v45 = vcombine.low %v237_v33, %v241_v34 }
  0x9a   :  { %v8597_v40 = vcombine.high %v238_v35, %v242_v36  ;;  %v246_v43 = vld [vmem:[#allocation5 + $0x348] sm:$0xff]  ;;  %v8596_v46 = vcombine.low %v238_v35, %v242_v36  ;;  %v8603_v47 = vcombine.high %v245_v41, %v249_v42  ;;  %v253_v49 = vld [vmem:[#allocation5 + $0x380] sm:$0xff]  ;;  %v8602_v53 = vcombine.low %v245_v41, %v249_v42 }
  0x9b   :  { %3268 = vmatpush1.bf16.msra.mxu0 %v8546_v61  ;;  %3440 = vmatpush1.bf16.msra.mxu1 %v8548_v62  ;;  %v250_v44 = vld [vmem:[#allocation5 + $0x368] sm:$0xff]  ;;  %v257_v50 = vld [vmem:[#allocation5 + $0x3a0] sm:$0xff] }
  0x9c   :  { %3269 = vmatprep.subr.bf16.mxu0 %v8555_v63  ;;  %3441 = vmatprep.subr.bf16.mxu1 %v8557_v0  ;;  %v8605_v48 = vcombine.high %v246_v43, %v250_v44  ;;  %v254_v51 = vld [vmem:[#allocation5 + $0x388] sm:$0xff]  ;;  %v8604_v54 = vcombine.low %v246_v43, %v250_v44  ;;  %v8611_v55 = vcombine.high %v253_v49, %v257_v50  ;;  %v261_v57 = vld [vmem:[#allocation5 + $0x3c0] sm:$0xff] }
  0x9d   :  { %v258_v52 = vld [vmem:[#allocation5 + $0x3a8] sm:$0xff]  ;;  %v265_v59 = vld [vmem:[#allocation5 + $0x3e0] sm:$0xff]  ;;  %v8610_v62 = vcombine.low %v253_v49, %v257_v50 }
  0x9e   :  { %v8613_v56 = vcombine.high %v254_v51, %v258_v52  ;;  %v262_v60 = vld [vmem:[#allocation5 + $0x3c8] sm:$0xff]  ;;  %v8612_v63 = vcombine.low %v254_v51, %v258_v52  ;;  %v8619_v0 = vcombine.high %v261_v57, %v265_v59  ;;  %v269_v2 = vld [vmem:[#allocation5 + $0x400] sm:$0xff] }
  0x9f   :  { %3270 = vmatpush1.bf16.msra.mxu0 %v8554_v5  ;;  %3442 = vmatpush1.bf16.msra.mxu1 %v8556_v6  ;;  %v266_v61 = vld [vmem:[#allocation5 + $0x3e8] sm:$0xff]  ;;  %v273_v3 = vld [vmem:[#allocation5 + $0x420] sm:$0xff]  ;;  %v8618_v6 = vcombine.low %v261_v57, %v265_v59 }
  0xa0   :  { %3271 = vmatprep.subr.bf16.mxu0 %v8563_v7  ;;  %3443 = vmatprep.subr.bf16.mxu1 %v8565_v8  ;;  %v8621_v1 = vcombine.high %v262_v60, %v266_v61  ;;  %v270_v4 = vld [vmem:[#allocation5 + $0x408] sm:$0xff]  ;;  %v117_v7 = vld [vmem:[#allocation2] sm:$0xff]  ;;  %v8620_v9 = vcombine.low %v262_v60, %v266_v61  ;;  %v8627_v10 = vcombine.high %v269_v2, %v273_v3 }
  0xa1   :  { %v274_v5 = vld [vmem:[#allocation5 + $0x428] sm:$0xff]  ;;  %v125_v8 = vld [vmem:[#allocation2 + $0x40] sm:$0xff]  ;;  %v8626_v19 = vcombine.low %v269_v2, %v273_v3 }
  0xa2   :  { %v8629_v11 = vcombine.high %v270_v4, %v274_v5  ;;  %v277_v12 = vld [vmem:[#allocation5 + $0x440] sm:$0xff]  ;;  %v8628_v20 = vcombine.low %v270_v4, %v274_v5  ;;  %v286_v26 = vld [vmem:[#allocation5 + $0x488] sm:$0xff] }
  0xa3   :  { %3272 = vmatpush1.bf16.msra.mxu0 %v8562_v13  ;;  %3444 = vmatpush1.bf16.msra.mxu1 %v8564_v14  ;;  %v281_v13 = vld [vmem:[#allocation5 + $0x460] sm:$0xff]  ;;  %v278_v14 = vld [vmem:[#allocation5 + $0x448] sm:$0xff] }
  0xa4   :  { %3273 = vmatprep.subr.bf16.mxu0 %v8571_v15  ;;  %3445 = vmatprep.subr.bf16.mxu1 %v8573_v16  ;;  %v10212_v15 = vpack.c.bf16 %v125_v8, %v117_v7  ;;  %v282_v16 = vld [vmem:[#allocation5 + $0x468] sm:$0xff]  ;;  %v8634_v28 = vcombine.low %v277_v12, %v281_v13  ;;  %v333_v8 = vld [vmem:[#allocation5 + $0x600] sm:$0xff] }
  0xa5   :  { %v290_v27 = vld [vmem:[#allocation5 + $0x4a8] sm:$0xff]  ;;  %v341_v17 = vld [vmem:[#allocation5 + $0x640] sm:$0xff] }
  0xa6   :  { %v8645_v33 = vcombine.high %v286_v26, %v290_v27  ;;  %v294_v34 = vld [vmem:[#allocation5 + $0x4c8] sm:$0xff]  ;;  %v345_v18 = vld [vmem:[#allocation5 + $0x660] sm:$0xff] }
  0xa7   :  { %3274 = vmatpush1.bf16.msra.mxu0 %v8570_v21  ;;  %3446 = vmatpush1.bf16.msra.mxu1 %v8572_v22  ;;  %v8635_v21 = vcombine.high %v277_v12, %v281_v13  ;;  %v8637_v22 = vcombine.high %v278_v14, %v282_v16  ;;  %v298_v35 = vld [vmem:[#allocation5 + $0x4e8] sm:$0xff] }
  0xa8   :  { %3275 = vmatprep.subr.bf16.mxu0 %v8579_v23  ;;  %3447 = vmatprep.subr.bf16.mxu1 %v8581_v24  ;;  %v285_v23 = vld [vmem:[#allocation5 + $0x480] sm:$0xff]  ;;  %v302_v41 = vld [vmem:[#allocation5 + $0x508] sm:$0xff]  ;;  %v8653_v42 = vcombine.high %v294_v34, %v298_v35 }
  0xa9   :  { %v289_v24 = vld [vmem:[#allocation5 + $0x4a0] sm:$0xff]  ;;  %v306_v43 = vld [vmem:[#allocation5 + $0x528] sm:$0xff] }
  0xaa   :  { %v8642_v36 = vcombine.low %v285_v23, %v289_v24  ;;  %v310_v49 = vld [vmem:[#allocation5 + $0x548] sm:$0xff]  ;;  %v8661_v50 = vcombine.high %v302_v41, %v306_v43 }
  0xab   :  { %3276 = vmatpush1.bf16.msra.mxu0 %v8578_v29  ;;  %3448 = vmatpush1.bf16.msra.mxu1 %v8580_v30  ;;  %v8636_v29 = vcombine.low %v278_v14, %v282_v16  ;;  %v8643_v30 = vcombine.high %v285_v23, %v289_v24  ;;  %v314_v51 = vld [vmem:[#allocation5 + $0x568] sm:$0xff]  ;;  %v8699_v24 = vcombine.high %v341_v17, %v345_v18 }
  0xac   :  { %3277 = vmatprep.subr.bf16.mxu0 %v8587_v31  ;;  %3449 = vmatprep.subr.bf16.mxu1 %v8589_v32  ;;  %v293_v31 = vld [vmem:[#allocation5 + $0x4c0] sm:$0xff]  ;;  %v318_v57 = vld [vmem:[#allocation5 + $0x588] sm:$0xff]  ;;  %v8669_v59 = vcombine.high %v310_v49, %v314_v51 }
  0xad   :  { %v297_v32 = vld [vmem:[#allocation5 + $0x4e0] sm:$0xff]  ;;  %v322_v60 = vld [vmem:[#allocation5 + $0x5a8] sm:$0xff] }
  0xae   :  { %v8650_v44 = vcombine.low %v293_v31, %v297_v32  ;;  %v326_v2 = vld [vmem:[#allocation5 + $0x5c8] sm:$0xff]  ;;  %v8677_v3 = vcombine.high %v318_v57, %v322_v60 }
  0xaf   :  { %3278 = vmatpush1.bf16.msra.mxu0 %v8586_v37  ;;  %3450 = vmatpush1.bf16.msra.mxu1 %v8588_v38  ;;  %v8644_v37 = vcombine.low %v286_v26, %v290_v27  ;;  %v8651_v38 = vcombine.high %v293_v31, %v297_v32  ;;  %v330_v4 = vld [vmem:[#allocation5 + $0x5e8] sm:$0xff]  ;;  %v349_v26 = vld [vmem:[#allocation5 + $0x680] sm:$0xff]  ;;  %v8698_v31 = vcombine.low %v341_v17, %v345_v18  ;;  %v119_v17 = vld [vmem:[#allocation2 + $0x10] sm:$0xff] }
  0xb0   :  { %3279 = vmatprep.subr.bf16.mxu0 %v8595_v39  ;;  %3451 = vmatprep.subr.bf16.mxu1 %v8597_v40  ;;  %v301_v39 = vld [vmem:[#allocation5 + $0x500] sm:$0xff]  ;;  %v338_v12 = vld [vmem:[#allocation5 + $0x628] sm:$0xff]  ;;  %v8684_v14 = vcombine.low %v326_v2, %v330_v4  ;;  %v127_v18 = vld [vmem:[#allocation2 + $0x50] sm:$0xff] }
  0xb1   :  { %v305_v40 = vld [vmem:[#allocation5 + $0x520] sm:$0xff] }
  0xb2   :  { %v8658_v52 = vcombine.low %v301_v39, %v305_v40  ;;  %v353_v27 = vld [vmem:[#allocation5 + $0x6a0] sm:$0xff] }
  0xb3   :  { %3280 = vmatpush1.bf16.msra.mxu0 %v8594_v45  ;;  %3452 = vmatpush1.bf16.msra.mxu1 %v8596_v46  ;;  %v8652_v45 = vcombine.low %v294_v34, %v298_v35  ;;  %v8659_v46 = vcombine.high %v301_v39, %v305_v40  ;;  %v357_v34 = vld [vmem:[#allocation5 + $0x6c0] sm:$0xff]  ;;  %v8706_v39 = vcombine.low %v349_v26, %v353_v27 }
  0xb4   :  { %3281 = vmatprep.subr.bf16.mxu0 %v8603_v47  ;;  %3453 = vmatprep.subr.bf16.mxu1 %v8605_v48  ;;  %v309_v47 = vld [vmem:[#allocation5 + $0x540] sm:$0xff] }
  0xb5   :  { %v313_v48 = vld [vmem:[#allocation5 + $0x560] sm:$0xff] }
  0xb6   :  { %v8666_v61 = vcombine.low %v309_v47, %v313_v48  ;;  %v361_v35 = vld [vmem:[#allocation5 + $0x6e0] sm:$0xff] }
  0xb7   :  { %3282 = vmatpush1.bf16.msra.mxu0 %v8602_v53  ;;  %3454 = vmatpush1.bf16.msra.mxu1 %v8604_v54  ;;  %v8660_v53 = vcombine.low %v302_v41, %v306_v43  ;;  %v8667_v54 = vcombine.high %v309_v47, %v313_v48  ;;  %v8715_v41 = vcombine.high %v357_v34, %v361_v35  ;;  %v369_v43 = vld [vmem:[#allocation5 + $0x720] sm:$0xff] }
  0xb8   :  { %3283 = vmatprep.subr.bf16.mxu0 %v8611_v55  ;;  %3455 = vmatprep.subr.bf16.mxu1 %v8613_v56  ;;  %v317_v55 = vld [vmem:[#allocation5 + $0x580] sm:$0xff]  ;;  %v8714_v47 = vcombine.low %v357_v34, %v361_v35 }
  0xb9   :  { %v321_v56 = vld [vmem:[#allocation5 + $0x5a0] sm:$0xff] }
  0xba   :  { %v8674_v5 = vcombine.low %v317_v55, %v321_v56  ;;  %v413_v34 = vld [vmem:[#allocation5 + $0x880] sm:$0xff] }
  0xbb   :  { %3284 = vmatpush1.bf16.msra.mxu0 %v8610_v62  ;;  %3456 = vmatpush1.bf16.msra.mxu1 %v8612_v63  ;;  %v8668_v62 = vcombine.low %v310_v49, %v314_v51  ;;  %v8675_v63 = vcombine.high %v317_v55, %v321_v56  ;;  %v377_v51 = vld [vmem:[#allocation5 + $0x760] sm:$0xff] }
  0xbc   :  { %3285 = vmatprep.subr.bf16.mxu0 %v8619_v0  ;;  %3457 = vmatprep.subr.bf16.mxu1 %v8621_v1  ;;  %v325_v0 = vld [vmem:[#allocation5 + $0x5c0] sm:$0xff] }
  0xbd   :  { %v329_v1 = vld [vmem:[#allocation5 + $0x5e0] sm:$0xff] }
  0xbe   :  { %v8683_v7 = vcombine.high %v325_v0, %v329_v1  ;;  %v8682_v13 = vcombine.low %v325_v0, %v329_v1 }
  0xbf   :  { %3286 = vmatpush1.bf16.msra.mxu0 %v8618_v6  ;;  %3458 = vmatpush1.bf16.msra.mxu1 %v8620_v9  ;;  %v8676_v6 = vcombine.low %v318_v57, %v322_v60  ;;  %v337_v9 = vld [vmem:[#allocation5 + $0x620] sm:$0xff] }
  0xc0   :  { %3298 = vmatprep.subr.bf16.mxu0 %v8627_v10  ;;  %3470 = vmatprep.subr.bf16.mxu1 %v8629_v11  ;;  %v334_v10 = vld [vmem:[#allocation5 + $0x608] sm:$0xff]  ;;  %v8685_v11 = vcombine.high %v326_v2, %v330_v4  ;;  %v8691_v16 = vcombine.high %v333_v8, %v337_v9  ;;  %v385_v60 = vld [vmem:[#allocation5 + $0x7a0] sm:$0xff] }
  0xc1   :  { %v8692_v23 = vcombine.low %v334_v10, %v338_v12  ;;  %v393_v4 = vld [vmem:[#allocation5 + $0x7e0] sm:$0xff] }
  0xc2   :  { %3288 = vmatmul.mubr.bf16.vlgmr.msra.gmra.mrb[0].mxu0 %v10212_v15  ;;  %3460 = vmatmul.mubr.bf16.vlgmr.msra.gmra.mrb[0].mxu1 %v10212_v15 }
  0xc3   :  { %3299 = vmatpush1.bf16.msra.mxu0 %v8626_v19  ;;  %3471 = vmatpush1.bf16.msra.mxu1 %v8628_v20  ;;  %v342_v19 = vld [vmem:[#allocation5 + $0x648] sm:$0xff]  ;;  %v8693_v20 = vcombine.high %v334_v10, %v338_v12  ;;  %v401_v12 = vld [vmem:[#allocation5 + $0x820] sm:$0xff] }
  0xc4   :  { %3300 = vmatprep.subr.bf16.mxu0 %v8635_v21  ;;  %3472 = vmatprep.subr.bf16.mxu1 %v8637_v22  ;;  %v346_v21 = vld [vmem:[#allocation5 + $0x668] sm:$0xff]  ;;  %v8690_v22 = vcombine.low %v333_v8, %v337_v9  ;;  %v397_v9 = vld [vmem:[#allocation5 + $0x800] sm:$0xff] }
  0xc5   :  { %3330 = vmatprep.mubr.bf16.mxu0 %v10214_v25  ;;  %3502 = vmatprep.mubr.bf16.mxu1 %v10214_v25  ;;  %v8700_v32 = vcombine.low %v342_v19, %v346_v21 }
  0xc7   :  { %3301 = vmatpush1.bf16.msra.mxu0 %v8634_v28  ;;  %3473 = vmatpush1.bf16.msra.mxu1 %v8636_v29  ;;  %v350_v28 = vld [vmem:[#allocation5 + $0x688] sm:$0xff]  ;;  %v8701_v29 = vcombine.high %v342_v19, %v346_v21  ;;  %v409_v21 = vld [vmem:[#allocation5 + $0x860] sm:$0xff] }
  0xc8   :  { %3302 = vmatprep.subr.bf16.mxu0 %v8643_v30  ;;  %3474 = vmatprep.subr.bf16.mxu1 %v8645_v33  ;;  %v354_v30 = vld [vmem:[#allocation5 + $0x6a8] sm:$0xff]  ;;  %v8707_v33 = vcombine.high %v349_v26, %v353_v27 }
  0xc9   :  { %v8708_v40 = vcombine.low %v350_v28, %v354_v30  ;;  %v410_v26 = vld [vmem:[#allocation5 + $0x868] sm:$0xff] }
  0xca   :  { %v122_v27 = vld [vmem:[#allocation2 + $0x28] sm:$0xff] }
  0xcb   :  { %3303 = vmatpush1.bf16.msra.mxu0 %v8642_v36  ;;  %3475 = vmatpush1.bf16.msra.mxu1 %v8644_v37  ;;  %v358_v36 = vld [vmem:[#allocation5 + $0x6c8] sm:$0xff]  ;;  %v8709_v37 = vcombine.high %v350_v28, %v354_v30  ;;  %v10220_v30 = vpack.c.bf16 %v127_v18, %v119_v17 }
  0xcc   :  { %3304 = vmatprep.subr.bf16.mxu0 %v8651_v38  ;;  %3476 = vmatprep.subr.bf16.mxu1 %v8653_v42  ;;  %v362_v38 = vld [vmem:[#allocation5 + $0x6e8] sm:$0xff]  ;;  %v365_v42 = vld [vmem:[#allocation5 + $0x700] sm:$0xff] }
  0xcd   :  { %v8716_v48 = vcombine.low %v358_v36, %v362_v38  ;;  %v8723_v49 = vcombine.high %v365_v42, %v369_v43  ;;  %v8722_v55 = vcombine.low %v365_v42, %v369_v43  ;;  %v421_v43 = vld [vmem:[#allocation5 + $0x8c0] sm:$0xff]  ;;  %v458_v17 = vld [vmem:[#allocation5 + $0x9e8] sm:$0xff] }
  0xcf   :  { %3305 = vmatpush1.bf16.msra.mxu0 %v8650_v44  ;;  %3477 = vmatpush1.bf16.msra.mxu1 %v8652_v45  ;;  %v366_v44 = vld [vmem:[#allocation5 + $0x708] sm:$0xff]  ;;  %v8717_v45 = vcombine.high %v358_v36, %v362_v38  ;;  %v417_v36 = vld [vmem:[#allocation5 + $0x8a0] sm:$0xff] }
  0xd0   :  { %3306 = vmatprep.subr.bf16.mxu0 %v8659_v46  ;;  %3478 = vmatprep.subr.bf16.mxu1 %v8661_v50  ;;  %v370_v46 = vld [vmem:[#allocation5 + $0x728] sm:$0xff]  ;;  %v373_v50 = vld [vmem:[#allocation5 + $0x740] sm:$0xff]  ;;  %v8771_v42 = vcombine.high %v413_v34, %v417_v36 }
  0xd1   :  { %v8724_v56 = vcombine.low %v366_v44, %v370_v46  ;;  %v8731_v57 = vcombine.high %v373_v50, %v377_v51  ;;  %v8730_v0 = vcombine.low %v373_v50, %v377_v51  ;;  %v418_v38 = vld [vmem:[#allocation5 + $0x8a8] sm:$0xff] }
  0xd3   :  { %3307 = vmatpush1.bf16.msra.mxu0 %v8658_v52  ;;  %3479 = vmatpush1.bf16.msra.mxu1 %v8660_v53  ;;  %v374_v52 = vld [vmem:[#allocation5 + $0x748] sm:$0xff]  ;;  %v8725_v53 = vcombine.high %v366_v44, %v370_v46  ;;  %v425_v44 = vld [vmem:[#allocation5 + $0x8e0] sm:$0xff] }
  0xd4   :  { %3308 = vmatprep.subr.bf16.mxu0 %v8667_v54  ;;  %3480 = vmatprep.subr.bf16.mxu1 %v8669_v59  ;;  %v378_v54 = vld [vmem:[#allocation5 + $0x768] sm:$0xff]  ;;  %v381_v59 = vld [vmem:[#allocation5 + $0x780] sm:$0xff]  ;;  %v8779_v50 = vcombine.high %v421_v43, %v425_v44 }
  0xd5   :  { %v8732_v1 = vcombine.low %v374_v52, %v378_v54  ;;  %v8739_v2 = vcombine.high %v381_v59, %v385_v60  ;;  %v8738_v8 = vcombine.low %v381_v59, %v385_v60 }
  0xd7   :  { %3309 = vmatpush1.bf16.msra.mxu0 %v8666_v61  ;;  %3481 = vmatpush1.bf16.msra.mxu1 %v8668_v62  ;;  %v382_v61 = vld [vmem:[#allocation5 + $0x788] sm:$0xff]  ;;  %v8733_v62 = vcombine.high %v374_v52, %v378_v54  ;;  %v429_v52 = vld [vmem:[#allocation5 + $0x900] sm:$0xff] }
  0xd8   :  { %3310 = vmatprep.subr.bf16.mxu0 %v8675_v63  ;;  %3482 = vmatprep.subr.bf16.mxu1 %v8677_v3  ;;  %v386_v63 = vld [vmem:[#allocation5 + $0x7a8] sm:$0xff]  ;;  %v389_v3 = vld [vmem:[#allocation5 + $0x7c0] sm:$0xff] }
  0xd9   :  { %v8740_v10 = vcombine.low %v382_v61, %v386_v63  ;;  %v8746_v19 = vcombine.low %v389_v3, %v393_v4  ;;  %v430_v54 = vld [vmem:[#allocation5 + $0x908] sm:$0xff] }
  0xdb   :  { %3311 = vmatpush1.bf16.msra.mxu0 %v8674_v5  ;;  %3483 = vmatpush1.bf16.msra.mxu1 %v8676_v6  ;;  %v390_v5 = vld [vmem:[#allocation5 + $0x7c8] sm:$0xff]  ;;  %v8741_v6 = vcombine.high %v382_v61, %v386_v63  ;;  %v437_v61 = vld [vmem:[#allocation5 + $0x940] sm:$0xff] }
  0xdc   :  { %3312 = vmatprep.subr.bf16.mxu0 %v8683_v7  ;;  %3484 = vmatprep.subr.bf16.mxu1 %v8685_v11  ;;  %v394_v7 = vld [vmem:[#allocation5 + $0x7e8] sm:$0xff]  ;;  %v8747_v11 = vcombine.high %v389_v3, %v393_v4 }
  0xdd   :  { %v438_v63 = vld [vmem:[#allocation5 + $0x948] sm:$0xff] }
  0xdf   :  { %3313 = vmatpush1.bf16.msra.mxu0 %v8682_v13  ;;  %3485 = vmatpush1.bf16.msra.mxu1 %v8684_v14  ;;  %v398_v13 = vld [vmem:[#allocation5 + $0x808] sm:$0xff] }
  0xe0   :  { %3314 = vmatprep.subr.bf16.mxu0 %v8691_v16  ;;  %3486 = vmatprep.subr.bf16.mxu1 %v8693_v20  ;;  %v402_v14 = vld [vmem:[#allocation5 + $0x828] sm:$0xff]  ;;  %v8749_v16 = vcombine.high %v390_v5, %v394_v7  ;;  %v405_v20 = vld [vmem:[#allocation5 + $0x840] sm:$0xff] }
  0xe1   :  { %v8757_v28 = vcombine.high %v398_v13, %v402_v14 }
  0xe3   :  { %3315 = vmatpush1.bf16.msra.mxu0 %v8690_v22  ;;  %3487 = vmatpush1.bf16.msra.mxu1 %v8692_v23  ;;  %v8748_v22 = vcombine.low %v390_v5, %v394_v7  ;;  %v8755_v23 = vcombine.high %v397_v9, %v401_v12  ;;  %v445_v5 = vld [vmem:[#allocation5 + $0x980] sm:$0xff]  ;;  %v446_v7 = vld [vmem:[#allocation5 + $0x988] sm:$0xff] }
  0xe4   :  { %3316 = vmatprep.subr.bf16.mxu0 %v8699_v24  ;;  %3488 = vmatprep.subr.bf16.mxu1 %v8701_v29  ;;  %v406_v24 = vld [vmem:[#allocation5 + $0x848] sm:$0xff] }
  0xe5   :  { %v130_v29 = vld [vmem:[#allocation2 + $0x68] sm:$0xff]  ;;  %v8765_v35 = vcombine.high %v406_v24, %v410_v26 }
  0xe7   :  { %3317 = vmatpush1.bf16.msra.mxu0 %v8698_v31  ;;  %3489 = vmatpush1.bf16.msra.mxu1 %v8700_v32  ;;  %v8754_v31 = vcombine.low %v397_v9, %v401_v12  ;;  %v8756_v32 = vcombine.low %v398_v13, %v402_v14  ;;  %v453_v13 = vld [vmem:[#allocation5 + $0x9c0] sm:$0xff] }
  0xe8   :  { %3318 = vmatprep.subr.bf16.mxu0 %v8707_v33  ;;  %3490 = vmatprep.subr.bf16.mxu1 %v8709_v37  ;;  %v8763_v33 = vcombine.high %v405_v20, %v409_v21  ;;  %v414_v37 = vld [vmem:[#allocation5 + $0x888] sm:$0xff]  ;;  %v457_v14 = vld [vmem:[#allocation5 + $0x9e0] sm:$0xff] }
  0xe9   :  { %v8773_v46 = vcombine.high %v414_v37, %v418_v38 }
  0xeb   :  { %3319 = vmatpush1.bf16.msra.mxu0 %v8706_v39  ;;  %3491 = vmatpush1.bf16.msra.mxu1 %v8708_v40  ;;  %v10222_v39 = vpack.c.bf16 %v130_v29, %v122_v27  ;;  %v8762_v40 = vcombine.low %v405_v20, %v409_v21  ;;  %v8811_v20 = vcombine.high %v453_v13, %v457_v14 }
  0xec   :  { %3320 = vmatprep.subr.bf16.mxu0 %v8715_v41  ;;  %3492 = vmatprep.subr.bf16.mxu1 %v8717_v45  ;;  %v8764_v41 = vcombine.low %v406_v24, %v410_v26  ;;  %v422_v45 = vld [vmem:[#allocation5 + $0x8c8] sm:$0xff]  ;;  %v8810_v27 = vcombine.low %v453_v13, %v457_v14 }
  0xed   :  { %v462_v24 = vld [vmem:[#allocation5 + $0xa08] sm:$0xff] }
  0xee   :  { %v466_v26 = vld [vmem:[#allocation5 + $0xa28] sm:$0xff] }
  0xef   :  { %3321 = vmatpush1.bf16.msra.mxu0 %v8714_v47  ;;  %3493 = vmatpush1.bf16.msra.mxu1 %v8716_v48  ;;  %v426_v47 = vld [vmem:[#allocation5 + $0x8e8] sm:$0xff]  ;;  %v8770_v48 = vcombine.low %v413_v34, %v417_v36 }
  0xf0   :  { %3322 = vmatprep.subr.bf16.mxu0 %v8723_v49  ;;  %3494 = vmatprep.subr.bf16.mxu1 %v8725_v53  ;;  %v8772_v49 = vcombine.low %v414_v37, %v418_v38  ;;  %v8781_v51 = vcombine.high %v422_v45, %v426_v47  ;;  %v433_v53 = vld [vmem:[#allocation5 + $0x920] sm:$0xff]  ;;  %v470_v34 = vld [vmem:[#allocation5 + $0xa48] sm:$0xff]  ;;  %v8820_v37 = vcombine.low %v462_v24, %v466_v26 }
  0xf1   :  { %v8787_v59 = vcombine.high %v429_v52, %v433_v53  ;;  %v514_v13 = vld [vmem:[#allocation5 + $0xba8] sm:$0xff] }
  0xf3   :  { %3323 = vmatpush1.bf16.msra.mxu0 %v8722_v55  ;;  %3495 = vmatpush1.bf16.msra.mxu1 %v8724_v56  ;;  %v434_v55 = vld [vmem:[#allocation5 + $0x928] sm:$0xff]  ;;  %v8778_v56 = vcombine.low %v421_v43, %v425_v44 }
  0xf4   :  { %3324 = vmatprep.subr.bf16.mxu0 %v8731_v57  ;;  %3496 = vmatprep.subr.bf16.mxu1 %v8733_v62  ;;  %v8780_v57 = vcombine.low %v422_v45, %v426_v47  ;;  %v8789_v60 = vcombine.high %v430_v54, %v434_v55  ;;  %v441_v62 = vld [vmem:[#allocation5 + $0x960] sm:$0xff]  ;;  %v478_v43 = vld [vmem:[#allocation5 + $0xa88] sm:$0xff] }
  0xf5   :  { %v8795_v3 = vcombine.high %v437_v61, %v441_v62  ;;  %v8794_v9 = vcombine.low %v437_v61, %v441_v62  ;;  %v482_v44 = vld [vmem:[#allocation5 + $0xaa8] sm:$0xff] }
  0xf6   :  { %v498_v61 = vld [vmem:[#allocation5 + $0xb28] sm:$0xff] }
  0xf7   :  { %3325 = vmatpush1.bf16.msra.mxu0 %v8730_v0  ;;  %3497 = vmatpush1.bf16.msra.mxu1 %v8732_v1  ;;  %v442_v0 = vld [vmem:[#allocation5 + $0x968] sm:$0xff]  ;;  %v8786_v1 = vcombine.low %v429_v52, %v433_v53 }
  0xf8   :  { %3326 = vmatprep.subr.bf16.mxu0 %v8739_v2  ;;  %3498 = vmatprep.subr.bf16.mxu1 %v8741_v6  ;;  %v8788_v2 = vcombine.low %v430_v54, %v434_v55  ;;  %v8797_v4 = vcombine.high %v438_v63, %v442_v0  ;;  %v449_v6 = vld [vmem:[#allocation5 + $0x9a0] sm:$0xff]  ;;  %v490_v52 = vld [vmem:[#allocation5 + $0xae8] sm:$0xff]  ;;  %v8836_v54 = vcombine.low %v478_v43, %v482_v44 }
  0xf9   :  { %v8802_v18 = vcombine.low %v445_v5, %v449_v6 }
  0xfb   :  { %3327 = vmatpush1.bf16.msra.mxu0 %v8738_v8  ;;  %3499 = vmatpush1.bf16.msra.mxu1 %v8740_v10  ;;  %v450_v8 = vld [vmem:[#allocation5 + $0x9a8] sm:$0xff]  ;;  %v8796_v10 = vcombine.low %v438_v63, %v442_v0 }
  0xfc   :  { %3328 = vmatprep.subr.bf16.mxu0 %v8747_v11  ;;  %3500 = vmatprep.subr.bf16.mxu1 %v8749_v16  ;;  %v8803_v11 = vcombine.high %v445_v5, %v449_v6  ;;  %v8805_v12 = vcombine.high %v446_v7, %v450_v8  ;;  %v454_v16 = vld [vmem:[#allocation5 + $0x9c8] sm:$0xff] }
  0xfd   :  { %v8813_v21 = vcombine.high %v454_v16, %v458_v17  ;;  %v506_v5 = vld [vmem:[#allocation5 + $0xb68] sm:$0xff] }
  0xff   :  { %3329 = vmatpush1.bf16.msra.mxu0 %v8746_v19  ;;  %3501 = vmatpush1.bf16.msra.mxu1 %v8748_v22  ;;  %v8804_v19 = vcombine.low %v446_v7, %v450_v8  ;;  %v461_v22 = vld [vmem:[#allocation5 + $0xa00] sm:$0xff] }
 0x100   :  { %3341 = vmatprep.subr.bf16.mxu0 %v8755_v23  ;;  %3513 = vmatprep.subr.bf16.mxu1 %v8757_v28  ;;  %v465_v23 = vld [vmem:[#allocation5 + $0xa20] sm:$0xff]  ;;  %v8812_v28 = vcombine.low %v454_v16, %v458_v17 }
 0x101   :  { %v8819_v29 = vcombine.high %v461_v22, %v465_v23  ;;  %v8818_v36 = vcombine.low %v461_v22, %v465_v23  ;;  %v522_v22 = vld [vmem:[#allocation5 + $0xbe8] sm:$0xff] }
 0x102   :  { %3331 = vmatmul.mubr.bf16.vlgmr.msra.gmra.mrb[0].mxu0 %v10220_v30  ;;  %3503 = vmatmul.mubr.bf16.vlgmr.msra.gmra.mrb[0].mxu1 %v10220_v30 }
 0x103   :  { %3342 = vmatpush1.bf16.msra.mxu0 %v8754_v31  ;;  %3514 = vmatpush1.bf16.msra.mxu1 %v8756_v32  ;;  %v8821_v31 = vcombine.high %v462_v24, %v466_v26  ;;  %v469_v32 = vld [vmem:[#allocation5 + $0xa40] sm:$0xff] }
 0x104   :  { %3343 = vmatprep.subr.bf16.mxu0 %v8763_v33  ;;  %3515 = vmatprep.subr.bf16.mxu1 %v8765_v35  ;;  %v473_v33 = vld [vmem:[#allocation5 + $0xa60] sm:$0xff]  ;;  %v474_v35 = vld [vmem:[#allocation5 + $0xa68] sm:$0xff] }
 0x105   :  { %3373 = vmatprep.mubr.bf16.mxu0 %v10222_v39  ;;  %3545 = vmatprep.mubr.bf16.mxu1 %v10222_v39  ;;  %v8827_v38 = vcombine.high %v469_v32, %v473_v33  ;;  %v8826_v45 = vcombine.low %v469_v32, %v473_v33  ;;  %v530_v32 = vld [vmem:[#allocation5 + $0xc28] sm:$0xff] }
 0x107   :  { %3344 = vmatpush1.bf16.msra.mxu0 %v8762_v40  ;;  %3516 = vmatpush1.bf16.msra.mxu1 %v8764_v41  ;;  %v8829_v40 = vcombine.high %v470_v34, %v474_v35  ;;  %v477_v41 = vld [vmem:[#allocation5 + $0xa80] sm:$0xff] }
 0x108   :  { %3345 = vmatprep.subr.bf16.mxu0 %v8771_v42  ;;  %3517 = vmatprep.subr.bf16.mxu1 %v8773_v46  ;;  %v481_v42 = vld [vmem:[#allocation5 + $0xaa0] sm:$0xff]  ;;  %v8828_v46 = vcombine.low %v470_v34, %v474_v35 }
 0x109   :  { %v8835_v47 = vcombine.high %v477_v41, %v481_v42  ;;  %v8834_v53 = vcombine.low %v477_v41, %v481_v42  ;;  %v121_v34 = vld [vmem:[#allocation2 + $0x20] sm:$0xff]  ;;  %v534_v42 = vld [vmem:[#allocation5 + $0xc48] sm:$0xff] }
 0x10a   :  { %v129_v35 = vld [vmem:[#allocation2 + $0x60] sm:$0xff] }
 0x10b   :  { %3346 = vmatpush1.bf16.msra.mxu0 %v8770_v48  ;;  %3518 = vmatpush1.bf16.msra.mxu1 %v8772_v49  ;;  %v8837_v48 = vcombine.high %v478_v43, %v482_v44  ;;  %v485_v49 = vld [vmem:[#allocation5 + $0xac0] sm:$0xff]  ;;  %v10228_v43 = vpack.c.bf16 %v129_v35, %v121_v34  ;;  %v538_v44 = vld [vmem:[#allocation5 + $0xc68] sm:$0xff] }
 0x10c   :  { %3347 = vmatprep.subr.bf16.mxu0 %v8779_v50  ;;  %3519 = vmatprep.subr.bf16.mxu1 %v8781_v51  ;;  %v489_v50 = vld [vmem:[#allocation5 + $0xae0] sm:$0xff]  ;;  %v486_v51 = vld [vmem:[#allocation5 + $0xac8] sm:$0xff] }
 0x10d   :  { %v8843_v55 = vcombine.high %v485_v49, %v489_v50  ;;  %v8842_v62 = vcombine.low %v485_v49, %v489_v50  ;;  %v8844_v63 = vcombine.low %v486_v51, %v490_v52  ;;  %v537_v41 = vld [vmem:[#allocation5 + $0xc60] sm:$0xff]  ;;  %v8893_v50 = vcombine.high %v534_v42, %v538_v44  ;;  %v582_v34 = vld [vmem:[#allocation5 + $0xdc8] sm:$0xff] }
 0x10e   :  { %v586_v35 = vld [vmem:[#allocation5 + $0xde8] sm:$0xff] }
 0x10f   :  { %3348 = vmatpush1.bf16.msra.mxu0 %v8778_v56  ;;  %3520 = vmatpush1.bf16.msra.mxu1 %v8780_v57  ;;  %v8845_v56 = vcombine.high %v486_v51, %v490_v52  ;;  %v493_v57 = vld [vmem:[#allocation5 + $0xb00] sm:$0xff] }
 0x110   :  { %3349 = vmatprep.subr.bf16.mxu0 %v8787_v59  ;;  %3521 = vmatprep.subr.bf16.mxu1 %v8789_v60  ;;  %v497_v59 = vld [vmem:[#allocation5 + $0xb20] sm:$0xff]  ;;  %v494_v60 = vld [vmem:[#allocation5 + $0xb08] sm:$0xff] }
 0x111   :  { %v8851_v0 = vcombine.high %v493_v57, %v497_v59  ;;  %v8850_v6 = vcombine.low %v493_v57, %v497_v59  ;;  %v8852_v7 = vcombine.low %v494_v60, %v498_v61  ;;  %v541_v51 = vld [vmem:[#allocation5 + $0xc80] sm:$0xff]  ;;  %v8892_v57 = vcombine.low %v534_v42, %v538_v44  ;;  %v590_v44 = vld [vmem:[#allocation5 + $0xe08] sm:$0xff] }
 0x112   :  { %v545_v52 = vld [vmem:[#allocation5 + $0xca0] sm:$0xff] }
 0x113   :  { %3350 = vmatpush1.bf16.msra.mxu0 %v8786_v1  ;;  %3522 = vmatpush1.bf16.msra.mxu1 %v8788_v2  ;;  %v8853_v1 = vcombine.high %v494_v60, %v498_v61  ;;  %v501_v2 = vld [vmem:[#allocation5 + $0xb40] sm:$0xff]  ;;  %v8899_v59 = vcombine.high %v541_v51, %v545_v52 }
 0x114   :  { %3351 = vmatprep.subr.bf16.mxu0 %v8795_v3  ;;  %3523 = vmatprep.subr.bf16.mxu1 %v8797_v4  ;;  %v505_v3 = vld [vmem:[#allocation5 + $0xb60] sm:$0xff]  ;;  %v502_v4 = vld [vmem:[#allocation5 + $0xb48] sm:$0xff] }
 0x115   :  { %v8859_v8 = vcombine.high %v501_v2, %v505_v3  ;;  %v8858_v14 = vcombine.low %v501_v2, %v505_v3  ;;  %v8860_v16 = vcombine.low %v502_v4, %v506_v5  ;;  %v549_v61 = vld [vmem:[#allocation5 + $0xcc0] sm:$0xff] }
 0x116   :  { %v593_v42 = vld [vmem:[#allocation5 + $0xe20] sm:$0xff] }
 0x117   :  { %3352 = vmatpush1.bf16.msra.mxu0 %v8794_v9  ;;  %3524 = vmatpush1.bf16.msra.mxu1 %v8796_v10  ;;  %v8861_v9 = vcombine.high %v502_v4, %v506_v5  ;;  %v509_v10 = vld [vmem:[#allocation5 + $0xb80] sm:$0xff] }
 0x118   :  { %3353 = vmatprep.subr.bf16.mxu0 %v8803_v11  ;;  %3525 = vmatprep.subr.bf16.mxu1 %v8805_v12  ;;  %v513_v11 = vld [vmem:[#allocation5 + $0xba0] sm:$0xff]  ;;  %v510_v12 = vld [vmem:[#allocation5 + $0xb88] sm:$0xff] }
 0x119   :  { %v8867_v17 = vcombine.high %v509_v10, %v513_v11  ;;  %v8866_v23 = vcombine.low %v509_v10, %v513_v11  ;;  %v8868_v24 = vcombine.low %v510_v12, %v514_v13  ;;  %v557_v5 = vld [vmem:[#allocation5 + $0xd00] sm:$0xff] }
 0x11b   :  { %3354 = vmatpush1.bf16.msra.mxu0 %v8802_v18  ;;  %3526 = vmatpush1.bf16.msra.mxu1 %v8804_v19  ;;  %v8869_v18 = vcombine.high %v510_v12, %v514_v13  ;;  %v517_v19 = vld [vmem:[#allocation5 + $0xbc0] sm:$0xff] }
 0x11c   :  { %3355 = vmatprep.subr.bf16.mxu0 %v8811_v20  ;;  %3527 = vmatprep.subr.bf16.mxu1 %v8813_v21  ;;  %v521_v20 = vld [vmem:[#allocation5 + $0xbe0] sm:$0xff]  ;;  %v518_v21 = vld [vmem:[#allocation5 + $0xbc8] sm:$0xff] }
 0x11d   :  { %v8875_v26 = vcombine.high %v517_v19, %v521_v20  ;;  %v8874_v33 = vcombine.low %v517_v19, %v521_v20  ;;  %v565_v13 = vld [vmem:[#allocation5 + $0xd40] sm:$0xff] }
 0x11f   :  { %3356 = vmatpush1.bf16.msra.mxu0 %v8810_v27  ;;  %3528 = vmatpush1.bf16.msra.mxu1 %v8812_v28  ;;  %v8877_v27 = vcombine.high %v518_v21, %v522_v22  ;;  %v525_v28 = vld [vmem:[#allocation5 + $0xc00] sm:$0xff] }
 0x120   :  { %3357 = vmatprep.subr.bf16.mxu0 %v8819_v29  ;;  %3529 = vmatprep.subr.bf16.mxu1 %v8821_v31  ;;  %v529_v29 = vld [vmem:[#allocation5 + $0xc20] sm:$0xff]  ;;  %v526_v31 = vld [vmem:[#allocation5 + $0xc08] sm:$0xff] }
 0x123   :  { %3358 = vmatpush1.bf16.msra.mxu0 %v8818_v36  ;;  %3530 = vmatpush1.bf16.msra.mxu1 %v8820_v37  ;;  %v8876_v36 = vcombine.low %v518_v21, %v522_v22  ;;  %v8883_v37 = vcombine.high %v525_v28, %v529_v29  ;;  %v573_v22 = vld [vmem:[#allocation5 + $0xd80] sm:$0xff] }
 0x124   :  { %3359 = vmatprep.subr.bf16.mxu0 %v8827_v38  ;;  %3531 = vmatprep.subr.bf16.mxu1 %v8829_v40  ;;  %v8885_v38 = vcombine.high %v526_v31, %v530_v32  ;;  %v533_v40 = vld [vmem:[#allocation5 + $0xc40] sm:$0xff] }
 0x125   :  { %v8891_v49 = vcombine.high %v533_v40, %v537_v41 }
 0x127   :  { %3360 = vmatpush1.bf16.msra.mxu0 %v8826_v45  ;;  %3532 = vmatpush1.bf16.msra.mxu1 %v8828_v46  ;;  %v124_v45 = vld [vmem:[#allocation2 + $0x38] sm:$0xff] }
 0x128   :  { %3361 = vmatprep.subr.bf16.mxu0 %v8835_v47  ;;  %3533 = vmatprep.subr.bf16.mxu1 %v8837_v48  ;;  %v132_v46 = vld [vmem:[#allocation2 + $0x78] sm:$0xff]  ;;  %v8882_v47 = vcombine.low %v525_v28, %v529_v29  ;;  %v8884_v48 = vcombine.low %v526_v31, %v530_v32  ;;  %v581_v32 = vld [vmem:[#allocation5 + $0xdc0] sm:$0xff] }
 0x12b   :  { %3362 = vmatpush1.bf16.msra.mxu0 %v8834_v53  ;;  %3534 = vmatpush1.bf16.msra.mxu1 %v8836_v54  ;;  %v10230_v53 = vpack.c.bf16 %v132_v46, %v124_v45  ;;  %v542_v54 = vld [vmem:[#allocation5 + $0xc88] sm:$0xff] }
 0x12c   :  { %3363 = vmatprep.subr.bf16.mxu0 %v8843_v55  ;;  %3535 = vmatprep.subr.bf16.mxu1 %v8845_v56  ;;  %v546_v55 = vld [vmem:[#allocation5 + $0xca8] sm:$0xff]  ;;  %v8890_v56 = vcombine.low %v533_v40, %v537_v41  ;;  %v8941_v40 = vcombine.high %v582_v34, %v586_v35  ;;  %v589_v41 = vld [vmem:[#allocation5 + $0xe00] sm:$0xff] }
 0x12d   :  { %v8901_v60 = vcombine.high %v542_v54, %v546_v55  ;;  %v8900_v2 = vcombine.low %v542_v54, %v546_v55  ;;  %v594_v45 = vld [vmem:[#allocation5 + $0xe28] sm:$0xff]  ;;  %v8946_v55 = vcombine.low %v589_v41, %v593_v42 }
 0x12e   :  { %v602_v54 = vld [vmem:[#allocation5 + $0xe68] sm:$0xff] }
 0x12f   :  { %3364 = vmatpush1.bf16.msra.mxu0 %v8842_v62  ;;  %3536 = vmatpush1.bf16.msra.mxu1 %v8844_v63  ;;  %v553_v62 = vld [vmem:[#allocation5 + $0xce0] sm:$0xff]  ;;  %v550_v63 = vld [vmem:[#allocation5 + $0xcc8] sm:$0xff] }
 0x130   :  { %3365 = vmatprep.subr.bf16.mxu0 %v8851_v0  ;;  %3537 = vmatprep.subr.bf16.mxu1 %v8853_v1  ;;  %v554_v0 = vld [vmem:[#allocation5 + $0xce8] sm:$0xff]  ;;  %v8898_v1 = vcombine.low %v541_v51, %v545_v52  ;;  %v8907_v3 = vcombine.high %v549_v61, %v553_v62  ;;  %v601_v51 = vld [vmem:[#allocation5 + $0xe60] sm:$0xff] }
 0x131   :  { %v8909_v4 = vcombine.high %v550_v63, %v554_v0  ;;  %v8908_v10 = vcombine.low %v550_v63, %v554_v0  ;;  %v598_v52 = vld [vmem:[#allocation5 + $0xe48] sm:$0xff] }
 0x132   :  { %v610_v63 = vld [vmem:[#allocation5 + $0xea8] sm:$0xff] }
 0x133   :  { %3366 = vmatpush1.bf16.msra.mxu0 %v8850_v6  ;;  %3538 = vmatpush1.bf16.msra.mxu1 %v8852_v7  ;;  %v561_v6 = vld [vmem:[#allocation5 + $0xd20] sm:$0xff]  ;;  %v558_v7 = vld [vmem:[#allocation5 + $0xd08] sm:$0xff] }
 0x134   :  { %3367 = vmatprep.subr.bf16.mxu0 %v8859_v8  ;;  %3539 = vmatprep.subr.bf16.mxu1 %v8861_v9  ;;  %v562_v8 = vld [vmem:[#allocation5 + $0xd28] sm:$0xff]  ;;  %v8906_v9 = vcombine.low %v549_v61, %v553_v62  ;;  %v8915_v11 = vcombine.high %v557_v5, %v561_v6  ;;  %v609_v61 = vld [vmem:[#allocation5 + $0xea0] sm:$0xff] }
 0x135   :  { %v8917_v12 = vcombine.high %v558_v7, %v562_v8  ;;  %v8916_v19 = vcombine.low %v558_v7, %v562_v8  ;;  %v606_v62 = vld [vmem:[#allocation5 + $0xe88] sm:$0xff] }
 0x136   :  { %v618_v7 = vld [vmem:[#allocation5 + $0xee8] sm:$0xff] }
 0x137   :  { %3368 = vmatpush1.bf16.msra.mxu0 %v8858_v14  ;;  %3540 = vmatpush1.bf16.msra.mxu1 %v8860_v16  ;;  %v569_v14 = vld [vmem:[#allocation5 + $0xd60] sm:$0xff]  ;;  %v566_v16 = vld [vmem:[#allocation5 + $0xd48] sm:$0xff] }
 0x138   :  { %3369 = vmatprep.subr.bf16.mxu0 %v8867_v17  ;;  %3541 = vmatprep.subr.bf16.mxu1 %v8869_v18  ;;  %v570_v17 = vld [vmem:[#allocation5 + $0xd68] sm:$0xff]  ;;  %v8914_v18 = vcombine.low %v557_v5, %v561_v6  ;;  %v8923_v20 = vcombine.high %v565_v13, %v569_v14  ;;  %v617_v5 = vld [vmem:[#allocation5 + $0xee0] sm:$0xff] }
 0x139   :  { %v8925_v21 = vcombine.high %v566_v16, %v570_v17  ;;  %v8924_v28 = vcombine.low %v566_v16, %v570_v17  ;;  %v614_v6 = vld [vmem:[#allocation5 + $0xec8] sm:$0xff] }
 0x13a   :  { %v626_v16 = vld [vmem:[#allocation5 + $0xf28] sm:$0xff] }
 0x13b   :  { %3370 = vmatpush1.bf16.msra.mxu0 %v8866_v23  ;;  %3542 = vmatpush1.bf16.msra.mxu1 %v8868_v24  ;;  %v577_v23 = vld [vmem:[#allocation5 + $0xda0] sm:$0xff]  ;;  %v574_v24 = vld [vmem:[#allocation5 + $0xd88] sm:$0xff] }
 0x13c   :  { %3371 = vmatprep.subr.bf16.mxu0 %v8875_v26  ;;  %3543 = vmatprep.subr.bf16.mxu1 %v8877_v27  ;;  %v578_v26 = vld [vmem:[#allocation5 + $0xda8] sm:$0xff]  ;;  %v8922_v27 = vcombine.low %v565_v13, %v569_v14  ;;  %v8931_v29 = vcombine.high %v573_v22, %v577_v23  ;;  %v625_v13 = vld [vmem:[#allocation5 + $0xf20] sm:$0xff] }
 0x13d   :  { %v8933_v31 = vcombine.high %v574_v24, %v578_v26  ;;  %v622_v14 = vld [vmem:[#allocation5 + $0xf08] sm:$0xff] }
 0x13f   :  { %3372 = vmatpush1.bf16.msra.mxu0 %v8874_v33  ;;  %3544 = vmatpush1.bf16.msra.mxu1 %v8876_v36  ;;  %v585_v33 = vld [vmem:[#allocation5 + $0xde0] sm:$0xff]  ;;  %v8930_v36 = vcombine.low %v573_v22, %v577_v23  ;;  %v630_v23 = vld [vmem:[#allocation5 + $0xf48] sm:$0xff] }
 0x140   :  { %3384 = vmatprep.subr.bf16.mxu0 %v8883_v37  ;;  %3556 = vmatprep.subr.bf16.mxu1 %v8885_v38  ;;  %v8932_v37 = vcombine.low %v574_v24, %v578_v26  ;;  %v8939_v38 = vcombine.high %v581_v32, %v585_v33  ;;  %v8938_v46 = vcombine.low %v581_v32, %v585_v33  ;;  %v633_v22 = vld [vmem:[#allocation5 + $0xf60] sm:$0xff]  ;;  %v634_v24 = vld [vmem:[#allocation5 + $0xf68] sm:$0xff] }
 0x141   :  { %v641_v32 = vld [vmem:[#allocation5 + $0xfa0] sm:$0xff]  ;;  %v638_v33 = vld [vmem:[#allocation5 + $0xf88] sm:$0xff] }
 0x142   :  { %3374 = vmatmul.mubr.bf16.vlgmr.msra.gmra.mrb[0].mxu0 %v10228_v43  ;;  %3546 = vmatmul.mubr.bf16.vlgmr.msra.gmra.mrb[0].mxu1 %v10228_v43 }
 0x143   :  { %3385 = vmatpush1.bf16.msra.mxu0 %v8882_v47  ;;  %3557 = vmatpush1.bf16.msra.mxu1 %v8884_v48  ;;  %v8940_v47 = vcombine.low %v582_v34, %v586_v35  ;;  %v8947_v48 = vcombine.high %v589_v41, %v593_v42  ;;  %v642_v34 = vld [vmem:[#allocation5 + $0xfa8] sm:$0xff]  ;;  %v649_v41 = vld [vmem:[#allocation5 + $0xfe0] sm:$0xff] }
 0x144   :  { %3386 = vmatprep.subr.bf16.mxu0 %v8891_v49  ;;  %3558 = vmatprep.subr.bf16.mxu1 %v8893_v50  ;;  %v8949_v49 = vcombine.high %v590_v44, %v594_v45  ;;  %v597_v50 = vld [vmem:[#allocation5 + $0xe40] sm:$0xff]  ;;  %v646_v42 = vld [vmem:[#allocation5 + $0xfc8] sm:$0xff] }
 0x145   :  { %3416 = vmatprep.mubr.bf16.mxu0 %v10230_v53  ;;  %3588 = vmatprep.mubr.bf16.mxu1 %v10230_v53  ;;  %v8954_v0 = vcombine.low %v597_v50, %v601_v51 }
 0x147   :  { %3387 = vmatpush1.bf16.msra.mxu0 %v8890_v56  ;;  %3559 = vmatpush1.bf16.msra.mxu1 %v8892_v57  ;;  %v8948_v56 = vcombine.low %v590_v44, %v594_v45  ;;  %v8955_v57 = vcombine.high %v597_v50, %v601_v51  ;;  %v650_v44 = vld [vmem:[#allocation5 + $0xfe8] sm:$0xff]  ;;  %v147_v50 = vld [vmem:[#allocation5 + $0x30] sm:$0xff]  ;;  %v144_v51 = vld [vmem:[#allocation5 + $0x18] sm:$0xff] }
 0x148   :  { %3388 = vmatprep.subr.bf16.mxu0 %v8899_v59  ;;  %3560 = vmatprep.subr.bf16.mxu1 %v8901_v60  ;;  %v8957_v59 = vcombine.high %v598_v52, %v602_v54  ;;  %v605_v60 = vld [vmem:[#allocation5 + $0xe80] sm:$0xff] }
 0x149   :  { %v8962_v8 = vcombine.low %v605_v60, %v609_v61 }
 0x14b   :  { %3389 = vmatpush1.bf16.msra.mxu0 %v8898_v1  ;;  %3561 = vmatpush1.bf16.msra.mxu1 %v8900_v2  ;;  %v8956_v1 = vcombine.low %v598_v52, %v602_v54  ;;  %v8963_v2 = vcombine.high %v605_v60, %v609_v61  ;;  %v148_v52 = vld [vmem:[#allocation5 + $0x38] sm:$0xff]  ;;  %v151_v61 = vld [vmem:[#allocation5 + $0x50] sm:$0xff] }
 0x14c   :  { %3390 = vmatprep.subr.bf16.mxu0 %v8907_v3  ;;  %3562 = vmatprep.subr.bf16.mxu1 %v8909_v4  ;;  %v8965_v3 = vcombine.high %v606_v62, %v610_v63  ;;  %v613_v4 = vld [vmem:[#allocation5 + $0xec0] sm:$0xff]  ;;  %v8505_v60 = vcombine.high %v144_v51, %v148_v52 }
 0x14d   :  { %v8970_v17 = vcombine.low %v613_v4, %v617_v5 }
 0x14f   :  { %3391 = vmatpush1.bf16.msra.mxu0 %v8906_v9  ;;  %3563 = vmatpush1.bf16.msra.mxu1 %v8908_v10  ;;  %v8964_v9 = vcombine.low %v606_v62, %v610_v63  ;;  %v8971_v10 = vcombine.high %v613_v4, %v617_v5  ;;  %v155_v62 = vld [vmem:[#allocation5 + $0x70] sm:$0xff] }
 0x150   :  { %3392 = vmatprep.subr.bf16.mxu0 %v8915_v11  ;;  %3564 = vmatprep.subr.bf16.mxu1 %v8917_v12  ;;  %v8973_v11 = vcombine.high %v614_v6, %v618_v7  ;;  %v621_v12 = vld [vmem:[#allocation5 + $0xf00] sm:$0xff]  ;;  %v8511_v4 = vcombine.high %v151_v61, %v155_v62 }
 0x151   :  { %v8978_v26 = vcombine.low %v621_v12, %v625_v13 }
 0x153   :  { %3393 = vmatpush1.bf16.msra.mxu0 %v8914_v18  ;;  %3565 = vmatpush1.bf16.msra.mxu1 %v8916_v19  ;;  %v8972_v18 = vcombine.low %v614_v6, %v618_v7  ;;  %v8979_v19 = vcombine.high %v621_v12, %v625_v13  ;;  %v159_v6 = vld [vmem:[#allocation5 + $0x90] sm:$0xff] }
 0x154   :  { %3394 = vmatprep.subr.bf16.mxu0 %v8923_v20  ;;  %3566 = vmatprep.subr.bf16.mxu1 %v8925_v21  ;;  %v8981_v20 = vcombine.high %v622_v14, %v626_v16  ;;  %v629_v21 = vld [vmem:[#allocation5 + $0xf40] sm:$0xff]  ;;  %v163_v7 = vld [vmem:[#allocation5 + $0xb0] sm:$0xff] }
 0x155   :  { %v8986_v35 = vcombine.low %v629_v21, %v633_v22  ;;  %v8519_v12 = vcombine.high %v159_v6, %v163_v7 }
 0x157   :  { %3395 = vmatpush1.bf16.msra.mxu0 %v8922_v27  ;;  %3567 = vmatpush1.bf16.msra.mxu1 %v8924_v28  ;;  %v8980_v27 = vcombine.low %v622_v14, %v626_v16  ;;  %v8987_v28 = vcombine.high %v629_v21, %v633_v22  ;;  %v167_v14 = vld [vmem:[#allocation5 + $0xd0] sm:$0xff] }
 0x158   :  { %3396 = vmatprep.subr.bf16.mxu0 %v8931_v29  ;;  %3568 = vmatprep.subr.bf16.mxu1 %v8933_v31  ;;  %v8989_v29 = vcombine.high %v630_v23, %v634_v24  ;;  %v637_v31 = vld [vmem:[#allocation5 + $0xf80] sm:$0xff]  ;;  %v171_v16 = vld [vmem:[#allocation5 + $0xf0] sm:$0xff] }
 0x159   :  { %v8994_v45 = vcombine.low %v637_v31, %v641_v32  ;;  %v8527_v21 = vcombine.high %v167_v14, %v171_v16 }
 0x15b   :  { %3397 = vmatpush1.bf16.msra.mxu0 %v8930_v36  ;;  %3569 = vmatpush1.bf16.msra.mxu1 %v8932_v37  ;;  %v8988_v36 = vcombine.low %v630_v23, %v634_v24  ;;  %v8995_v37 = vcombine.high %v637_v31, %v641_v32  ;;  %v175_v23 = vld [vmem:[#allocation5 + $0x110] sm:$0xff] }
 0x15c   :  { %3398 = vmatprep.subr.bf16.mxu0 %v8939_v38  ;;  %3570 = vmatprep.subr.bf16.mxu1 %v8941_v40  ;;  %v8997_v38 = vcombine.high %v638_v33, %v642_v34  ;;  %v645_v40 = vld [vmem:[#allocation5 + $0xfc0] sm:$0xff]  ;;  %v179_v24 = vld [vmem:[#allocation5 + $0x130] sm:$0xff] }
 0x15d   :  { %v9002_v54 = vcombine.low %v645_v40, %v649_v41  ;;  %v8535_v31 = vcombine.high %v175_v23, %v179_v24  ;;  %v183_v32 = vld [vmem:[#allocation5 + $0x150] sm:$0xff] }
 0x15f   :  { %3399 = vmatpush1.bf16.msra.mxu0 %v8938_v46  ;;  %3571 = vmatpush1.bf16.msra.mxu1 %v8940_v47  ;;  %v8996_v46 = vcombine.low %v638_v33, %v642_v34  ;;  %v9003_v47 = vcombine.high %v645_v40, %v649_v41  ;;  %v187_v33 = vld [vmem:[#allocation5 + $0x170] sm:$0xff]  ;;  %v184_v34 = vld [vmem:[#allocation5 + $0x158] sm:$0xff] }
 0x160   :  { %3400 = vmatprep.subr.bf16.mxu0 %v8947_v48  ;;  %3572 = vmatprep.subr.bf16.mxu1 %v8949_v49  ;;  %v9005_v48 = vcombine.high %v646_v42, %v650_v44  ;;  %v143_v49 = vld [vmem:[#allocation5 + $0x10] sm:$0xff] }
 0x161   :  { %v191_v41 = vld [vmem:[#allocation5 + $0x190] sm:$0xff] }
 0x163   :  { %3401 = vmatpush1.bf16.msra.mxu0 %v8946_v55  ;;  %3573 = vmatpush1.bf16.msra.mxu1 %v8948_v56  ;;  %v123_v55 = vld [vmem:[#allocation2 + $0x30] sm:$0xff] }
 0x164   :  { %3402 = vmatprep.subr.bf16.mxu0 %v8955_v57  ;;  %3574 = vmatprep.subr.bf16.mxu1 %v8957_v59  ;;  %v131_v56 = vld [vmem:[#allocation2 + $0x70] sm:$0xff]  ;;  %v9004_v57 = vcombine.low %v646_v42, %v650_v44  ;;  %v8503_v59 = vcombine.high %v143_v49, %v147_v50  ;;  %v192_v44 = vld [vmem:[#allocation5 + $0x198] sm:$0xff] }
 0x165   :  { %v10236_v63 = vpack.c.bf16 %v131_v56, %v123_v55  ;;  %v195_v42 = vld [vmem:[#allocation5 + $0x1b0] sm:$0xff] }
 0x166   :  { %v8550_v55 = vcombine.low %v191_v41, %v195_v42 }
 0x167   :  { %3403 = vmatpush1.bf16.msra.mxu0 %v8954_v0  ;;  %3575 = vmatpush1.bf16.msra.mxu1 %v8956_v1  ;;  %v152_v0 = vld [vmem:[#allocation5 + $0x58] sm:$0xff] }
 0x168   :  { %3404 = vmatprep.subr.bf16.mxu0 %v8963_v2  ;;  %3576 = vmatprep.subr.bf16.mxu1 %v8965_v3  ;;  %v156_v1 = vld [vmem:[#allocation5 + $0x78] sm:$0xff]  ;;  %v8502_v2 = vcombine.low %v143_v49, %v147_v50  ;;  %v8504_v3 = vcombine.low %v144_v51, %v148_v52  ;;  %v199_v50 = vld [vmem:[#allocation5 + $0x1d0] sm:$0xff] }
 0x169   :  { %v8513_v5 = vcombine.high %v152_v0, %v156_v1  ;;  %v203_v51 = vld [vmem:[#allocation5 + $0x1f0] sm:$0xff]  ;;  %v200_v52 = vld [vmem:[#allocation5 + $0x1d8] sm:$0xff] }
 0x16b   :  { %3405 = vmatpush1.bf16.msra.mxu0 %v8962_v8  ;;  %3577 = vmatpush1.bf16.msra.mxu1 %v8964_v9  ;;  %v160_v8 = vld [vmem:[#allocation5 + $0x98] sm:$0xff] }
 0x16c   :  { %3406 = vmatprep.subr.bf16.mxu0 %v8971_v10  ;;  %3578 = vmatprep.subr.bf16.mxu1 %v8973_v11  ;;  %v164_v9 = vld [vmem:[#allocation5 + $0xb8] sm:$0xff]  ;;  %v8510_v10 = vcombine.low %v151_v61, %v155_v62  ;;  %v8512_v11 = vcombine.low %v152_v0, %v156_v1  ;;  %v211_v61 = vld [vmem:[#allocation5 + $0x230] sm:$0xff]  ;;  %v8558_v1 = vcombine.low %v199_v50, %v203_v51 }
 0x16d   :  { %v8521_v13 = vcombine.high %v160_v8, %v164_v9  ;;  %v208_v62 = vld [vmem:[#allocation5 + $0x218] sm:$0xff] }
 0x16e   :  { %v212_v0 = vld [vmem:[#allocation5 + $0x238] sm:$0xff] }
 0x16f   :  { %3407 = vmatpush1.bf16.msra.mxu0 %v8970_v17  ;;  %3579 = vmatpush1.bf16.msra.mxu1 %v8972_v18  ;;  %v168_v17 = vld [vmem:[#allocation5 + $0xd8] sm:$0xff] }
 0x170   :  { %3408 = vmatprep.subr.bf16.mxu0 %v8979_v19  ;;  %3580 = vmatprep.subr.bf16.mxu1 %v8981_v20  ;;  %v172_v18 = vld [vmem:[#allocation5 + $0xf8] sm:$0xff]  ;;  %v8518_v19 = vcombine.low %v159_v6, %v163_v7  ;;  %v8520_v20 = vcombine.low %v160_v8, %v164_v9  ;;  %v219_v6 = vld [vmem:[#allocation5 + $0x270] sm:$0xff] }
 0x171   :  { %v8529_v22 = vcombine.high %v168_v17, %v172_v18  ;;  %v216_v7 = vld [vmem:[#allocation5 + $0x258] sm:$0xff] }
 0x172   :  { %v220_v8 = vld [vmem:[#allocation5 + $0x278] sm:$0xff] }
 0x173   :  { %3409 = vmatpush1.bf16.msra.mxu0 %v8978_v26  ;;  %3581 = vmatpush1.bf16.msra.mxu1 %v8980_v27  ;;  %v176_v26 = vld [vmem:[#allocation5 + $0x118] sm:$0xff] }
 0x174   :  { %3410 = vmatprep.subr.bf16.mxu0 %v8987_v28  ;;  %3582 = vmatprep.subr.bf16.mxu1 %v8989_v29  ;;  %v180_v27 = vld [vmem:[#allocation5 + $0x138] sm:$0xff]  ;;  %v8526_v28 = vcombine.low %v167_v14, %v171_v16  ;;  %v8528_v29 = vcombine.low %v168_v17, %v172_v18  ;;  %v227_v14 = vld [vmem:[#allocation5 + $0x2b0] sm:$0xff] }
 0x175   :  { %v224_v16 = vld [vmem:[#allocation5 + $0x298] sm:$0xff] }
 0x176   :  { %v228_v17 = vld [vmem:[#allocation5 + $0x2b8] sm:$0xff] }
 0x177   :  { %3411 = vmatpush1.bf16.msra.mxu0 %v8986_v35  ;;  %3583 = vmatpush1.bf16.msra.mxu1 %v8988_v36  ;;  %v188_v35 = vld [vmem:[#allocation5 + $0x178] sm:$0xff]  ;;  %v8534_v36 = vcombine.low %v175_v23, %v179_v24  ;;  %v235_v23 = vld [vmem:[#allocation5 + $0x2f0] sm:$0xff] }
 0x178   :  { %3412 = vmatprep.subr.bf16.mxu0 %v8995_v37  ;;  %3584 = vmatprep.subr.bf16.mxu1 %v8997_v38  ;;  %v8536_v37 = vcombine.low %v176_v26, %v180_v27  ;;  %v8543_v38 = vcombine.high %v183_v32, %v187_v33  ;;  %v8545_v40 = vcombine.high %v184_v34, %v188_v35  ;;  %v232_v24 = vld [vmem:[#allocation5 + $0x2d8] sm:$0xff] }
 0x17b   :  { %3413 = vmatpush1.bf16.msra.mxu0 %v8994_v45  ;;  %3585 = vmatpush1.bf16.msra.mxu1 %v8996_v46  ;;  %v196_v45 = vld [vmem:[#allocation5 + $0x1b8] sm:$0xff]  ;;  %v8542_v46 = vcombine.low %v183_v32, %v187_v33  ;;  %v243_v32 = vld [vmem:[#allocation5 + $0x330] sm:$0xff] }
 0x17c   :  { %3414 = vmatprep.subr.bf16.mxu0 %v9003_v47  ;;  %3586 = vmatprep.subr.bf16.mxu1 %v9005_v48  ;;  %v8544_v47 = vcombine.low %v184_v34, %v188_v35  ;;  %v8551_v48 = vcombine.high %v191_v41, %v195_v42  ;;  %v8553_v49 = vcombine.high %v192_v44, %v196_v45  ;;  %v240_v33 = vld [vmem:[#allocation5 + $0x318] sm:$0xff]  ;;  %v251_v41 = vld [vmem:[#allocation5 + $0x370] sm:$0xff] }
 0x17d   :  { %v8552_v56 = vcombine.low %v192_v44, %v196_v45  ;;  %v244_v34 = vld [vmem:[#allocation5 + $0x338] sm:$0xff] }
 0x17e   :  { %v248_v42 = vld [vmem:[#allocation5 + $0x358] sm:$0xff] }
 0x17f   :  { %3415 = vmatpush1.bf16.msra.mxu0 %v9002_v54  ;;  %3587 = vmatpush1.bf16.msra.mxu1 %v9004_v57  ;;  %v204_v54 = vld [vmem:[#allocation5 + $0x1f8] sm:$0xff]  ;;  %v8559_v57 = vcombine.high %v199_v50, %v203_v51  ;;  %v259_v50 = vld [vmem:[#allocation5 + $0x3b0] sm:$0xff] }
 0x180   :  { %3599 = vmatprep.subr.bf16.mxu0 %v8503_v59  ;;  %3771 = vmatprep.subr.bf16.mxu1 %v8505_v60  ;;  %v8561_v59 = vcombine.high %v200_v52, %v204_v54  ;;  %v207_v60 = vld [vmem:[#allocation5 + $0x210] sm:$0xff]  ;;  %v252_v44 = vld [vmem:[#allocation5 + $0x378] sm:$0xff] }
 0x181   :  { %v8566_v9 = vcombine.low %v207_v60, %v211_v61  ;;  %v256_v51 = vld [vmem:[#allocation5 + $0x398] sm:$0xff] }
 0x182   :  { %3417 = vmatmul.mubr.bf16.vlgmr.msra.gmra.mrb[0].mxu0 %v10236_v63  ;;  %3589 = vmatmul.mubr.bf16.vlgmr.msra.gmra.mrb[0].mxu1 %v10236_v63 }
 0x183   :  { %3600 = vmatpush1.bf16.msra.mxu0 %v8502_v2  ;;  %3772 = vmatpush1.bf16.msra.mxu1 %v8504_v3  ;;  %v8560_v2 = vcombine.low %v200_v52, %v204_v54  ;;  %v8567_v3 = vcombine.high %v207_v60, %v211_v61  ;;  %v260_v52 = vld [vmem:[#allocation5 + $0x3b8] sm:$0xff]  ;;  %v267_v60 = vld [vmem:[#allocation5 + $0x3f0] sm:$0xff] }
 0x184   :  { %3601 = vmatprep.subr.bf16.mxu0 %v8511_v4  ;;  %3773 = vmatprep.subr.bf16.mxu1 %v8513_v5  ;;  %v8569_v4 = vcombine.high %v208_v62, %v212_v0  ;;  %v215_v5 = vld [vmem:[#allocation5 + $0x250] sm:$0xff]  ;;  %v264_v61 = vld [vmem:[#allocation5 + $0x3d8] sm:$0xff] }
 0x185   :  { %3631 = vmatprep.mubr.bf16.mxu0 %v10208_v58  ;;  %3803 = vmatprep.mubr.bf16.mxu1 %v10208_v58  ;;  %v8537_v58 = vcombine.high %v176_v26, %v180_v27  ;;  %v8574_v18 = vcombine.low %v215_v5, %v219_v6  ;;  %v236_v26 = vld [vmem:[#allocation5 + $0x2f8] sm:$0xff] }
 0x187   :  { %3602 = vmatpush1.bf16.msra.mxu0 %v8510_v10  ;;  %3774 = vmatpush1.bf16.msra.mxu1 %v8512_v11  ;;  %v8568_v10 = vcombine.low %v208_v62, %v212_v0  ;;  %v8575_v11 = vcombine.high %v215_v5, %v219_v6  ;;  %v268_v62 = vld [vmem:[#allocation5 + $0x3f8] sm:$0xff]  ;;  %v275_v5 = vld [vmem:[#allocation5 + $0x430] sm:$0xff] }
 0x188   :  { %3603 = vmatprep.subr.bf16.mxu0 %v8519_v12  ;;  %3775 = vmatprep.subr.bf16.mxu1 %v8521_v13  ;;  %v8577_v12 = vcombine.high %v216_v7, %v220_v8  ;;  %v223_v13 = vld [vmem:[#allocation5 + $0x290] sm:$0xff]  ;;  %v272_v6 = vld [vmem:[#allocation5 + $0x418] sm:$0xff] }
 0x189   :  { %v8582_v27 = vcombine.low %v223_v13, %v227_v14 }
 0x18b   :  { %3604 = vmatpush1.bf16.msra.mxu0 %v8518_v19  ;;  %3776 = vmatpush1.bf16.msra.mxu1 %v8520_v20  ;;  %v8576_v19 = vcombine.low %v216_v7, %v220_v8  ;;  %v8583_v20 = vcombine.high %v223_v13, %v227_v14  ;;  %v276_v7 = vld [vmem:[#allocation5 + $0x438] sm:$0xff]  ;;  %v283_v13 = vld [vmem:[#allocation5 + $0x470] sm:$0xff] }
 0x18c   :  { %3605 = vmatprep.subr.bf16.mxu0 %v8527_v21  ;;  %3777 = vmatprep.subr.bf16.mxu1 %v8529_v22  ;;  %v8585_v21 = vcombine.high %v224_v16, %v228_v17  ;;  %v231_v22 = vld [vmem:[#allocation5 + $0x2d0] sm:$0xff]  ;;  %v280_v14 = vld [vmem:[#allocation5 + $0x458] sm:$0xff] }
 0x18d   :  { %v8590_v35 = vcombine.low %v231_v22, %v235_v23 }
 0x18f   :  { %3606 = vmatpush1.bf16.msra.mxu0 %v8526_v28  ;;  %3778 = vmatpush1.bf16.msra.mxu1 %v8528_v29  ;;  %v8584_v28 = vcombine.low %v224_v16, %v228_v17  ;;  %v8591_v29 = vcombine.high %v231_v22, %v235_v23  ;;  %v284_v16 = vld [vmem:[#allocation5 + $0x478] sm:$0xff]  ;;  %v291_v22 = vld [vmem:[#allocation5 + $0x4b0] sm:$0xff] }
 0x190   :  { %3607 = vmatprep.subr.bf16.mxu0 %v8535_v31  ;;  %3779 = vmatprep.subr.bf16.mxu1 %v8537_v58  ;;  %v8593_v31 = vcombine.high %v232_v24, %v236_v26  ;;  %v239_v58 = vld [vmem:[#allocation5 + $0x310] sm:$0xff]  ;;  %v288_v23 = vld [vmem:[#allocation5 + $0x498] sm:$0xff] }
 0x191   :  { %v8598_v45 = vcombine.low %v239_v58, %v243_v32 }
 0x193   :  { %3608 = vmatpush1.bf16.msra.mxu0 %v8534_v36  ;;  %3780 = vmatpush1.bf16.msra.mxu1 %v8536_v37  ;;  %v8592_v36 = vcombine.low %v232_v24, %v236_v26  ;;  %v8599_v37 = vcombine.high %v239_v58, %v243_v32  ;;  %v292_v24 = vld [vmem:[#allocation5 + $0x4b8] sm:$0xff]  ;;  %v299_v58 = vld [vmem:[#allocation5 + $0x4f0] sm:$0xff] }
 0x194   :  { %3609 = vmatprep.subr.bf16.mxu0 %v8543_v38  ;;  %3781 = vmatprep.subr.bf16.mxu1 %v8545_v40  ;;  %v8601_v38 = vcombine.high %v240_v33, %v244_v34  ;;  %v247_v40 = vld [vmem:[#allocation5 + $0x350] sm:$0xff]  ;;  %v296_v32 = vld [vmem:[#allocation5 + $0x4d8] sm:$0xff] }
 0x195   :  { %v8606_v54 = vcombine.low %v247_v40, %v251_v41 }
 0x197   :  { %3610 = vmatpush1.bf16.msra.mxu0 %v8542_v46  ;;  %3782 = vmatpush1.bf16.msra.mxu1 %v8544_v47  ;;  %v8600_v46 = vcombine.low %v240_v33, %v244_v34  ;;  %v8607_v47 = vcombine.high %v247_v40, %v251_v41  ;;  %v300_v33 = vld [vmem:[#allocation5 + $0x4f8] sm:$0xff] }
 0x198   :  { %3611 = vmatprep.subr.bf16.mxu0 %v8551_v48  ;;  %3783 = vmatprep.subr.bf16.mxu1 %v8553_v49  ;;  %v8609_v48 = vcombine.high %v248_v42, %v252_v44  ;;  %v255_v49 = vld [vmem:[#allocation5 + $0x390] sm:$0xff]  ;;  %v304_v40 = vld [vmem:[#allocation5 + $0x518] sm:$0xff] }
 0x199   :  { %v8614_v0 = vcombine.low %v255_v49, %v259_v50  ;;  %v308_v41 = vld [vmem:[#allocation5 + $0x538] sm:$0xff] }
 0x19b   :  { %3612 = vmatpush1.bf16.msra.mxu0 %v8550_v55  ;;  %3784 = vmatpush1.bf16.msra.mxu1 %v8552_v56  ;;  %v8608_v55 = vcombine.low %v248_v42, %v252_v44  ;;  %v8615_v56 = vcombine.high %v255_v49, %v259_v50  ;;  %v8656_v44 = vcombine.low %v296_v32, %v300_v33  ;;  %v316_v49 = vld [vmem:[#allocation5 + $0x578] sm:$0xff] }
 0x19c   :  { %3613 = vmatprep.subr.bf16.mxu0 %v8559_v57  ;;  %3785 = vmatprep.subr.bf16.mxu1 %v8561_v59  ;;  %v8617_v57 = vcombine.high %v256_v51, %v260_v52  ;;  %v263_v59 = vld [vmem:[#allocation5 + $0x3d0] sm:$0xff] }
 0x19d   :  { %v8622_v8 = vcombine.low %v263_v59, %v267_v60 }
 0x19f   :  { %3614 = vmatpush1.bf16.msra.mxu0 %v8558_v1  ;;  %3786 = vmatpush1.bf16.msra.mxu1 %v8560_v2  ;;  %v8616_v1 = vcombine.low %v256_v51, %v260_v52  ;;  %v8623_v2 = vcombine.high %v263_v59, %v267_v60  ;;  %v8664_v51 = vcombine.low %v304_v40, %v308_v41  ;;  %v324_v59 = vld [vmem:[#allocation5 + $0x5b8] sm:$0xff] }
 0x1a0   :  { %3615 = vmatprep.subr.bf16.mxu0 %v8567_v3  ;;  %3787 = vmatprep.subr.bf16.mxu1 %v8569_v4  ;;  %v8625_v3 = vcombine.high %v264_v61, %v268_v62  ;;  %v271_v4 = vld [vmem:[#allocation5 + $0x410] sm:$0xff] }
 0x1a1   :  { %v8630_v17 = vcombine.low %v271_v4, %v275_v5 }
 0x1a3   :  { %3616 = vmatpush1.bf16.msra.mxu0 %v8566_v9  ;;  %3788 = vmatpush1.bf16.msra.mxu1 %v8568_v10  ;;  %v8624_v9 = vcombine.low %v264_v61, %v268_v62  ;;  %v8631_v10 = vcombine.high %v271_v4, %v275_v5  ;;  %v332_v4 = vld [vmem:[#allocation5 + $0x5f8] sm:$0xff] }
 0x1a4   :  { %3617 = vmatprep.subr.bf16.mxu0 %v8575_v11  ;;  %3789 = vmatprep.subr.bf16.mxu1 %v8577_v12  ;;  %v8633_v11 = vcombine.high %v272_v6, %v276_v7  ;;  %v279_v12 = vld [vmem:[#allocation5 + $0x450] sm:$0xff] }
 0x1a5   :  { %v8638_v26 = vcombine.low %v279_v12, %v283_v13 }
 0x1a7   :  { %3618 = vmatpush1.bf16.msra.mxu0 %v8574_v18  ;;  %3790 = vmatpush1.bf16.msra.mxu1 %v8576_v19  ;;  %v8632_v18 = vcombine.low %v272_v6, %v276_v7  ;;  %v8639_v19 = vcombine.high %v279_v12, %v283_v13  ;;  %v340_v12 = vld [vmem:[#allocation5 + $0x638] sm:$0xff] }
 0x1a8   :  { %3619 = vmatprep.subr.bf16.mxu0 %v8583_v20  ;;  %3791 = vmatprep.subr.bf16.mxu1 %v8585_v21  ;;  %v8641_v20 = vcombine.high %v280_v14, %v284_v16  ;;  %v287_v21 = vld [vmem:[#allocation5 + $0x490] sm:$0xff] }
 0x1a9   :  { %v8646_v34 = vcombine.low %v287_v21, %v291_v22 }
 0x1ab   :  { %3620 = vmatpush1.bf16.msra.mxu0 %v8582_v27  ;;  %3792 = vmatpush1.bf16.msra.mxu1 %v8584_v28  ;;  %v8640_v27 = vcombine.low %v280_v14, %v284_v16  ;;  %v8647_v28 = vcombine.high %v287_v21, %v291_v22  ;;  %v348_v21 = vld [vmem:[#allocation5 + $0x678] sm:$0xff] }
 0x1ac   :  { %3621 = vmatprep.subr.bf16.mxu0 %v8591_v29  ;;  %3793 = vmatprep.subr.bf16.mxu1 %v8593_v31  ;;  %v8649_v29 = vcombine.high %v288_v23, %v292_v24  ;;  %v295_v31 = vld [vmem:[#allocation5 + $0x4d0] sm:$0xff] }
 0x1ad   :  { %v8654_v42 = vcombine.low %v295_v31, %v299_v58 }
 0x1af   :  { %3622 = vmatpush1.bf16.msra.mxu0 %v8590_v35  ;;  %3794 = vmatpush1.bf16.msra.mxu1 %v8592_v36  ;;  %v8655_v35 = vcombine.high %v295_v31, %v299_v58  ;;  %v8657_v36 = vcombine.high %v296_v32, %v300_v33  ;;  %v356_v31 = vld [vmem:[#allocation5 + $0x6b8] sm:$0xff] }
 0x1b0   :  { %3623 = vmatprep.subr.bf16.mxu0 %v8599_v37  ;;  %3795 = vmatprep.subr.bf16.mxu1 %v8601_v38  ;;  %v303_v37 = vld [vmem:[#allocation5 + $0x510] sm:$0xff] }
 0x1b1   :  { %v307_v38 = vld [vmem:[#allocation5 + $0x530] sm:$0xff] }
 0x1b2   :  { %v8662_v50 = vcombine.low %v303_v37, %v307_v38 }
 0x1b3   :  { %3624 = vmatpush1.bf16.msra.mxu0 %v8598_v45  ;;  %3796 = vmatpush1.bf16.msra.mxu1 %v8600_v46  ;;  %v8663_v45 = vcombine.high %v303_v37, %v307_v38  ;;  %v311_v46 = vld [vmem:[#allocation5 + $0x550] sm:$0xff]  ;;  %v364_v37 = vld [vmem:[#allocation5 + $0x6f8] sm:$0xff] }
 0x1b4   :  { %3625 = vmatprep.subr.bf16.mxu0 %v8607_v47  ;;  %3797 = vmatprep.subr.bf16.mxu1 %v8609_v48  ;;  %v315_v47 = vld [vmem:[#allocation5 + $0x570] sm:$0xff]  ;;  %v312_v48 = vld [vmem:[#allocation5 + $0x558] sm:$0xff] }
 0x1b5   :  { %v8671_v52 = vcombine.high %v311_v46, %v315_v47  ;;  %v8670_v60 = vcombine.low %v311_v46, %v315_v47  ;;  %v8672_v61 = vcombine.low %v312_v48, %v316_v49  ;;  %v372_v46 = vld [vmem:[#allocation5 + $0x738] sm:$0xff] }
 0x1b7   :  { %3626 = vmatpush1.bf16.msra.mxu0 %v8606_v54  ;;  %3798 = vmatpush1.bf16.msra.mxu1 %v8608_v55  ;;  %v8673_v54 = vcombine.high %v312_v48, %v316_v49  ;;  %v319_v55 = vld [vmem:[#allocation5 + $0x590] sm:$0xff] }
 0x1b8   :  { %3627 = vmatprep.subr.bf16.mxu0 %v8615_v56  ;;  %3799 = vmatprep.subr.bf16.mxu1 %v8617_v57  ;;  %v323_v56 = vld [vmem:[#allocation5 + $0x5b0] sm:$0xff]  ;;  %v320_v57 = vld [vmem:[#allocation5 + $0x598] sm:$0xff] }
 0x1b9   :  { %v8679_v62 = vcombine.high %v319_v55, %v323_v56  ;;  %v8678_v5 = vcombine.low %v319_v55, %v323_v56  ;;  %v8680_v6 = vcombine.low %v320_v57, %v324_v59  ;;  %v380_v55 = vld [vmem:[#allocation5 + $0x778] sm:$0xff] }
 0x1bb   :  { %3628 = vmatpush1.bf16.msra.mxu0 %v8614_v0  ;;  %3800 = vmatpush1.bf16.msra.mxu1 %v8616_v1  ;;  %v8681_v0 = vcombine.high %v320_v57, %v324_v59  ;;  %v327_v1 = vld [vmem:[#allocation5 + $0x5d0] sm:$0xff] }
 0x1bc   :  { %3629 = vmatprep.subr.bf16.mxu0 %v8623_v2  ;;  %3801 = vmatprep.subr.bf16.mxu1 %v8625_v3  ;;  %v331_v2 = vld [vmem:[#allocation5 + $0x5f0] sm:$0xff]  ;;  %v328_v3 = vld [vmem:[#allocation5 + $0x5d8] sm:$0xff] }
 0x1bd   :  { %v8687_v7 = vcombine.high %v327_v1, %v331_v2  ;;  %v8686_v13 = vcombine.low %v327_v1, %v331_v2  ;;  %v8688_v14 = vcombine.low %v328_v3, %v332_v4  ;;  %v388_v1 = vld [vmem:[#allocation5 + $0x7b8] sm:$0xff] }
 0x1bf   :  { %3630 = vmatpush1.bf16.msra.mxu0 %v8622_v8  ;;  %3802 = vmatpush1.bf16.msra.mxu1 %v8624_v9  ;;  %v8689_v8 = vcombine.high %v328_v3, %v332_v4  ;;  %v335_v9 = vld [vmem:[#allocation5 + $0x610] sm:$0xff] }
 0x1c0   :  { %3642 = vmatprep.subr.bf16.mxu0 %v8631_v10  ;;  %3814 = vmatprep.subr.bf16.mxu1 %v8633_v11  ;;  %v339_v10 = vld [vmem:[#allocation5 + $0x630] sm:$0xff]  ;;  %v336_v11 = vld [vmem:[#allocation5 + $0x618] sm:$0xff] }
 0x1c1   :  { %v8695_v16 = vcombine.high %v335_v9, %v339_v10  ;;  %v8694_v22 = vcombine.low %v335_v9, %v339_v10  ;;  %v396_v9 = vld [vmem:[#allocation5 + $0x7f8] sm:$0xff] }
 0x1c2   :  { %3632 = vmatmul.mubr.bf16.vlgmr.msra.gmra.mrb[4].mxu0 %v10212_v15  ;;  %3804 = vmatmul.mubr.bf16.vlgmr.msra.gmra.mrb[4].mxu1 %v10212_v15  ;;  %v8648_v15 = vcombine.low %v288_v23, %v292_v24  ;;  %v8696_v23 = vcombine.low %v336_v11, %v340_v12 }
 0x1c3   :  { %3643 = vmatpush1.bf16.msra.mxu0 %v8630_v17  ;;  %3815 = vmatpush1.bf16.msra.mxu1 %v8632_v18  ;;  %v8697_v17 = vcombine.high %v336_v11, %v340_v12  ;;  %v343_v18 = vld [vmem:[#allocation5 + $0x650] sm:$0xff] }
 0x1c4   :  { %3644 = vmatprep.subr.bf16.mxu0 %v8639_v19  ;;  %3816 = vmatprep.subr.bf16.mxu1 %v8641_v20  ;;  %v347_v19 = vld [vmem:[#allocation5 + $0x670] sm:$0xff]  ;;  %v344_v20 = vld [vmem:[#allocation5 + $0x658] sm:$0xff] }
 0x1c5   :  { %3674 = vmatprep.mubr.bf16.mxu0 %v10214_v25  ;;  %3846 = vmatprep.mubr.bf16.mxu1 %v10214_v25  ;;  %v8665_v25 = vcombine.high %v304_v40, %v308_v41  ;;  %v8703_v24 = vcombine.high %v343_v18, %v347_v19  ;;  %v8702_v58 = vcombine.low %v343_v18, %v347_v19  ;;  %v404_v18 = vld [vmem:[#allocation5 + $0x838] sm:$0xff] }
 0x1c6   :  { %v8704_v32 = vcombine.low %v344_v20, %v348_v21 }
 0x1c7   :  { %3645 = vmatpush1.bf16.msra.mxu0 %v8638_v26  ;;  %3817 = vmatpush1.bf16.msra.mxu1 %v8640_v27  ;;  %v8705_v26 = vcombine.high %v344_v20, %v348_v21  ;;  %v351_v27 = vld [vmem:[#allocation5 + $0x690] sm:$0xff] }
 0x1c8   :  { %3646 = vmatprep.subr.bf16.mxu0 %v8647_v28  ;;  %3818 = vmatprep.subr.bf16.mxu1 %v8649_v29  ;;  %v355_v28 = vld [vmem:[#allocation5 + $0x6b0] sm:$0xff]  ;;  %v352_v29 = vld [vmem:[#allocation5 + $0x698] sm:$0xff] }
 0x1c9   :  { %v8711_v33 = vcombine.high %v351_v27, %v355_v28  ;;  %v8710_v38 = vcombine.low %v351_v27, %v355_v28  ;;  %v8712_v40 = vcombine.low %v352_v29, %v356_v31  ;;  %v412_v27 = vld [vmem:[#allocation5 + $0x878] sm:$0xff] }
 0x1cb   :  { %3647 = vmatpush1.bf16.msra.mxu0 %v8646_v34  ;;  %3819 = vmatpush1.bf16.msra.mxu1 %v8648_v15  ;;  %v8713_v34 = vcombine.high %v352_v29, %v356_v31  ;;  %v359_v15 = vld [vmem:[#allocation5 + $0x6d0] sm:$0xff] }
 0x1cc   :  { %3648 = vmatprep.subr.bf16.mxu0 %v8655_v35  ;;  %3820 = vmatprep.subr.bf16.mxu1 %v8657_v36  ;;  %v363_v35 = vld [vmem:[#allocation5 + $0x6f0] sm:$0xff]  ;;  %v360_v36 = vld [vmem:[#allocation5 + $0x6d8] sm:$0xff] }
 0x1cd   :  { %v8719_v41 = vcombine.high %v359_v15, %v363_v35  ;;  %v8718_v47 = vcombine.low %v359_v15, %v363_v35  ;;  %v8720_v48 = vcombine.low %v360_v36, %v364_v37  ;;  %v420_v15 = vld [vmem:[#allocation5 + $0x8b8] sm:$0xff] }
 0x1cf   :  { %3649 = vmatpush1.bf16.msra.mxu0 %v8654_v42  ;;  %3821 = vmatpush1.bf16.msra.mxu1 %v8656_v44  ;;  %v8721_v42 = vcombine.high %v360_v36, %v364_v37  ;;  %v367_v44 = vld [vmem:[#allocation5 + $0x710] sm:$0xff] }
 0x1d0   :  { %3650 = vmatprep.subr.bf16.mxu0 %v8663_v45  ;;  %3822 = vmatprep.subr.bf16.mxu1 %v8665_v25  ;;  %v371_v45 = vld [vmem:[#allocation5 + $0x730] sm:$0xff]  ;;  %v368_v25 = vld [vmem:[#allocation5 + $0x718] sm:$0xff] }
 0x1d1   :  { %v8727_v49 = vcombine.high %v367_v44, %v371_v45  ;;  %v8726_v56 = vcombine.low %v367_v44, %v371_v45  ;;  %v8728_v57 = vcombine.low %v368_v25, %v372_v46  ;;  %v428_v44 = vld [vmem:[#allocation5 + $0x8f8] sm:$0xff] }
 0x1d3   :  { %3651 = vmatpush1.bf16.msra.mxu0 %v8662_v50  ;;  %3823 = vmatpush1.bf16.msra.mxu1 %v8664_v51  ;;  %v8729_v50 = vcombine.high %v368_v25, %v372_v46  ;;  %v375_v51 = vld [vmem:[#allocation5 + $0x750] sm:$0xff] }
 0x1d4   :  { %3652 = vmatprep.subr.bf16.mxu0 %v8671_v52  ;;  %3824 = vmatprep.subr.bf16.mxu1 %v8673_v54  ;;  %v379_v52 = vld [vmem:[#allocation5 + $0x770] sm:$0xff]  ;;  %v376_v54 = vld [vmem:[#allocation5 + $0x758] sm:$0xff] }
 0x1d5   :  { %v8735_v59 = vcombine.high %v375_v51, %v379_v52  ;;  %v8734_v2 = vcombine.low %v375_v51, %v379_v52  ;;  %v8736_v3 = vcombine.low %v376_v54, %v380_v55 }
 0x1d7   :  { %3653 = vmatpush1.bf16.msra.mxu0 %v8670_v60  ;;  %3825 = vmatpush1.bf16.msra.mxu1 %v8672_v61  ;;  %v8737_v60 = vcombine.high %v376_v54, %v380_v55  ;;  %v383_v61 = vld [vmem:[#allocation5 + $0x790] sm:$0xff] }
 0x1d8   :  { %3654 = vmatprep.subr.bf16.mxu0 %v8679_v62  ;;  %3826 = vmatprep.subr.bf16.mxu1 %v8681_v0  ;;  %v387_v62 = vld [vmem:[#allocation5 + $0x7b0] sm:$0xff]  ;;  %v384_v0 = vld [vmem:[#allocation5 + $0x798] sm:$0xff] }
 0x1d9   :  { %v8743_v4 = vcombine.high %v383_v61, %v387_v62  ;;  %v8742_v10 = vcombine.low %v383_v61, %v387_v62  ;;  %v8744_v11 = vcombine.low %v384_v0, %v388_v1  ;;  %v439_v55 = vld [vmem:[#allocation5 + $0x950] sm:$0xff] }
 0x1db   :  { %3655 = vmatpush1.bf16.msra.mxu0 %v8678_v5  ;;  %3827 = vmatpush1.bf16.msra.mxu1 %v8680_v6  ;;  %v8745_v5 = vcombine.high %v384_v0, %v388_v1  ;;  %v391_v6 = vld [vmem:[#allocation5 + $0x7d0] sm:$0xff] }
 0x1dc   :  { %3656 = vmatprep.subr.bf16.mxu0 %v8687_v7  ;;  %3828 = vmatprep.subr.bf16.mxu1 %v8689_v8  ;;  %v395_v7 = vld [vmem:[#allocation5 + $0x7f0] sm:$0xff]  ;;  %v392_v8 = vld [vmem:[#allocation5 + $0x7d8] sm:$0xff] }
 0x1dd   :  { %v8751_v12 = vcombine.high %v391_v6, %v395_v7  ;;  %v8750_v19 = vcombine.low %v391_v6, %v395_v7  ;;  %v8752_v20 = vcombine.low %v392_v8, %v396_v9  ;;  %v447_v1 = vld [vmem:[#allocation5 + $0x990] sm:$0xff] }
 0x1df   :  { %3657 = vmatpush1.bf16.msra.mxu0 %v8686_v13  ;;  %3829 = vmatpush1.bf16.msra.mxu1 %v8688_v14  ;;  %v8753_v13 = vcombine.high %v392_v8, %v396_v9  ;;  %v399_v14 = vld [vmem:[#allocation5 + $0x810] sm:$0xff] }
 0x1e0   :  { %3658 = vmatprep.subr.bf16.mxu0 %v8695_v16  ;;  %3830 = vmatprep.subr.bf16.mxu1 %v8697_v17  ;;  %v403_v16 = vld [vmem:[#allocation5 + $0x830] sm:$0xff]  ;;  %v400_v17 = vld [vmem:[#allocation5 + $0x818] sm:$0xff] }
 0x1e1   :  { %v8759_v21 = vcombine.high %v399_v14, %v403_v16  ;;  %v8758_v28 = vcombine.low %v399_v14, %v403_v16  ;;  %v8760_v29 = vcombine.low %v400_v17, %v404_v18  ;;  %v455_v9 = vld [vmem:[#allocation5 + $0x9d0] sm:$0xff] }
 0x1e3   :  { %3659 = vmatpush1.bf16.msra.mxu0 %v8694_v22  ;;  %3831 = vmatpush1.bf16.msra.mxu1 %v8696_v23  ;;  %v8761_v22 = vcombine.high %v400_v17, %v404_v18  ;;  %v407_v23 = vld [vmem:[#allocation5 + $0x850] sm:$0xff] }
 0x1e4   :  { %3660 = vmatprep.subr.bf16.mxu0 %v8703_v24  ;;  %3832 = vmatprep.subr.bf16.mxu1 %v8705_v26  ;;  %v411_v24 = vld [vmem:[#allocation5 + $0x870] sm:$0xff]  ;;  %v408_v26 = vld [vmem:[#allocation5 + $0x858] sm:$0xff] }
 0x1e5   :  { %v8767_v31 = vcombine.high %v407_v23, %v411_v24  ;;  %v8766_v35 = vcombine.low %v407_v23, %v411_v24  ;;  %v8768_v36 = vcombine.low %v408_v26, %v412_v27  ;;  %v463_v18 = vld [vmem:[#allocation5 + $0xa10] sm:$0xff] }
 0x1e7   :  { %3661 = vmatpush1.bf16.msra.mxu0 %v8702_v58  ;;  %3833 = vmatpush1.bf16.msra.mxu1 %v8704_v32  ;;  %v8769_v58 = vcombine.high %v408_v26, %v412_v27  ;;  %v415_v32 = vld [vmem:[#allocation5 + $0x890] sm:$0xff] }
 0x1e8   :  { %3662 = vmatprep.subr.bf16.mxu0 %v8711_v33  ;;  %3834 = vmatprep.subr.bf16.mxu1 %v8713_v34  ;;  %v419_v33 = vld [vmem:[#allocation5 + $0x8b0] sm:$0xff]  ;;  %v416_v34 = vld [vmem:[#allocation5 + $0x898] sm:$0xff] }
 0x1e9   :  { %v8775_v37 = vcombine.high %v415_v32, %v419_v33  ;;  %v8774_v45 = vcombine.low %v415_v32, %v419_v33  ;;  %v471_v27 = vld [vmem:[#allocation5 + $0xa50] sm:$0xff] }
 0x1eb   :  { %3663 = vmatpush1.bf16.msra.mxu0 %v8710_v38  ;;  %3835 = vmatpush1.bf16.msra.mxu1 %v8712_v40  ;;  %v8777_v38 = vcombine.high %v416_v34, %v420_v15  ;;  %v423_v40 = vld [vmem:[#allocation5 + $0x8d0] sm:$0xff] }
 0x1ec   :  { %3664 = vmatprep.subr.bf16.mxu0 %v8719_v41  ;;  %3836 = vmatprep.subr.bf16.mxu1 %v8721_v42  ;;  %v427_v41 = vld [vmem:[#allocation5 + $0x8f0] sm:$0xff]  ;;  %v424_v42 = vld [vmem:[#allocation5 + $0x8d8] sm:$0xff] }
 0x1ed   :  { %v8783_v25 = vcombine.high %v423_v40, %v427_v41  ;;  %v8785_v46 = vcombine.high %v424_v42, %v428_v44  ;;  %v8782_v51 = vcombine.low %v423_v40, %v427_v41  ;;  %v8784_v52 = vcombine.low %v424_v42, %v428_v44  ;;  %v487_v44 = vld [vmem:[#allocation5 + $0xad0] sm:$0xff] }
 0x1ef   :  { %3665 = vmatpush1.bf16.msra.mxu0 %v8718_v47  ;;  %3837 = vmatpush1.bf16.msra.mxu1 %v8720_v48  ;;  %v431_v47 = vld [vmem:[#allocation5 + $0x910] sm:$0xff] }
 0x1f0   :  { %3666 = vmatprep.subr.bf16.mxu0 %v8727_v49  ;;  %3838 = vmatprep.subr.bf16.mxu1 %v8729_v50  ;;  %v435_v48 = vld [vmem:[#allocation5 + $0x930] sm:$0xff]  ;;  %v432_v49 = vld [vmem:[#allocation5 + $0x918] sm:$0xff] }
 0x1f1   :  { %v436_v50 = vld [vmem:[#allocation5 + $0x938] sm:$0xff]  ;;  %v8791_v54 = vcombine.high %v431_v47, %v435_v48 }
 0x1f2   :  { %v8792_v61 = vcombine.low %v432_v49, %v436_v50 }
 0x1f3   :  { %3667 = vmatpush1.bf16.msra.mxu0 %v8726_v56  ;;  %3839 = vmatpush1.bf16.msra.mxu1 %v8728_v57  ;;  %v443_v56 = vld [vmem:[#allocation5 + $0x970] sm:$0xff]  ;;  %v440_v57 = vld [vmem:[#allocation5 + $0x958] sm:$0xff] }
 0x1f4   :  { %3668 = vmatprep.subr.bf16.mxu0 %v8735_v59  ;;  %3840 = vmatprep.subr.bf16.mxu1 %v8737_v60  ;;  %v444_v59 = vld [vmem:[#allocation5 + $0x978] sm:$0xff]  ;;  %v8790_v60 = vcombine.low %v431_v47, %v435_v48  ;;  %v8799_v62 = vcombine.high %v439_v55, %v443_v56 }
 0x1f5   :  { %v8801_v0 = vcombine.high %v440_v57, %v444_v59  ;;  %v8800_v6 = vcombine.low %v440_v57, %v444_v59  ;;  %v503_v59 = vld [vmem:[#allocation5 + $0xb50] sm:$0xff] }
 0x1f7   :  { %3669 = vmatpush1.bf16.msra.mxu0 %v8734_v2  ;;  %3841 = vmatpush1.bf16.msra.mxu1 %v8736_v3  ;;  %v451_v2 = vld [vmem:[#allocation5 + $0x9b0] sm:$0xff]  ;;  %v448_v3 = vld [vmem:[#allocation5 + $0x998] sm:$0xff] }
 0x1f8   :  { %3670 = vmatprep.subr.bf16.mxu0 %v8743_v4  ;;  %3842 = vmatprep.subr.bf16.mxu1 %v8745_v5  ;;  %v452_v4 = vld [vmem:[#allocation5 + $0x9b8] sm:$0xff]  ;;  %v8798_v5 = vcombine.low %v439_v55, %v443_v56  ;;  %v8807_v7 = vcombine.high %v447_v1, %v451_v2 }
 0x1f9   :  { %v8809_v8 = vcombine.high %v448_v3, %v452_v4  ;;  %v8808_v14 = vcombine.low %v448_v3, %v452_v4  ;;  %v511_v4 = vld [vmem:[#allocation5 + $0xb90] sm:$0xff] }
 0x1fb   :  { %3671 = vmatpush1.bf16.msra.mxu0 %v8742_v10  ;;  %3843 = vmatpush1.bf16.msra.mxu1 %v8744_v11  ;;  %v459_v10 = vld [vmem:[#allocation5 + $0x9f0] sm:$0xff]  ;;  %v456_v11 = vld [vmem:[#allocation5 + $0x9d8] sm:$0xff] }
 0x1fc   :  { %3672 = vmatprep.subr.bf16.mxu0 %v8751_v12  ;;  %3844 = vmatprep.subr.bf16.mxu1 %v8753_v13  ;;  %v460_v12 = vld [vmem:[#allocation5 + $0x9f8] sm:$0xff]  ;;  %v8806_v13 = vcombine.low %v447_v1, %v451_v2  ;;  %v8815_v16 = vcombine.high %v455_v9, %v459_v10 }
 0x1fd   :  { %v8817_v17 = vcombine.high %v456_v11, %v460_v12  ;;  %v8816_v23 = vcombine.low %v456_v11, %v460_v12  ;;  %v519_v12 = vld [vmem:[#allocation5 + $0xbd0] sm:$0xff] }
 0x1ff   :  { %3673 = vmatpush1.bf16.msra.mxu0 %v8750_v19  ;;  %3845 = vmatpush1.bf16.msra.mxu1 %v8752_v20  ;;  %v467_v19 = vld [vmem:[#allocation5 + $0xa30] sm:$0xff]  ;;  %v464_v20 = vld [vmem:[#allocation5 + $0xa18] sm:$0xff] }
 0x200   :  { %3685 = vmatprep.subr.bf16.mxu0 %v8759_v21  ;;  %3857 = vmatprep.subr.bf16.mxu1 %v8761_v22  ;;  %v468_v21 = vld [vmem:[#allocation5 + $0xa38] sm:$0xff]  ;;  %v8814_v22 = vcombine.low %v455_v9, %v459_v10  ;;  %v8823_v24 = vcombine.high %v463_v18, %v467_v19 }
 0x201   :  { %v8825_v26 = vcombine.high %v464_v20, %v468_v21  ;;  %v8824_v32 = vcombine.low %v464_v20, %v468_v21  ;;  %v527_v21 = vld [vmem:[#allocation5 + $0xc10] sm:$0xff] }
 0x202   :  { %3675 = vmatmul.mubr.bf16.vlgmr.msra.gmra.mrb[4].mxu0 %v10220_v30  ;;  %3847 = vmatmul.mubr.bf16.vlgmr.msra.gmra.mrb[4].mxu1 %v10220_v30  ;;  %v8776_v30 = vcombine.low %v416_v34, %v420_v15  ;;  %v479_v15 = vld [vmem:[#allocation5 + $0xa90] sm:$0xff] }
 0x203   :  { %3686 = vmatpush1.bf16.msra.mxu0 %v8758_v28  ;;  %3858 = vmatpush1.bf16.msra.mxu1 %v8760_v29  ;;  %v475_v28 = vld [vmem:[#allocation5 + $0xa70] sm:$0xff]  ;;  %v472_v29 = vld [vmem:[#allocation5 + $0xa58] sm:$0xff] }
 0x204   :  { %3687 = vmatprep.subr.bf16.mxu0 %v8767_v31  ;;  %3859 = vmatprep.subr.bf16.mxu1 %v8769_v58  ;;  %v476_v31 = vld [vmem:[#allocation5 + $0xa78] sm:$0xff]  ;;  %v8822_v58 = vcombine.low %v463_v18, %v467_v19  ;;  %v8831_v33 = vcombine.high %v471_v27, %v475_v28 }
 0x205   :  { %3717 = vmatprep.mubr.bf16.mxu0 %v10222_v39  ;;  %3889 = vmatprep.mubr.bf16.mxu1 %v10222_v39  ;;  %v8793_v39 = vcombine.high %v432_v49, %v436_v50  ;;  %v8833_v34 = vcombine.high %v472_v29, %v476_v31  ;;  %v8832_v40 = vcombine.low %v472_v29, %v476_v31  ;;  %v495_v50 = vld [vmem:[#allocation5 + $0xb10] sm:$0xff] }
 0x206   :  { %v535_v31 = vld [vmem:[#allocation5 + $0xc50] sm:$0xff] }
 0x207   :  { %3688 = vmatpush1.bf16.msra.mxu0 %v8766_v35  ;;  %3860 = vmatpush1.bf16.msra.mxu1 %v8768_v36  ;;  %v483_v35 = vld [vmem:[#allocation5 + $0xab0] sm:$0xff]  ;;  %v480_v36 = vld [vmem:[#allocation5 + $0xa98] sm:$0xff] }
 0x208   :  { %3689 = vmatprep.subr.bf16.mxu0 %v8775_v37  ;;  %3861 = vmatprep.subr.bf16.mxu1 %v8777_v38  ;;  %v484_v37 = vld [vmem:[#allocation5 + $0xab8] sm:$0xff]  ;;  %v8830_v38 = vcombine.low %v471_v27, %v475_v28  ;;  %v8839_v41 = vcombine.high %v479_v15, %v483_v35 }
 0x209   :  { %v8841_v42 = vcombine.high %v480_v36, %v484_v37  ;;  %v8840_v47 = vcombine.low %v480_v36, %v484_v37  ;;  %v543_v37 = vld [vmem:[#allocation5 + $0xc90] sm:$0xff] }
 0x20b   :  { %3690 = vmatpush1.bf16.msra.mxu0 %v8774_v45  ;;  %3862 = vmatpush1.bf16.msra.mxu1 %v8776_v30  ;;  %v491_v45 = vld [vmem:[#allocation5 + $0xaf0] sm:$0xff]  ;;  %v488_v30 = vld [vmem:[#allocation5 + $0xad8] sm:$0xff] }
 0x20c   :  { %3691 = vmatprep.subr.bf16.mxu0 %v8783_v25  ;;  %3863 = vmatprep.subr.bf16.mxu1 %v8785_v46  ;;  %v492_v25 = vld [vmem:[#allocation5 + $0xaf8] sm:$0xff]  ;;  %v8838_v46 = vcombine.low %v479_v15, %v483_v35  ;;  %v8847_v48 = vcombine.high %v487_v44, %v491_v45 }
 0x20d   :  { %v8849_v49 = vcombine.high %v488_v30, %v492_v25  ;;  %v8848_v55 = vcombine.low %v488_v30, %v492_v25  ;;  %v551_v25 = vld [vmem:[#allocation5 + $0xcd0] sm:$0xff] }
 0x20f   :  { %3692 = vmatpush1.bf16.msra.mxu0 %v8782_v51  ;;  %3864 = vmatpush1.bf16.msra.mxu1 %v8784_v52  ;;  %v499_v51 = vld [vmem:[#allocation5 + $0xb30] sm:$0xff]  ;;  %v496_v52 = vld [vmem:[#allocation5 + $0xb18] sm:$0xff] }
 0x210   :  { %3693 = vmatprep.subr.bf16.mxu0 %v8791_v54  ;;  %3865 = vmatprep.subr.bf16.mxu1 %v8793_v39  ;;  %v500_v54 = vld [vmem:[#allocation5 + $0xb38] sm:$0xff]  ;;  %v8846_v39 = vcombine.low %v487_v44, %v491_v45  ;;  %v8855_v56 = vcombine.high %v495_v50, %v499_v51 }
 0x211   :  { %v8857_v57 = vcombine.high %v496_v52, %v500_v54  ;;  %v8856_v1 = vcombine.low %v496_v52, %v500_v54  ;;  %v559_v54 = vld [vmem:[#allocation5 + $0xd10] sm:$0xff] }
 0x213   :  { %3694 = vmatpush1.bf16.msra.mxu0 %v8790_v60  ;;  %3866 = vmatpush1.bf16.msra.mxu1 %v8792_v61  ;;  %v507_v60 = vld [vmem:[#allocation5 + $0xb70] sm:$0xff]  ;;  %v504_v61 = vld [vmem:[#allocation5 + $0xb58] sm:$0xff] }
 0x214   :  { %3695 = vmatprep.subr.bf16.mxu0 %v8799_v62  ;;  %3867 = vmatprep.subr.bf16.mxu1 %v8801_v0  ;;  %v508_v62 = vld [vmem:[#allocation5 + $0xb78] sm:$0xff]  ;;  %v8854_v0 = vcombine.low %v495_v50, %v499_v51  ;;  %v8863_v2 = vcombine.high %v503_v59, %v507_v60 }
 0x215   :  { %v8865_v3 = vcombine.high %v504_v61, %v508_v62  ;;  %v8864_v9 = vcombine.low %v504_v61, %v508_v62  ;;  %v567_v62 = vld [vmem:[#allocation5 + $0xd50] sm:$0xff] }
 0x217   :  { %3696 = vmatpush1.bf16.msra.mxu0 %v8798_v5  ;;  %3868 = vmatpush1.bf16.msra.mxu1 %v8800_v6  ;;  %v515_v5 = vld [vmem:[#allocation5 + $0xbb0] sm:$0xff]  ;;  %v512_v6 = vld [vmem:[#allocation5 + $0xb98] sm:$0xff] }
 0x218   :  { %3697 = vmatprep.subr.bf16.mxu0 %v8807_v7  ;;  %3869 = vmatprep.subr.bf16.mxu1 %v8809_v8  ;;  %v516_v7 = vld [vmem:[#allocation5 + $0xbb8] sm:$0xff]  ;;  %v8862_v8 = vcombine.low %v503_v59, %v507_v60  ;;  %v8871_v10 = vcombine.high %v511_v4, %v515_v5 }
 0x219   :  { %v8873_v11 = vcombine.high %v512_v6, %v516_v7  ;;  %v8872_v18 = vcombine.low %v512_v6, %v516_v7 }
 0x21b   :  { %3698 = vmatpush1.bf16.msra.mxu0 %v8806_v13  ;;  %3870 = vmatpush1.bf16.msra.mxu1 %v8808_v14  ;;  %v523_v13 = vld [vmem:[#allocation5 + $0xbf0] sm:$0xff]  ;;  %v520_v14 = vld [vmem:[#allocation5 + $0xbd8] sm:$0xff] }
 0x21c   :  { %3699 = vmatprep.subr.bf16.mxu0 %v8815_v16  ;;  %3871 = vmatprep.subr.bf16.mxu1 %v8817_v17  ;;  %v524_v16 = vld [vmem:[#allocation5 + $0xbf8] sm:$0xff]  ;;  %v8870_v17 = vcombine.low %v511_v4, %v515_v5  ;;  %v8879_v19 = vcombine.high %v519_v12, %v523_v13  ;;  %v653_v5 = vld [vmem:[#allocation7] sm:$0xff] }
 0x21d   :  { %v8881_v20 = vcombine.high %v520_v14, %v524_v16  ;;  %v8880_v27 = vcombine.low %v520_v14, %v524_v16  ;;  %v576_v16 = vld [vmem:[#allocation5 + $0xd98] sm:$0xff] }
 0x21f   :  { %3700 = vmatpush1.bf16.msra.mxu0 %v8814_v22  ;;  %3872 = vmatpush1.bf16.msra.mxu1 %v8816_v23  ;;  %v531_v22 = vld [vmem:[#allocation5 + $0xc30] sm:$0xff]  ;;  %v528_v23 = vld [vmem:[#allocation5 + $0xc18] sm:$0xff] }
 0x220   :  { %3701 = vmatprep.subr.bf16.mxu0 %v8823_v24  ;;  %3873 = vmatprep.subr.bf16.mxu1 %v8825_v26  ;;  %v532_v24 = vld [vmem:[#allocation5 + $0xc38] sm:$0xff]  ;;  %v8878_v26 = vcombine.low %v519_v12, %v523_v13  ;;  %v8887_v28 = vcombine.high %v527_v21, %v531_v22  ;;  %v575_v12 = vld [vmem:[#allocation5 + $0xd90] sm:$0xff] }
 0x221   :  { %v8889_v29 = vcombine.high %v528_v23, %v532_v24  ;;  %v8888_v15 = vcombine.low %v528_v23, %v532_v24  ;;  %v579_v13 = vld [vmem:[#allocation5 + $0xdb0] sm:$0xff] }
 0x222   :  { %v8935_v23 = vcombine.high %v575_v12, %v579_v13 }
 0x223   :  { %3702 = vmatpush1.bf16.msra.mxu0 %v8822_v58  ;;  %3874 = vmatpush1.bf16.msra.mxu1 %v8824_v32  ;;  %v539_v58 = vld [vmem:[#allocation5 + $0xc70] sm:$0xff]  ;;  %v536_v32 = vld [vmem:[#allocation5 + $0xc58] sm:$0xff] }
 0x224   :  { %3703 = vmatprep.subr.bf16.mxu0 %v8831_v33  ;;  %3875 = vmatprep.subr.bf16.mxu1 %v8833_v34  ;;  %v540_v33 = vld [vmem:[#allocation5 + $0xc78] sm:$0xff]  ;;  %v8886_v34 = vcombine.low %v527_v21, %v531_v22  ;;  %v8895_v35 = vcombine.high %v535_v31, %v539_v58 }
 0x225   :  { %v8897_v36 = vcombine.high %v536_v32, %v540_v33  ;;  %v8896_v44 = vcombine.low %v536_v32, %v540_v33  ;;  %v584_v32 = vld [vmem:[#allocation5 + $0xdd8] sm:$0xff] }
 0x226   :  { %v588_v33 = vld [vmem:[#allocation5 + $0xdf8] sm:$0xff] }
 0x227   :  { %3704 = vmatpush1.bf16.msra.mxu0 %v8830_v38  ;;  %3876 = vmatpush1.bf16.msra.mxu1 %v8832_v40  ;;  %v547_v38 = vld [vmem:[#allocation5 + $0xcb0] sm:$0xff]  ;;  %v544_v40 = vld [vmem:[#allocation5 + $0xc98] sm:$0xff] }
 0x228   :  { %3705 = vmatprep.subr.bf16.mxu0 %v8839_v41  ;;  %3877 = vmatprep.subr.bf16.mxu1 %v8841_v42  ;;  %v548_v41 = vld [vmem:[#allocation5 + $0xcb8] sm:$0xff]  ;;  %v8894_v42 = vcombine.low %v535_v31, %v539_v58  ;;  %v8903_v45 = vcombine.high %v543_v37, %v547_v38  ;;  %v8902_v50 = vcombine.low %v543_v37, %v547_v38 }
 0x229   :  { %v8905_v30 = vcombine.high %v544_v40, %v548_v41  ;;  %v8934_v37 = vcombine.low %v575_v12, %v579_v13  ;;  %v600_v12 = vld [vmem:[#allocation5 + $0xe58] sm:$0xff] }
 0x22a   :  { %v604_v13 = vld [vmem:[#allocation5 + $0xe78] sm:$0xff] }
 0x22b   :  { %3706 = vmatpush1.bf16.msra.mxu0 %v8838_v46  ;;  %3878 = vmatpush1.bf16.msra.mxu1 %v8840_v47  ;;  %v555_v46 = vld [vmem:[#allocation5 + $0xcf0] sm:$0xff]  ;;  %v552_v47 = vld [vmem:[#allocation5 + $0xcd8] sm:$0xff] }
 0x22c   :  { %3707 = vmatprep.subr.bf16.mxu0 %v8847_v48  ;;  %3879 = vmatprep.subr.bf16.mxu1 %v8849_v49  ;;  %v556_v48 = vld [vmem:[#allocation5 + $0xcf8] sm:$0xff]  ;;  %v655_v49 = vlaneseq  ;;  %v8911_v51 = vcombine.high %v551_v25, %v555_v46  ;;  %v8910_v59 = vcombine.low %v551_v25, %v555_v46 }
 0x22d   :  { %v8913_v52 = vcombine.high %v552_v47, %v556_v48  ;;  %v8912_v60 = vcombine.low %v552_v47, %v556_v48  ;;  %v8945_v48 = vcombine.high %v584_v32, %v588_v33 }
 0x22f   :  { %3708 = vmatpush1.bf16.msra.mxu0 %v8846_v39  ;;  %3880 = vmatpush1.bf16.msra.mxu1 %v8848_v55  ;;  %v563_v39 = vld [vmem:[#allocation5 + $0xd30] sm:$0xff]  ;;  %v560_v55 = vld [vmem:[#allocation5 + $0xd18] sm:$0xff] }
 0x230   :  { %3709 = vmatprep.subr.bf16.mxu0 %v8855_v56  ;;  %3881 = vmatprep.subr.bf16.mxu1 %v8857_v57  ;;  %v564_v56 = vld [vmem:[#allocation5 + $0xd38] sm:$0xff]  ;;  %v10254_v57 = vshrl.u32 %v655_v49, 7  ;;  %v8918_v4 = vcombine.low %v559_v54, %v563_v39  ;;  %v591_v49 = vld [vmem:[#allocation5 + $0xe10] sm:$0xff] }
 0x231   :  { %v8921_v61 = vcombine.high %v560_v55, %v564_v56 }
 0x232   :  { %v665_v6 = vsub.s32 2, %v10254_v57  ;;  %v661_v7 = vsub.s32 1, %v10254_v57 }
 0x233   :  { %3710 = vmatpush1.bf16.msra.mxu0 %v8854_v0  ;;  %3882 = vmatpush1.bf16.msra.mxu1 %v8856_v1  ;;  %v571_v0 = vld [vmem:[#allocation5 + $0xd70] sm:$0xff]  ;;  %v657_v1 = vsub.s32 0, %v10254_v57 }
 0x234   :  { %3711 = vmatprep.subr.bf16.mxu0 %v8863_v2  ;;  %3883 = vmatprep.subr.bf16.mxu1 %v8865_v3  ;;  %v568_v2 = vld [vmem:[#allocation5 + $0xd58] sm:$0xff] }
 0x235   :  { %v572_v3 = vld [vmem:[#allocation5 + $0xd78] sm:$0xff]  ;;  %v658_v14 = vrot.slane %v653_v5, %v657_v1 }
 0x236   :  { %v8928_v22 = vcombine.low %v568_v2, %v572_v3 }
 0x237   :  { %3712 = vmatpush1.bf16.msra.mxu0 %v8862_v8  ;;  %3884 = vmatpush1.bf16.msra.mxu1 %v8864_v9  ;;  %v8920_v8 = vcombine.low %v560_v55, %v564_v56  ;;  %v669_v9 = vsub.s32 3, %v10254_v57  ;;  %v596_v55 = vld [vmem:[#allocation5 + $0xe38] sm:$0xff] }
 0x238   :  { %3713 = vmatprep.subr.bf16.mxu0 %v8871_v10  ;;  %3885 = vmatprep.subr.bf16.mxu1 %v8873_v11  ;;  %v8927_v10 = vcombine.high %v567_v62, %v571_v0  ;;  %v8929_v11 = vcombine.high %v568_v2, %v572_v3 }
 0x239   :  { %v670_v21 = vrot.slane %v653_v5, %v669_v9 }
 0x23b   :  { %3714 = vmatpush1.bf16.msra.mxu0 %v8870_v17  ;;  %3886 = vmatpush1.bf16.msra.mxu1 %v8872_v18  ;;  %v580_v17 = vld [vmem:[#allocation5 + $0xdb8] sm:$0xff]  ;;  %v666_v18 = vrot.slane %v653_v5, %v665_v6 }
 0x23c   :  { %3715 = vmatprep.subr.bf16.mxu0 %v8879_v19  ;;  %3887 = vmatprep.subr.bf16.mxu1 %v8881_v20  ;;  %v662_v19 = vrot.slane %v653_v5, %v661_v7  ;;  %v8926_v20 = vcombine.low %v567_v62, %v571_v0  ;;  %v8936_v38 = vcombine.low %v576_v16, %v580_v17 }
 0x23f   :  { %3716 = vmatpush1.bf16.msra.mxu0 %v8878_v26  ;;  %3888 = vmatpush1.bf16.msra.mxu1 %v8880_v27  ;;  %v8937_v26 = vcombine.high %v576_v16, %v580_v17  ;;  %v583_v27 = vld [vmem:[#allocation5 + $0xdd0] sm:$0xff] }
 0x240   :  { %3728 = vmatprep.subr.bf16.mxu0 %v8887_v28  ;;  %3900 = vmatprep.subr.bf16.mxu1 %v8889_v29  ;;  %v587_v28 = vld [vmem:[#allocation5 + $0xdf0] sm:$0xff] }
 0x241   :  { %v8942_v47 = vcombine.low %v583_v27, %v587_v28 }
 0x242   :  { %3718 = vmatmul.mubr.bf16.vlgmr.msra.gmra.mrb[4].mxu0 %v10228_v43  ;;  %3890 = vmatmul.mubr.bf16.vlgmr.msra.gmra.mrb[4].mxu1 %v10228_v43  ;;  %v8904_v43 = vcombine.low %v544_v40, %v548_v41 }
 0x243   :  { %3729 = vmatpush1.bf16.msra.mxu0 %v8886_v34  ;;  %3901 = vmatpush1.bf16.msra.mxu1 %v8888_v15 }
 0x244   :  { %3730 = vmatprep.subr.bf16.mxu0 %v8895_v35  ;;  %3902 = vmatprep.subr.bf16.mxu1 %v8897_v36 }
 0x245   :  { %3760 = vmatprep.mubr.bf16.mxu0 %v10230_v53  ;;  %3932 = vmatprep.mubr.bf16.mxu1 %v10230_v53  ;;  %v8919_v53 = vcombine.high %v559_v54, %v563_v39  ;;  %v8944_v54 = vcombine.low %v584_v32, %v588_v33  ;;  %v592_v39 = vld [vmem:[#allocation5 + $0xe18] sm:$0xff] }
 0x246   :  { %v8953_v5 = vcombine.high %v592_v39, %v596_v55  ;;  %v8952_v16 = vcombine.low %v592_v39, %v596_v55 }
 0x247   :  { %3731 = vmatpush1.bf16.msra.mxu0 %v8894_v42  ;;  %3903 = vmatpush1.bf16.msra.mxu1 %v8896_v44 }
 0x248   :  { %3732 = vmatprep.subr.bf16.mxu0 %v8903_v45  ;;  %3904 = vmatprep.subr.bf16.mxu1 %v8905_v30  ;;  %v8943_v45 = vcombine.high %v583_v27, %v587_v28  ;;  %v615_v28 = vld [vmem:[#allocation5 + $0xed0] sm:$0xff] }
 0x24b   :  { %3733 = vmatpush1.bf16.msra.mxu0 %v8902_v50  ;;  %3905 = vmatpush1.bf16.msra.mxu1 %v8904_v43  ;;  %v595_v50 = vld [vmem:[#allocation5 + $0xe30] sm:$0xff] }
 0x24c   :  { %3734 = vmatprep.subr.bf16.mxu0 %v8911_v51  ;;  %3906 = vmatprep.subr.bf16.mxu1 %v8913_v52  ;;  %v8951_v2 = vcombine.high %v591_v49, %v595_v50 }
 0x24f   :  { %3735 = vmatpush1.bf16.msra.mxu0 %v8910_v59  ;;  %3907 = vmatpush1.bf16.msra.mxu1 %v8912_v60 }
 0x250   :  { %3736 = vmatprep.subr.bf16.mxu0 %v8919_v53  ;;  %3908 = vmatprep.subr.bf16.mxu1 %v8921_v61 }
 0x253   :  { %3737 = vmatpush1.bf16.msra.mxu0 %v8918_v4  ;;  %3909 = vmatpush1.bf16.msra.mxu1 %v8920_v8  ;;  %v599_v8 = vld [vmem:[#allocation5 + $0xe50] sm:$0xff] }
 0x254   :  { %3738 = vmatprep.subr.bf16.mxu0 %v8927_v10  ;;  %3910 = vmatprep.subr.bf16.mxu1 %v8929_v11  ;;  %v603_v10 = vld [vmem:[#allocation5 + $0xe70] sm:$0xff] }
 0x255   :  { %v3418_v24 = vpop.f32.mrb[0].mxu0  ;;  %v3590_v31 = vpop.f32.mrb[0].mxu1  ;;  %v8959_v17 = vcombine.high %v599_v8, %v603_v10 }
 0x256   :  { %v9675_v29 = vadd.f32 %v3418_v24, %v658_v14  ;;  %v3420_v58 = vpop.f32.mrb[1].mxu0  ;;  %v9679_v34 = vadd.f32 %v3590_v31, %v666_v18  ;;  %v3592_v35 = vpop.f32.mrb[1].mxu1  ;;  %v8960_v24 = vcombine.low %v600_v12, %v604_v13  ;;  %v616_v31 = vld [vmem:[#allocation5 + $0xed8] sm:$0xff] }
 0x257   :  { %v9676_v15 = vadd.f32 %v3420_v58, %v662_v19  ;;  %v3422_v36 = vpop.f32.mrb[2].mxu0  ;;  %3739 = vmatpush1.bf16.msra.mxu0 %v8926_v20  ;;  %v9680_v40 = vadd.f32 %v3592_v35, %v670_v21  ;;  %v3594_v42 = vpop.f32.mrb[2].mxu1  ;;  %3911 = vmatpush1.bf16.msra.mxu1 %v8928_v22  ;;  %v611_v20 = vld [vmem:[#allocation5 + $0xeb0] sm:$0xff]  ;;  %v612_v22 = vld [vmem:[#allocation5 + $0xeb8] sm:$0xff] }
 0x258   :  { %v9677_v41 = vadd.f32 %v3422_v36, %v658_v14  ;;  %v3424_v44 = vpop.f32.mrb[3].mxu0  ;;  %3740 = vmatprep.subr.bf16.mxu0 %v8935_v23  ;;  %v9681_v30 = vadd.f32 %v3594_v42, %v666_v18  ;;  %v3596_v46 = vpop.f32.mrb[3].mxu1  ;;  %3912 = vmatprep.subr.bf16.mxu1 %v8937_v26  ;;  %v3943_v43 = vmax.f32 %v9675_v29, 0.0  ;;  %v3945_v56 = vmax.f32 %v9679_v34, 0.0  ;;  %v619_v29 = vld [vmem:[#allocation5 + $0xef0] sm:$0xff]  ;;  %v620_v58 = vld [vmem:[#allocation5 + $0xef8] sm:$0xff] }
 0x259   :  { %v9678_v25 = vadd.f32 %v3424_v44, %v662_v19  ;;  %v9682_v52 = vadd.f32 %v3596_v46, %v670_v21  ;;  %v3944_v59 = vmax.f32 %v9676_v15, 0.0  ;;  %v3946_v61 = vmax.f32 %v9680_v40, 0.0  ;;  %v607_v19 = vld [vmem:[#allocation5 + $0xe90] sm:$0xff]  ;;  %v608_v21 = vld [vmem:[#allocation5 + $0xe98] sm:$0xff] }
 0x25a   :  { %v3951_v51 = vmax.f32 %v9677_v41, 0.0  ;;  %v3953_v60 = vmax.f32 %v9681_v30, 0.0  ;;  %v8950_v14 = vcombine.low %v591_v49, %v595_v50  ;;  %v8961_v18 = vcombine.high %v600_v12, %v604_v13  ;;  %v623_v35 = vld [vmem:[#allocation5 + $0xf10] sm:$0xff]  ;;  %v636_v46 = vld [vmem:[#allocation5 + $0xf78] sm:$0xff]  ;;  %v3967_v12 = vld [vmem:[#allocation8] sm:$0xff] }
 0x25b   :  { %v3952_v53 = vmax.f32 %v9678_v25, 0.0  ;;  %3741 = vmatpush1.bf16.msra.mxu0 %v8934_v37  ;;  %v3954_v0 = vmax.f32 %v9682_v52, 0.0  ;;  %3913 = vmatpush1.bf16.msra.mxu1 %v8936_v38  ;;  %v8958_v23 = vcombine.low %v599_v8, %v603_v10  ;;  %v8967_v26 = vcombine.high %v607_v19, %v611_v20  ;;  %v627_v36 = vld [vmem:[#allocation5 + $0xf30] sm:$0xff]  ;;  %v624_v37 = vld [vmem:[#allocation5 + $0xf18] sm:$0xff]  ;;  %v3971_v13 = vld [vmem:[#allocation8 + $0x20] sm:$0xff] }
 0x25c   :  { %v10268_v62 = vpack.c.bf16 %v3951_v51, %v3943_v43  ;;  %3742 = vmatprep.subr.bf16.mxu0 %v8943_v45  ;;  %v10270_v3 = vpack.c.bf16 %v3953_v60, %v3945_v56  ;;  %3914 = vmatprep.subr.bf16.mxu1 %v8945_v48  ;;  %v8969_v27 = vcombine.high %v608_v21, %v612_v22  ;;  %v628_v38 = vld [vmem:[#allocation5 + $0xf38] sm:$0xff]  ;;  %v631_v45 = vld [vmem:[#allocation5 + $0xf50] sm:$0xff] }
 0x25d   :  { %v10272_v4 = vpack.c.bf16 %v3952_v53, %v3944_v59  ;;  %v10274_v11 = vpack.c.bf16 %v3954_v0, %v3946_v61  ;;  %v8966_v32 = vcombine.low %v607_v19, %v611_v20  ;;  %v8968_v33 = vcombine.low %v608_v21, %v612_v22  ;;  %v635_v30 = vld [vmem:[#allocation5 + $0xf70] sm:$0xff]  ;;  %v632_v25 = vld [vmem:[#allocation5 + $0xf58] sm:$0xff]  ;;  %v3975_v21 = vld [vmem:[#allocation8 + $0x40] sm:$0xff] }
 0x25e   :  { %v8975_v34 = vcombine.high %v615_v28, %v619_v29  ;;  %v8977_v15 = vcombine.high %v616_v31, %v620_v58  ;;  %v8974_v40 = vcombine.low %v615_v28, %v619_v29  ;;  %v8976_v41 = vcombine.low %v616_v31, %v620_v58  ;;  %v639_v43 = vld [vmem:[#allocation5 + $0xf90] sm:$0xff]  ;;  %v640_v52 = vld [vmem:[#allocation5 + $0xf98] sm:$0xff]  ;;  %v3979_v22 = vld [vmem:[#allocation8 + $0x60] sm:$0xff] }
 0x25f   :  { %3743 = vmatpush1.bf16.msra.mxu0 %v8942_v47  ;;  %3915 = vmatpush1.bf16.msra.mxu1 %v8944_v54  ;;  %v8983_v42 = vcombine.high %v623_v35, %v627_v36  ;;  %v8985_v44 = vcombine.high %v624_v37, %v628_v38  ;;  %v8982_v47 = vcombine.low %v623_v35, %v627_v36  ;;  %v643_v51 = vld [vmem:[#allocation5 + $0xfb0] sm:$0xff]  ;;  %v644_v54 = vld [vmem:[#allocation5 + $0xfb8] sm:$0xff]  ;;  %v3983_v29 = vld [vmem:[#allocation8 + $0x80] sm:$0xff] }
 0x260   :  { %3744 = vmatprep.subr.bf16.mxu0 %v8951_v2  ;;  %3916 = vmatprep.subr.bf16.mxu1 %v8953_v5  ;;  %v8984_v48 = vcombine.low %v624_v37, %v628_v38  ;;  %v8991_v49 = vcombine.high %v631_v45, %v635_v30  ;;  %v8993_v50 = vcombine.high %v632_v25, %v636_v46  ;;  %v647_v60 = vld [vmem:[#allocation5 + $0xfd0] sm:$0xff]  ;;  %v648_v61 = vld [vmem:[#allocation5 + $0xfd8] sm:$0xff]  ;;  %v3987_v31 = vld [vmem:[#allocation8 + $0xa0] sm:$0xff] }
 0x261   :  { %v8990_v39 = vcombine.low %v631_v45, %v635_v30  ;;  %v8992_v55 = vcombine.low %v632_v25, %v636_v46  ;;  %v8999_v56 = vcombine.high %v639_v43, %v643_v51  ;;  %v9001_v59 = vcombine.high %v640_v52, %v644_v54  ;;  %v651_v53 = vld [vmem:[#allocation5 + $0xff0] sm:$0xff]  ;;  %v652_v0 = vld [vmem:[#allocation5 + $0xff8] sm:$0xff]  ;;  %v3991_v37 = vld [vmem:[#allocation8 + $0xc0] sm:$0xff] }
 0x262   :  { %v8998_v2 = vcombine.low %v639_v43, %v643_v51  ;;  %v9000_v5 = vcombine.low %v640_v52, %v644_v54  ;;  %v9007_v8 = vcombine.high %v647_v60, %v651_v53  ;;  %v9009_v10 = vcombine.high %v648_v61, %v652_v0  ;;  %v3995_v38 = vld [vmem:[#allocation8 + $0xe0] sm:$0xff]  ;;  %v4000_v46 = vld [vmem:[#allocation8 + $0x108] sm:$0xff] }
 0x263   :  { %3745 = vmatpush1.bf16.msra.mxu0 %v8950_v14  ;;  %3917 = vmatpush1.bf16.msra.mxu1 %v8952_v16  ;;  %v3968_v14 = vld [vmem:[#allocation8 + $0x8] sm:$0xff]  ;;  %v9011_v19 = vcombine.high %v3967_v12, %v3971_v13  ;;  %v9019_v28 = vcombine.high %v3975_v21, %v3979_v22  ;;  %v9027_v35 = vcombine.high %v3983_v29, %v3987_v31  ;;  %v3999_v30 = vld [vmem:[#allocation8 + $0x100] sm:$0xff] }
 0x264   :  { %3746 = vmatprep.subr.bf16.mxu0 %v8959_v17  ;;  %3918 = vmatprep.subr.bf16.mxu1 %v8961_v18  ;;  %v3972_v16 = vld [vmem:[#allocation8 + $0x28] sm:$0xff]  ;;  %v9006_v17 = vcombine.low %v647_v60, %v651_v53  ;;  %v9008_v18 = vcombine.low %v648_v61, %v652_v0  ;;  %v4003_v25 = vld [vmem:[#allocation8 + $0x120] sm:$0xff] }
 0x265   :  { %v9013_v20 = vcombine.high %v3968_v14, %v3972_v16  ;;  %v4007_v51 = vld [vmem:[#allocation8 + $0x140] sm:$0xff]  ;;  %v4008_v54 = vld [vmem:[#allocation8 + $0x148] sm:$0xff] }
 0x266   :  { %v4011_v52 = vld [vmem:[#allocation8 + $0x160] sm:$0xff]  ;;  %v4016_v0 = vld [vmem:[#allocation8 + $0x188] sm:$0xff] }
 0x267   :  { %3747 = vmatpush1.bf16.msra.mxu0 %v8958_v23  ;;  %3919 = vmatpush1.bf16.msra.mxu1 %v8960_v24  ;;  %v9010_v23 = vcombine.low %v3967_v12, %v3971_v13  ;;  %v3976_v24 = vld [vmem:[#allocation8 + $0x48] sm:$0xff]  ;;  %v4015_v53 = vld [vmem:[#allocation8 + $0x180] sm:$0xff] }
 0x268   :  { %3748 = vmatprep.subr.bf16.mxu0 %v8967_v26  ;;  %3920 = vmatprep.subr.bf16.mxu1 %v8969_v27  ;;  %v3980_v26 = vld [vmem:[#allocation8 + $0x68] sm:$0xff]  ;;  %v9012_v27 = vcombine.low %v3968_v14, %v3972_v16  ;;  %v4019_v61 = vld [vmem:[#allocation8 + $0x1a0] sm:$0xff] }
 0x269   :  { %v9021_v58 = vcombine.high %v3976_v24, %v3980_v26  ;;  %v4023_v13 = vld [vmem:[#allocation8 + $0x1c0] sm:$0xff]  ;;  %v4024_v16 = vld [vmem:[#allocation8 + $0x1c8] sm:$0xff] }
 0x26a   :  { %v4027_v14 = vld [vmem:[#allocation8 + $0x1e0] sm:$0xff] }
 0x26b   :  { %3749 = vmatpush1.bf16.msra.mxu0 %v8966_v32  ;;  %3921 = vmatpush1.bf16.msra.mxu1 %v8968_v33  ;;  %v3984_v32 = vld [vmem:[#allocation8 + $0x88] sm:$0xff] }
 0x26c   :  { %3750 = vmatprep.subr.bf16.mxu0 %v8975_v34  ;;  %3922 = vmatprep.subr.bf16.mxu1 %v8977_v15  ;;  %v3988_v33 = vld [vmem:[#allocation8 + $0xa8] sm:$0xff]  ;;  %v9018_v34 = vcombine.low %v3975_v21, %v3979_v22  ;;  %v9020_v15 = vcombine.low %v3976_v24, %v3980_v26  ;;  %v4031_v22 = vld [vmem:[#allocation8 + $0x200] sm:$0xff] }
 0x26d   :  { %v9029_v36 = vcombine.high %v3984_v32, %v3988_v33  ;;  %v4032_v24 = vld [vmem:[#allocation8 + $0x208] sm:$0xff] }
 0x26e   :  { %v4036_v26 = vld [vmem:[#allocation8 + $0x228] sm:$0xff] }
 0x26f   :  { %3751 = vmatpush1.bf16.msra.mxu0 %v8974_v40  ;;  %3923 = vmatpush1.bf16.msra.mxu1 %v8976_v41  ;;  %v3992_v40 = vld [vmem:[#allocation8 + $0xc8] sm:$0xff] }
 0x270   :  { %3752 = vmatprep.subr.bf16.mxu0 %v8983_v42  ;;  %3924 = vmatprep.subr.bf16.mxu1 %v8985_v44  ;;  %v3996_v41 = vld [vmem:[#allocation8 + $0xe8] sm:$0xff]  ;;  %v9026_v42 = vcombine.low %v3983_v29, %v3987_v31  ;;  %v9035_v44 = vcombine.high %v3991_v37, %v3995_v38  ;;  %v9077_v31 = vcombine.high %v4032_v24, %v4036_v26 }
 0x271   :  { %v9037_v45 = vcombine.high %v3992_v40, %v3996_v41 }
 0x273   :  { %3753 = vmatpush1.bf16.msra.mxu0 %v8982_v47  ;;  %3925 = vmatpush1.bf16.msra.mxu1 %v8984_v48  ;;  %v4004_v47 = vld [vmem:[#allocation8 + $0x128] sm:$0xff]  ;;  %v9034_v48 = vcombine.low %v3991_v37, %v3995_v38  ;;  %v4047_v38 = vld [vmem:[#allocation8 + $0x280] sm:$0xff] }
 0x274   :  { %3754 = vmatprep.subr.bf16.mxu0 %v8991_v49  ;;  %3926 = vmatprep.subr.bf16.mxu1 %v8993_v50  ;;  %v9036_v49 = vcombine.low %v3992_v40, %v3996_v41  ;;  %v9043_v50 = vcombine.high %v3999_v30, %v4003_v25  ;;  %v9045_v43 = vcombine.high %v4000_v46, %v4004_v47  ;;  %v4051_v40 = vld [vmem:[#allocation8 + $0x2a0] sm:$0xff]  ;;  %v4048_v41 = vld [vmem:[#allocation8 + $0x288] sm:$0xff] }
 0x277   :  { %3755 = vmatpush1.bf16.msra.mxu0 %v8990_v39  ;;  %3927 = vmatpush1.bf16.msra.mxu1 %v8992_v55  ;;  %v4012_v39 = vld [vmem:[#allocation8 + $0x168] sm:$0xff]  ;;  %v9042_v55 = vcombine.low %v3999_v30, %v4003_v25  ;;  %v4055_v25 = vld [vmem:[#allocation8 + $0x2c0] sm:$0xff] }
 0x278   :  { %3756 = vmatprep.subr.bf16.mxu0 %v8999_v56  ;;  %3928 = vmatprep.subr.bf16.mxu1 %v9001_v59  ;;  %v9044_v56 = vcombine.low %v4000_v46, %v4004_v47  ;;  %v9051_v59 = vcombine.high %v4007_v51, %v4011_v52  ;;  %v9053_v60 = vcombine.high %v4008_v54, %v4012_v39  ;;  %v4059_v46 = vld [vmem:[#allocation8 + $0x2e0] sm:$0xff]  ;;  %v4056_v47 = vld [vmem:[#allocation8 + $0x2c8] sm:$0xff] }
 0x27b   :  { %3757 = vmatpush1.bf16.msra.mxu0 %v8998_v2  ;;  %3929 = vmatpush1.bf16.msra.mxu1 %v9000_v5  ;;  %v4020_v2 = vld [vmem:[#allocation8 + $0x1a8] sm:$0xff]  ;;  %v9050_v5 = vcombine.low %v4007_v51, %v4011_v52  ;;  %v4063_v52 = vld [vmem:[#allocation8 + $0x300] sm:$0xff] }
 0x27c   :  { %3758 = vmatprep.subr.bf16.mxu0 %v9007_v8  ;;  %3930 = vmatprep.subr.bf16.mxu1 %v9009_v10  ;;  %v9052_v8 = vcombine.low %v4008_v54, %v4012_v39  ;;  %v9059_v10 = vcombine.high %v4015_v53, %v4019_v61  ;;  %v9061_v12 = vcombine.high %v4016_v0, %v4020_v2  ;;  %v4067_v54 = vld [vmem:[#allocation8 + $0x320] sm:$0xff]  ;;  %v4064_v39 = vld [vmem:[#allocation8 + $0x308] sm:$0xff] }
 0x27f   :  { %3759 = vmatpush1.bf16.msra.mxu0 %v9006_v17  ;;  %3931 = vmatpush1.bf16.msra.mxu1 %v9008_v18  ;;  %v4028_v17 = vld [vmem:[#allocation8 + $0x1e8] sm:$0xff]  ;;  %v9058_v18 = vcombine.low %v4015_v53, %v4019_v61  ;;  %v4071_v61 = vld [vmem:[#allocation8 + $0x340] sm:$0xff] }
 0x280   :  { %7081 = vmatprep.subr.bf16.mxu0 %v9011_v19  ;;  %7253 = vmatprep.subr.bf16.mxu1 %v9013_v20  ;;  %v9060_v19 = vcombine.low %v4016_v0, %v4020_v2  ;;  %v9067_v20 = vcombine.high %v4023_v13, %v4027_v14  ;;  %v9069_v21 = vcombine.high %v4024_v16, %v4028_v17  ;;  %v4075_v0 = vld [vmem:[#allocation8 + $0x360] sm:$0xff]  ;;  %v4072_v2 = vld [vmem:[#allocation8 + $0x348] sm:$0xff] }
 0x282   :  { %3761 = vmatmul.mubr.bf16.vlgmr.msra.gmra.mrb[4].mxu0 %v10236_v63  ;;  %3933 = vmatmul.mubr.bf16.vlgmr.msra.gmra.mrb[4].mxu1 %v10236_v63  ;;  %v9028_v63 = vcombine.low %v3984_v32, %v3988_v33  ;;  %v4043_v32 = vld [vmem:[#allocation8 + $0x260] sm:$0xff]  ;;  %v4040_v33 = vld [vmem:[#allocation8 + $0x248] sm:$0xff] }
 0x283   :  { %7082 = vmatpush1.bf16.msra.mxu0 %v9010_v23  ;;  %7113 = vmatprep.mubr.bf16.mxu0 %v10272_v4  ;;  %v4035_v23 = vld [vmem:[#allocation8 + $0x220] sm:$0xff] }
 0x284   :  { %7254 = vmatpush1.bf16.msra.mxu1 %v9012_v27  ;;  %7285 = vmatprep.mubr.bf16.mxu1 %v10272_v4  ;;  %v9066_v27 = vcombine.low %v4023_v13, %v4027_v14  ;;  %v9075_v29 = vcombine.high %v4031_v22, %v4035_v23  ;;  %v4079_v14 = vld [vmem:[#allocation8 + $0x380] sm:$0xff] }
 0x285   :  { %7083 = vmatprep.subr.bf16.mxu0 %v9019_v28  ;;  %7255 = vmatprep.subr.bf16.mxu1 %v9021_v58  ;;  %v9068_v28 = vcombine.low %v4024_v16, %v4028_v17  ;;  %v4039_v58 = vld [vmem:[#allocation8 + $0x240] sm:$0xff]  ;;  %v4080_v17 = vld [vmem:[#allocation8 + $0x388] sm:$0xff] }
 0x286   :  { %v4083_v16 = vld [vmem:[#allocation8 + $0x3a0] sm:$0xff] }
 0x287   :  { %7084 = vmatpush1.bf16.msra.mxu0 %v9018_v34  ;;  %v4044_v34 = vld [vmem:[#allocation8 + $0x268] sm:$0xff] }
 0x288   :  { %7256 = vmatpush1.bf16.msra.mxu1 %v9020_v15  ;;  %7085 = vmatprep.subr.bf16.mxu0 %v9027_v35  ;;  %v9074_v15 = vcombine.low %v4031_v22, %v4035_v23  ;;  %v9076_v35 = vcombine.low %v4032_v24, %v4036_v26  ;;  %v9085_v37 = vcombine.high %v4040_v33, %v4044_v34  ;;  %v4087_v23 = vld [vmem:[#allocation8 + $0x3c0] sm:$0xff]  ;;  %v4088_v26 = vld [vmem:[#allocation8 + $0x3c8] sm:$0xff] }
 0x289   :  { %7257 = vmatprep.subr.bf16.mxu1 %v9029_v36  ;;  %v9083_v36 = vcombine.high %v4039_v58, %v4043_v32  ;;  %v4091_v24 = vld [vmem:[#allocation8 + $0x3e0] sm:$0xff] }
 0x28b   :  { %7086 = vmatpush1.bf16.msra.mxu0 %v9026_v42  ;;  %v4052_v42 = vld [vmem:[#allocation8 + $0x2a8] sm:$0xff] }
 0x28c   :  { %7258 = vmatpush1.bf16.msra.mxu1 %v9028_v63  ;;  %7087 = vmatprep.subr.bf16.mxu0 %v9035_v44  ;;  %v9082_v63 = vcombine.low %v4039_v58, %v4043_v32  ;;  %v9084_v44 = vcombine.low %v4040_v33, %v4044_v34  ;;  %v9093_v30 = vcombine.high %v4048_v41, %v4052_v42  ;;  %v4095_v32 = vld [vmem:[#allocation8 + $0x400] sm:$0xff]  ;;  %v4096_v34 = vld [vmem:[#allocation8 + $0x408] sm:$0xff] }
 0x28d   :  { %7259 = vmatprep.subr.bf16.mxu1 %v9037_v45  ;;  %v9091_v45 = vcombine.high %v4047_v38, %v4051_v40  ;;  %v4099_v33 = vld [vmem:[#allocation8 + $0x420] sm:$0xff] }
 0x28f   :  { %7088 = vmatpush1.bf16.msra.mxu0 %v9034_v48  ;;  %v4060_v48 = vld [vmem:[#allocation8 + $0x2e8] sm:$0xff] }
 0x290   :  { %7260 = vmatpush1.bf16.msra.mxu1 %v9036_v49  ;;  %7089 = vmatprep.subr.bf16.mxu0 %v9043_v50  ;;  %v9090_v49 = vcombine.low %v4047_v38, %v4051_v40  ;;  %v9092_v50 = vcombine.low %v4048_v41, %v4052_v42  ;;  %v9101_v51 = vcombine.high %v4056_v47, %v4060_v48  ;;  %v4103_v40 = vld [vmem:[#allocation8 + $0x440] sm:$0xff] }
 0x291   :  { %7261 = vmatprep.subr.bf16.mxu1 %v9045_v43  ;;  %v9099_v43 = vcombine.high %v4055_v25, %v4059_v46  ;;  %v4107_v41 = vld [vmem:[#allocation8 + $0x460] sm:$0xff]  ;;  %v9138_v42 = vcombine.low %v4095_v32, %v4099_v33 }
 0x293   :  { %7090 = vmatpush1.bf16.msra.mxu0 %v9042_v55  ;;  %v4068_v55 = vld [vmem:[#allocation8 + $0x328] sm:$0xff] }
 0x294   :  { %7262 = vmatpush1.bf16.msra.mxu1 %v9044_v56  ;;  %7091 = vmatprep.subr.bf16.mxu0 %v9051_v59  ;;  %v9098_v56 = vcombine.low %v4055_v25, %v4059_v46  ;;  %v9100_v59 = vcombine.low %v4056_v47, %v4060_v48  ;;  %v9109_v53 = vcombine.high %v4064_v39, %v4068_v55  ;;  %v4111_v25 = vld [vmem:[#allocation8 + $0x480] sm:$0xff]  ;;  %v4112_v48 = vld [vmem:[#allocation8 + $0x488] sm:$0xff] }
 0x295   :  { %7263 = vmatprep.subr.bf16.mxu1 %v9053_v60  ;;  %v9107_v60 = vcombine.high %v4063_v52, %v4067_v54  ;;  %v4115_v46 = vld [vmem:[#allocation8 + $0x4a0] sm:$0xff] }
 0x297   :  { %7092 = vmatpush1.bf16.msra.mxu0 %v9050_v5  ;;  %v4076_v5 = vld [vmem:[#allocation8 + $0x368] sm:$0xff] }
 0x298   :  { %7264 = vmatpush1.bf16.msra.mxu1 %v9052_v8  ;;  %7093 = vmatprep.subr.bf16.mxu0 %v9059_v10  ;;  %v9106_v8 = vcombine.low %v4063_v52, %v4067_v54  ;;  %v9108_v10 = vcombine.low %v4064_v39, %v4068_v55  ;;  %v9117_v13 = vcombine.high %v4072_v2, %v4076_v5  ;;  %v4119_v54 = vld [vmem:[#allocation8 + $0x4c0] sm:$0xff]  ;;  %v4120_v55 = vld [vmem:[#allocation8 + $0x4c8] sm:$0xff] }
 0x299   :  { %7265 = vmatprep.subr.bf16.mxu1 %v9061_v12  ;;  %v9115_v12 = vcombine.high %v4071_v61, %v4075_v0  ;;  %v4123_v39 = vld [vmem:[#allocation8 + $0x4e0] sm:$0xff] }
 0x29b   :  { %7094 = vmatpush1.bf16.msra.mxu0 %v9058_v18  ;;  %v4084_v18 = vld [vmem:[#allocation8 + $0x3a8] sm:$0xff] }
 0x29c   :  { %7266 = vmatpush1.bf16.msra.mxu1 %v9060_v19  ;;  %7095 = vmatprep.subr.bf16.mxu0 %v9067_v20  ;;  %v9114_v19 = vcombine.low %v4071_v61, %v4075_v0  ;;  %v9116_v20 = vcombine.low %v4072_v2, %v4076_v5  ;;  %v9125_v22 = vcombine.high %v4080_v17, %v4084_v18  ;;  %v4127_v0 = vld [vmem:[#allocation8 + $0x500] sm:$0xff]  ;;  %v4128_v5 = vld [vmem:[#allocation8 + $0x508] sm:$0xff] }
 0x29d   :  { %7267 = vmatprep.subr.bf16.mxu1 %v9069_v21  ;;  %v9123_v21 = vcombine.high %v4079_v14, %v4083_v16  ;;  %v4131_v2 = vld [vmem:[#allocation8 + $0x520] sm:$0xff] }
 0x29f   :  { %7096 = vmatpush1.bf16.msra.mxu0 %v9066_v27  ;;  %v4092_v27 = vld [vmem:[#allocation8 + $0x3e8] sm:$0xff] }
 0x2a0   :  { %7268 = vmatpush1.bf16.msra.mxu1 %v9068_v28  ;;  %7097 = vmatprep.subr.bf16.mxu0 %v9075_v29  ;;  %v9122_v28 = vcombine.low %v4079_v14, %v4083_v16  ;;  %v9124_v29 = vcombine.low %v4080_v17, %v4084_v18  ;;  %v9133_v58 = vcombine.high %v4088_v26, %v4092_v27  ;;  %v4135_v16 = vld [vmem:[#allocation8 + $0x540] sm:$0xff]  ;;  %v4136_v18 = vld [vmem:[#allocation8 + $0x548] sm:$0xff] }
 0x2a1   :  { %7269 = vmatprep.subr.bf16.mxu1 %v9077_v31  ;;  %v9131_v31 = vcombine.high %v4087_v23, %v4091_v24  ;;  %v4139_v17 = vld [vmem:[#allocation8 + $0x560] sm:$0xff] }
 0x2a3   :  { %7098 = vmatpush1.bf16.msra.mxu0 %v9074_v15  ;;  %v4100_v15 = vld [vmem:[#allocation8 + $0x428] sm:$0xff] }
 0x2a4   :  { %7270 = vmatpush1.bf16.msra.mxu1 %v9076_v35  ;;  %7099 = vmatprep.subr.bf16.mxu0 %v9083_v36  ;;  %v9130_v35 = vcombine.low %v4087_v23, %v4091_v24  ;;  %v9132_v36 = vcombine.low %v4088_v26, %v4092_v27  ;;  %v9141_v38 = vcombine.high %v4096_v34, %v4100_v15  ;;  %v4143_v24 = vld [vmem:[#allocation8 + $0x580] sm:$0xff]  ;;  %v4144_v27 = vld [vmem:[#allocation8 + $0x588] sm:$0xff] }
 0x2a5   :  { %7271 = vmatprep.subr.bf16.mxu1 %v9085_v37  ;;  %v9139_v37 = vcombine.high %v4095_v32, %v4099_v33  ;;  %v4147_v26 = vld [vmem:[#allocation8 + $0x5a0] sm:$0xff] }
 0x2a6   :  { %v4151_v33 = vld [vmem:[#allocation8 + $0x5c0] sm:$0xff] }
 0x2a7   :  { %7100 = vmatpush1.bf16.msra.mxu0 %v9082_v63  ;;  %v4104_v63 = vld [vmem:[#allocation8 + $0x448] sm:$0xff] }
 0x2a8   :  { %7272 = vmatpush1.bf16.msra.mxu1 %v9084_v44  ;;  %7101 = vmatprep.subr.bf16.mxu0 %v9091_v45  ;;  %v4108_v44 = vld [vmem:[#allocation8 + $0x468] sm:$0xff]  ;;  %v9140_v45 = vcombine.low %v4096_v34, %v4100_v15  ;;  %v4155_v34 = vld [vmem:[#allocation8 + $0x5e0] sm:$0xff] }
 0x2a9   :  { %7273 = vmatprep.subr.bf16.mxu1 %v9093_v30  ;;  %v9147_v30 = vcombine.high %v4103_v40, %v4107_v41  ;;  %v9149_v47 = vcombine.high %v4104_v63, %v4108_v44  ;;  %v4152_v15 = vld [vmem:[#allocation8 + $0x5c8] sm:$0xff] }
 0x2ab   :  { %7102 = vmatpush1.bf16.msra.mxu0 %v9090_v49  ;;  %v4116_v49 = vld [vmem:[#allocation8 + $0x4a8] sm:$0xff] }
 0x2ac   :  { %7274 = vmatpush1.bf16.msra.mxu1 %v9092_v50  ;;  %7103 = vmatprep.subr.bf16.mxu0 %v9099_v43  ;;  %v9146_v50 = vcombine.low %v4103_v40, %v4107_v41  ;;  %v9148_v43 = vcombine.low %v4104_v63, %v4108_v44  ;;  %v9157_v52 = vcombine.high %v4112_v48, %v4116_v49  ;;  %v4159_v41 = vld [vmem:[#allocation8 + $0x600] sm:$0xff]  ;;  %v4160_v63 = vld [vmem:[#allocation8 + $0x608] sm:$0xff] }
 0x2ad   :  { %7275 = vmatprep.subr.bf16.mxu1 %v9101_v51  ;;  %v9155_v51 = vcombine.high %v4111_v25, %v4115_v46  ;;  %v4164_v44 = vld [vmem:[#allocation8 + $0x628] sm:$0xff] }
 0x2af   :  { %7104 = vmatpush1.bf16.msra.mxu0 %v9098_v56  ;;  %v4124_v56 = vld [vmem:[#allocation8 + $0x4e8] sm:$0xff] }
 0x2b0   :  { %7276 = vmatpush1.bf16.msra.mxu1 %v9100_v59  ;;  %7105 = vmatprep.subr.bf16.mxu0 %v9107_v60  ;;  %v9154_v59 = vcombine.low %v4111_v25, %v4115_v46  ;;  %v9156_v60 = vcombine.low %v4112_v48, %v4116_v49  ;;  %v9165_v61 = vcombine.high %v4120_v55, %v4124_v56  ;;  %v4171_v48 = vld [vmem:[#allocation8 + $0x660] sm:$0xff]  ;;  %v4168_v49 = vld [vmem:[#allocation8 + $0x648] sm:$0xff] }
 0x2b1   :  { %7277 = vmatprep.subr.bf16.mxu1 %v9109_v53  ;;  %v9163_v53 = vcombine.high %v4119_v54, %v4123_v39  ;;  %v9205_v46 = vcombine.high %v4160_v63, %v4164_v44 }
 0x2b3   :  { %7106 = vmatpush1.bf16.msra.mxu0 %v9106_v8  ;;  %v4132_v8 = vld [vmem:[#allocation8 + $0x528] sm:$0xff] }
 0x2b4   :  { %7278 = vmatpush1.bf16.msra.mxu1 %v9108_v10  ;;  %7107 = vmatprep.subr.bf16.mxu0 %v9115_v12  ;;  %v9162_v10 = vcombine.low %v4119_v54, %v4123_v39  ;;  %v9164_v12 = vcombine.low %v4120_v55, %v4124_v56  ;;  %v9173_v14 = vcombine.high %v4128_v5, %v4132_v8  ;;  %v4175_v39 = vld [vmem:[#allocation8 + $0x680] sm:$0xff]  ;;  %v4176_v56 = vld [vmem:[#allocation8 + $0x688] sm:$0xff] }
 0x2b5   :  { %7279 = vmatprep.subr.bf16.mxu1 %v9117_v13  ;;  %v9171_v13 = vcombine.high %v4127_v0, %v4131_v2  ;;  %v4179_v55 = vld [vmem:[#allocation8 + $0x6a0] sm:$0xff] }
 0x2b7   :  { %7108 = vmatpush1.bf16.msra.mxu0 %v9114_v19  ;;  %v4140_v19 = vld [vmem:[#allocation8 + $0x568] sm:$0xff] }
 0x2b8   :  { %7280 = vmatpush1.bf16.msra.mxu1 %v9116_v20  ;;  %7109 = vmatprep.subr.bf16.mxu0 %v9123_v21  ;;  %v9170_v20 = vcombine.low %v4127_v0, %v4131_v2  ;;  %v9172_v21 = vcombine.low %v4128_v5, %v4132_v8  ;;  %v9181_v23 = vcombine.high %v4136_v18, %v4140_v19  ;;  %v4183_v2 = vld [vmem:[#allocation8 + $0x6c0] sm:$0xff]  ;;  %v4184_v8 = vld [vmem:[#allocation8 + $0x6c8] sm:$0xff] }
 0x2b9   :  { %7281 = vmatprep.subr.bf16.mxu1 %v9125_v22  ;;  %v9179_v22 = vcombine.high %v4135_v16, %v4139_v17  ;;  %v4187_v5 = vld [vmem:[#allocation8 + $0x6e0] sm:$0xff] }
 0x2bb   :  { %7110 = vmatpush1.bf16.msra.mxu0 %v9122_v28  ;;  %v4148_v28 = vld [vmem:[#allocation8 + $0x5a8] sm:$0xff] }
 0x2bc   :  { %7282 = vmatpush1.bf16.msra.mxu1 %v9124_v29  ;;  %7111 = vmatprep.subr.bf16.mxu0 %v9131_v31  ;;  %v9178_v29 = vcombine.low %v4135_v16, %v4139_v17  ;;  %v9180_v31 = vcombine.low %v4136_v18, %v4140_v19  ;;  %v9189_v32 = vcombine.high %v4144_v27, %v4148_v28  ;;  %v4191_v17 = vld [vmem:[#allocation8 + $0x700] sm:$0xff]  ;;  %v4192_v19 = vld [vmem:[#allocation8 + $0x708] sm:$0xff] }
 0x2bd   :  { %7283 = vmatprep.subr.bf16.mxu1 %v9133_v58  ;;  %v9187_v58 = vcombine.high %v4143_v24, %v4147_v26  ;;  %v4195_v18 = vld [vmem:[#allocation8 + $0x720] sm:$0xff] }
 0x2bf   :  { %7112 = vmatpush1.bf16.msra.mxu0 %v9130_v35  ;;  %v4156_v35 = vld [vmem:[#allocation8 + $0x5e8] sm:$0xff] }
 0x2c0   :  { %7284 = vmatpush1.bf16.msra.mxu1 %v9132_v36  ;;  %7124 = vmatprep.subr.bf16.mxu0 %v9139_v37  ;;  %v9186_v36 = vcombine.low %v4143_v24, %v4147_v26  ;;  %v9188_v37 = vcombine.low %v4144_v27, %v4148_v28  ;;  %v9197_v40 = vcombine.high %v4152_v15, %v4156_v35  ;;  %v4199_v26 = vld [vmem:[#allocation8 + $0x740] sm:$0xff]  ;;  %v4200_v28 = vld [vmem:[#allocation8 + $0x748] sm:$0xff] }
 0x2c1   :  { %7296 = vmatprep.subr.bf16.mxu1 %v9141_v38  ;;  %v9195_v38 = vcombine.high %v4151_v33, %v4155_v34  ;;  %v4203_v27 = vld [vmem:[#allocation8 + $0x760] sm:$0xff] }
 0x2c2   :  { %7114 = vmatmul.mubr.bf16.vlgmr.msra.gmra.mrb[8].mxu0 %v10268_v62 }
 0x2c3   :  { %7286 = vmatmul.mubr.bf16.vlgmr.msra.gmra.mrb[8].mxu1 %v10268_v62  ;;  %7125 = vmatpush1.bf16.msra.mxu0 %v9138_v42  ;;  %v4163_v42 = vld [vmem:[#allocation8 + $0x620] sm:$0xff] }
 0x2c4   :  { %7156 = vmatprep.mubr.bf16.mxu0 %v10274_v11  ;;  %7297 = vmatpush1.bf16.msra.mxu1 %v9140_v45  ;;  %v9194_v45 = vcombine.low %v4151_v33, %v4155_v34  ;;  %v9203_v25 = vcombine.high %v4159_v41, %v4163_v42  ;;  %v4207_v34 = vld [vmem:[#allocation8 + $0x780] sm:$0xff] }
 0x2c5   :  { %7328 = vmatprep.mubr.bf16.mxu1 %v10274_v11  ;;  %7126 = vmatprep.subr.bf16.mxu0 %v9147_v30  ;;  %v9196_v30 = vcombine.low %v4152_v15, %v4156_v35  ;;  %v4211_v15 = vld [vmem:[#allocation8 + $0x7a0] sm:$0xff]  ;;  %v4208_v35 = vld [vmem:[#allocation8 + $0x788] sm:$0xff] }
 0x2c6   :  { %7298 = vmatprep.subr.bf16.mxu1 %v9149_v47  ;;  %v4167_v47 = vld [vmem:[#allocation8 + $0x640] sm:$0xff] }
 0x2c7   :  { %7127 = vmatpush1.bf16.msra.mxu0 %v9146_v50  ;;  %v4172_v50 = vld [vmem:[#allocation8 + $0x668] sm:$0xff] }
 0x2c8   :  { %7299 = vmatpush1.bf16.msra.mxu1 %v9148_v43  ;;  %7128 = vmatprep.subr.bf16.mxu0 %v9155_v51  ;;  %v9202_v43 = vcombine.low %v4159_v41, %v4163_v42  ;;  %v9204_v51 = vcombine.low %v4160_v63, %v4164_v44  ;;  %v9213_v54 = vcombine.high %v4168_v49, %v4172_v50  ;;  %v4215_v42 = vld [vmem:[#allocation8 + $0x7c0] sm:$0xff]  ;;  %v4216_v44 = vld [vmem:[#allocation8 + $0x7c8] sm:$0xff] }
 0x2c9   :  { %7300 = vmatprep.subr.bf16.mxu1 %v9157_v52  ;;  %v9211_v52 = vcombine.high %v4167_v47, %v4171_v48  ;;  %v4219_v63 = vld [vmem:[#allocation8 + $0x7e0] sm:$0xff] }
 0x2cb   :  { %7129 = vmatpush1.bf16.msra.mxu0 %v9154_v59  ;;  %v4180_v59 = vld [vmem:[#allocation8 + $0x6a8] sm:$0xff] }
 0x2cc   :  { %7301 = vmatpush1.bf16.msra.mxu1 %v9156_v60  ;;  %7130 = vmatprep.subr.bf16.mxu0 %v9163_v53  ;;  %v9210_v60 = vcombine.low %v4167_v47, %v4171_v48  ;;  %v9212_v53 = vcombine.low %v4168_v49, %v4172_v50  ;;  %v9221_v0 = vcombine.high %v4176_v56, %v4180_v59  ;;  %v4223_v48 = vld [vmem:[#allocation8 + $0x800] sm:$0xff]  ;;  %v4224_v50 = vld [vmem:[#allocation8 + $0x808] sm:$0xff] }
 0x2cd   :  { %7302 = vmatprep.subr.bf16.mxu1 %v9165_v61  ;;  %v9219_v61 = vcombine.high %v4175_v39, %v4179_v55  ;;  %v4227_v49 = vld [vmem:[#allocation8 + $0x820] sm:$0xff] }
 0x2cf   :  { %7131 = vmatpush1.bf16.msra.mxu0 %v9162_v10  ;;  %v4188_v10 = vld [vmem:[#allocation8 + $0x6e8] sm:$0xff] }
 0x2d0   :  { %7303 = vmatpush1.bf16.msra.mxu1 %v9164_v12  ;;  %7132 = vmatprep.subr.bf16.mxu0 %v9171_v13  ;;  %v9218_v12 = vcombine.low %v4175_v39, %v4179_v55  ;;  %v9220_v13 = vcombine.low %v4176_v56, %v4180_v59  ;;  %v9229_v16 = vcombine.high %v4184_v8, %v4188_v10  ;;  %v4231_v55 = vld [vmem:[#allocation8 + $0x840] sm:$0xff]  ;;  %v4232_v59 = vld [vmem:[#allocation8 + $0x848] sm:$0xff] }
 0x2d1   :  { %7304 = vmatprep.subr.bf16.mxu1 %v9173_v14  ;;  %v9227_v14 = vcombine.high %v4183_v2, %v4187_v5  ;;  %v4235_v56 = vld [vmem:[#allocation8 + $0x860] sm:$0xff] }
 0x2d3   :  { %7133 = vmatpush1.bf16.msra.mxu0 %v9170_v20  ;;  %v4196_v20 = vld [vmem:[#allocation8 + $0x728] sm:$0xff] }
 0x2d4   :  { %7305 = vmatpush1.bf16.msra.mxu1 %v9172_v21  ;;  %7134 = vmatprep.subr.bf16.mxu0 %v9179_v22  ;;  %v9226_v21 = vcombine.low %v4183_v2, %v4187_v5  ;;  %v9228_v22 = vcombine.low %v4184_v8, %v4188_v10  ;;  %v9237_v24 = vcombine.high %v4192_v19, %v4196_v20  ;;  %v4239_v5 = vld [vmem:[#allocation8 + $0x880] sm:$0xff]  ;;  %v4240_v10 = vld [vmem:[#allocation8 + $0x888] sm:$0xff] }
 0x2d5   :  { %7306 = vmatprep.subr.bf16.mxu1 %v9181_v23  ;;  %v9235_v23 = vcombine.high %v4191_v17, %v4195_v18  ;;  %v4243_v8 = vld [vmem:[#allocation8 + $0x8a0] sm:$0xff] }
 0x2d7   :  { %7135 = vmatpush1.bf16.msra.mxu0 %v9178_v29  ;;  %v4204_v29 = vld [vmem:[#allocation8 + $0x768] sm:$0xff] }
 0x2d8   :  { %7307 = vmatpush1.bf16.msra.mxu1 %v9180_v31  ;;  %7136 = vmatprep.subr.bf16.mxu0 %v9187_v58  ;;  %v9234_v31 = vcombine.low %v4191_v17, %v4195_v18  ;;  %v9236_v58 = vcombine.low %v4192_v19, %v4196_v20  ;;  %v9245_v33 = vcombine.high %v4200_v28, %v4204_v29  ;;  %v4247_v18 = vld [vmem:[#allocation8 + $0x8c0] sm:$0xff]  ;;  %v4248_v20 = vld [vmem:[#allocation8 + $0x8c8] sm:$0xff] }
 0x2d9   :  { %7308 = vmatprep.subr.bf16.mxu1 %v9189_v32  ;;  %v9243_v32 = vcombine.high %v4199_v26, %v4203_v27  ;;  %v4251_v19 = vld [vmem:[#allocation8 + $0x8e0] sm:$0xff] }
 0x2db   :  { %7137 = vmatpush1.bf16.msra.mxu0 %v9186_v36  ;;  %v4212_v36 = vld [vmem:[#allocation8 + $0x7a8] sm:$0xff] }
 0x2dc   :  { %7309 = vmatpush1.bf16.msra.mxu1 %v9188_v37  ;;  %7138 = vmatprep.subr.bf16.mxu0 %v9195_v38  ;;  %v9242_v37 = vcombine.low %v4199_v26, %v4203_v27  ;;  %v9244_v38 = vcombine.low %v4200_v28, %v4204_v29  ;;  %v9253_v41 = vcombine.high %v4208_v35, %v4212_v36  ;;  %v4255_v27 = vld [vmem:[#allocation8 + $0x900] sm:$0xff]  ;;  %v4256_v29 = vld [vmem:[#allocation8 + $0x908] sm:$0xff] }
 0x2dd   :  { %7310 = vmatprep.subr.bf16.mxu1 %v9197_v40  ;;  %v9251_v40 = vcombine.high %v4207_v34, %v4211_v15  ;;  %v4259_v28 = vld [vmem:[#allocation8 + $0x920] sm:$0xff] }
 0x2df   :  { %7139 = vmatpush1.bf16.msra.mxu0 %v9194_v45  ;;  %v4220_v45 = vld [vmem:[#allocation8 + $0x7e8] sm:$0xff] }
 0x2e0   :  { %7311 = vmatpush1.bf16.msra.mxu1 %v9196_v30  ;;  %7140 = vmatprep.subr.bf16.mxu0 %v9203_v25  ;;  %v9250_v30 = vcombine.low %v4207_v34, %v4211_v15  ;;  %v9252_v25 = vcombine.low %v4208_v35, %v4212_v36  ;;  %v9261_v47 = vcombine.high %v4216_v44, %v4220_v45  ;;  %v4263_v15 = vld [vmem:[#allocation8 + $0x940] sm:$0xff]  ;;  %v4264_v36 = vld [vmem:[#allocation8 + $0x948] sm:$0xff] }
 0x2e1   :  { %7312 = vmatprep.subr.bf16.mxu1 %v9205_v46  ;;  %v9259_v46 = vcombine.high %v4215_v42, %v4219_v63  ;;  %v4267_v35 = vld [vmem:[#allocation8 + $0x960] sm:$0xff] }
 0x2e3   :  { %7141 = vmatpush1.bf16.msra.mxu0 %v9202_v43  ;;  %v4228_v43 = vld [vmem:[#allocation8 + $0x828] sm:$0xff] }
 0x2e4   :  { %7313 = vmatpush1.bf16.msra.mxu1 %v9204_v51  ;;  %7142 = vmatprep.subr.bf16.mxu0 %v9211_v52  ;;  %v9258_v51 = vcombine.low %v4215_v42, %v4219_v63  ;;  %v9260_v52 = vcombine.low %v4216_v44, %v4220_v45  ;;  %v9269_v39 = vcombine.high %v4224_v50, %v4228_v43  ;;  %v4271_v63 = vld [vmem:[#allocation8 + $0x980] sm:$0xff]  ;;  %v4272_v45 = vld [vmem:[#allocation8 + $0x988] sm:$0xff] }
 0x2e5   :  { %7314 = vmatprep.subr.bf16.mxu1 %v9213_v54  ;;  %v9267_v54 = vcombine.high %v4223_v48, %v4227_v49  ;;  %v4275_v44 = vld [vmem:[#allocation8 + $0x9a0] sm:$0xff] }
 0x2e7   :  { %7143 = vmatpush1.bf16.msra.mxu0 %v9210_v60  ;;  %v4236_v60 = vld [vmem:[#allocation8 + $0x868] sm:$0xff] }
 0x2e8   :  { %7315 = vmatpush1.bf16.msra.mxu1 %v9212_v53  ;;  %7144 = vmatprep.subr.bf16.mxu0 %v9219_v61  ;;  %v9266_v53 = vcombine.low %v4223_v48, %v4227_v49  ;;  %v9268_v61 = vcombine.low %v4224_v50, %v4228_v43  ;;  %v9277_v2 = vcombine.high %v4232_v59, %v4236_v60  ;;  %v4279_v49 = vld [vmem:[#allocation8 + $0x9c0] sm:$0xff]  ;;  %v4280_v43 = vld [vmem:[#allocation8 + $0x9c8] sm:$0xff] }
 0x2e9   :  { %7316 = vmatprep.subr.bf16.mxu1 %v9221_v0  ;;  %v9275_v0 = vcombine.high %v4231_v55, %v4235_v56  ;;  %v4283_v50 = vld [vmem:[#allocation8 + $0x9e0] sm:$0xff] }
 0x2eb   :  { %7145 = vmatpush1.bf16.msra.mxu0 %v9218_v12  ;;  %v4244_v12 = vld [vmem:[#allocation8 + $0x8a8] sm:$0xff] }
 0x2ec   :  { %7317 = vmatpush1.bf16.msra.mxu1 %v9220_v13  ;;  %7146 = vmatprep.subr.bf16.mxu0 %v9227_v14  ;;  %v9274_v13 = vcombine.low %v4231_v55, %v4235_v56  ;;  %v9276_v14 = vcombine.low %v4232_v59, %v4236_v60  ;;  %v9285_v17 = vcombine.high %v4240_v10, %v4244_v12  ;;  %v4287_v56 = vld [vmem:[#allocation8 + $0xa00] sm:$0xff]  ;;  %v4288_v60 = vld [vmem:[#allocation8 + $0xa08] sm:$0xff] }
 0x2ed   :  { %7318 = vmatprep.subr.bf16.mxu1 %v9229_v16  ;;  %v9283_v16 = vcombine.high %v4239_v5, %v4243_v8  ;;  %v4291_v59 = vld [vmem:[#allocation8 + $0xa20] sm:$0xff] }
 0x2ef   :  { %7147 = vmatpush1.bf16.msra.mxu0 %v9226_v21  ;;  %v4252_v21 = vld [vmem:[#allocation8 + $0x8e8] sm:$0xff] }
 0x2f0   :  { %7319 = vmatpush1.bf16.msra.mxu1 %v9228_v22  ;;  %7148 = vmatprep.subr.bf16.mxu0 %v9235_v23  ;;  %v9282_v22 = vcombine.low %v4239_v5, %v4243_v8  ;;  %v9284_v23 = vcombine.low %v4240_v10, %v4244_v12  ;;  %v9293_v26 = vcombine.high %v4248_v20, %v4252_v21  ;;  %v4295_v8 = vld [vmem:[#allocation8 + $0xa40] sm:$0xff]  ;;  %v4296_v12 = vld [vmem:[#allocation8 + $0xa48] sm:$0xff] }
 0x2f1   :  { %7320 = vmatprep.subr.bf16.mxu1 %v9237_v24  ;;  %v9291_v24 = vcombine.high %v4247_v18, %v4251_v19  ;;  %v4299_v10 = vld [vmem:[#allocation8 + $0xa60] sm:$0xff] }
 0x2f3   :  { %7149 = vmatpush1.bf16.msra.mxu0 %v9234_v31  ;;  %v4260_v31 = vld [vmem:[#allocation8 + $0x928] sm:$0xff] }
 0x2f4   :  { %7321 = vmatpush1.bf16.msra.mxu1 %v9236_v58  ;;  %7150 = vmatprep.subr.bf16.mxu0 %v9243_v32  ;;  %v9290_v58 = vcombine.low %v4247_v18, %v4251_v19  ;;  %v9292_v32 = vcombine.low %v4248_v20, %v4252_v21  ;;  %v9301_v34 = vcombine.high %v4256_v29, %v4260_v31  ;;  %v4303_v19 = vld [vmem:[#allocation8 + $0xa80] sm:$0xff]  ;;  %v4304_v21 = vld [vmem:[#allocation8 + $0xa88] sm:$0xff] }
 0x2f5   :  { %7322 = vmatprep.subr.bf16.mxu1 %v9245_v33  ;;  %v9299_v33 = vcombine.high %v4255_v27, %v4259_v28  ;;  %v4307_v20 = vld [vmem:[#allocation8 + $0xaa0] sm:$0xff] }
 0x2f7   :  { %7151 = vmatpush1.bf16.msra.mxu0 %v9242_v37  ;;  %v4268_v37 = vld [vmem:[#allocation8 + $0x968] sm:$0xff] }
 0x2f8   :  { %7323 = vmatpush1.bf16.msra.mxu1 %v9244_v38  ;;  %7152 = vmatprep.subr.bf16.mxu0 %v9251_v40  ;;  %v9298_v38 = vcombine.low %v4255_v27, %v4259_v28  ;;  %v9300_v40 = vcombine.low %v4256_v29, %v4260_v31  ;;  %v9309_v42 = vcombine.high %v4264_v36, %v4268_v37  ;;  %v4311_v28 = vld [vmem:[#allocation8 + $0xac0] sm:$0xff]  ;;  %v4312_v31 = vld [vmem:[#allocation8 + $0xac8] sm:$0xff] }
 0x2f9   :  { %7324 = vmatprep.subr.bf16.mxu1 %v9253_v41  ;;  %v9307_v41 = vcombine.high %v4263_v15, %v4267_v35  ;;  %v4315_v29 = vld [vmem:[#allocation8 + $0xae0] sm:$0xff] }
 0x2fb   :  { %7153 = vmatpush1.bf16.msra.mxu0 %v9250_v30  ;;  %v4276_v30 = vld [vmem:[#allocation8 + $0x9a8] sm:$0xff] }
 0x2fc   :  { %7325 = vmatpush1.bf16.msra.mxu1 %v9252_v25  ;;  %7154 = vmatprep.subr.bf16.mxu0 %v9259_v46  ;;  %v9306_v25 = vcombine.low %v4263_v15, %v4267_v35  ;;  %v9308_v46 = vcombine.low %v4264_v36, %v4268_v37  ;;  %v9317_v48 = vcombine.high %v4272_v45, %v4276_v30  ;;  %v4319_v35 = vld [vmem:[#allocation8 + $0xb00] sm:$0xff]  ;;  %v4320_v37 = vld [vmem:[#allocation8 + $0xb08] sm:$0xff] }
 0x2fd   :  { %7326 = vmatprep.subr.bf16.mxu1 %v9261_v47  ;;  %v9315_v47 = vcombine.high %v4271_v63, %v4275_v44  ;;  %v4323_v36 = vld [vmem:[#allocation8 + $0xb20] sm:$0xff] }
 0x2ff   :  { %7155 = vmatpush1.bf16.msra.mxu0 %v9258_v51  ;;  %v4284_v51 = vld [vmem:[#allocation8 + $0x9e8] sm:$0xff] }
 0x300   :  { %7327 = vmatpush1.bf16.msra.mxu1 %v9260_v52  ;;  %7167 = vmatprep.subr.bf16.mxu0 %v9267_v54  ;;  %v9314_v52 = vcombine.low %v4271_v63, %v4275_v44  ;;  %v9316_v54 = vcombine.low %v4272_v45, %v4276_v30  ;;  %v9325_v55 = vcombine.high %v4280_v43, %v4284_v51  ;;  %v4327_v44 = vld [vmem:[#allocation8 + $0xb40] sm:$0xff]  ;;  %v4328_v30 = vld [vmem:[#allocation8 + $0xb48] sm:$0xff] }
 0x301   :  { %7339 = vmatprep.subr.bf16.mxu1 %v9269_v39  ;;  %v9323_v39 = vcombine.high %v4279_v49, %v4283_v50  ;;  %v4331_v45 = vld [vmem:[#allocation8 + $0xb60] sm:$0xff] }
 0x302   :  { %7157 = vmatmul.mubr.bf16.vlgmr.msra.gmra.mrb[8].mxu0 %v10270_v3 }
 0x303   :  { %7329 = vmatmul.mubr.bf16.vlgmr.msra.gmra.mrb[8].mxu1 %v10270_v3  ;;  %7168 = vmatpush1.bf16.msra.mxu0 %v9266_v53  ;;  %v4292_v53 = vld [vmem:[#allocation8 + $0xa28] sm:$0xff] }
 0x304   :  { %7340 = vmatpush1.bf16.msra.mxu1 %v9268_v61  ;;  %7169 = vmatprep.subr.bf16.mxu0 %v9275_v0  ;;  %v9322_v61 = vcombine.low %v4279_v49, %v4283_v50  ;;  %v9324_v0 = vcombine.low %v4280_v43, %v4284_v51  ;;  %v9333_v5 = vcombine.high %v4288_v60, %v4292_v53  ;;  %v4335_v50 = vld [vmem:[#allocation8 + $0xb80] sm:$0xff]  ;;  %v4336_v51 = vld [vmem:[#allocation8 + $0xb88] sm:$0xff] }
 0x305   :  { %7341 = vmatprep.subr.bf16.mxu1 %v9277_v2  ;;  %v9331_v2 = vcombine.high %v4287_v56, %v4291_v59  ;;  %v4339_v43 = vld [vmem:[#allocation8 + $0xba0] sm:$0xff] }
 0x307   :  { %7170 = vmatpush1.bf16.msra.mxu0 %v9274_v13  ;;  %v4300_v13 = vld [vmem:[#allocation8 + $0xa68] sm:$0xff] }
 0x308   :  { %7342 = vmatpush1.bf16.msra.mxu1 %v9276_v14  ;;  %7171 = vmatprep.subr.bf16.mxu0 %v9283_v16  ;;  %v9330_v14 = vcombine.low %v4287_v56, %v4291_v59  ;;  %v9332_v16 = vcombine.low %v4288_v60, %v4292_v53  ;;  %v9341_v18 = vcombine.high %v4296_v12, %v4300_v13  ;;  %v4343_v59 = vld [vmem:[#allocation8 + $0xbc0] sm:$0xff]  ;;  %v4344_v53 = vld [vmem:[#allocation8 + $0xbc8] sm:$0xff] }
 0x309   :  { %7343 = vmatprep.subr.bf16.mxu1 %v9285_v17  ;;  %v9339_v17 = vcombine.high %v4295_v8, %v4299_v10  ;;  %v4347_v60 = vld [vmem:[#allocation8 + $0xbe0] sm:$0xff] }
 0x30b   :  { %7172 = vmatpush1.bf16.msra.mxu0 %v9282_v22  ;;  %v4308_v22 = vld [vmem:[#allocation8 + $0xaa8] sm:$0xff] }
 0x30c   :  { %7344 = vmatpush1.bf16.msra.mxu1 %v9284_v23  ;;  %7173 = vmatprep.subr.bf16.mxu0 %v9291_v24  ;;  %v9338_v23 = vcombine.low %v4295_v8, %v4299_v10  ;;  %v9340_v24 = vcombine.low %v4296_v12, %v4300_v13  ;;  %v9349_v27 = vcombine.high %v4304_v21, %v4308_v22  ;;  %v10286_v10 = vld [vmem:[#allocation8 + $0xc00] sm:$0xff]  ;;  %v10290_v13 = vld [vmem:[#allocation8 + $0xc08] sm:$0xff] }
 0x30d   :  { %7345 = vmatprep.subr.bf16.mxu1 %v9293_v26  ;;  %v9347_v26 = vcombine.high %v4303_v19, %v4307_v20  ;;  %v10288_v12 = vld [vmem:[#allocation8 + $0xc20] sm:$0xff] }
 0x30f   :  { %7174 = vmatpush1.bf16.msra.mxu0 %v9290_v58  ;;  %v4316_v58 = vld [vmem:[#allocation8 + $0xae8] sm:$0xff] }
 0x310   :  { %7346 = vmatpush1.bf16.msra.mxu1 %v9292_v32  ;;  %7175 = vmatprep.subr.bf16.mxu0 %v9299_v33  ;;  %v9346_v32 = vcombine.low %v4303_v19, %v4307_v20  ;;  %v9348_v33 = vcombine.low %v4304_v21, %v4308_v22  ;;  %v9357_v15 = vcombine.high %v4312_v31, %v4316_v58  ;;  %v673_v20 = vsub.s32 4, %v10254_v57 }
 0x311   :  { %7347 = vmatprep.subr.bf16.mxu1 %v9301_v34  ;;  %v9355_v34 = vcombine.high %v4311_v28, %v4315_v29  ;;  %v681_v21 = vsub.s32 6, %v10254_v57  ;;  %v677_v22 = vsub.s32 5, %v10254_v57 }
 0x313   :  { %7176 = vmatpush1.bf16.msra.mxu0 %v9298_v38  ;;  %v4324_v38 = vld [vmem:[#allocation8 + $0xb28] sm:$0xff] }
 0x314   :  { %7348 = vmatpush1.bf16.msra.mxu1 %v9300_v40  ;;  %7177 = vmatprep.subr.bf16.mxu0 %v9307_v41  ;;  %v9354_v40 = vcombine.low %v4311_v28, %v4315_v29  ;;  %v9356_v41 = vcombine.low %v4312_v31, %v4316_v58  ;;  %v9365_v63 = vcombine.high %v4320_v37, %v4324_v38 }
 0x315   :  { %7349 = vmatprep.subr.bf16.mxu1 %v9309_v42  ;;  %v9363_v42 = vcombine.high %v4319_v35, %v4323_v36 }
 0x317   :  { %7178 = vmatpush1.bf16.msra.mxu0 %v9306_v25  ;;  %v4332_v25 = vld [vmem:[#allocation8 + $0xb68] sm:$0xff] }
 0x318   :  { %7350 = vmatpush1.bf16.msra.mxu1 %v9308_v46  ;;  %7179 = vmatprep.subr.bf16.mxu0 %v9315_v47  ;;  %v9362_v46 = vcombine.low %v4319_v35, %v4323_v36  ;;  %v9364_v47 = vcombine.low %v4320_v37, %v4324_v38  ;;  %v9373_v49 = vcombine.high %v4328_v30, %v4332_v25 }
 0x319   :  { %7351 = vmatprep.subr.bf16.mxu1 %v9317_v48  ;;  %v9371_v48 = vcombine.high %v4327_v44, %v4331_v45 }
 0x31b   :  { %7180 = vmatpush1.bf16.msra.mxu0 %v9314_v52  ;;  %v4340_v52 = vld [vmem:[#allocation8 + $0xba8] sm:$0xff] }
 0x31c   :  { %7352 = vmatpush1.bf16.msra.mxu1 %v9316_v54  ;;  %7181 = vmatprep.subr.bf16.mxu0 %v9323_v39  ;;  %v9370_v54 = vcombine.low %v4327_v44, %v4331_v45  ;;  %v9372_v39 = vcombine.low %v4328_v30, %v4332_v25  ;;  %v9381_v56 = vcombine.high %v4336_v51, %v4340_v52 }
 0x31d   :  { %7353 = vmatprep.subr.bf16.mxu1 %v9325_v55  ;;  %v9379_v55 = vcombine.high %v4335_v50, %v4339_v43 }
 0x31f   :  { %7182 = vmatpush1.bf16.msra.mxu0 %v9322_v61  ;;  %v4348_v61 = vld [vmem:[#allocation8 + $0xbe8] sm:$0xff] }
 0x320   :  { %7354 = vmatpush1.bf16.msra.mxu1 %v9324_v0  ;;  %7183 = vmatprep.subr.bf16.mxu0 %v9331_v2  ;;  %v9378_v0 = vcombine.low %v4335_v50, %v4339_v43  ;;  %v9380_v2 = vcombine.low %v4336_v51, %v4340_v52  ;;  %v9389_v8 = vcombine.high %v4344_v53, %v4348_v61  ;;  %v4359_v50 = vld [vmem:[#allocation8 + $0xc40] sm:$0xff] }
 0x321   :  { %7355 = vmatprep.subr.bf16.mxu1 %v9333_v5  ;;  %v9387_v5 = vcombine.high %v4343_v59, %v4347_v60 }
 0x323   :  { %7184 = vmatpush1.bf16.msra.mxu0 %v9330_v14  ;;  %v10292_v14 = vld [vmem:[#allocation8 + $0xc28] sm:$0xff] }
 0x324   :  { %7356 = vmatpush1.bf16.msra.mxu1 %v9332_v16  ;;  %7185 = vmatprep.subr.bf16.mxu0 %v9339_v17  ;;  %v9386_v16 = vcombine.low %v4343_v59, %v4347_v60  ;;  %v9388_v17 = vcombine.low %v4344_v53, %v4348_v61  ;;  %v9397_v19 = vcombine.high %v10290_v13, %v10292_v14 }
 0x325   :  { %7357 = vmatprep.subr.bf16.mxu1 %v9341_v18  ;;  %v9395_v18 = vcombine.high %v10286_v10, %v10288_v12  ;;  %v9394_v60 = vcombine.low %v10286_v10, %v10288_v12  ;;  %v9396_v53 = vcombine.low %v10290_v13, %v10292_v14 }
 0x327   :  { %7186 = vmatpush1.bf16.msra.mxu0 %v9338_v23  ;;  %v685_v23 = vsub.s32 7, %v10254_v57 }
 0x328   :  { %7358 = vmatpush1.bf16.msra.mxu1 %v9340_v24  ;;  %7187 = vmatprep.subr.bf16.mxu0 %v9347_v26  ;;  %v9882_v24 = vld [vmem:[#allocation7] sm:$0xff] }
 0x329   :  { %7359 = vmatprep.subr.bf16.mxu1 %v9349_v27  ;;  %v674_v26 = vrot.slane %v9882_v24, %v673_v20  ;;  %v682_v27 = vrot.slane %v9882_v24, %v681_v21  ;;  %v678_v28 = vrot.slane %v9882_v24, %v677_v22  ;;  %v686_v29 = vrot.slane %v9882_v24, %v685_v23  ;;  %v4376_v24 = vld [vmem:[#allocation8 + $0xcc8] sm:$0xff] }
 0x32b   :  { %7188 = vmatpush1.bf16.msra.mxu0 %v9346_v32 }
 0x32c   :  { %7360 = vmatpush1.bf16.msra.mxu1 %v9348_v33  ;;  %7189 = vmatprep.subr.bf16.mxu0 %v9355_v34 }
 0x32d   :  { %7361 = vmatprep.subr.bf16.mxu1 %v9357_v15 }
 0x32f   :  { %7190 = vmatpush1.bf16.msra.mxu0 %v9354_v40 }
 0x330   :  { %7362 = vmatpush1.bf16.msra.mxu1 %v9356_v41  ;;  %7191 = vmatprep.subr.bf16.mxu0 %v9363_v42 }
 0x331   :  { %7363 = vmatprep.subr.bf16.mxu1 %v9365_v63 }
 0x333   :  { %7192 = vmatpush1.bf16.msra.mxu0 %v9362_v46 }
 0x334   :  { %7364 = vmatpush1.bf16.msra.mxu1 %v9364_v47  ;;  %7193 = vmatprep.subr.bf16.mxu0 %v9371_v48 }
 0x335   :  { %7365 = vmatprep.subr.bf16.mxu1 %v9373_v49 }
 0x337   :  { %7194 = vmatpush1.bf16.msra.mxu0 %v9370_v54  ;;  %v4363_v54 = vld [vmem:[#allocation8 + $0xc60] sm:$0xff] }
 0x338   :  { %7366 = vmatpush1.bf16.msra.mxu1 %v9372_v39  ;;  %7195 = vmatprep.subr.bf16.mxu0 %v9379_v55  ;;  %v4360_v39 = vld [vmem:[#allocation8 + $0xc48] sm:$0xff]  ;;  %v9402_v10 = vcombine.low %v4359_v50, %v4363_v54 }
 0x339   :  { %7367 = vmatprep.subr.bf16.mxu1 %v9381_v56  ;;  %v4364_v55 = vld [vmem:[#allocation8 + $0xc68] sm:$0xff] }
 0x33a   :  { %v9404_v12 = vcombine.low %v4360_v39, %v4364_v55 }
 0x33b   :  { %7196 = vmatpush1.bf16.msra.mxu0 %v9378_v0  ;;  %v4367_v0 = vld [vmem:[#allocation8 + $0xc80] sm:$0xff] }
 0x33c   :  { %7368 = vmatpush1.bf16.msra.mxu1 %v9380_v2  ;;  %7197 = vmatprep.subr.bf16.mxu0 %v9387_v5  ;;  %v9403_v2 = vcombine.high %v4359_v50, %v4363_v54  ;;  %v9405_v5 = vcombine.high %v4360_v39, %v4364_v55  ;;  %v4407_v54 = vld [vmem:[#allocation8 + $0xdc0] sm:$0xff]  ;;  %v4408_v55 = vld [vmem:[#allocation8 + $0xdc8] sm:$0xff] }
 0x33d   :  { %7369 = vmatprep.subr.bf16.mxu1 %v9389_v8  ;;  %v4371_v8 = vld [vmem:[#allocation8 + $0xca0] sm:$0xff] }
 0x33e   :  { %v9411_v13 = vcombine.high %v4367_v0, %v4371_v8  ;;  %v4411_v39 = vld [vmem:[#allocation8 + $0xde0] sm:$0xff] }
 0x33f   :  { %7198 = vmatpush1.bf16.msra.mxu0 %v9386_v16  ;;  %v4368_v16 = vld [vmem:[#allocation8 + $0xc88] sm:$0xff] }
 0x340   :  { %7370 = vmatpush1.bf16.msra.mxu1 %v9388_v17  ;;  %7210 = vmatprep.subr.bf16.mxu0 %v9395_v18  ;;  %v4372_v17 = vld [vmem:[#allocation8 + $0xca8] sm:$0xff]  ;;  %v4375_v18 = vld [vmem:[#allocation8 + $0xcc0] sm:$0xff] }
 0x341   :  { %7382 = vmatprep.subr.bf16.mxu1 %v9397_v19  ;;  %v9413_v14 = vcombine.high %v4368_v16, %v4372_v17  ;;  %v4379_v19 = vld [vmem:[#allocation8 + $0xce0] sm:$0xff] }
 0x355   :  { %v3762_v31 = vpop.f32.mrb[4].mxu0  ;;  %v3934_v32 = vpop.f32.mrb[4].mxu1 }
 0x356   :  { %v9683_v58 = vadd.f32 %v3762_v31, %v674_v26  ;;  %v3764_v33 = vpop.f32.mrb[5].mxu0  ;;  %v9687_v34 = vadd.f32 %v3934_v32, %v682_v27  ;;  %v3936_v35 = vpop.f32.mrb[5].mxu1  ;;  %v4387_v32 = vld [vmem:[#allocation8 + $0xd20] sm:$0xff] }
 0x357   :  { %v9684_v15 = vadd.f32 %v3764_v33, %v678_v28  ;;  %v3766_v36 = vpop.f32.mrb[6].mxu0  ;;  %v9688_v37 = vadd.f32 %v3936_v35, %v686_v29  ;;  %v3938_v40 = vpop.f32.mrb[6].mxu1  ;;  %v4384_v33 = vld [vmem:[#allocation8 + $0xd08] sm:$0xff] }
 0x358   :  { %v9685_v38 = vadd.f32 %v3766_v36, %v674_v26  ;;  %v3768_v41 = vpop.f32.mrb[7].mxu0  ;;  %v9689_v42 = vadd.f32 %v3938_v40, %v682_v27  ;;  %v3940_v44 = vpop.f32.mrb[7].mxu1  ;;  %v3947_v45 = vmax.f32 %v9683_v58, 0.0  ;;  %v3949_v46 = vmax.f32 %v9687_v34, 0.0  ;;  %v4380_v26 = vld [vmem:[#allocation8 + $0xce8] sm:$0xff]  ;;  %v4383_v58 = vld [vmem:[#allocation8 + $0xd00] sm:$0xff] }
 0x359   :  { %v9686_v63 = vadd.f32 %v3768_v41, %v678_v28  ;;  %v9690_v25 = vadd.f32 %v3940_v44, %v686_v29  ;;  %v3948_v47 = vmax.f32 %v9684_v15, 0.0  ;;  %v3950_v43 = vmax.f32 %v9688_v37, 0.0  ;;  %v4388_v34 = vld [vmem:[#allocation8 + $0xd28] sm:$0xff]  ;;  %v4395_v40 = vld [vmem:[#allocation8 + $0xd60] sm:$0xff] }
 0x35a   :  { %v3955_v30 = vmax.f32 %v9685_v38, 0.0  ;;  %v3957_v48 = vmax.f32 %v9689_v42, 0.0  ;;  %v9410_v27 = vcombine.low %v4367_v0, %v4371_v8  ;;  %v9412_v28 = vcombine.low %v4368_v16, %v4372_v17  ;;  %v4391_v38 = vld [vmem:[#allocation8 + $0xd40] sm:$0xff]  ;;  %v4392_v41 = vld [vmem:[#allocation8 + $0xd48] sm:$0xff] }
 0x35b   :  { %v3956_v49 = vmax.f32 %v9686_v63, 0.0  ;;  %v3958_v52 = vmax.f32 %v9690_v25, 0.0  ;;  %v9419_v29 = vcombine.high %v4375_v18, %v4379_v19  ;;  %v9421_v31 = vcombine.high %v4376_v24, %v4380_v26  ;;  %v4396_v42 = vld [vmem:[#allocation8 + $0xd68] sm:$0xff]  ;;  %v4399_v25 = vld [vmem:[#allocation8 + $0xd80] sm:$0xff] }
 0x35c   :  { %v10310_v51 = vpack.c.bf16 %v3955_v30, %v3947_v45  ;;  %v10312_v56 = vpack.c.bf16 %v3957_v48, %v3949_v46  ;;  %v9418_v15 = vcombine.low %v4375_v18, %v4379_v19  ;;  %v9420_v35 = vcombine.low %v4376_v24, %v4380_v26  ;;  %v4403_v46 = vld [vmem:[#allocation8 + $0xda0] sm:$0xff]  ;;  %v4404_v48 = vld [vmem:[#allocation8 + $0xda8] sm:$0xff] }
 0x35d   :  { %v10314_v59 = vpack.c.bf16 %v3956_v49, %v3948_v47  ;;  %v10320_v61 = vpack.c.bf16 %v3958_v52, %v3950_v43  ;;  %v9427_v36 = vcombine.high %v4383_v58, %v4387_v32  ;;  %v9429_v37 = vcombine.high %v4384_v33, %v4388_v34  ;;  %v4400_v47 = vld [vmem:[#allocation8 + $0xd88] sm:$0xff]  ;;  %v4415_v8 = vld [vmem:[#allocation8 + $0xe00] sm:$0xff] }
 0x35e   :  { %v9426_v63 = vcombine.low %v4383_v58, %v4387_v32  ;;  %v9428_v44 = vcombine.low %v4384_v33, %v4388_v34  ;;  %v9435_v45 = vcombine.high %v4391_v38, %v4395_v40  ;;  %v9437_v30 = vcombine.high %v4392_v41, %v4396_v42  ;;  %v4419_v16 = vld [vmem:[#allocation8 + $0xe20] sm:$0xff]  ;;  %v4416_v17 = vld [vmem:[#allocation8 + $0xe08] sm:$0xff] }
 0x35f   :  { %7199 = vmatprep.mubr.bf16.mxu0 %v10314_v59  ;;  %7371 = vmatprep.mubr.bf16.mxu1 %v10314_v59  ;;  %v9434_v49 = vcombine.low %v4391_v38, %v4395_v40  ;;  %v9436_v50 = vcombine.low %v4392_v41, %v4396_v42  ;;  %v9443_v43 = vcombine.high %v4399_v25, %v4403_v46  ;;  %v4423_v19 = vld [vmem:[#allocation8 + $0xe40] sm:$0xff]  ;;  %v4424_v26 = vld [vmem:[#allocation8 + $0xe48] sm:$0xff] }
 0x360   :  { %7200 = vmatmul.mubr.bf16.vlgmr.msra.gmra.mrb[8].mxu0 %v10310_v51  ;;  %7372 = vmatmul.mubr.bf16.vlgmr.msra.gmra.mrb[8].mxu1 %v10310_v51  ;;  %v9445_v52 = vcombine.high %v4400_v47, %v4404_v48  ;;  %v9444_v0 = vcombine.low %v4400_v47, %v4404_v48  ;;  %v4427_v24 = vld [vmem:[#allocation8 + $0xe60] sm:$0xff]  ;;  %v4432_v34 = vld [vmem:[#allocation8 + $0xe88] sm:$0xff] }
 0x361   :  { %7211 = vmatpush1.bf16.msra.mxu0 %v9394_v60  ;;  %7383 = vmatpush1.bf16.msra.mxu1 %v9396_v53  ;;  %v4412_v60 = vld [vmem:[#allocation8 + $0xde8] sm:$0xff]  ;;  %v9442_v53 = vcombine.low %v4399_v25, %v4403_v46  ;;  %v4431_v32 = vld [vmem:[#allocation8 + $0xe80] sm:$0xff] }
 0x362   :  { %7242 = vmatprep.mubr.bf16.mxu0 %v10320_v61  ;;  %7414 = vmatprep.mubr.bf16.mxu1 %v10320_v61  ;;  %v4435_v33 = vld [vmem:[#allocation8 + $0xea0] sm:$0xff]  ;;  %v4440_v42 = vld [vmem:[#allocation8 + $0xec8] sm:$0xff] }
 0x363   :  { %7212 = vmatprep.subr.bf16.mxu0 %v9403_v2  ;;  %7384 = vmatprep.subr.bf16.mxu1 %v9405_v5  ;;  %v9451_v2 = vcombine.high %v4407_v54, %v4411_v39  ;;  %v9453_v5 = vcombine.high %v4408_v55, %v4412_v60  ;;  %v4439_v40 = vld [vmem:[#allocation8 + $0xec0] sm:$0xff]  ;;  %v4448_v48 = vld [vmem:[#allocation8 + $0xf08] sm:$0xff] }
 0x364   :  { %v4443_v41 = vld [vmem:[#allocation8 + $0xee0] sm:$0xff] }
 0x365   :  { %7213 = vmatpush1.bf16.msra.mxu0 %v9402_v10  ;;  %7385 = vmatpush1.bf16.msra.mxu1 %v9404_v12  ;;  %v4420_v10 = vld [vmem:[#allocation8 + $0xe28] sm:$0xff]  ;;  %v9450_v12 = vcombine.low %v4407_v54, %v4411_v39  ;;  %v4447_v46 = vld [vmem:[#allocation8 + $0xf00] sm:$0xff] }
 0x366   :  { %7214 = vmatprep.subr.bf16.mxu0 %v9411_v13  ;;  %7386 = vmatprep.subr.bf16.mxu1 %v9413_v14  ;;  %v9452_v13 = vcombine.low %v4408_v55, %v4412_v60  ;;  %v9459_v14 = vcombine.high %v4415_v8, %v4419_v16  ;;  %v9461_v18 = vcombine.high %v4416_v17, %v4420_v10  ;;  %v4451_v47 = vld [vmem:[#allocation8 + $0xf20] sm:$0xff]  ;;  %v4456_v60 = vld [vmem:[#allocation8 + $0xf48] sm:$0xff] }
 0x367   :  { %v4455_v39 = vld [vmem:[#allocation8 + $0xf40] sm:$0xff] }
 0x368   :  { %v4459_v55 = vld [vmem:[#allocation8 + $0xf60] sm:$0xff] }
 0x369   :  { %7215 = vmatpush1.bf16.msra.mxu0 %v9410_v27  ;;  %7387 = vmatpush1.bf16.msra.mxu1 %v9412_v28  ;;  %v4428_v27 = vld [vmem:[#allocation8 + $0xe68] sm:$0xff]  ;;  %v9458_v28 = vcombine.low %v4415_v8, %v4419_v16  ;;  %v4463_v16 = vld [vmem:[#allocation8 + $0xf80] sm:$0xff] }
 0x36a   :  { %7216 = vmatprep.subr.bf16.mxu0 %v9419_v29  ;;  %7388 = vmatprep.subr.bf16.mxu1 %v9421_v31  ;;  %v9460_v29 = vcombine.low %v4416_v17, %v4420_v10  ;;  %v9467_v31 = vcombine.high %v4423_v19, %v4427_v24  ;;  %v9469_v58 = vcombine.high %v4424_v26, %v4428_v27  ;;  %v4467_v17 = vld [vmem:[#allocation8 + $0xfa0] sm:$0xff]  ;;  %v4464_v10 = vld [vmem:[#allocation8 + $0xf88] sm:$0xff] }
 0x36d   :  { %7217 = vmatpush1.bf16.msra.mxu0 %v9418_v15  ;;  %7389 = vmatpush1.bf16.msra.mxu1 %v9420_v35  ;;  %v4436_v15 = vld [vmem:[#allocation8 + $0xea8] sm:$0xff]  ;;  %v9466_v35 = vcombine.low %v4423_v19, %v4427_v24  ;;  %v4471_v24 = vld [vmem:[#allocation8 + $0xfc0] sm:$0xff] }
 0x36e   :  { %7218 = vmatprep.subr.bf16.mxu0 %v9427_v36  ;;  %7390 = vmatprep.subr.bf16.mxu1 %v9429_v37  ;;  %v9468_v36 = vcombine.low %v4424_v26, %v4428_v27  ;;  %v9475_v37 = vcombine.high %v4431_v32, %v4435_v33  ;;  %v9477_v38 = vcombine.high %v4432_v34, %v4436_v15  ;;  %v4475_v26 = vld [vmem:[#allocation8 + $0xfe0] sm:$0xff]  ;;  %v4472_v27 = vld [vmem:[#allocation8 + $0xfc8] sm:$0xff] }
 0x371   :  { %7219 = vmatpush1.bf16.msra.mxu0 %v9426_v63  ;;  %7391 = vmatpush1.bf16.msra.mxu1 %v9428_v44  ;;  %v4444_v63 = vld [vmem:[#allocation8 + $0xee8] sm:$0xff]  ;;  %v9474_v44 = vcombine.low %v4431_v32, %v4435_v33  ;;  %v3969_v33 = vld [vmem:[#allocation8 + $0x10] sm:$0xff] }
 0x372   :  { %7220 = vmatprep.subr.bf16.mxu0 %v9435_v45  ;;  %7392 = vmatprep.subr.bf16.mxu1 %v9437_v30  ;;  %v9476_v45 = vcombine.low %v4432_v34, %v4436_v15  ;;  %v9483_v30 = vcombine.high %v4439_v40, %v4443_v41  ;;  %v9485_v25 = vcombine.high %v4440_v42, %v4444_v63  ;;  %v3973_v34 = vld [vmem:[#allocation8 + $0x30] sm:$0xff]  ;;  %v3970_v15 = vld [vmem:[#allocation8 + $0x18] sm:$0xff] }
 0x375   :  { %7221 = vmatpush1.bf16.msra.mxu0 %v9434_v49  ;;  %7393 = vmatpush1.bf16.msra.mxu1 %v9436_v50  ;;  %v4452_v49 = vld [vmem:[#allocation8 + $0xf28] sm:$0xff]  ;;  %v9482_v50 = vcombine.low %v4439_v40, %v4443_v41  ;;  %v3977_v41 = vld [vmem:[#allocation8 + $0x50] sm:$0xff] }
 0x376   :  { %7222 = vmatprep.subr.bf16.mxu0 %v9443_v43  ;;  %7394 = vmatprep.subr.bf16.mxu1 %v9445_v52  ;;  %v9484_v43 = vcombine.low %v4440_v42, %v4444_v63  ;;  %v9491_v52 = vcombine.high %v4447_v46, %v4451_v47  ;;  %v9493_v54 = vcombine.high %v4448_v48, %v4452_v49  ;;  %v3981_v42 = vld [vmem:[#allocation8 + $0x70] sm:$0xff]  ;;  %v3978_v63 = vld [vmem:[#allocation8 + $0x58] sm:$0xff] }
 0x379   :  { %7223 = vmatpush1.bf16.msra.mxu0 %v9442_v53  ;;  %7395 = vmatpush1.bf16.msra.mxu1 %v9444_v0  ;;  %v4460_v53 = vld [vmem:[#allocation8 + $0xf68] sm:$0xff]  ;;  %v9490_v0 = vcombine.low %v4447_v46, %v4451_v47  ;;  %v3985_v47 = vld [vmem:[#allocation8 + $0x90] sm:$0xff] }
 0x37a   :  { %7224 = vmatprep.subr.bf16.mxu0 %v9451_v2  ;;  %7396 = vmatprep.subr.bf16.mxu1 %v9453_v5  ;;  %v9492_v2 = vcombine.low %v4448_v48, %v4452_v49  ;;  %v9499_v5 = vcombine.high %v4455_v39, %v4459_v55  ;;  %v9501_v8 = vcombine.high %v4456_v60, %v4460_v53  ;;  %v3989_v48 = vld [vmem:[#allocation8 + $0xb0] sm:$0xff]  ;;  %v3986_v49 = vld [vmem:[#allocation8 + $0x98] sm:$0xff] }
 0x37d   :  { %7225 = vmatpush1.bf16.msra.mxu0 %v9450_v12  ;;  %7397 = vmatpush1.bf16.msra.mxu1 %v9452_v13  ;;  %v4468_v12 = vld [vmem:[#allocation8 + $0xfa8] sm:$0xff]  ;;  %v9498_v13 = vcombine.low %v4455_v39, %v4459_v55  ;;  %v3993_v55 = vld [vmem:[#allocation8 + $0xd0] sm:$0xff] }
 0x37e   :  { %7226 = vmatprep.subr.bf16.mxu0 %v9459_v14  ;;  %7398 = vmatprep.subr.bf16.mxu1 %v9461_v18  ;;  %v9500_v14 = vcombine.low %v4456_v60, %v4460_v53  ;;  %v9507_v18 = vcombine.high %v4463_v16, %v4467_v17  ;;  %v9509_v19 = vcombine.high %v4464_v10, %v4468_v12  ;;  %v3997_v60 = vld [vmem:[#allocation8 + $0xf0] sm:$0xff]  ;;  %v3994_v53 = vld [vmem:[#allocation8 + $0xd8] sm:$0xff] }
 0x381   :  { %7227 = vmatpush1.bf16.msra.mxu0 %v9458_v28  ;;  %7399 = vmatpush1.bf16.msra.mxu1 %v9460_v29  ;;  %v4476_v28 = vld [vmem:[#allocation8 + $0xfe8] sm:$0xff]  ;;  %v9506_v29 = vcombine.low %v4463_v16, %v4467_v17  ;;  %v4001_v17 = vld [vmem:[#allocation8 + $0x110] sm:$0xff] }
 0x382   :  { %7228 = vmatprep.subr.bf16.mxu0 %v9467_v31  ;;  %7400 = vmatprep.subr.bf16.mxu1 %v9469_v58  ;;  %v9508_v31 = vcombine.low %v4464_v10, %v4468_v12  ;;  %v9515_v58 = vcombine.high %v4471_v24, %v4475_v26  ;;  %v9517_v32 = vcombine.high %v4472_v27, %v4476_v28  ;;  %v4005_v10 = vld [vmem:[#allocation8 + $0x130] sm:$0xff]  ;;  %v4006_v12 = vld [vmem:[#allocation8 + $0x138] sm:$0xff] }
 0x385   :  { %7229 = vmatpush1.bf16.msra.mxu0 %v9466_v35  ;;  %7401 = vmatpush1.bf16.msra.mxu1 %v9468_v36  ;;  %v3974_v35 = vld [vmem:[#allocation8 + $0x38] sm:$0xff]  ;;  %v9514_v36 = vcombine.low %v4471_v24, %v4475_v26  ;;  %v4009_v24 = vld [vmem:[#allocation8 + $0x150] sm:$0xff] }
 0x386   :  { %7230 = vmatprep.subr.bf16.mxu0 %v9475_v37  ;;  %7402 = vmatprep.subr.bf16.mxu1 %v9477_v38  ;;  %v9516_v37 = vcombine.low %v4472_v27, %v4476_v28  ;;  %v9015_v38 = vcombine.high %v3969_v33, %v3973_v34  ;;  %v9017_v40 = vcombine.high %v3970_v15, %v3974_v35  ;;  %v4013_v26 = vld [vmem:[#allocation8 + $0x170] sm:$0xff]  ;;  %v4010_v27 = vld [vmem:[#allocation8 + $0x158] sm:$0xff] }
 0x387   :  { %v4014_v28 = vld [vmem:[#allocation8 + $0x178] sm:$0xff] }
 0x389   :  { %7231 = vmatpush1.bf16.msra.mxu0 %v9474_v44  ;;  %7403 = vmatpush1.bf16.msra.mxu1 %v9476_v45  ;;  %v3982_v44 = vld [vmem:[#allocation8 + $0x78] sm:$0xff]  ;;  %v9014_v45 = vcombine.low %v3969_v33, %v3973_v34  ;;  %v4017_v33 = vld [vmem:[#allocation8 + $0x190] sm:$0xff] }
 0x38a   :  { %7232 = vmatprep.subr.bf16.mxu0 %v9483_v30  ;;  %7404 = vmatprep.subr.bf16.mxu1 %v9485_v25  ;;  %v9016_v30 = vcombine.low %v3970_v15, %v3974_v35  ;;  %v9023_v25 = vcombine.high %v3977_v41, %v3981_v42  ;;  %v9025_v46 = vcombine.high %v3978_v63, %v3982_v44  ;;  %v4021_v34 = vld [vmem:[#allocation8 + $0x1b0] sm:$0xff]  ;;  %v4018_v15 = vld [vmem:[#allocation8 + $0x198] sm:$0xff] }
 0x38b   :  { %v4022_v35 = vld [vmem:[#allocation8 + $0x1b8] sm:$0xff] }
 0x38d   :  { %7233 = vmatpush1.bf16.msra.mxu0 %v9482_v50  ;;  %7405 = vmatpush1.bf16.msra.mxu1 %v9484_v43  ;;  %v3990_v50 = vld [vmem:[#allocation8 + $0xb8] sm:$0xff]  ;;  %v9022_v43 = vcombine.low %v3977_v41, %v3981_v42  ;;  %v4025_v41 = vld [vmem:[#allocation8 + $0x1d0] sm:$0xff] }
 0x38e   :  { %7234 = vmatprep.subr.bf16.mxu0 %v9491_v52  ;;  %7406 = vmatprep.subr.bf16.mxu1 %v9493_v54  ;;  %v9024_v52 = vcombine.low %v3978_v63, %v3982_v44  ;;  %v9031_v54 = vcombine.high %v3985_v47, %v3989_v48  ;;  %v9033_v39 = vcombine.high %v3986_v49, %v3990_v50  ;;  %v4029_v42 = vld [vmem:[#allocation8 + $0x1f0] sm:$0xff]  ;;  %v4026_v63 = vld [vmem:[#allocation8 + $0x1d8] sm:$0xff] }
 0x38f   :  { %v4030_v44 = vld [vmem:[#allocation8 + $0x1f8] sm:$0xff] }
 0x391   :  { %7235 = vmatpush1.bf16.msra.mxu0 %v9490_v0  ;;  %7407 = vmatpush1.bf16.msra.mxu1 %v9492_v2  ;;  %v3998_v0 = vld [vmem:[#allocation8 + $0xf8] sm:$0xff]  ;;  %v9030_v2 = vcombine.low %v3985_v47, %v3989_v48  ;;  %v4033_v47 = vld [vmem:[#allocation8 + $0x210] sm:$0xff] }
 0x392   :  { %7236 = vmatprep.subr.bf16.mxu0 %v9499_v5  ;;  %7408 = vmatprep.subr.bf16.mxu1 %v9501_v8  ;;  %v9032_v5 = vcombine.low %v3986_v49, %v3990_v50  ;;  %v9039_v8 = vcombine.high %v3993_v55, %v3997_v60  ;;  %v9041_v16 = vcombine.high %v3994_v53, %v3998_v0  ;;  %v4037_v48 = vld [vmem:[#allocation8 + $0x230] sm:$0xff]  ;;  %v4034_v49 = vld [vmem:[#allocation8 + $0x218] sm:$0xff] }
 0x393   :  { %v4038_v50 = vld [vmem:[#allocation8 + $0x238] sm:$0xff] }
 0x395   :  { %7237 = vmatpush1.bf16.msra.mxu0 %v9498_v13  ;;  %7409 = vmatpush1.bf16.msra.mxu1 %v9500_v14  ;;  %v9038_v13 = vcombine.low %v3993_v55, %v3997_v60  ;;  %v9040_v14 = vcombine.low %v3994_v53, %v3998_v0  ;;  %v4041_v55 = vld [vmem:[#allocation8 + $0x250] sm:$0xff]  ;;  %v4042_v53 = vld [vmem:[#allocation8 + $0x258] sm:$0xff] }
 0x396   :  { %7238 = vmatprep.subr.bf16.mxu0 %v9507_v18  ;;  %7410 = vmatprep.subr.bf16.mxu1 %v9509_v19  ;;  %v9047_v18 = vcombine.high %v4001_v17, %v4005_v10  ;;  %v4045_v60 = vld [vmem:[#allocation8 + $0x270] sm:$0xff]  ;;  %v4046_v0 = vld [vmem:[#allocation8 + $0x278] sm:$0xff] }
 0x399   :  { %7239 = vmatpush1.bf16.msra.mxu0 %v9506_v29  ;;  %7411 = vmatpush1.bf16.msra.mxu1 %v9508_v31  ;;  %v9046_v29 = vcombine.low %v4001_v17, %v4005_v10  ;;  %v4049_v17 = vld [vmem:[#allocation8 + $0x290] sm:$0xff] }
 0x39a   :  { %7240 = vmatprep.subr.bf16.mxu0 %v9515_v58  ;;  %7412 = vmatprep.subr.bf16.mxu1 %v9517_v32  ;;  %v9055_v58 = vcombine.high %v4009_v24, %v4013_v26  ;;  %v9057_v32 = vcombine.high %v4010_v27, %v4014_v28  ;;  %v4053_v10 = vld [vmem:[#allocation8 + $0x2b0] sm:$0xff] }
 0x39d   :  { %7241 = vmatpush1.bf16.msra.mxu0 %v9514_v36  ;;  %7413 = vmatpush1.bf16.msra.mxu1 %v9516_v37  ;;  %v9054_v36 = vcombine.low %v4009_v24, %v4013_v26  ;;  %v9056_v37 = vcombine.low %v4010_v27, %v4014_v28  ;;  %v4057_v24 = vld [vmem:[#allocation8 + $0x2d0] sm:$0xff]  ;;  %v4058_v27 = vld [vmem:[#allocation8 + $0x2d8] sm:$0xff] }
 0x39e   :  { %7425 = vmatprep.subr.bf16.mxu0 %v9015_v38  ;;  %7597 = vmatprep.subr.bf16.mxu1 %v9017_v40  ;;  %v9063_v38 = vcombine.high %v4017_v33, %v4021_v34  ;;  %v9065_v40 = vcombine.high %v4018_v15, %v4022_v35  ;;  %v4061_v26 = vld [vmem:[#allocation8 + $0x2f0] sm:$0xff]  ;;  %v4062_v28 = vld [vmem:[#allocation8 + $0x2f8] sm:$0xff] }
 0x3a0   :  { %7243 = vmatmul.mubr.bf16.vlgmr.msra.gmra.mrb[8].mxu0 %v10312_v56  ;;  %7415 = vmatmul.mubr.bf16.vlgmr.msra.gmra.mrb[8].mxu1 %v10312_v56 }
 0x3a1   :  { %7426 = vmatpush1.bf16.msra.mxu0 %v9014_v45  ;;  %7457 = vmatprep.mubr.bf16.mxu0 %v10272_v4  ;;  %v9062_v45 = vcombine.low %v4017_v33, %v4021_v34  ;;  %v4065_v33 = vld [vmem:[#allocation8 + $0x310] sm:$0xff] }
 0x3a2   :  { %7598 = vmatpush1.bf16.msra.mxu1 %v9016_v30  ;;  %7629 = vmatprep.mubr.bf16.mxu1 %v10272_v4  ;;  %v4002_v4 = vld [vmem:[#allocation8 + $0x118] sm:$0xff]  ;;  %v9064_v30 = vcombine.low %v4018_v15, %v4022_v35  ;;  %v4069_v34 = vld [vmem:[#allocation8 + $0x330] sm:$0xff] }
 0x3a3   :  { %7427 = vmatprep.subr.bf16.mxu0 %v9023_v25  ;;  %7599 = vmatprep.subr.bf16.mxu1 %v9025_v46  ;;  %v9049_v19 = vcombine.high %v4002_v4, %v4006_v12  ;;  %v9048_v31 = vcombine.low %v4002_v4, %v4006_v12  ;;  %v9071_v25 = vcombine.high %v4025_v41, %v4029_v42  ;;  %v4050_v4 = vld [vmem:[#allocation8 + $0x298] sm:$0xff] }
 0x3a4   :  { %v9073_v46 = vcombine.high %v4026_v63, %v4030_v44  ;;  %v4054_v12 = vld [vmem:[#allocation8 + $0x2b8] sm:$0xff] }
 0x3a5   :  { %7428 = vmatpush1.bf16.msra.mxu0 %v9022_v43  ;;  %v9070_v43 = vcombine.low %v4025_v41, %v4029_v42  ;;  %v4066_v15 = vld [vmem:[#allocation8 + $0x318] sm:$0xff]  ;;  %v4073_v41 = vld [vmem:[#allocation8 + $0x350] sm:$0xff] }
 0x3a6   :  { %7600 = vmatpush1.bf16.msra.mxu1 %v9024_v52  ;;  %7429 = vmatprep.subr.bf16.mxu0 %v9031_v54  ;;  %v9072_v52 = vcombine.low %v4026_v63, %v4030_v44  ;;  %v9079_v54 = vcombine.high %v4033_v47, %v4037_v48  ;;  %v4070_v35 = vld [vmem:[#allocation8 + $0x338] sm:$0xff]  ;;  %v4077_v42 = vld [vmem:[#allocation8 + $0x370] sm:$0xff] }
 0x3a7   :  { %7601 = vmatprep.subr.bf16.mxu1 %v9033_v39  ;;  %v9081_v39 = vcombine.high %v4034_v49, %v4038_v50  ;;  %v4074_v63 = vld [vmem:[#allocation8 + $0x358] sm:$0xff] }
 0x3a8   :  { %v4078_v44 = vld [vmem:[#allocation8 + $0x378] sm:$0xff] }
 0x3a9   :  { %7430 = vmatpush1.bf16.msra.mxu0 %v9030_v2  ;;  %v9078_v2 = vcombine.low %v4033_v47, %v4037_v48  ;;  %v4081_v47 = vld [vmem:[#allocation8 + $0x390] sm:$0xff] }
 0x3aa   :  { %7602 = vmatpush1.bf16.msra.mxu1 %v9032_v5  ;;  %7431 = vmatprep.subr.bf16.mxu0 %v9039_v8  ;;  %v9080_v5 = vcombine.low %v4034_v49, %v4038_v50  ;;  %v9087_v8 = vcombine.high %v4041_v55, %v4045_v60  ;;  %v4085_v48 = vld [vmem:[#allocation8 + $0x3b0] sm:$0xff]  ;;  %v4082_v49 = vld [vmem:[#allocation8 + $0x398] sm:$0xff] }
 0x3ab   :  { %7603 = vmatprep.subr.bf16.mxu1 %v9041_v16  ;;  %v9089_v16 = vcombine.high %v4042_v53, %v4046_v0  ;;  %v4086_v50 = vld [vmem:[#allocation8 + $0x3b8] sm:$0xff] }
 0x3ad   :  { %7432 = vmatpush1.bf16.msra.mxu0 %v9038_v13  ;;  %v9086_v13 = vcombine.low %v4041_v55, %v4045_v60  ;;  %v4089_v55 = vld [vmem:[#allocation8 + $0x3d0] sm:$0xff] }
 0x3ae   :  { %7604 = vmatpush1.bf16.msra.mxu1 %v9040_v14  ;;  %7433 = vmatprep.subr.bf16.mxu0 %v9047_v18  ;;  %v9088_v14 = vcombine.low %v4042_v53, %v4046_v0  ;;  %v9095_v18 = vcombine.high %v4049_v17, %v4053_v10  ;;  %v4093_v60 = vld [vmem:[#allocation8 + $0x3f0] sm:$0xff]  ;;  %v4090_v53 = vld [vmem:[#allocation8 + $0x3d8] sm:$0xff] }
 0x3af   :  { %7605 = vmatprep.subr.bf16.mxu1 %v9049_v19  ;;  %v9097_v19 = vcombine.high %v4050_v4, %v4054_v12  ;;  %v4094_v0 = vld [vmem:[#allocation8 + $0x3f8] sm:$0xff] }
 0x3b1   :  { %7434 = vmatpush1.bf16.msra.mxu0 %v9046_v29  ;;  %v9094_v29 = vcombine.low %v4049_v17, %v4053_v10  ;;  %v4097_v17 = vld [vmem:[#allocation8 + $0x410] sm:$0xff] }
 0x3b2   :  { %7606 = vmatpush1.bf16.msra.mxu1 %v9048_v31  ;;  %7435 = vmatprep.subr.bf16.mxu0 %v9055_v58  ;;  %v9096_v31 = vcombine.low %v4050_v4, %v4054_v12  ;;  %v9103_v58 = vcombine.high %v4057_v24, %v4061_v26  ;;  %v4101_v10 = vld [vmem:[#allocation8 + $0x430] sm:$0xff]  ;;  %v4098_v4 = vld [vmem:[#allocation8 + $0x418] sm:$0xff] }
 0x3b3   :  { %7607 = vmatprep.subr.bf16.mxu1 %v9057_v32  ;;  %v9105_v32 = vcombine.high %v4058_v27, %v4062_v28  ;;  %v4102_v12 = vld [vmem:[#allocation8 + $0x438] sm:$0xff] }
 0x3b5   :  { %7436 = vmatpush1.bf16.msra.mxu0 %v9054_v36  ;;  %v9102_v36 = vcombine.low %v4057_v24, %v4061_v26  ;;  %v4105_v24 = vld [vmem:[#allocation8 + $0x450] sm:$0xff] }
 0x3b6   :  { %7608 = vmatpush1.bf16.msra.mxu1 %v9056_v37  ;;  %7437 = vmatprep.subr.bf16.mxu0 %v9063_v38  ;;  %v9104_v37 = vcombine.low %v4058_v27, %v4062_v28  ;;  %v9111_v38 = vcombine.high %v4065_v33, %v4069_v34  ;;  %v4109_v26 = vld [vmem:[#allocation8 + $0x470] sm:$0xff]  ;;  %v9142_v27 = vcombine.low %v4097_v17, %v4101_v10  ;;  %v4106_v28 = vld [vmem:[#allocation8 + $0x458] sm:$0xff] }
 0x3b7   :  { %7609 = vmatprep.subr.bf16.mxu1 %v9065_v40  ;;  %v9113_v40 = vcombine.high %v4066_v15, %v4070_v35 }
 0x3b9   :  { %7438 = vmatpush1.bf16.msra.mxu0 %v9062_v45  ;;  %v9110_v45 = vcombine.low %v4065_v33, %v4069_v34  ;;  %v4117_v33 = vld [vmem:[#allocation8 + $0x4b0] sm:$0xff] }
 0x3ba   :  { %7610 = vmatpush1.bf16.msra.mxu1 %v9064_v30  ;;  %7439 = vmatprep.subr.bf16.mxu0 %v9071_v25  ;;  %v9112_v30 = vcombine.low %v4066_v15, %v4070_v35  ;;  %v9119_v25 = vcombine.high %v4073_v41, %v4077_v42  ;;  %v4114_v15 = vld [vmem:[#allocation8 + $0x498] sm:$0xff] }
 0x3bb   :  { %7611 = vmatprep.subr.bf16.mxu1 %v9073_v46  ;;  %v9121_v46 = vcombine.high %v4074_v63, %v4078_v44  ;;  %v4118_v35 = vld [vmem:[#allocation8 + $0x4b8] sm:$0xff] }
 0x3bd   :  { %7440 = vmatpush1.bf16.msra.mxu0 %v9070_v43  ;;  %v9118_v43 = vcombine.low %v4073_v41, %v4077_v42  ;;  %v4121_v41 = vld [vmem:[#allocation8 + $0x4d0] sm:$0xff] }
 0x3be   :  { %7612 = vmatpush1.bf16.msra.mxu1 %v9072_v52  ;;  %7441 = vmatprep.subr.bf16.mxu0 %v9079_v54  ;;  %v9120_v52 = vcombine.low %v4074_v63, %v4078_v44  ;;  %v9127_v54 = vcombine.high %v4081_v47, %v4085_v48  ;;  %v4125_v42 = vld [vmem:[#allocation8 + $0x4f0] sm:$0xff]  ;;  %v4122_v63 = vld [vmem:[#allocation8 + $0x4d8] sm:$0xff] }
 0x3bf   :  { %7613 = vmatprep.subr.bf16.mxu1 %v9081_v39  ;;  %v9129_v39 = vcombine.high %v4082_v49, %v4086_v50  ;;  %v4126_v44 = vld [vmem:[#allocation8 + $0x4f8] sm:$0xff] }
 0x3c1   :  { %7442 = vmatpush1.bf16.msra.mxu0 %v9078_v2  ;;  %v9126_v2 = vcombine.low %v4081_v47, %v4085_v48  ;;  %v4133_v47 = vld [vmem:[#allocation8 + $0x530] sm:$0xff]  ;;  %v4130_v48 = vld [vmem:[#allocation8 + $0x518] sm:$0xff] }
 0x3c2   :  { %7614 = vmatpush1.bf16.msra.mxu1 %v9080_v5  ;;  %7443 = vmatprep.subr.bf16.mxu0 %v9087_v8  ;;  %v9128_v5 = vcombine.low %v4082_v49, %v4086_v50  ;;  %v9135_v8 = vcombine.high %v4089_v55, %v4093_v60  ;;  %v4134_v49 = vld [vmem:[#allocation8 + $0x538] sm:$0xff]  ;;  %v9168_v50 = vcombine.low %v4122_v63, %v4126_v44 }
 0x3c3   :  { %7615 = vmatprep.subr.bf16.mxu1 %v9089_v16  ;;  %v9137_v16 = vcombine.high %v4090_v53, %v4094_v0 }
 0x3c5   :  { %7444 = vmatpush1.bf16.msra.mxu0 %v9086_v13  ;;  %v9134_v13 = vcombine.low %v4089_v55, %v4093_v60  ;;  %v4138_v55 = vld [vmem:[#allocation8 + $0x558] sm:$0xff] }
 0x3c6   :  { %7616 = vmatpush1.bf16.msra.mxu1 %v9088_v14  ;;  %7445 = vmatprep.subr.bf16.mxu0 %v9095_v18  ;;  %v9136_v14 = vcombine.low %v4090_v53, %v4094_v0  ;;  %v9143_v18 = vcombine.high %v4097_v17, %v4101_v10  ;;  %v4142_v60 = vld [vmem:[#allocation8 + $0x578] sm:$0xff]  ;;  %v9176_v0 = vcombine.low %v4130_v48, %v4134_v49 }
 0x3c7   :  { %7617 = vmatprep.subr.bf16.mxu1 %v9097_v19  ;;  %v9145_v19 = vcombine.high %v4098_v4, %v4102_v12  ;;  %v4146_v17 = vld [vmem:[#allocation8 + $0x598] sm:$0xff] }
 0x3c8   :  { %v4150_v10 = vld [vmem:[#allocation8 + $0x5b8] sm:$0xff] }
 0x3c9   :  { %7446 = vmatpush1.bf16.msra.mxu0 %v9094_v29  ;;  %v4110_v29 = vld [vmem:[#allocation8 + $0x478] sm:$0xff] }
 0x3ca   :  { %7618 = vmatpush1.bf16.msra.mxu1 %v9096_v31  ;;  %7447 = vmatprep.subr.bf16.mxu0 %v9103_v58  ;;  %v9144_v31 = vcombine.low %v4098_v4, %v4102_v12  ;;  %v9151_v58 = vcombine.high %v4105_v24, %v4109_v26  ;;  %v9153_v34 = vcombine.high %v4106_v28, %v4110_v29 }
 0x3cb   :  { %7619 = vmatprep.subr.bf16.mxu1 %v9105_v32  ;;  %v4113_v32 = vld [vmem:[#allocation8 + $0x490] sm:$0xff]  ;;  %v9184_v12 = vcombine.low %v4138_v55, %v4142_v60 }
 0x3cd   :  { %7448 = vmatpush1.bf16.msra.mxu0 %v9102_v36  ;;  %v9150_v36 = vcombine.low %v4105_v24, %v4109_v26  ;;  %v4154_v24 = vld [vmem:[#allocation8 + $0x5d8] sm:$0xff] }
 0x3ce   :  { %7620 = vmatpush1.bf16.msra.mxu1 %v9104_v37  ;;  %7449 = vmatprep.subr.bf16.mxu0 %v9111_v38  ;;  %v9152_v37 = vcombine.low %v4106_v28, %v4110_v29  ;;  %v9159_v38 = vcombine.high %v4113_v32, %v4117_v33  ;;  %v4158_v26 = vld [vmem:[#allocation8 + $0x5f8] sm:$0xff]  ;;  %v9192_v28 = vcombine.low %v4146_v17, %v4150_v10 }
 0x3cf   :  { %7621 = vmatprep.subr.bf16.mxu1 %v9113_v40  ;;  %v9161_v40 = vcombine.high %v4114_v15, %v4118_v35 }
 0x3d1   :  { %7450 = vmatpush1.bf16.msra.mxu0 %v9110_v45  ;;  %v9158_v45 = vcombine.low %v4113_v32, %v4117_v33  ;;  %v4165_v32 = vld [vmem:[#allocation8 + $0x630] sm:$0xff]  ;;  %v4162_v33 = vld [vmem:[#allocation8 + $0x618] sm:$0xff] }
 0x3d2   :  { %7622 = vmatpush1.bf16.msra.mxu1 %v9112_v30  ;;  %7451 = vmatprep.subr.bf16.mxu0 %v9119_v25  ;;  %v9167_v30 = vcombine.high %v4121_v41, %v4125_v42  ;;  %v9169_v25 = vcombine.high %v4122_v63, %v4126_v44 }
 0x3d3   :  { %7623 = vmatprep.subr.bf16.mxu1 %v9121_v46  ;;  %v4129_v46 = vld [vmem:[#allocation8 + $0x510] sm:$0xff] }
 0x3d4   :  { %v9174_v53 = vcombine.low %v4129_v46, %v4133_v47 }
 0x3d5   :  { %7452 = vmatpush1.bf16.msra.mxu0 %v9118_v43  ;;  %v9175_v43 = vcombine.high %v4129_v46, %v4133_v47  ;;  %v4178_v46 = vld [vmem:[#allocation8 + $0x698] sm:$0xff] }
 0x3d6   :  { %7624 = vmatpush1.bf16.msra.mxu1 %v9120_v52  ;;  %7453 = vmatprep.subr.bf16.mxu0 %v9127_v54  ;;  %v9177_v52 = vcombine.high %v4130_v48, %v4134_v49  ;;  %v4137_v54 = vld [vmem:[#allocation8 + $0x550] sm:$0xff]  ;;  %v4182_v47 = vld [vmem:[#allocation8 + $0x6b8] sm:$0xff] }
 0x3d7   :  { %7625 = vmatprep.subr.bf16.mxu1 %v9129_v39  ;;  %v4141_v39 = vld [vmem:[#allocation8 + $0x570] sm:$0xff] }
 0x3d8   :  { %v9182_v4 = vcombine.low %v4137_v54, %v4141_v39 }
 0x3d9   :  { %7454 = vmatpush1.bf16.msra.mxu0 %v9126_v2  ;;  %v9183_v2 = vcombine.high %v4137_v54, %v4141_v39  ;;  %v4186_v54 = vld [vmem:[#allocation8 + $0x6d8] sm:$0xff] }
 0x3da   :  { %7626 = vmatpush1.bf16.msra.mxu1 %v9128_v5  ;;  %7455 = vmatprep.subr.bf16.mxu0 %v9135_v8  ;;  %v9185_v5 = vcombine.high %v4138_v55, %v4142_v60  ;;  %v4145_v8 = vld [vmem:[#allocation8 + $0x590] sm:$0xff]  ;;  %v4190_v39 = vld [vmem:[#allocation8 + $0x6f8] sm:$0xff]  ;;  %v9224_v60 = vcombine.low %v4178_v46, %v4182_v47 }
 0x3db   :  { %7627 = vmatprep.subr.bf16.mxu1 %v9137_v16  ;;  %v4149_v16 = vld [vmem:[#allocation8 + $0x5b0] sm:$0xff] }
 0x3dd   :  { %7456 = vmatpush1.bf16.msra.mxu0 %v9134_v13  ;;  %v9191_v13 = vcombine.high %v4145_v8, %v4149_v16 }
 0x3de   :  { %7628 = vmatpush1.bf16.msra.mxu1 %v9136_v14  ;;  %7468 = vmatprep.subr.bf16.mxu0 %v9143_v18  ;;  %v9193_v14 = vcombine.high %v4146_v17, %v4150_v10  ;;  %v4153_v18 = vld [vmem:[#allocation8 + $0x5d0] sm:$0xff]  ;;  %v9232_v10 = vcombine.low %v4186_v54, %v4190_v39 }
 0x3df   :  { %7640 = vmatprep.subr.bf16.mxu1 %v9145_v19  ;;  %v4157_v19 = vld [vmem:[#allocation8 + $0x5f0] sm:$0xff] }
 0x3e0   :  { %7458 = vmatmul.mubr.bf16.vlgmr.msra.gmra.mrb[12].mxu0 %v10268_v62  ;;  %v9199_v29 = vcombine.high %v4153_v18, %v4157_v19 }
 0x3e1   :  { %7630 = vmatmul.mubr.bf16.vlgmr.msra.gmra.mrb[12].mxu1 %v10268_v62  ;;  %7469 = vmatpush1.bf16.msra.mxu0 %v9142_v27  ;;  %v9160_v62 = vcombine.low %v4114_v15, %v4118_v35  ;;  %v9190_v27 = vcombine.low %v4145_v8, %v4149_v16  ;;  %v9198_v15 = vcombine.low %v4153_v18, %v4157_v19  ;;  %v4194_v8 = vld [vmem:[#allocation8 + $0x718] sm:$0xff] }
 0x3e2   :  { %7500 = vmatprep.mubr.bf16.mxu0 %v10274_v11  ;;  %7641 = vmatpush1.bf16.msra.mxu1 %v9144_v31  ;;  %v9201_v31 = vcombine.high %v4154_v24, %v4158_v26  ;;  %v9200_v35 = vcombine.low %v4154_v24, %v4158_v26  ;;  %v4198_v16 = vld [vmem:[#allocation8 + $0x738] sm:$0xff] }
 0x3e3   :  { %7672 = vmatprep.mubr.bf16.mxu1 %v10274_v11  ;;  %7470 = vmatprep.subr.bf16.mxu0 %v9151_v58  ;;  %v9166_v11 = vcombine.low %v4121_v41, %v4125_v42  ;;  %v4161_v58 = vld [vmem:[#allocation8 + $0x610] sm:$0xff]  ;;  %v4170_v41 = vld [vmem:[#allocation8 + $0x658] sm:$0xff]  ;;  %v9240_v26 = vcombine.low %v4194_v8, %v4198_v16 }
 0x3e4   :  { %7642 = vmatprep.subr.bf16.mxu1 %v9153_v34  ;;  %v4166_v34 = vld [vmem:[#allocation8 + $0x638] sm:$0xff]  ;;  %v9206_v63 = vcombine.low %v4161_v58, %v4165_v32 }
 0x3e5   :  { %7471 = vmatpush1.bf16.msra.mxu0 %v9150_v36  ;;  %v9207_v36 = vcombine.high %v4161_v58, %v4165_v32  ;;  %v4174_v42 = vld [vmem:[#allocation8 + $0x678] sm:$0xff]  ;;  %v9208_v44 = vcombine.low %v4162_v33, %v4166_v34 }
 0x3e6   :  { %7643 = vmatpush1.bf16.msra.mxu1 %v9152_v37  ;;  %7472 = vmatprep.subr.bf16.mxu0 %v9159_v38  ;;  %v9209_v37 = vcombine.high %v4162_v33, %v4166_v34  ;;  %v4169_v38 = vld [vmem:[#allocation8 + $0x650] sm:$0xff]  ;;  %v9216_v49 = vcombine.low %v4170_v41, %v4174_v42  ;;  %v4202_v18 = vld [vmem:[#allocation8 + $0x758] sm:$0xff] }
 0x3e7   :  { %7644 = vmatprep.subr.bf16.mxu1 %v9161_v40  ;;  %v4173_v40 = vld [vmem:[#allocation8 + $0x670] sm:$0xff]  ;;  %v4206_v19 = vld [vmem:[#allocation8 + $0x778] sm:$0xff] }
 0x3e8   :  { %v9214_v48 = vcombine.low %v4169_v38, %v4173_v40  ;;  %v4210_v58 = vld [vmem:[#allocation8 + $0x798] sm:$0xff]  ;;  %v9248_v34 = vcombine.low %v4202_v18, %v4206_v19 }
 0x3e9   :  { %7473 = vmatpush1.bf16.msra.mxu0 %v9158_v45  ;;  %v9215_v45 = vcombine.high %v4169_v38, %v4173_v40  ;;  %v4214_v32 = vld [vmem:[#allocation8 + $0x7b8] sm:$0xff] }
 0x3ea   :  { %7645 = vmatpush1.bf16.msra.mxu1 %v9160_v62  ;;  %7474 = vmatprep.subr.bf16.mxu0 %v9167_v30  ;;  %v9217_v62 = vcombine.high %v4170_v41, %v4174_v42  ;;  %v4177_v30 = vld [vmem:[#allocation8 + $0x690] sm:$0xff]  ;;  %v4218_v38 = vld [vmem:[#allocation8 + $0x7d8] sm:$0xff]  ;;  %v9256_v42 = vcombine.low %v4210_v58, %v4214_v32 }
 0x3eb   :  { %7646 = vmatprep.subr.bf16.mxu1 %v9169_v25  ;;  %v4181_v25 = vld [vmem:[#allocation8 + $0x6b0] sm:$0xff]  ;;  %v4222_v40 = vld [vmem:[#allocation8 + $0x7f8] sm:$0xff] }
 0x3ec   :  { %v9222_v55 = vcombine.low %v4177_v30, %v4181_v25 }
 0x3ed   :  { %7475 = vmatpush1.bf16.msra.mxu0 %v9166_v11  ;;  %v9223_v11 = vcombine.high %v4177_v30, %v4181_v25  ;;  %v4226_v30 = vld [vmem:[#allocation8 + $0x818] sm:$0xff] }
 0x3ee   :  { %7647 = vmatpush1.bf16.msra.mxu1 %v9168_v50  ;;  %7476 = vmatprep.subr.bf16.mxu0 %v9175_v43  ;;  %v9225_v50 = vcombine.high %v4178_v46, %v4182_v47  ;;  %v4185_v43 = vld [vmem:[#allocation8 + $0x6d0] sm:$0xff]  ;;  %v4230_v25 = vld [vmem:[#allocation8 + $0x838] sm:$0xff]  ;;  %v9264_v47 = vcombine.low %v4218_v38, %v4222_v40 }
 0x3ef   :  { %7648 = vmatprep.subr.bf16.mxu1 %v9177_v52  ;;  %v4189_v52 = vld [vmem:[#allocation8 + $0x6f0] sm:$0xff] }
 0x3f0   :  { %v9230_v17 = vcombine.low %v4185_v43, %v4189_v52 }
 0x3f1   :  { %7477 = vmatpush1.bf16.msra.mxu0 %v9174_v53  ;;  %v9231_v53 = vcombine.high %v4185_v43, %v4189_v52  ;;  %v4234_v52 = vld [vmem:[#allocation8 + $0x858] sm:$0xff] }
 0x3f2   :  { %7649 = vmatpush1.bf16.msra.mxu1 %v9176_v0  ;;  %7478 = vmatprep.subr.bf16.mxu0 %v9183_v2  ;;  %v9233_v0 = vcombine.high %v4186_v54, %v4190_v39  ;;  %v4193_v2 = vld [vmem:[#allocation8 + $0x710] sm:$0xff]  ;;  %v4238_v54 = vld [vmem:[#allocation8 + $0x878] sm:$0xff]  ;;  %v9272_v39 = vcombine.low %v4226_v30, %v4230_v25 }
 0x3f3   :  { %7650 = vmatprep.subr.bf16.mxu1 %v9185_v5  ;;  %v4197_v5 = vld [vmem:[#allocation8 + $0x730] sm:$0xff] }
 0x3f4   :  { %v9238_v24 = vcombine.low %v4193_v2, %v4197_v5 }
 0x3f5   :  { %7479 = vmatpush1.bf16.msra.mxu0 %v9182_v4  ;;  %v9239_v4 = vcombine.high %v4193_v2, %v4197_v5  ;;  %v4242_v2 = vld [vmem:[#allocation8 + $0x898] sm:$0xff] }
 0x3f6   :  { %7651 = vmatpush1.bf16.msra.mxu1 %v9184_v12  ;;  %7480 = vmatprep.subr.bf16.mxu0 %v9191_v13  ;;  %v9241_v12 = vcombine.high %v4194_v8, %v4198_v16  ;;  %v4201_v13 = vld [vmem:[#allocation8 + $0x750] sm:$0xff]  ;;  %v4246_v5 = vld [vmem:[#allocation8 + $0x8b8] sm:$0xff]  ;;  %v9280_v16 = vcombine.low %v4234_v52, %v4238_v54 }
 0x3f7   :  { %7652 = vmatprep.subr.bf16.mxu1 %v9193_v14  ;;  %v4205_v14 = vld [vmem:[#allocation8 + $0x770] sm:$0xff] }
 0x3f8   :  { %v9246_v33 = vcombine.low %v4201_v13, %v4205_v14 }
 0x3f9   :  { %7481 = vmatpush1.bf16.msra.mxu0 %v9190_v27  ;;  %v9247_v27 = vcombine.high %v4201_v13, %v4205_v14  ;;  %v4250_v13 = vld [vmem:[#allocation8 + $0x8d8] sm:$0xff] }
 0x3fa   :  { %7653 = vmatpush1.bf16.msra.mxu1 %v9192_v28  ;;  %7482 = vmatprep.subr.bf16.mxu0 %v9199_v29  ;;  %v9249_v28 = vcombine.high %v4202_v18, %v4206_v19  ;;  %v4209_v29 = vld [vmem:[#allocation8 + $0x790] sm:$0xff]  ;;  %v4254_v14 = vld [vmem:[#allocation8 + $0x8f8] sm:$0xff] }
 0x3fb   :  { %7654 = vmatprep.subr.bf16.mxu1 %v9201_v31  ;;  %v4213_v31 = vld [vmem:[#allocation8 + $0x7b0] sm:$0xff] }
 0x3fc   :  { %v9254_v41 = vcombine.low %v4209_v29, %v4213_v31 }
 0x3fd   :  { %7483 = vmatpush1.bf16.msra.mxu0 %v9198_v15  ;;  %v9255_v15 = vcombine.high %v4209_v29, %v4213_v31  ;;  %v4262_v29 = vld [vmem:[#allocation8 + $0x938] sm:$0xff]  ;;  %v9296_v31 = vcombine.low %v4250_v13, %v4254_v14 }
 0x3fe   :  { %7655 = vmatpush1.bf16.msra.mxu1 %v9200_v35  ;;  %7484 = vmatprep.subr.bf16.mxu0 %v9207_v36  ;;  %v9257_v35 = vcombine.high %v4210_v58, %v4214_v32  ;;  %v4217_v36 = vld [vmem:[#allocation8 + $0x7d0] sm:$0xff] }
 0x3ff   :  { %7656 = vmatprep.subr.bf16.mxu1 %v9209_v37  ;;  %v4221_v37 = vld [vmem:[#allocation8 + $0x7f0] sm:$0xff] }
 0x400   :  { %v9262_v46 = vcombine.low %v4217_v36, %v4221_v37 }
 0x401   :  { %7485 = vmatpush1.bf16.msra.mxu0 %v9206_v63  ;;  %v9263_v63 = vcombine.high %v4217_v36, %v4221_v37 }
 0x402   :  { %7657 = vmatpush1.bf16.msra.mxu1 %v9208_v44  ;;  %7486 = vmatprep.subr.bf16.mxu0 %v9215_v45  ;;  %v9265_v44 = vcombine.high %v4218_v38, %v4222_v40  ;;  %v4225_v45 = vld [vmem:[#allocation8 + $0x810] sm:$0xff] }
 0x403   :  { %7658 = vmatprep.subr.bf16.mxu1 %v9217_v62  ;;  %v4229_v62 = vld [vmem:[#allocation8 + $0x830] sm:$0xff] }
 0x404   :  { %v9270_v43 = vcombine.low %v4225_v45, %v4229_v62 }
 0x405   :  { %7487 = vmatpush1.bf16.msra.mxu0 %v9214_v48  ;;  %v9271_v48 = vcombine.high %v4225_v45, %v4229_v62 }
 0x406   :  { %7659 = vmatpush1.bf16.msra.mxu1 %v9216_v49  ;;  %7488 = vmatprep.subr.bf16.mxu0 %v9223_v11  ;;  %v9273_v49 = vcombine.high %v4226_v30, %v4230_v25  ;;  %v4233_v11 = vld [vmem:[#allocation8 + $0x850] sm:$0xff] }
 0x407   :  { %7660 = vmatprep.subr.bf16.mxu1 %v9225_v50  ;;  %v4237_v50 = vld [vmem:[#allocation8 + $0x870] sm:$0xff] }
 0x408   :  { %v9278_v8 = vcombine.low %v4233_v11, %v4237_v50 }
 0x409   :  { %7489 = vmatpush1.bf16.msra.mxu0 %v9222_v55  ;;  %v9279_v55 = vcombine.high %v4233_v11, %v4237_v50 }
 0x40a   :  { %7661 = vmatpush1.bf16.msra.mxu1 %v9224_v60  ;;  %7490 = vmatprep.subr.bf16.mxu0 %v9231_v53  ;;  %v4241_v60 = vld [vmem:[#allocation8 + $0x890] sm:$0xff] }
 0x40b   :  { %7662 = vmatprep.subr.bf16.mxu1 %v9233_v0  ;;  %v4245_v53 = vld [vmem:[#allocation8 + $0x8b0] sm:$0xff]  ;;  %v9281_v0 = vcombine.high %v4234_v52, %v4238_v54 }
 0x40c   :  { %v9286_v18 = vcombine.low %v4241_v60, %v4245_v53  ;;  %v4289_v54 = vld [vmem:[#allocation8 + $0xa10] sm:$0xff] }
 0x40d   :  { %7491 = vmatpush1.bf16.msra.mxu0 %v9230_v17  ;;  %v9287_v17 = vcombine.high %v4241_v60, %v4245_v53  ;;  %v4294_v60 = vld [vmem:[#allocation8 + $0xa38] sm:$0xff] }
 0x40e   :  { %7663 = vmatpush1.bf16.msra.mxu1 %v9232_v10  ;;  %7492 = vmatprep.subr.bf16.mxu0 %v9239_v4  ;;  %v9289_v10 = vcombine.high %v4242_v2, %v4246_v5  ;;  %v4249_v4 = vld [vmem:[#allocation8 + $0x8d0] sm:$0xff] }
 0x40f   :  { %7664 = vmatprep.subr.bf16.mxu1 %v9241_v12  ;;  %v4253_v12 = vld [vmem:[#allocation8 + $0x8f0] sm:$0xff] }
 0x410   :  { %v9295_v19 = vcombine.high %v4249_v4, %v4253_v12 }
 0x411   :  { %7493 = vmatpush1.bf16.msra.mxu0 %v9238_v24  ;;  %v9297_v24 = vcombine.high %v4250_v13, %v4254_v14 }
 0x412   :  { %7665 = vmatpush1.bf16.msra.mxu1 %v9240_v26  ;;  %7494 = vmatprep.subr.bf16.mxu0 %v9247_v27  ;;  %v4257_v26 = vld [vmem:[#allocation8 + $0x910] sm:$0xff] }
 0x413   :  { %7666 = vmatprep.subr.bf16.mxu1 %v9249_v28  ;;  %v4261_v27 = vld [vmem:[#allocation8 + $0x930] sm:$0xff]  ;;  %v4258_v28 = vld [vmem:[#allocation8 + $0x918] sm:$0xff] }
 0x414   :  { %v9303_v58 = vcombine.high %v4257_v26, %v4261_v27  ;;  %v9305_v32 = vcombine.high %v4258_v28, %v4262_v29  ;;  %v9302_v36 = vcombine.low %v4257_v26, %v4261_v27  ;;  %v9304_v37 = vcombine.low %v4258_v28, %v4262_v29 }
 0x415   :  { %7495 = vmatpush1.bf16.msra.mxu0 %v9246_v33  ;;  %v4265_v33 = vld [vmem:[#allocation8 + $0x950] sm:$0xff] }
 0x416   :  { %7667 = vmatpush1.bf16.msra.mxu1 %v9248_v34  ;;  %7496 = vmatprep.subr.bf16.mxu0 %v9255_v15  ;;  %v4269_v34 = vld [vmem:[#allocation8 + $0x970] sm:$0xff]  ;;  %v4266_v15 = vld [vmem:[#allocation8 + $0x958] sm:$0xff] }
 0x417   :  { %7668 = vmatprep.subr.bf16.mxu1 %v9257_v35  ;;  %v4270_v35 = vld [vmem:[#allocation8 + $0x978] sm:$0xff]  ;;  %v9311_v38 = vcombine.high %v4265_v33, %v4269_v34  ;;  %v9310_v45 = vcombine.low %v4265_v33, %v4269_v34 }
 0x418   :  { %v9313_v40 = vcombine.high %v4266_v15, %v4270_v35  ;;  %v9312_v62 = vcombine.low %v4266_v15, %v4270_v35 }
 0x419   :  { %7497 = vmatpush1.bf16.msra.mxu0 %v9254_v41  ;;  %v4273_v41 = vld [vmem:[#allocation8 + $0x990] sm:$0xff] }
 0x41a   :  { %7669 = vmatpush1.bf16.msra.mxu1 %v9256_v42  ;;  %7498 = vmatprep.subr.bf16.mxu0 %v9263_v63  ;;  %v4277_v42 = vld [vmem:[#allocation8 + $0x9b0] sm:$0xff]  ;;  %v4274_v63 = vld [vmem:[#allocation8 + $0x998] sm:$0xff] }
 0x41b   :  { %7670 = vmatprep.subr.bf16.mxu1 %v9265_v44  ;;  %v4278_v44 = vld [vmem:[#allocation8 + $0x9b8] sm:$0xff]  ;;  %v9319_v30 = vcombine.high %v4273_v41, %v4277_v42  ;;  %v9318_v11 = vcombine.low %v4273_v41, %v4277_v42 }
 0x41c   :  { %v9321_v25 = vcombine.high %v4274_v63, %v4278_v44  ;;  %v9320_v50 = vcombine.low %v4274_v63, %v4278_v44 }
 0x41d   :  { %7499 = vmatpush1.bf16.msra.mxu0 %v9262_v46  ;;  %v4281_v46 = vld [vmem:[#allocation8 + $0x9d0] sm:$0xff] }
 0x41e   :  { %7671 = vmatpush1.bf16.msra.mxu1 %v9264_v47  ;;  %7511 = vmatprep.subr.bf16.mxu0 %v9271_v48  ;;  %v4285_v47 = vld [vmem:[#allocation8 + $0x9f0] sm:$0xff]  ;;  %v4282_v48 = vld [vmem:[#allocation8 + $0x9d8] sm:$0xff] }
 0x41f   :  { %7683 = vmatprep.subr.bf16.mxu1 %v9273_v49  ;;  %v4286_v49 = vld [vmem:[#allocation8 + $0x9f8] sm:$0xff]  ;;  %v9326_v53 = vcombine.low %v4281_v46, %v4285_v47 }
 0x420   :  { %7501 = vmatmul.mubr.bf16.vlgmr.msra.gmra.mrb[12].mxu0 %v10270_v3  ;;  %v9329_v52 = vcombine.high %v4282_v48, %v4286_v49 }
 0x421   :  { %7673 = vmatmul.mubr.bf16.vlgmr.msra.gmra.mrb[12].mxu1 %v10270_v3  ;;  %7512 = vmatpush1.bf16.msra.mxu0 %v9270_v43  ;;  %v9288_v3 = vcombine.low %v4242_v2, %v4246_v5  ;;  %v9327_v43 = vcombine.high %v4281_v46, %v4285_v47 }
 0x422   :  { %7543 = vmatprep.mubr.bf16.mxu0 %v10314_v59  ;;  %7684 = vmatpush1.bf16.msra.mxu1 %v9272_v39  ;;  %v4293_v39 = vld [vmem:[#allocation8 + $0xa30] sm:$0xff] }
 0x423   :  { %7715 = vmatprep.mubr.bf16.mxu1 %v10314_v59  ;;  %7513 = vmatprep.subr.bf16.mxu0 %v9279_v55  ;;  %v9294_v59 = vcombine.low %v4249_v4, %v4253_v12  ;;  %v4290_v55 = vld [vmem:[#allocation8 + $0xa18] sm:$0xff]  ;;  %v9335_v2 = vcombine.high %v4289_v54, %v4293_v39  ;;  %v9334_v4 = vcombine.low %v4289_v54, %v4293_v39 }
 0x424   :  { %7685 = vmatprep.subr.bf16.mxu1 %v9281_v0  ;;  %v9328_v0 = vcombine.low %v4282_v48, %v4286_v49  ;;  %v9337_v5 = vcombine.high %v4290_v55, %v4294_v60  ;;  %v9336_v12 = vcombine.low %v4290_v55, %v4294_v60 }
 0x425   :  { %7514 = vmatpush1.bf16.msra.mxu0 %v9278_v8  ;;  %v4297_v8 = vld [vmem:[#allocation8 + $0xa50] sm:$0xff] }
 0x426   :  { %7686 = vmatpush1.bf16.msra.mxu1 %v9280_v16  ;;  %7515 = vmatprep.subr.bf16.mxu0 %v9287_v17  ;;  %v4301_v16 = vld [vmem:[#allocation8 + $0xa70] sm:$0xff]  ;;  %v4298_v17 = vld [vmem:[#allocation8 + $0xa58] sm:$0xff] }
 0x427   :  { %7687 = vmatprep.subr.bf16.mxu1 %v9289_v10  ;;  %v4302_v10 = vld [vmem:[#allocation8 + $0xa78] sm:$0xff]  ;;  %v9343_v13 = vcombine.high %v4297_v8, %v4301_v16  ;;  %v9342_v26 = vcombine.low %v4297_v8, %v4301_v16 }
 0x428   :  { %v9345_v14 = vcombine.high %v4298_v17, %v4302_v10  ;;  %v9344_v27 = vcombine.low %v4298_v17, %v4302_v10 }
 0x429   :  { %7516 = vmatpush1.bf16.msra.mxu0 %v9286_v18  ;;  %v4305_v18 = vld [vmem:[#allocation8 + $0xa90] sm:$0xff] }
 0x42a   :  { %7688 = vmatpush1.bf16.msra.mxu1 %v9288_v3  ;;  %7517 = vmatprep.subr.bf16.mxu0 %v9295_v19  ;;  %v4309_v3 = vld [vmem:[#allocation8 + $0xab0] sm:$0xff]  ;;  %v4306_v19 = vld [vmem:[#allocation8 + $0xa98] sm:$0xff] }
 0x42b   :  { %7689 = vmatprep.subr.bf16.mxu1 %v9297_v24  ;;  %v4310_v24 = vld [vmem:[#allocation8 + $0xab8] sm:$0xff]  ;;  %v9351_v28 = vcombine.high %v4305_v18, %v4309_v3  ;;  %v9350_v33 = vcombine.low %v4305_v18, %v4309_v3 }
 0x42c   :  { %v9353_v29 = vcombine.high %v4306_v19, %v4310_v24  ;;  %v9352_v34 = vcombine.low %v4306_v19, %v4310_v24 }
 0x42d   :  { %7518 = vmatpush1.bf16.msra.mxu0 %v9294_v59  ;;  %v4313_v59 = vld [vmem:[#allocation8 + $0xad0] sm:$0xff] }
 0x42e   :  { %7690 = vmatpush1.bf16.msra.mxu1 %v9296_v31  ;;  %7519 = vmatprep.subr.bf16.mxu0 %v9303_v58  ;;  %v4317_v31 = vld [vmem:[#allocation8 + $0xaf0] sm:$0xff]  ;;  %v4314_v58 = vld [vmem:[#allocation8 + $0xad8] sm:$0xff] }
 0x42f   :  { %7691 = vmatprep.subr.bf16.mxu1 %v9305_v32  ;;  %v4318_v32 = vld [vmem:[#allocation8 + $0xaf8] sm:$0xff]  ;;  %v9359_v15 = vcombine.high %v4313_v59, %v4317_v31  ;;  %v9358_v41 = vcombine.low %v4313_v59, %v4317_v31 }
 0x430   :  { %v9361_v35 = vcombine.high %v4314_v58, %v4318_v32  ;;  %v9360_v42 = vcombine.low %v4314_v58, %v4318_v32  ;;  %v4366_v59 = vld [vmem:[#allocation8 + $0xc78] sm:$0xff]  ;;  %v4369_v32 = vld [vmem:[#allocation8 + $0xc90] sm:$0xff] }
 0x431   :  { %7520 = vmatpush1.bf16.msra.mxu0 %v9302_v36  ;;  %v4321_v36 = vld [vmem:[#allocation8 + $0xb10] sm:$0xff] }
 0x432   :  { %7692 = vmatpush1.bf16.msra.mxu1 %v9304_v37  ;;  %7521 = vmatprep.subr.bf16.mxu0 %v9311_v38  ;;  %v4325_v37 = vld [vmem:[#allocation8 + $0xb30] sm:$0xff]  ;;  %v4322_v38 = vld [vmem:[#allocation8 + $0xb18] sm:$0xff] }
 0x433   :  { %7693 = vmatprep.subr.bf16.mxu1 %v9313_v40  ;;  %v4326_v40 = vld [vmem:[#allocation8 + $0xb38] sm:$0xff]  ;;  %v9367_v63 = vcombine.high %v4321_v36, %v4325_v37  ;;  %v9366_v46 = vcombine.low %v4321_v36, %v4325_v37 }
 0x434   :  { %v9369_v44 = vcombine.high %v4322_v38, %v4326_v40  ;;  %v9368_v47 = vcombine.low %v4322_v38, %v4326_v40 }
 0x435   :  { %7522 = vmatpush1.bf16.msra.mxu0 %v9310_v45  ;;  %v4329_v45 = vld [vmem:[#allocation8 + $0xb50] sm:$0xff] }
 0x436   :  { %7694 = vmatpush1.bf16.msra.mxu1 %v9312_v62  ;;  %7523 = vmatprep.subr.bf16.mxu0 %v9319_v30  ;;  %v4333_v62 = vld [vmem:[#allocation8 + $0xb70] sm:$0xff]  ;;  %v4330_v30 = vld [vmem:[#allocation8 + $0xb58] sm:$0xff] }
 0x437   :  { %7695 = vmatprep.subr.bf16.mxu1 %v9321_v25  ;;  %v4334_v25 = vld [vmem:[#allocation8 + $0xb78] sm:$0xff]  ;;  %v9375_v48 = vcombine.high %v4329_v45, %v4333_v62  ;;  %v9374_v54 = vcombine.low %v4329_v45, %v4333_v62 }
 0x438   :  { %v9377_v49 = vcombine.high %v4330_v30, %v4334_v25  ;;  %v9376_v39 = vcombine.low %v4330_v30, %v4334_v25  ;;  %v4385_v25 = vld [vmem:[#allocation8 + $0xd10] sm:$0xff] }
 0x439   :  { %7524 = vmatpush1.bf16.msra.mxu0 %v9318_v11  ;;  %v4337_v11 = vld [vmem:[#allocation8 + $0xb90] sm:$0xff] }
 0x43a   :  { %7696 = vmatpush1.bf16.msra.mxu1 %v9320_v50  ;;  %7525 = vmatprep.subr.bf16.mxu0 %v9327_v43  ;;  %v4341_v50 = vld [vmem:[#allocation8 + $0xbb0] sm:$0xff]  ;;  %v4338_v43 = vld [vmem:[#allocation8 + $0xb98] sm:$0xff] }
 0x43b   :  { %7697 = vmatprep.subr.bf16.mxu1 %v9329_v52  ;;  %v4342_v52 = vld [vmem:[#allocation8 + $0xbb8] sm:$0xff]  ;;  %v9383_v55 = vcombine.high %v4337_v11, %v4341_v50  ;;  %v9382_v8 = vcombine.low %v4337_v11, %v4341_v50 }
 0x43c   :  { %v9385_v60 = vcombine.high %v4338_v43, %v4342_v52  ;;  %v9384_v16 = vcombine.low %v4338_v43, %v4342_v52  ;;  %v4393_v43 = vld [vmem:[#allocation8 + $0xd50] sm:$0xff] }
 0x43d   :  { %7526 = vmatpush1.bf16.msra.mxu0 %v9326_v53  ;;  %v4345_v53 = vld [vmem:[#allocation8 + $0xbd0] sm:$0xff] }
 0x43e   :  { %7698 = vmatpush1.bf16.msra.mxu1 %v9328_v0  ;;  %7527 = vmatprep.subr.bf16.mxu0 %v9335_v2  ;;  %v4349_v0 = vld [vmem:[#allocation8 + $0xbf0] sm:$0xff]  ;;  %v4346_v2 = vld [vmem:[#allocation8 + $0xbd8] sm:$0xff] }
 0x43f   :  { %7699 = vmatprep.subr.bf16.mxu1 %v9337_v5  ;;  %v4350_v5 = vld [vmem:[#allocation8 + $0xbf8] sm:$0xff]  ;;  %v9391_v17 = vcombine.high %v4345_v53, %v4349_v0  ;;  %v9390_v18 = vcombine.low %v4345_v53, %v4349_v0  ;;  %v4397_v52 = vld [vmem:[#allocation8 + $0xd70] sm:$0xff] }
 0x440   :  { %v9393_v10 = vcombine.high %v4346_v2, %v4350_v5  ;;  %v9392_v3 = vcombine.low %v4346_v2, %v4350_v5  ;;  %v9439_v0 = vcombine.high %v4393_v43, %v4397_v52  ;;  %v4401_v5 = vld [vmem:[#allocation8 + $0xd90] sm:$0xff] }
 0x441   :  { %7528 = vmatpush1.bf16.msra.mxu0 %v9334_v4  ;;  %v4353_v4 = vld [vmem:[#allocation8 + $0xc10] sm:$0xff] }
 0x442   :  { %7700 = vmatpush1.bf16.msra.mxu1 %v9336_v12  ;;  %7529 = vmatprep.subr.bf16.mxu0 %v9343_v13  ;;  %v4357_v12 = vld [vmem:[#allocation8 + $0xc30] sm:$0xff]  ;;  %v4354_v13 = vld [vmem:[#allocation8 + $0xc18] sm:$0xff] }
 0x443   :  { %7701 = vmatprep.subr.bf16.mxu1 %v9345_v14  ;;  %v4358_v14 = vld [vmem:[#allocation8 + $0xc38] sm:$0xff]  ;;  %v9399_v19 = vcombine.high %v4353_v4, %v4357_v12 }
 0x444   :  { %v9401_v24 = vcombine.high %v4354_v13, %v4358_v14  ;;  %v9400_v31 = vcombine.low %v4354_v13, %v4358_v14  ;;  %v9438_v14 = vcombine.low %v4393_v43, %v4397_v52 }
 0x445   :  { %7530 = vmatpush1.bf16.msra.mxu0 %v9342_v26  ;;  %v4361_v26 = vld [vmem:[#allocation8 + $0xc50] sm:$0xff] }
 0x446   :  { %7702 = vmatpush1.bf16.msra.mxu1 %v9344_v27  ;;  %7531 = vmatprep.subr.bf16.mxu0 %v9351_v28  ;;  %v4365_v27 = vld [vmem:[#allocation8 + $0xc70] sm:$0xff]  ;;  %v9398_v28 = vcombine.low %v4353_v4, %v4357_v12  ;;  %v4406_v4 = vld [vmem:[#allocation8 + $0xdb8] sm:$0xff] }
 0x447   :  { %7703 = vmatprep.subr.bf16.mxu1 %v9353_v29  ;;  %v4362_v29 = vld [vmem:[#allocation8 + $0xc58] sm:$0xff]  ;;  %v9407_v58 = vcombine.high %v4361_v26, %v4365_v27  ;;  %v9406_v36 = vcombine.low %v4361_v26, %v4365_v27 }
 0x448   :  { %v9408_v37 = vcombine.low %v4362_v29, %v4366_v59 }
 0x449   :  { %7532 = vmatpush1.bf16.msra.mxu0 %v9350_v33  ;;  %v4373_v33 = vld [vmem:[#allocation8 + $0xcb0] sm:$0xff] }
 0x44a   :  { %7704 = vmatpush1.bf16.msra.mxu1 %v9352_v34  ;;  %7533 = vmatprep.subr.bf16.mxu0 %v9359_v15  ;;  %v9409_v34 = vcombine.high %v4362_v29, %v4366_v59  ;;  %v4370_v15 = vld [vmem:[#allocation8 + $0xc98] sm:$0xff]  ;;  %v9415_v38 = vcombine.high %v4369_v32, %v4373_v33  ;;  %v9414_v45 = vcombine.low %v4369_v32, %v4373_v33 }
 0x44b   :  { %7705 = vmatprep.subr.bf16.mxu1 %v9361_v35  ;;  %v4374_v35 = vld [vmem:[#allocation8 + $0xcb8] sm:$0xff] }
 0x44c   :  { %v9417_v40 = vcombine.high %v4370_v15, %v4374_v35 }
 0x44d   :  { %7534 = vmatpush1.bf16.msra.mxu0 %v9358_v41  ;;  %v4377_v41 = vld [vmem:[#allocation8 + $0xcd0] sm:$0xff] }
 0x44e   :  { %7706 = vmatpush1.bf16.msra.mxu1 %v9360_v42  ;;  %7535 = vmatprep.subr.bf16.mxu0 %v9367_v63  ;;  %v4381_v42 = vld [vmem:[#allocation8 + $0xcf0] sm:$0xff]  ;;  %v4378_v63 = vld [vmem:[#allocation8 + $0xcd8] sm:$0xff] }
 0x44f   :  { %7707 = vmatprep.subr.bf16.mxu1 %v9369_v44  ;;  %v4382_v44 = vld [vmem:[#allocation8 + $0xcf8] sm:$0xff]  ;;  %v9423_v62 = vcombine.high %v4377_v41, %v4381_v42 }
 0x450   :  { %v9425_v30 = vcombine.high %v4378_v63, %v4382_v44 }
 0x451   :  { %7536 = vmatpush1.bf16.msra.mxu0 %v9366_v46  ;;  %v4389_v46 = vld [vmem:[#allocation8 + $0xd30] sm:$0xff] }
 0x452   :  { %7708 = vmatpush1.bf16.msra.mxu1 %v9368_v47  ;;  %7537 = vmatprep.subr.bf16.mxu0 %v9375_v48  ;;  %v4386_v47 = vld [vmem:[#allocation8 + $0xd18] sm:$0xff]  ;;  %v9431_v11 = vcombine.high %v4385_v25, %v4389_v46 }
 0x453   :  { %7709 = vmatprep.subr.bf16.mxu1 %v9377_v49  ;;  %v4390_v48 = vld [vmem:[#allocation8 + $0xd38] sm:$0xff]  ;;  %v9424_v49 = vcombine.low %v4378_v63, %v4382_v44 }
 0x454   :  { %v9433_v50 = vcombine.high %v4386_v47, %v4390_v48  ;;  %v9432_v53 = vcombine.low %v4386_v47, %v4390_v48  ;;  %v4418_v48 = vld [vmem:[#allocation8 + $0xe18] sm:$0xff] }
 0x455   :  { %7538 = vmatpush1.bf16.msra.mxu0 %v9374_v54  ;;  %v4394_v54 = vld [vmem:[#allocation8 + $0xd58] sm:$0xff] }
 0x456   :  { %7710 = vmatpush1.bf16.msra.mxu1 %v9376_v39  ;;  %7539 = vmatprep.subr.bf16.mxu0 %v9383_v55  ;;  %v4398_v39 = vld [vmem:[#allocation8 + $0xd78] sm:$0xff]  ;;  %v9430_v55 = vcombine.low %v4385_v25, %v4389_v46 }
 0x457   :  { %7711 = vmatprep.subr.bf16.mxu1 %v9385_v60  ;;  %v10344_v60 = vld [vmem:[#allocation10] sm:$0xff]  ;;  %v9441_v2 = vcombine.high %v4394_v54, %v4398_v39 }
 0x458   :  { %v4488_v12 = vrot.slane %v10344_v60, %v661_v7  ;;  %v4496_v13 = vrot.slane %v10344_v60, %v669_v9 }
 0x459   :  { %7540 = vmatpush1.bf16.msra.mxu0 %v9382_v8  ;;  %v4405_v8 = vld [vmem:[#allocation8 + $0xdb0] sm:$0xff] }
 0x45a   :  { %7712 = vmatpush1.bf16.msra.mxu1 %v9384_v16  ;;  %7541 = vmatprep.subr.bf16.mxu0 %v9391_v17  ;;  %v4484_v16 = vrot.slane %v10344_v60, %v657_v1  ;;  %v4492_v17 = vrot.slane %v10344_v60, %v665_v6  ;;  %v9447_v1 = vcombine.high %v4401_v5, %v4405_v8 }
 0x45b   :  { %7713 = vmatprep.subr.bf16.mxu1 %v9393_v10  ;;  %v4402_v10 = vld [vmem:[#allocation8 + $0xd98] sm:$0xff]  ;;  %v9446_v7 = vcombine.low %v4401_v5, %v4405_v8  ;;  %v4429_v5 = vld [vmem:[#allocation8 + $0xe70] sm:$0xff] }
 0x45c   :  { %v9449_v26 = vcombine.high %v4402_v10, %v4406_v4  ;;  %v4426_v8 = vld [vmem:[#allocation8 + $0xe58] sm:$0xff] }
 0x45d   :  { %7542 = vmatpush1.bf16.msra.mxu0 %v9390_v18  ;;  %v9440_v18 = vcombine.low %v4394_v54, %v4398_v39 }
 0x45e   :  { %7714 = vmatpush1.bf16.msra.mxu1 %v9392_v3  ;;  %7554 = vmatprep.subr.bf16.mxu0 %v9399_v19  ;;  %v4409_v3 = vld [vmem:[#allocation8 + $0xdd0] sm:$0xff] }
 0x45f   :  { %7726 = vmatprep.subr.bf16.mxu1 %v9401_v24  ;;  %v4413_v19 = vld [vmem:[#allocation8 + $0xdf0] sm:$0xff] }
 0x460   :  { %7544 = vmatmul.mubr.bf16.vlgmr.msra.gmra.mrb[12].mxu0 %v10310_v51 }
 0x461   :  { %7716 = vmatmul.mubr.bf16.vlgmr.msra.gmra.mrb[12].mxu1 %v10310_v51  ;;  %7555 = vmatpush1.bf16.msra.mxu0 %v9398_v28  ;;  %v9416_v51 = vcombine.low %v4370_v15, %v4374_v35  ;;  %v9448_v15 = vcombine.low %v4402_v10, %v4406_v4  ;;  %v9454_v35 = vcombine.low %v4409_v3, %v4413_v19 }
 0x462   :  { %7586 = vmatprep.mubr.bf16.mxu0 %v10320_v61  ;;  %7727 = vmatpush1.bf16.msra.mxu1 %v9400_v31  ;;  %v4410_v31 = vld [vmem:[#allocation8 + $0xdd8] sm:$0xff] }
 0x463   :  { %7758 = vmatprep.mubr.bf16.mxu1 %v10320_v61  ;;  %7556 = vmatprep.subr.bf16.mxu0 %v9407_v58  ;;  %v9422_v61 = vcombine.low %v4377_v41, %v4381_v42  ;;  %v4414_v58 = vld [vmem:[#allocation8 + $0xdf8] sm:$0xff]  ;;  %v9455_v41 = vcombine.high %v4409_v3, %v4413_v19 }
 0x464   :  { %7728 = vmatprep.subr.bf16.mxu1 %v9409_v34  ;;  %v9456_v44 = vcombine.low %v4410_v31, %v4414_v58 }
 0x465   :  { %7557 = vmatpush1.bf16.msra.mxu0 %v9406_v36 }
 0x466   :  { %7729 = vmatpush1.bf16.msra.mxu1 %v9408_v37  ;;  %7558 = vmatprep.subr.bf16.mxu0 %v9415_v38 }
 0x467   :  { %7730 = vmatprep.subr.bf16.mxu1 %v9417_v40 }
 0x469   :  { %7559 = vmatpush1.bf16.msra.mxu0 %v9414_v45  ;;  %v9457_v45 = vcombine.high %v4410_v31, %v4414_v58 }
 0x46a   :  { %7731 = vmatpush1.bf16.msra.mxu1 %v9416_v51  ;;  %7560 = vmatprep.subr.bf16.mxu0 %v9423_v62  ;;  %v4417_v51 = vld [vmem:[#allocation8 + $0xe10] sm:$0xff] }
 0x46b   :  { %7732 = vmatprep.subr.bf16.mxu1 %v9425_v30  ;;  %v4421_v62 = vld [vmem:[#allocation8 + $0xe30] sm:$0xff] }
 0x46c   :  { %v9463_v39 = vcombine.high %v4417_v51, %v4421_v62 }
 0x46d   :  { %7561 = vmatpush1.bf16.msra.mxu0 %v9422_v61  ;;  %v4422_v61 = vld [vmem:[#allocation8 + $0xe38] sm:$0xff] }
 0x46e   :  { %7733 = vmatpush1.bf16.msra.mxu1 %v9424_v49  ;;  %7562 = vmatprep.subr.bf16.mxu0 %v9431_v11  ;;  %v9464_v10 = vcombine.low %v4418_v48, %v4422_v61 }
 0x46f   :  { %7734 = vmatprep.subr.bf16.mxu1 %v9433_v50 }
 0x471   :  { %7563 = vmatpush1.bf16.msra.mxu0 %v9430_v55 }
 0x472   :  { %7735 = vmatpush1.bf16.msra.mxu1 %v9432_v53  ;;  %7564 = vmatprep.subr.bf16.mxu0 %v9439_v0  ;;  %v9465_v0 = vcombine.high %v4418_v48, %v4422_v61 }
 0x473   :  { %v7244_v24 = vpop.f32.mrb[8].mxu0  ;;  %v7416_v6 = vpop.f32.mrb[8].mxu1  ;;  %7736 = vmatprep.subr.bf16.mxu1 %v9441_v2  ;;  %v4425_v2 = vld [vmem:[#allocation8 + $0xe50] sm:$0xff] }
 0x474   :  { %v9691_v27 = vadd.f32 %v7244_v24, %v4484_v16  ;;  %v9695_v28 = vadd.f32 %v7416_v6, %v4492_v17  ;;  %v7246_v29 = vpop.f32.mrb[9].mxu0  ;;  %v7418_v59 = vpop.f32.mrb[9].mxu1  ;;  %v9471_v4 = vcombine.high %v4425_v2, %v4429_v5  ;;  %v9470_v3 = vcombine.low %v4425_v2, %v4429_v5 }
 0x475   :  { %v9692_v32 = vadd.f32 %v7246_v29, %v4488_v12  ;;  %v9696_v9 = vadd.f32 %v7418_v59, %v4496_v13  ;;  %v7248_v33 = vpop.f32.mrb[10].mxu0  ;;  %v7420_v34 = vpop.f32.mrb[10].mxu1  ;;  %7565 = vmatpush1.bf16.msra.mxu0 %v9438_v14  ;;  %v4437_v14 = vld [vmem:[#allocation8 + $0xeb0] sm:$0xff]  ;;  %v4446_v29 = vld [vmem:[#allocation8 + $0xef8] sm:$0xff] }
 0x476   :  { %v9693_v36 = vadd.f32 %v7248_v33, %v4484_v16  ;;  %v9697_v37 = vadd.f32 %v7420_v34, %v4492_v17  ;;  %7737 = vmatpush1.bf16.msra.mxu1 %v9440_v18  ;;  %v7250_v38 = vpop.f32.mrb[11].mxu0  ;;  %v7422_v40 = vpop.f32.mrb[11].mxu1  ;;  %7566 = vmatprep.subr.bf16.mxu0 %v9447_v1  ;;  %v7769_v30 = vmax.f32 %v9691_v27, 0.0  ;;  %v7771_v25 = vmax.f32 %v9695_v28, 0.0  ;;  %v4430_v16 = vld [vmem:[#allocation8 + $0xe78] sm:$0xff]  ;;  %v4445_v27 = vld [vmem:[#allocation8 + $0xef0] sm:$0xff] }
 0x477   :  { %v9694_v42 = vadd.f32 %v7250_v38, %v4488_v12  ;;  %v9698_v63 = vadd.f32 %v7422_v40, %v4496_v13  ;;  %7738 = vmatprep.subr.bf16.mxu1 %v9449_v26  ;;  %v7770_v49 = vmax.f32 %v9692_v32, 0.0  ;;  %v7772_v11 = vmax.f32 %v9696_v9, 0.0  ;;  %v4433_v13 = vld [vmem:[#allocation8 + $0xe90] sm:$0xff]  ;;  %v4434_v18 = vld [vmem:[#allocation8 + $0xe98] sm:$0xff] }
 0x478   :  { %v7777_v46 = vmax.f32 %v9693_v36, 0.0  ;;  %v7779_v47 = vmax.f32 %v9697_v37, 0.0  ;;  %v9462_v17 = vcombine.low %v4417_v51, %v4421_v62  ;;  %v9473_v12 = vcombine.high %v4426_v8, %v4430_v16  ;;  %v4438_v1 = vld [vmem:[#allocation8 + $0xeb8] sm:$0xff]  ;;  %v4441_v26 = vld [vmem:[#allocation8 + $0xed0] sm:$0xff] }
 0x479   :  { %v7778_v50 = vmax.f32 %v9694_v42, 0.0  ;;  %v7780_v43 = vmax.f32 %v9698_v63, 0.0  ;;  %7567 = vmatpush1.bf16.msra.mxu0 %v9446_v7  ;;  %v9472_v19 = vcombine.low %v4426_v8, %v4430_v16  ;;  %v9479_v24 = vcombine.high %v4433_v13, %v4437_v14  ;;  %v4442_v28 = vld [vmem:[#allocation8 + $0xed8] sm:$0xff]  ;;  %v4449_v32 = vld [vmem:[#allocation8 + $0xf10] sm:$0xff] }
 0x47a   :  { %v10358_v52 = vpack.c.bf16 %v7777_v46, %v7769_v30  ;;  %v10360_v54 = vpack.c.bf16 %v7779_v47, %v7771_v25  ;;  %7739 = vmatpush1.bf16.msra.mxu1 %v9448_v15  ;;  %7568 = vmatprep.subr.bf16.mxu0 %v9455_v41  ;;  %v9481_v6 = vcombine.high %v4434_v18, %v4438_v1  ;;  %v4453_v9 = vld [vmem:[#allocation8 + $0xf30] sm:$0xff]  ;;  %v4450_v33 = vld [vmem:[#allocation8 + $0xf18] sm:$0xff] }
 0x47b   :  { %v10362_v55 = vpack.c.bf16 %v7778_v50, %v7770_v49  ;;  %v10364_v53 = vpack.c.bf16 %v7780_v43, %v7772_v11  ;;  %7740 = vmatprep.subr.bf16.mxu1 %v9457_v45  ;;  %v9478_v59 = vcombine.low %v4433_v13, %v4437_v14  ;;  %v9480_v7 = vcombine.low %v4434_v18, %v4438_v1  ;;  %v4454_v34 = vld [vmem:[#allocation8 + $0xf38] sm:$0xff]  ;;  %v4457_v38 = vld [vmem:[#allocation8 + $0xf50] sm:$0xff]  ;;  %v9821_v13 = vld [vmem:[#allocation11 + $0x80] sm:$0xff]  }
 0x47c   :  { %v9487_v31 = vcombine.high %v4441_v26, %v4445_v27  ;;  %v9489_v58 = vcombine.high %v4442_v28, %v4446_v29  ;;  %v9486_v15 = vcombine.low %v4441_v26, %v4445_v27  ;;  %v9495_v36 = vcombine.high %v4449_v32, %v4453_v9  ;;  %v4461_v40 = vld [vmem:[#allocation8 + $0xf70] sm:$0xff]  ;;  %v4458_v41 = vld [vmem:[#allocation8 + $0xf58] sm:$0xff]  ;;  %v9830_v27 = vld [vmem:[#allocation11 + $0x58] sm:$0xff]  }
 0x47d   :  { %7569 = vmatpush1.bf16.msra.mxu0 %v9454_v35  ;;  %v9488_v35 = vcombine.low %v4442_v28, %v4446_v29  ;;  %v9497_v37 = vcombine.high %v4450_v33, %v4454_v34  ;;  %v4462_v42 = vld [vmem:[#allocation8 + $0xf78] sm:$0xff]  ;;  %v9494_v63 = vcombine.low %v4449_v32, %v4453_v9  ;;  %v9503_v45 = vcombine.high %v4457_v38, %v4461_v40  ;;  %v4465_v62 = vld [vmem:[#allocation8 + $0xf90] sm:$0xff]  ;;  %v9832_v28 = vld [vmem:[#allocation11 + $0x18] sm:$0xff]  }
 0x47e   :  { %7741 = vmatpush1.bf16.msra.mxu1 %v9456_v44  ;;  %7570 = vmatprep.subr.bf16.mxu0 %v9463_v39  ;;  %v9496_v44 = vcombine.low %v4450_v33, %v4454_v34  ;;  %v9505_v51 = vcombine.high %v4458_v41, %v4462_v42  ;;  %v4469_v30 = vld [vmem:[#allocation8 + $0xfb0] sm:$0xff]  ;;  %v4466_v25 = vld [vmem:[#allocation8 + $0xf98] sm:$0xff]  ;;  %v9502_v47 = vcombine.low %v4457_v38, %v4461_v40  ;;  %v9834_v29 = vld [vmem:[#allocation11 + $0x60] sm:$0xff]  }
 0x47f   :  { %7742 = vmatprep.subr.bf16.mxu1 %v9465_v0  ;;  %v4470_v46 = vld [vmem:[#allocation8 + $0xfb8] sm:$0xff]  ;;  %v9504_v48 = vcombine.low %v4458_v41, %v4462_v42  ;;  %v9511_v61 = vcombine.high %v4465_v62, %v4469_v30  ;;  %v4473_v11 = vld [vmem:[#allocation8 + $0xfd0] sm:$0xff]  ;;  %v9510_v0 = vcombine.low %v4465_v62, %v4469_v30  ;;  %v9848_v38 = vld [vmem:[#allocation11 + $0x38] sm:$0xff]  }
 0x480   :  { %v9513_v49 = vcombine.high %v4466_v25, %v4470_v46  ;;  %v4477_v50 = vld [vmem:[#allocation8 + $0xff0] sm:$0xff]  ;;  %v4474_v43 = vld [vmem:[#allocation8 + $0xfd8] sm:$0xff]  ;;  %v9512_v2 = vcombine.low %v4466_v25, %v4470_v46  ;;  %v9849_v40 = vld [vmem:[#allocation11 + $0xb8] sm:$0xff]  }
 0x481   :  { %7571 = vmatpush1.bf16.msra.mxu0 %v9462_v17  ;;  %v4478_v39 = vld [vmem:[#allocation8 + $0xff8] sm:$0xff]  ;;  %v9519_v5 = vcombine.high %v4473_v11, %v4477_v50  ;;  %v9518_v16 = vcombine.low %v4473_v11, %v4477_v50  ;;  %v9822_v14 = vld [vmem:[#allocation11 + $0x48] sm:$0xff]   ;;  %v9850_v41 = vld [vmem:[#allocation11 + $0x140] sm:$0xff]  }
 0x482   :  { %7743 = vmatpush1.bf16.msra.mxu1 %v9464_v10  ;;  %7572 = vmatprep.subr.bf16.mxu0 %v9471_v4  ;;  %v9521_v8 = vcombine.high %v4474_v43, %v4478_v39  ;;  %v9520_v17 = vcombine.low %v4474_v43, %v4478_v39  ;;  %v9818_v10 = vld [vmem:[#allocation11 + $0x40] sm:$0xff]   ;;  %v9823_v18 = vld [vmem:[#allocation11 + $0xc8] sm:$0xff]   ;;  %v9829_v26 = vld [vmem:[#allocation11 + $0x90] sm:$0xff]  }
 0x483   :  { %7744 = vmatprep.subr.bf16.mxu1 %v9473_v12  ;;  %v9819_v4 = vld [vmem:[#allocation11 + $0xc0] sm:$0xff]   ;;  %v9824_v1 = vld [vmem:[#allocation11 + $0x8] sm:$0xff]   ;;  %v9842_v33 = vld [vmem:[#allocation11 + $0x70] sm:$0xff]  }
 0x484   :  { %v9820_v12 = vld [vmem:[#allocation11] sm:$0xff]   ;;  %v9840_v32 = vld [vmem:[#allocation11 + $0x28] sm:$0xff]   ;;  %v9843_v34 = vld [vmem:[#allocation11 + $0xf0] sm:$0xff]  }
 0x485   :  { %7573 = vmatpush1.bf16.msra.mxu0 %v9470_v3  ;;  %v9825_v3 = vld [vmem:[#allocation11 + $0x88] sm:$0xff]   ;;  %v9851_v42 = vld [vmem:[#allocation11 + $0x1c0] sm:$0xff]   ;;  %v9858_v25 = vld [vmem:[#allocation11 + $0x150] sm:$0xff]  }
 0x486   :  { %7745 = vmatpush1.bf16.msra.mxu1 %v9472_v19  ;;  %7574 = vmatprep.subr.bf16.mxu0 %v9479_v24  ;;  %v9826_v19 = vld [vmem:[#allocation11 + $0x50] sm:$0xff]   ;;  %v9841_v9 = vld [vmem:[#allocation11 + $0xa8] sm:$0xff]   ;;  %v9866_v11 = vld [vmem:[#allocation11 + $0x160] sm:$0xff]  }
 0x487   :  { %7746 = vmatprep.subr.bf16.mxu1 %v9481_v6  ;;  %v9827_v24 = vld [vmem:[#allocation11 + $0xd0] sm:$0xff]   ;;  %v9856_v62 = vld [vmem:[#allocation11 + $0x108] sm:$0xff]   ;;  %v9867_v50 = vld [vmem:[#allocation11 + $0x1e0] sm:$0xff]  }
 0x488   :  { %v9828_v6 = vld [vmem:[#allocation11 + $0x10] sm:$0xff]   ;;  %v9857_v30 = vld [vmem:[#allocation11 + $0x188] sm:$0xff]   ;;  %v9868_v43 = vld [vmem:[#allocation11 + $0x120] sm:$0xff]  }
 0x489   :  { %7575 = vmatpush1.bf16.msra.mxu0 %v9478_v59  ;;  %v9835_v59 = vld [vmem:[#allocation11 + $0xe0] sm:$0xff]   ;;  %v9859_v46 = vld [vmem:[#allocation11 + $0x1d0] sm:$0xff]  }
 0x48a   :  { %7747 = vmatpush1.bf16.msra.mxu1 %v9480_v7  ;;  %7576 = vmatprep.subr.bf16.mxu0 %v9487_v31  ;;  %v9837_v7 = vld [vmem:[#allocation11 + $0xa0] sm:$0xff]   ;;  %v9838_v31 = vld [vmem:[#allocation11 + $0x68] sm:$0xff]  }
 0x48b   :  { %7748 = vmatprep.subr.bf16.mxu1 %v9489_v58  ;;  %v9839_v58 = vld [vmem:[#allocation11 + $0xe8] sm:$0xff]   ;;  %v9869_v39 = vld [vmem:[#allocation11 + $0x1a0] sm:$0xff]  }
 0x48d   :  { %7577 = vmatpush1.bf16.msra.mxu0 %v9486_v15  ;;  %v9844_v15 = vld [vmem:[#allocation11 + $0x30] sm:$0xff]  }
 0x48e   :  { %7749 = vmatpush1.bf16.msra.mxu1 %v9488_v35  ;;  %7578 = vmatprep.subr.bf16.mxu0 %v9495_v36  ;;  %v9845_v35 = vld [vmem:[#allocation11 + $0xb0] sm:$0xff]   ;;  %v9846_v36 = vld [vmem:[#allocation11 + $0x78] sm:$0xff]  }
 0x48f   :  { %7750 = vmatprep.subr.bf16.mxu1 %v9497_v37  ;;  %v9847_v37 = vld [vmem:[#allocation11 + $0xf8] sm:$0xff]  }
 0x491   :  { %7579 = vmatpush1.bf16.msra.mxu0 %v9494_v63  ;;  %v9852_v63 = vld [vmem:[#allocation11 + $0x100] sm:$0xff]  }
 0x492   :  { %7751 = vmatpush1.bf16.msra.mxu1 %v9496_v44  ;;  %7580 = vmatprep.subr.bf16.mxu0 %v9503_v45  ;;  %v9853_v44 = vld [vmem:[#allocation11 + $0x180] sm:$0xff]   ;;  %v9854_v45 = vld [vmem:[#allocation11 + $0x148] sm:$0xff]  }
 0x493   :  { %7752 = vmatprep.subr.bf16.mxu1 %v9505_v51  ;;  %v9855_v51 = vld [vmem:[#allocation11 + $0x1c8] sm:$0xff]  }
 0x495   :  { %7581 = vmatpush1.bf16.msra.mxu0 %v9502_v47  ;;  %v9860_v47 = vld [vmem:[#allocation11 + $0x110] sm:$0xff]  }
 0x496   :  { %7753 = vmatpush1.bf16.msra.mxu1 %v9504_v48  ;;  %7582 = vmatprep.subr.bf16.mxu0 %v9511_v61  ;;  %v9861_v48 = vld [vmem:[#allocation11 + $0x190] sm:$0xff]   ;;  %v9862_v61 = vld [vmem:[#allocation11 + $0x158] sm:$0xff]  }
 0x497   :  { %7754 = vmatprep.subr.bf16.mxu1 %v9513_v49  ;;  %v9863_v49 = vld [vmem:[#allocation11 + $0x1d8] sm:$0xff]  }
 0x499   :  { %7583 = vmatpush1.bf16.msra.mxu0 %v9510_v0  ;;  %v9870_v0 = vld [vmem:[#allocation11 + $0x168] sm:$0xff]  }
 0x49a   :  { %7755 = vmatpush1.bf16.msra.mxu1 %v9512_v2  ;;  %7584 = vmatprep.subr.bf16.mxu0 %v9519_v5  ;;  %v9871_v2 = vld [vmem:[#allocation11 + $0x1e8] sm:$0xff]  }
 0x49b   :  { %7756 = vmatprep.subr.bf16.mxu1 %v9521_v8  ;;  %v9872_v5 = vld [vmem:[#allocation11 + $0x128] sm:$0xff]  }
 0x49c   :  { %v9873_v8 = vld [vmem:[#allocation11 + $0x1a8] sm:$0xff]  }
 0x49d   :  { %7585 = vmatpush1.bf16.msra.mxu0 %v9518_v16  ;;  %v9874_v16 = vld [vmem:[#allocation11 + $0x170] sm:$0xff]  }
 0x49e   :  { %7757 = vmatpush1.bf16.msra.mxu1 %v9520_v17  ;;  %9587 = vmatprep.subr.bf16.mxu0 %v9818_v10  ;;  %v9875_v17 = vld [vmem:[#allocation11 + $0x1f0] sm:$0xff]  }
 0x49f   :  { %9609 = vmatprep.subr.bf16.mxu1 %v9819_v4  ;;  %v9876_v10 = vld [vmem:[#allocation11 + $0x130] sm:$0xff]  }
 0x4a0   :  { %7587 = vmatmul.mubr.bf16.vlgmr.msra.gmra.mrb[12].mxu0 %v10312_v56  ;;  %v9877_v4 = vld [vmem:[#allocation11 + $0x1b0] sm:$0xff]  }
 0x4a1   :  { %7759 = vmatmul.mubr.bf16.vlgmr.msra.gmra.mrb[12].mxu1 %v10312_v56  ;;  %9588 = vmatpush3.bf16.msra.mxu0 %v9820_v12  ;;  %v9831_v56 = vld [vmem:[#allocation11 + $0xd8] sm:$0xff]  }
 0x4a2   :  { %8344 = vmatprep.mubr.bf16.mxu0 %v10362_v55  ;;  %9610 = vmatpush3.bf16.msra.mxu1 %v9821_v13  ;;  %v9833_v55 = vld [vmem:[#allocation11 + $0x98] sm:$0xff]  }
 0x4a3   :  { %8385 = vmatprep.mubr.bf16.mxu1 %v10364_v53  ;;  %9589 = vmatprep.subr.bf16.mxu0 %v9822_v14  ;;  %v9836_v53 = vld [vmem:[#allocation11 + $0x20] sm:$0xff]   ;;  %v9878_v12 = vld [vmem:[#allocation11 + $0x178] sm:$0xff]  }
 0x4a4   :  { %9611 = vmatprep.subr.bf16.mxu1 %v9823_v18  ;;  %v9879_v13 = vld [vmem:[#allocation11 + $0x1f8] sm:$0xff]  }
 0x4a5   :  { %9590 = vmatpush3.bf16.msra.mxu0 %v9824_v1  ;;  %v9880_v14 = vld [vmem:[#allocation11 + $0x138] sm:$0xff]   ;;  %v4500_v1 = vrot.slane %v10344_v60, %v673_v20 }
 0x4a6   :  { %9612 = vmatpush3.bf16.msra.mxu1 %v9825_v3  ;;  %9591 = vmatprep.subr.bf16.mxu0 %v9826_v19  ;;  %v9881_v18 = vld [vmem:[#allocation11 + $0x1b8] sm:$0xff]   ;;  %v4508_v3 = vrot.slane %v10344_v60, %v681_v21  ;;  %v4504_v19 = vrot.slane %v10344_v60, %v677_v22 }
 0x4a7   :  { %9613 = vmatprep.subr.bf16.mxu1 %v9827_v24  ;;  %v4512_v24 = vrot.slane %v10344_v60, %v685_v23 }
 0x4a9   :  { %9592 = vmatpush3.bf16.msra.mxu0 %v9828_v6 }
 0x4aa   :  { %9614 = vmatpush3.bf16.msra.mxu1 %v9829_v26  ;;  %9593 = vmatprep.subr.bf16.mxu0 %v9830_v27 }
 0x4ab   :  { %9615 = vmatprep.subr.bf16.mxu1 %v9831_v56 }
 0x4ad   :  { %9594 = vmatpush3.bf16.msra.mxu0 %v9832_v28 }
 0x4ae   :  { %9616 = vmatpush3.bf16.msra.mxu1 %v9833_v55  ;;  %9595 = vmatprep.subr.bf16.mxu0 %v9834_v29 }
 0x4af   :  { %9617 = vmatprep.subr.bf16.mxu1 %v9835_v59 }
 0x4b1   :  { %9596 = vmatpush3.bf16.msra.mxu0 %v9836_v53 }
 0x4b2   :  { %9618 = vmatpush3.bf16.msra.mxu1 %v9837_v7  ;;  %9597 = vmatprep.subr.bf16.mxu0 %v9838_v31 }
 0x4b3   :  { %9619 = vmatprep.subr.bf16.mxu1 %v9839_v58 }
 0x4b5   :  { %9598 = vmatpush3.bf16.msra.mxu0 %v9840_v32 }
 0x4b6   :  { %9620 = vmatpush3.bf16.msra.mxu1 %v9841_v9  ;;  %9599 = vmatprep.subr.bf16.mxu0 %v9842_v33 }
 0x4b7   :  { %9621 = vmatprep.subr.bf16.mxu1 %v9843_v34 }
 0x4b9   :  { %9600 = vmatpush3.bf16.msra.mxu0 %v9844_v15 }
 0x4ba   :  { %9622 = vmatpush3.bf16.msra.mxu1 %v9845_v35  ;;  %9601 = vmatprep.subr.bf16.mxu0 %v9846_v36 }
 0x4bb   :  { %9623 = vmatprep.subr.bf16.mxu1 %v9847_v37 }
 0x4bd   :  { %9602 = vmatpush3.bf16.msra.mxu0 %v9848_v38 }
 0x4be   :  { %9624 = vmatpush3.bf16.msra.mxu1 %v9849_v40  ;;  %9631 = vmatprep.subr.bf16.mxu0 %v9850_v41 }
 0x4bf   :  { %9653 = vmatprep.subr.bf16.mxu1 %v9851_v42 }
 0x4c0   :  { %8345 = vmatmul.mubr.bf16.vlgmr.msra.gmra.mrb[16].mxu0 %v10358_v52  ;;  %v9864_v52 = vld [vmem:[#allocation11 + $0x118] sm:$0xff]  }
 0x4c1   :  { %8386 = vmatmul.mubr.bf16.vlgmr.msra.gmra.mrb[16].mxu1 %v10360_v54  ;;  %9632 = vmatpush3.bf16.msra.mxu0 %v9852_v63  ;;  %v9865_v54 = vld [vmem:[#allocation11 + $0x198] sm:$0xff]   ;;  %v9522_v63 = vld [vmem:[#allocation13] ss:$0 sm:$0xff] }
 0x4c2   :  { %9654 = vmatpush3.bf16.msra.mxu1 %v9853_v44  ;;  %9633 = vmatprep.subr.bf16.mxu0 %v9854_v45 }
 0x4c3   :  { %9655 = vmatprep.subr.bf16.mxu1 %v9855_v51 }
 0x4c5   :  { %9634 = vmatpush3.bf16.msra.mxu0 %v9856_v62 }
 0x4c6   :  { %9656 = vmatpush3.bf16.msra.mxu1 %v9857_v30  ;;  %9635 = vmatprep.subr.bf16.mxu0 %v9858_v25 }
 0x4c7   :  { %9657 = vmatprep.subr.bf16.mxu1 %v9859_v46 }
 0x4c9   :  { %9636 = vmatpush3.bf16.msra.mxu0 %v9860_v47 }
 0x4ca   :  { %9658 = vmatpush3.bf16.msra.mxu1 %v9861_v48  ;;  %9637 = vmatprep.subr.bf16.mxu0 %v9862_v61 }
 0x4cb   :  { %9659 = vmatprep.subr.bf16.mxu1 %v9863_v49 }
 0x4cd   :  { %9638 = vmatpush3.bf16.msra.mxu0 %v9864_v52 }
 0x4ce   :  { %9660 = vmatpush3.bf16.msra.mxu1 %v9865_v54  ;;  %9639 = vmatprep.subr.bf16.mxu0 %v9866_v11 }
 0x4cf   :  { %9661 = vmatprep.subr.bf16.mxu1 %v9867_v50 }
 0x4d1   :  { %9640 = vmatpush3.bf16.msra.mxu0 %v9868_v43 }
 0x4d2   :  { %9662 = vmatpush3.bf16.msra.mxu1 %v9869_v39  ;;  %9641 = vmatprep.subr.bf16.mxu0 %v9870_v0 }
 0x4d3   :  { %9663 = vmatprep.subr.bf16.mxu1 %v9871_v2 }
 0x4d5   :  { %9642 = vmatpush3.bf16.msra.mxu0 %v9872_v5 }
 0x4d6   :  { %9664 = vmatpush3.bf16.msra.mxu1 %v9873_v8  ;;  %9643 = vmatprep.subr.bf16.mxu0 %v9874_v16 }
 0x4d7   :  { %9665 = vmatprep.subr.bf16.mxu1 %v9875_v17 }
 0x4d9   :  { %9644 = vmatpush3.bf16.msra.mxu0 %v9876_v10 }
 0x4da   :  { %9666 = vmatpush3.bf16.msra.mxu1 %v9877_v4  ;;  %9645 = vmatprep.subr.bf16.mxu0 %v9878_v12 }
 0x4db   :  { %9667 = vmatprep.subr.bf16.mxu1 %v9879_v13 }
 0x4dd   :  { %9646 = vmatpush3.bf16.msra.mxu0 %v9880_v14 }
 0x4de   :  { %9668 = vmatpush3.bf16.msra.mxu1 %v9881_v18 }
 0x573   :  { %v7588_v6 = vpop.f32.mrb[12].mxu0 }
 0x574   :  { %v9699_v26 = vadd.f32 %v7588_v6, %v4500_v1  ;;  %v7760_v27 = vpop.f32.mrb[12].mxu1  ;;  %v7590_v56 = vpop.f32.mrb[13].mxu0 }
 0x575   :  { %v9703_v28 = vadd.f32 %v7760_v27, %v4508_v3  ;;  %v9700_v55 = vadd.f32 %v7590_v56, %v4504_v19  ;;  %v7762_v29 = vpop.f32.mrb[13].mxu1  ;;  %v7592_v20 = vpop.f32.mrb[14].mxu0 }
 0x576   :  { %v9704_v59 = vadd.f32 %v7762_v29, %v4512_v24  ;;  %v9701_v53 = vadd.f32 %v7592_v20, %v4500_v1  ;;  %v7764_v7 = vpop.f32.mrb[14].mxu1  ;;  %v7594_v21 = vpop.f32.mrb[15].mxu0  ;;  %v7773_v22 = vmax.f32 %v9699_v26, 0.0 }
 0x577   :  { %v9705_v31 = vadd.f32 %v7764_v7, %v4508_v3  ;;  %v9702_v58 = vadd.f32 %v7594_v21, %v4504_v19  ;;  %v7766_v32 = vpop.f32.mrb[15].mxu1  ;;  %v7775_v33 = vmax.f32 %v9703_v28, 0.0  ;;  %v7774_v23 = vmax.f32 %v9700_v55, 0.0 }
 0x578   :  { %v7781_v9 = vmax.f32 %v9701_v53, 0.0  ;;  %v9706_v57 = vadd.f32 %v7766_v32, %v4512_v24  ;;  %v7776_v15 = vmax.f32 %v9704_v59, 0.0 }
 0x579   :  { %v7783_v60 = vmax.f32 %v9705_v31, 0.0  ;;  %v7782_v34 = vmax.f32 %v9702_v58, 0.0 }
 0x57a   :  { %v7789_v35 = vpack.c.bf16 %v7781_v9, %v7773_v22  ;;  %v7784_v36 = vmax.f32 %v9706_v57, 0.0 }
 0x57b   :  { %v7791_v37 = vpack.c.bf16 %v7783_v60, %v7775_v33  ;;  %v7790_v38 = vpack.c.bf16 %v7782_v34, %v7774_v23 }
 0x57c   :  { %v7792_v40 = vpack.c.bf16 %v7784_v36, %v7776_v15 }
 0x57d   :  { %8426 = vmatprep.mubr.bf16.mxu0 %v7790_v38 }
 0x57e   :  { %8467 = vmatprep.mubr.bf16.mxu1 %v7792_v40  ;;  %8427 = vmatmul.mubr.bf16.vlgmr.msra.gmra.mrb[20].mxu0 %v7789_v35 }
 0x57f   :  { %8468 = vmatmul.mubr.bf16.vlgmr.msra.gmra.mrb[20].mxu1 %v7791_v37 }
 0x593   :  { %v9603_v41 = vpop.f32.mrb[16].mxu0 }
 0x594   :  { %v9625_v42 = vpop.f32.mrb[16].mxu1  ;;  %v9604_v44 = vpop.f32.mrb[17].mxu0 }
 0x595   :  { %v9605_v45 = vadd.f32 %v9604_v44, %v9603_v41  ;;  %v9626_v51 = vpop.f32.mrb[17].mxu1  ;;  %v9606_v62 = vpop.f32.mrb[18].mxu0 }
 0x596   :  { %v9627_v30 = vadd.f32 %v9626_v51, %v9625_v42  ;;  %v9628_v25 = vpop.f32.mrb[18].mxu1  ;;  %v9607_v46 = vpop.f32.mrb[19].mxu0 }
 0x597   :  { %v8347_v47 = vadd.f32 %v9605_v45, %v9522_v63  ;;  %v9608_v48 = vadd.f32 %v9607_v46, %v9606_v62  ;;  %v9629_v61 = vpop.f32.mrb[19].mxu1 }
 0x598   :  { %v9630_v49 = vadd.f32 %v9629_v61, %v9628_v25 }
 0x599   :  { %v8388_v52 = vadd.f32 %v9627_v30, %v8347_v47  ;;  %v8350_v54 = vadd.f32 %v9608_v48, %v9522_v63 }
 0x59b   :  { %v8391_v11 = vadd.f32 %v9630_v49, %v8350_v54 }
 0x651   :  { %v9647_v50 = vpop.f32.mrb[20].mxu0 }
 0x652   :  { %v9669_v43 = vpop.f32.mrb[20].mxu1  ;;  %v9648_v39 = vpop.f32.mrb[21].mxu0 }
 0x653   :  { %v9649_v0 = vadd.f32 %v9648_v39, %v9647_v50  ;;  %v9670_v2 = vpop.f32.mrb[21].mxu1  ;;  %v9650_v5 = vpop.f32.mrb[22].mxu0 }
 0x654   :  { %v9671_v8 = vadd.f32 %v9670_v2, %v9669_v43  ;;  %v9672_v16 = vpop.f32.mrb[22].mxu1  ;;  %v9651_v17 = vpop.f32.mrb[23].mxu0 }
 0x655   :  { %v8429_v10 = vadd.f32 %v9649_v0, %v8388_v52  ;;  %v9652_v4 = vadd.f32 %v9651_v17, %v9650_v5  ;;  %v9673_v12 = vpop.f32.mrb[23].mxu1 }
 0x656   :  { %v9674_v13 = vadd.f32 %v9673_v12, %v9672_v16 }
 0x657   :  { %v8470_v14 = vadd.f32 %v9671_v8, %v8429_v10  ;;  %v8432_v18 = vadd.f32 %v9652_v4, %v8391_v11 }
 0x659   :  { %8476 = vst [vmem:[#allocation14] sm:$0xff] %v8470_v14  ;;  %v8473_v1 = vadd.f32 %v9674_v13, %v8432_v18 }
 0x65b   :  { %8477 = vst [vmem:[#allocation14 + $0x8] sm:$0xff] %v8473_v1 }
 0x65c   :  { %10048 = shalt.err (!%p10045_p4)
}
 0x65d   :  { %s10049_s3 = scalar_lea.hbm %s10403_s7, 256 }
 0x65e   :  { %p10050_p5 = scmp.ne.s32.totalorder %s10403_s7, %s10049_s3  ;;  %p10053_p6 = scmp.lt.u32.totalorder %s10049_s3, %s10403_s7 }
 0x660   :  { %p10055_p7 = pnand %p10053_p6, %p10050_p5 }
 0x662   :  { %10058 = shalt.err (!%p10055_p7)
}
 0x663   :  { %s10082_s19 = smov 128   ;;  %s10083_s20 = smov 8  }
 0x664   :  { %8489 = dma.vmem_to_hbm [thread:$0]  %s8484_s14, 256, %s10403_s7, [#allocation4], %s10082_s19, %s10082_s19, %s10083_s20  }
 0x665   :  { %10067 = dma.done.wait [#allocation4], 256  }
 0x666   :  { %10068 = vsyncadd [#allocation4], 4294967040 }
 0x667   :  { %8493 = vsyncpa [#allocation3], 1 }
 0x668   :  { %8494 = vsyncpa [#allocation6], 1 }
 0x669   :  { %8495 = vsyncpa [#allocation9], 1 }
 0x66a   :  { %8496 = vsyncpa [#allocation12], 1 }
 0x66b   :  { %8497 = vsyncpa [#allocation4], 1 }

</bundles_post_ra>
